<compile_context>
chip_gen: v6e
topology: v6e:2x2x1
jax: 0.10.0
libtpu: 0.0.40
codegen_flags: <defaults>
</compile_context>

<pallas_src>
import functools

import jax
import jax.numpy as jnp
from jax import lax
from jax.experimental import pallas as pl
from jax.experimental.pallas import tpu as pltpu

EPS = 1e-5


def _rup(x, m):
    return (x + m - 1) // m * m


def _full_spec(shape):
    shape = tuple(shape)
    return pl.BlockSpec(shape, lambda *_: (0,) * len(shape))


# --------------------------------------------------------------------------
# Fused bottleneck kernel
# --------------------------------------------------------------------------
# Every activation is (Cp, NPpad): Cp = channels padded to a multiple of 8,
# NPpad = N*Dp*Hp*Wp padded to a multiple of 128 (Dp = D+2 etc., row-major n,d,h,w).
# The padding ring / extra lanes hold exact zeros, so the 27 taps of a 3x3x3 / pad-1
# conv are plain shifts of +/- (kd-1)*Hp*Wp + (kh-1)*Wp + (kw-1) along the flat lane
# axis.  The activation is staged once into a margin-padded VMEM scratch; the 27
# shifted slices are copied (as bf16) into an im2col scratch and contracted in a
# single (Cout, 27*Cin) @ (27*Cin, NPpad) MXU matmul.

def _bottleneck_kernel(xf_ref, mi_ref, ms_ref,
                       w1_ref, w2_ref, w3_ref, ws_ref,
                       g1_ref, b1_ref, g2_ref, b2_ref,
                       g3_ref, b3_ref, gs_ref, bs_ref,
                       o_ref, act_scr, col_scr,
                       *, cin, mid, n_in, n_out, eps, margin, npad, offs):
    f32 = jnp.float32
    bf16 = jnp.bfloat16

    # Zero only the two shift-margin column stripes of the staging scratch.  The data
    # region [margin, margin+npad) is fully overwritten by every conv3x3 staging
    # store before it is read, and rows beyond the active channel count are never
    # read (tap slices use rows 0:ci), so stale VMEM cannot leak.
    nrow, ls = act_scr.shape
    act_scr[:, 0:margin] = jnp.zeros((nrow, margin), f32)
    act_scr[:, margin + npad:ls] = jnp.zeros((nrow, ls - margin - npad), f32)

    def masked_stats(v, m_ref, count):
        """Training-mode BatchNorm statistics over the masked positions.
        Two-pass (masked) variance to avoid E[x^2]-E[x]^2 cancellation."""
        m = m_ref[...]
        mean = jnp.sum(v * m, axis=1, keepdims=True) / count          # (C, 1)
        d = (v - mean) * m
        var = jnp.sum(d * d, axis=1, keepdims=True) / count
        return mean, lax.rsqrt(var + eps)

    def norm_act(v, mean, rstd, g_ref, b_ref, m_ref):
        """Affine BN + ReLU, re-masked so padding stays exactly zero."""
        out = jnp.maximum(g_ref[...] * (v - mean) * rstd + b_ref[...], 0.0)
        return out * m_ref[...]

    def conv3x3(act, wf_ref, ci):
        """3x3x3 / pad-1 conv of a flat, zero-ring-padded activation as ONE im2col
        matmul.  act: (ci, npad) f32; wf_ref: (co, 27*ci) bf16."""
        act_scr[0:ci, margin:margin + npad] = act                     # stage once
        for t in range(27):                                           # 27 tap copies
            start = margin + offs[t]
            col_scr[t * ci:(t + 1) * ci, :] = (
                act_scr[0:ci, start:start + npad].astype(bf16))
        return jnp.dot(wf_ref[...], col_scr[0:27 * ci, :],
                       preferred_element_type=f32)                    # K = 27*ci

    # Shared BN(x) statistics: conv1 and the shortcut normalize the same tensor;
    # only the affine (gamma, beta) differs.
    mean_x, rstd_x = masked_stats(xf_ref[...], mi_ref, n_in)

    # Shortcut path first; its result parks in o_ref so hs and h3 never coexist.
    a_s = norm_act(xf_ref[...], mean_x, rstd_x, gs_ref, bs_ref, mi_ref)
    o_ref[...] = conv3x3(a_s, ws_ref, cin)                            # (Cout, npad)

    # Main path (x re-read so it is not held live across the shortcut conv).
    a1 = norm_act(xf_ref[...], mean_x, rstd_x, g1_ref, b1_ref, mi_ref)
    h1 = jnp.dot(w1_ref[...], a1.astype(bf16), preferred_element_type=f32)

    mean1, rstd1 = masked_stats(h1, mi_ref, n_in)
    a2 = norm_act(h1, mean1, rstd1, g2_ref, b2_ref, mi_ref)
    h2 = conv3x3(a2, w2_ref, mid)                                     # (mid, npad)

    # BN3 statistics only over the (strided) valid conv2 output positions.
    mean2, rstd2 = masked_stats(h2, ms_ref, n_out)
    a3 = norm_act(h2, mean2, rstd2, g3_ref, b3_ref, ms_ref)
    h3 = jnp.dot(w3_ref[...], a3.astype(bf16), preferred_element_type=f32)

    # Fused residual add; single lane-dense store per write, both 128-multiples wide.
    o_ref[...] = o_ref[...] + h3


# --------------------------------------------------------------------------
# Wrapper
# --------------------------------------------------------------------------

def bottleneck_forward(x_ncdhw, p, stride=1):
    """Bottleneck forward (preact=True). Input/output layout: NCDHW (PyTorch)."""
    f32 = jnp.float32
    bf16 = jnp.bfloat16

    N, Cin, D, H, W = x_ncdhw.shape
    mid = p["w1"].shape[1]
    Cout = p["w3"].shape[1]

    # Channel padding (sublane alignment); padded channels are exact zeros everywhere.
    Cin_p, mid_p, Cout_p = _rup(Cin, 8), _rup(mid, 8), _rup(Cout, 8)
    Cmax_p = max(Cin_p, mid_p)

    Dp, Hp, Wp = D + 2, H + 2, W + 2
    Do = (D - 1) // stride + 1
    Ho = (H - 1) // stride + 1
    Wo = (W - 1) // stride + 1
    P = Dp * Hp * Wp
    NP = N * P
    NPpad = _rup(NP, 128)                            # lane-dense flat extent
    OFF_MAX = Hp * Wp + Wp + 1                       # largest |tap shift|
    MARGIN = _rup(OFF_MAX, 128)                      # lane-aligned shift margin
    LS = MARGIN + NPpad + MARGIN                     # staging scratch width

    # --- layout plumbing (one small fused copy under jit) ---------------------------
    # TODO(synk): when chaining blocks, keep activations in this (C, flat-padded)
    # layout between blocks to avoid per-block transpose/pad HBM passes.
    xt = jnp.transpose(x_ncdhw.astype(f32), (1, 0, 2, 3, 4))          # (Cin,N,D,H,W)
    xp = jnp.pad(xt, ((0, Cin_p - Cin), (0, 0), (1, 1), (1, 1), (1, 1)))
    xf = jnp.pad(xp.reshape(Cin_p, NP), ((0, 0), (0, NPpad - NP)))    # (Cin_p, NPpad)

    # Tiny (1, NPpad) masks over the flat padded axis; pure functions of static shapes
    # so they constant-fold under jit.
    def axis_masks(size_p, size, out_size):
        idx = jnp.arange(size_p)
        interior = (idx >= 1) & (idx <= size)
        valid = jnp.zeros_like(interior)
        for k in range(out_size):                    # output centers 1, 1+s, ...
            valid = valid | (idx == 1 + k * stride)
        return interior, valid

    di, dv = axis_masks(Dp, D, Do)
    hi, hv = axis_masks(Hp, H, Ho)
    wi, wv = axis_masks(Wp, W, Wo)
    m_int = di[:, None, None] & hi[None, :, None] & wi[None, None, :]
    m_str = dv[:, None, None] & hv[None, :, None] & wv[None, None, :]
    mask_int = jnp.pad(jnp.tile(m_int.reshape(1, P).astype(f32), (1, N)),
                       ((0, 0), (0, NPpad - NP)))                      # (1, NPpad)
    mask_str = jnp.pad(jnp.tile(m_str.reshape(1, P).astype(f32), (1, N)),
                       ((0, 0), (0, NPpad - NP)))                      # (1, NPpad)

    # Weights: bf16, pre-transposed / im2col-flattened, zero-padded channels.
    def pad2(a, r, c):
        return jnp.pad(a, ((0, r - a.shape[0]), (0, c - a.shape[1])))

    w1t = pad2(p["w1"].astype(f32).T, mid_p, Cin_p).astype(bf16)       # (mid_p, Cin_p)
    w3t = pad2(p["w3"].astype(f32).T, Cout_p, mid_p).astype(bf16)      # (Cout_p, mid_p)

    w2r = jnp.pad(p["w2"].astype(f32).reshape(27, mid, mid),
                  ((0, 0), (0, mid_p - mid), (0, mid_p - mid)))
    w2f = jnp.transpose(w2r, (2, 0, 1)).reshape(mid_p, 27 * mid_p).astype(bf16)

    wsr = jnp.pad(p["ws"].astype(f32).reshape(27, Cin, Cout),
                  ((0, 0), (0, Cin_p - Cin), (0, Cout_p - Cout)))
    wsf = jnp.transpose(wsr, (2, 0, 1)).reshape(Cout_p, 27 * Cin_p).astype(bf16)

    def padc(a, cp):
        return jnp.pad(a.astype(f32).reshape(-1, 1), ((0, cp - a.shape[0]), (0, 0)))

    g1, b1 = padc(p["g1"], Cin_p), padc(p["b1"], Cin_p)
    g2, b2 = padc(p["g2"], mid_p), padc(p["b2"], mid_p)
    g3, b3 = padc(p["g3"], mid_p), padc(p["b3"], mid_p)
    gs, bs = padc(p["gs"], Cin_p), padc(p["bs"], Cin_p)

    offs = tuple((kd - 1) * Hp * Wp + (kh - 1) * Wp + (kw - 1)
                 for kd in range(3) for kh in range(3) for kw in range(3))

    kern = functools.partial(
        _bottleneck_kernel,
        cin=Cin_p, mid=mid_p,
        n_in=float(N * D * H * W),                   # batch-stat counts (real voxels)
        n_out=float(N * Do * Ho * Wo),
        eps=EPS, margin=MARGIN, npad=NPpad, offs=offs)

    args = (xf, mask_int, mask_str, w1t, w2f, w3t, wsf,
            g1, b1, g2, b2, g3, b3, gs, bs)

    # VMEM budget (toy shapes): act_scr ~ Cmax_p*LS*4 B, col_scr ~ 27*Cmax_p*NPpad*2 B
    # (~1 MiB total here) + double-buffered in/out blocks; well under every gen's VMEM.
    out_flat = pl.pallas_call(
        kern,
        out_shape=jax.ShapeDtypeStruct((Cout_p, NPpad), f32),
        grid=(1,),
        in_specs=[_full_spec(a.shape) for a in args],
        out_specs=_full_spec((Cout_p, NPpad)),
        scratch_shapes=[pltpu.VMEM((Cmax_p, LS), f32),
                        pltpu.VMEM((27 * Cmax_p, NPpad), bf16)],
        compiler_params=pltpu.CompilerParams(
            dimension_semantics=("arbitrary",),
            vmem_limit_bytes=32 * 1024 * 1024),
    )(*args)

    # Extract the real channels and the (strided) valid output positions; NCDHW out.
    out5 = out_flat[:Cout, :NP].reshape(Cout, N, Dp, Hp, Wp)
    out5 = out5[:, :,
                1:2 + (Do - 1) * stride:stride,
                1:2 + (Ho - 1) * stride:stride,
                1:2 + (Wo - 1) * stride:stride]
    return jnp.transpose(out5, (1, 0, 2, 3, 4))


# --------------------------------------------------------------------------
# Pure-JAX reference
# --------------------------------------------------------------------------

def _ref_bn_relu(v, g, b):
    mean = jnp.mean(v, axis=(0, 1, 2, 3), keepdims=True)
    var = jnp.mean((v - mean) ** 2, axis=(0, 1, 2, 3), keepdims=True)
    return jnp.maximum(g * (v - mean) / jnp.sqrt(var + EPS) + b, 0.0)


def ref_forward(x_ncdhw, p, stride=1):
    x = jnp.transpose(x_ncdhw, (0, 2, 3, 4, 1)).astype(jnp.float32)

    def conv1x1(v, w):
        return jnp.einsum("ndhwc,co->ndhwo", v, w)

    def conv3(v, w, s):
        return lax.conv_general_dilated(
            v, w, (s,) * 3, [(1, 1)] * 3,
            dimension_numbers=("NDHWC", "DHWIO", "NDHWC"))

    h = conv1x1(_ref_bn_relu(x, p["g1"], p["b1"]), p["w1"])
    h = conv3(_ref_bn_relu(h, p["g2"], p["b2"]), p["w2"], stride)
    out = conv1x1(_ref_bn_relu(h, p["g3"], p["b3"]), p["w3"])
    out = out + conv3(_ref_bn_relu(x, p["gs"], p["bs"]), p["ws"], stride)
    return jnp.transpose(out, (0, 4, 1, 2, 3))


# --------------------------------------------------------------------------

if __name__ == "__main__":
    key = jax.random.PRNGKey(0)
    ks = jax.random.split(key, 16)

    N, in_ch, out_ch = 2, 4, 8
    D = H = W = 8
    mid = out_ch // 2                      # Bottleneck expansion = 2

    p = {
        # conv weights: (Cin, Cout) for 1x1x1 and (kd, kh, kw, Cin, Cout) for 3x3x3
        "w1": 0.3 * jax.random.normal(ks[0], (in_ch, mid), jnp.float32),
        "w2": 0.2 * jax.random.normal(ks[1], (3, 3, 3, mid, mid), jnp.float32),
        "w3": 0.3 * jax.random.normal(ks[2], (mid, out_ch), jnp.float32),
        "ws": 0.2 * jax.random.normal(ks[3], (3, 3, 3, in_ch, out_ch), jnp.float32),
        # BatchNorm affine params
        "g1": 1.0 + 0.1 * jax.random.normal(ks[4], (in_ch,), jnp.float32),
        "b1": 0.1 * jax.random.normal(ks[5], (in_ch,), jnp.float32),
        "g2": 1.0 + 0.1 * jax.random.normal(ks[6], (mid,), jnp.float32),
        "b2": 0.1 * jax.random.normal(ks[7], (mid,), jnp.float32),
        "g3": 1.0 + 0.1 * jax.random.normal(ks[8], (mid,), jnp.float32),
        "b3": 0.1 * jax.random.normal(ks[9], (mid,), jnp.float32),
        "gs": 1.0 + 0.1 * jax.random.normal(ks[10], (in_ch,), jnp.float32),
        "bs": 0.1 * jax.random.normal(ks[11], (in_ch,), jnp.float32),
    }
    x = jax.random.normal(ks[12], (N, in_ch, D, H, W), jnp.float32)   # NCDHW

    fwd = jax.jit(bottleneck_forward, static_argnums=2)
    ref_fn = jax.jit(ref_forward, static_argnums=2)

    # Tolerance sized for single-pass bf16 MXU (explicit operand casts) vs the
    # default-precision JAX reference, over up to 216-deep accumulations.
    for stride in (1, 2):
        out = jax.block_until_ready(fwd(x, p, stride))
        ref = jax.block_until_ready(ref_fn(x, p, stride))
        Do = (D - 1) // stride + 1
        assert out.shape == (N, out_ch, Do, Do, Do), (stride, out.shape)
        if not bool(jnp.allclose(out, ref, rtol=3e-2, atol=3e-2)):
            raise AssertionError(
                f"Pallas Bottleneck output mismatch at stride={stride}")
    print("KERNEL_OK")
</pallas_src>

<mosaic_0001>
module attributes {stable_mosaic.version = 11 : i64} {
  func.func @_bottleneck_kernel(%arg0: i32, %arg1: memref<8x2048xf32, #tpu.memory_space<vmem>>, %arg2: memref<1x2048xf32, #tpu.memory_space<vmem>>, %arg3: memref<1x2048xf32, #tpu.memory_space<vmem>>, %arg4: memref<8x8xbf16, #tpu.memory_space<vmem>>, %arg5: memref<8x216xbf16, #tpu.memory_space<vmem>>, %arg6: memref<8x8xbf16, #tpu.memory_space<vmem>>, %arg7: memref<8x216xbf16, #tpu.memory_space<vmem>>, %arg8: memref<8x1xf32, #tpu.memory_space<vmem>>, %arg9: memref<8x1xf32, #tpu.memory_space<vmem>>, %arg10: memref<8x1xf32, #tpu.memory_space<vmem>>, %arg11: memref<8x1xf32, #tpu.memory_space<vmem>>, %arg12: memref<8x1xf32, #tpu.memory_space<vmem>>, %arg13: memref<8x1xf32, #tpu.memory_space<vmem>>, %arg14: memref<8x1xf32, #tpu.memory_space<vmem>>, %arg15: memref<8x1xf32, #tpu.memory_space<vmem>>, %arg16: memref<8x2048xf32, #tpu.memory_space<vmem>>, %arg17: memref<8x2304xf32, #tpu.memory_space<vmem>>, %arg18: memref<216x2048xbf16, #tpu.memory_space<vmem>>) attributes {dimension_semantics = [#tpu.dimension_semantics<arbitrary>], iteration_bounds = array<i64: 1>, scalar_prefetch = 0 : i64, scratch_operands = 2 : i64, tpu.core_type = #tpu.core_type<tc>, window_params = [{pipeline_mode = #tpu.pipeline_mode<synchronous>, transform_indices = @transform_0, window_bounds = array<i64: 8, 2048>}, {pipeline_mode = #tpu.pipeline_mode<synchronous>, transform_indices = @transform_1, window_bounds = array<i64: 1, 2048>}, {pipeline_mode = #tpu.pipeline_mode<synchronous>, transform_indices = @transform_2, window_bounds = array<i64: 1, 2048>}, {pipeline_mode = #tpu.pipeline_mode<synchronous>, transform_indices = @transform_3, window_bounds = array<i64: 8, 8>}, {pipeline_mode = #tpu.pipeline_mode<synchronous>, transform_indices = @transform_4, window_bounds = array<i64: 8, 216>}, {pipeline_mode = #tpu.pipeline_mode<synchronous>, transform_indices = @transform_5, window_bounds = array<i64: 8, 8>}, {pipeline_mode = #tpu.pipeline_mode<synchronous>, transform_indices = @transform_6, window_bounds = array<i64: 8, 216>}, {pipeline_mode = #tpu.pipeline_mode<synchronous>, transform_indices = @transform_7, window_bounds = array<i64: 8, 1>}, {pipeline_mode = #tpu.pipeline_mode<synchronous>, transform_indices = @transform_8, window_bounds = array<i64: 8, 1>}, {pipeline_mode = #tpu.pipeline_mode<synchronous>, transform_indices = @transform_9, window_bounds = array<i64: 8, 1>}, {pipeline_mode = #tpu.pipeline_mode<synchronous>, transform_indices = @transform_10, window_bounds = array<i64: 8, 1>}, {pipeline_mode = #tpu.pipeline_mode<synchronous>, transform_indices = @transform_11, window_bounds = array<i64: 8, 1>}, {pipeline_mode = #tpu.pipeline_mode<synchronous>, transform_indices = @transform_12, window_bounds = array<i64: 8, 1>}, {pipeline_mode = #tpu.pipeline_mode<synchronous>, transform_indices = @transform_13, window_bounds = array<i64: 8, 1>}, {pipeline_mode = #tpu.pipeline_mode<synchronous>, transform_indices = @transform_14, window_bounds = array<i64: 8, 1>}, {pipeline_mode = #tpu.pipeline_mode<synchronous>, transform_indices = @transform_15, window_bounds = array<i64: 8, 2048>}]} {
    %cst = arith.constant 0.000000e+00 : f32
    %0 = vector.broadcast %cst : f32 to vector<8x128xf32>
    %c0 = arith.constant 0 : index
    %c0_0 = arith.constant 0 : index
    %1 = vector.load %arg17[%c0, %c0_0] : memref<8x2304xf32, #tpu.memory_space<vmem>>, vector<8x128xf32>
    tpu.vector_store %arg17[%c0, %c0_0], %0 {strides = array<i32>} : memref<8x2304xf32, #tpu.memory_space<vmem>>, vector<8x128xf32>,
    %cst_1 = arith.constant 0.000000e+00 : f32
    %2 = vector.broadcast %cst_1 : f32 to vector<8x128xf32>
    %c0_2 = arith.constant 0 : index
    %c2176 = arith.constant 2176 : index
    %3 = vector.load %arg17[%c0_2, %c2176] : memref<8x2304xf32, #tpu.memory_space<vmem>>, vector<8x128xf32>
    tpu.vector_store %arg17[%c0_2, %c2176], %2 {strides = array<i32>} : memref<8x2304xf32, #tpu.memory_space<vmem>>, vector<8x128xf32>,
    %c0_3 = arith.constant 0 : index
    %c0_4 = arith.constant 0 : index
    %4 = vector.load %arg1[%c0_3, %c0_4] : memref<8x2048xf32, #tpu.memory_space<vmem>>, vector<8x2048xf32>
    %c0_5 = arith.constant 0 : index
    %c0_6 = arith.constant 0 : index
    %5 = vector.load %arg2[%c0_5, %c0_6] : memref<1x2048xf32, #tpu.memory_space<vmem>>, vector<1x2048xf32>
    %6 = vector.broadcast %5 : vector<1x2048xf32> to vector<8x2048xf32>
    %7 = arith.mulf %4, %6 : vector<8x2048xf32>
    %cst_7 = arith.constant dense<0.000000e+00> : vector<8xf32>
    %8 = vector.multi_reduction <add>, %7, %cst_7 [1] : vector<8x2048xf32> to vector<8xf32>
    %9 = vector.shape_cast %8 : vector<8xf32> to vector<8x1xf32>
    %cst_8 = arith.constant 1.024000e+03 : f32
    %10 = vector.broadcast %cst_8 : f32 to vector<8x1xf32>
    %11 = arith.divf %9, %10 : vector<8x1xf32>
    %12 = vector.broadcast %11 : vector<8x1xf32> to vector<8x2048xf32>
    %13 = arith.subf %4, %12 : vector<8x2048xf32>
    %14 = vector.broadcast %5 : vector<1x2048xf32> to vector<8x2048xf32>
    %15 = arith.mulf %13, %14 : vector<8x2048xf32>
    %16 = arith.mulf %15, %15 : vector<8x2048xf32>
    %cst_9 = arith.constant dense<0.000000e+00> : vector<8xf32>
    %17 = vector.multi_reduction <add>, %16, %cst_9 [1] : vector<8x2048xf32> to vector<8xf32>
    %18 = vector.shape_cast %17 : vector<8xf32> to vector<8x1xf32>
    %cst_10 = arith.constant 1.024000e+03 : f32
    %19 = vector.broadcast %cst_10 : f32 to vector<8x1xf32>
    %20 = arith.divf %18, %19 : vector<8x1xf32>
    %cst_11 = arith.constant 9.99999974E-6 : f32
    %21 = vector.broadcast %cst_11 : f32 to vector<8x1xf32>
    %22 = arith.addf %20, %21 : vector<8x1xf32>
    %23 = math.rsqrt %22 : vector<8x1xf32>
    %c0_12 = arith.constant 0 : index
    %c0_13 = arith.constant 0 : index
    %24 = vector.load %arg1[%c0_12, %c0_13] : memref<8x2048xf32, #tpu.memory_space<vmem>>, vector<8x2048xf32>
    %c0_14 = arith.constant 0 : index
    %c0_15 = arith.constant 0 : index
    %25 = vector.load %arg14[%c0_14, %c0_15] : memref<8x1xf32, #tpu.memory_space<vmem>>, vector<8x1xf32>
    %26 = vector.broadcast %11 : vector<8x1xf32> to vector<8x2048xf32>
    %27 = arith.subf %24, %26 : vector<8x2048xf32>
    %28 = vector.broadcast %25 : vector<8x1xf32> to vector<8x2048xf32>
    %29 = arith.mulf %28, %27 : vector<8x2048xf32>
    %30 = vector.broadcast %23 : vector<8x1xf32> to vector<8x2048xf32>
    %31 = arith.mulf %29, %30 : vector<8x2048xf32>
    %c0_16 = arith.constant 0 : index
    %c0_17 = arith.constant 0 : index
    %32 = vector.load %arg15[%c0_16, %c0_17] : memref<8x1xf32, #tpu.memory_space<vmem>>, vector<8x1xf32>
    %33 = vector.broadcast %32 : vector<8x1xf32> to vector<8x2048xf32>
    %34 = arith.addf %31, %33 : vector<8x2048xf32>
    %cst_18 = arith.constant 0.000000e+00 : f32
    %35 = vector.broadcast %cst_18 : f32 to vector<8x2048xf32>
    %36 = arith.maximumf %34, %35 : vector<8x2048xf32>
    %c0_19 = arith.constant 0 : index
    %c0_20 = arith.constant 0 : index
    %37 = vector.load %arg2[%c0_19, %c0_20] : memref<1x2048xf32, #tpu.memory_space<vmem>>, vector<1x2048xf32>
    %38 = vector.broadcast %37 : vector<1x2048xf32> to vector<8x2048xf32>
    %39 = arith.mulf %36, %38 : vector<8x2048xf32>
    %c0_21 = arith.constant 0 : index
    %c128 = arith.constant 128 : index
    %40 = vector.load %arg17[%c0_21, %c128] : memref<8x2304xf32, #tpu.memory_space<vmem>>, vector<8x2048xf32>
    tpu.vector_store %arg17[%c0_21, %c128], %39 {strides = array<i32>} : memref<8x2304xf32, #tpu.memory_space<vmem>>, vector<8x2048xf32>,
    %c0_22 = arith.constant 0 : index
    %c17 = arith.constant 17 : index
    %41 = vector.load %arg17[%c0_22, %c17] : memref<8x2304xf32, #tpu.memory_space<vmem>>, vector<8x2048xf32>
    %42 = arith.truncf %41 : vector<8x2048xf32> to vector<8x2048xbf16>
    %c0_23 = arith.constant 0 : index
    %c0_24 = arith.constant 0 : index
    %43 = vector.load %arg18[%c0_23, %c0_24] : memref<216x2048xbf16, #tpu.memory_space<vmem>>, vector<8x2048xbf16>
    tpu.vector_store %arg18[%c0_23, %c0_24], %42 {strides = array<i32>} : memref<216x2048xbf16, #tpu.memory_space<vmem>>, vector<8x2048xbf16>,
    %c0_25 = arith.constant 0 : index
    %c18 = arith.constant 18 : index
    %44 = vector.load %arg17[%c0_25, %c18] : memref<8x2304xf32, #tpu.memory_space<vmem>>, vector<8x2048xf32>
    %45 = arith.truncf %44 : vector<8x2048xf32> to vector<8x2048xbf16>
    %c8 = arith.constant 8 : index
    %c0_26 = arith.constant 0 : index
    %46 = vector.load %arg18[%c8, %c0_26] : memref<216x2048xbf16, #tpu.memory_space<vmem>>, vector<8x2048xbf16>
    tpu.vector_store %arg18[%c8, %c0_26], %45 {strides = array<i32>} : memref<216x2048xbf16, #tpu.memory_space<vmem>>, vector<8x2048xbf16>,
    %c0_27 = arith.constant 0 : index
    %c19 = arith.constant 19 : index
    %47 = vector.load %arg17[%c0_27, %c19] : memref<8x2304xf32, #tpu.memory_space<vmem>>, vector<8x2048xf32>
    %48 = arith.truncf %47 : vector<8x2048xf32> to vector<8x2048xbf16>
    %c16 = arith.constant 16 : index
    %c0_28 = arith.constant 0 : index
    %49 = vector.load %arg18[%c16, %c0_28] : memref<216x2048xbf16, #tpu.memory_space<vmem>>, vector<8x2048xbf16>
    tpu.vector_store %arg18[%c16, %c0_28], %48 {strides = array<i32>} : memref<216x2048xbf16, #tpu.memory_space<vmem>>, vector<8x2048xbf16>,
    %c0_29 = arith.constant 0 : index
    %c27 = arith.constant 27 : index
    %50 = vector.load %arg17[%c0_29, %c27] : memref<8x2304xf32, #tpu.memory_space<vmem>>, vector<8x2048xf32>
    %51 = arith.truncf %50 : vector<8x2048xf32> to vector<8x2048xbf16>
    %c24 = arith.constant 24 : index
    %c0_30 = arith.constant 0 : index
    %52 = vector.load %arg18[%c24, %c0_30] : memref<216x2048xbf16, #tpu.memory_space<vmem>>, vector<8x2048xbf16>
    tpu.vector_store %arg18[%c24, %c0_30], %51 {strides = array<i32>} : memref<216x2048xbf16, #tpu.memory_space<vmem>>, vector<8x2048xbf16>,
    %c0_31 = arith.constant 0 : index
    %c28 = arith.constant 28 : index
    %53 = vector.load %arg17[%c0_31, %c28] : memref<8x2304xf32, #tpu.memory_space<vmem>>, vector<8x2048xf32>
    %54 = arith.truncf %53 : vector<8x2048xf32> to vector<8x2048xbf16>
    %c32 = arith.constant 32 : index
    %c0_32 = arith.constant 0 : index
    %55 = vector.load %arg18[%c32, %c0_32] : memref<216x2048xbf16, #tpu.memory_space<vmem>>, vector<8x2048xbf16>
    tpu.vector_store %arg18[%c32, %c0_32], %54 {strides = array<i32>} : memref<216x2048xbf16, #tpu.memory_space<vmem>>, vector<8x2048xbf16>,
    %c0_33 = arith.constant 0 : index
    %c29 = arith.constant 29 : index
    %56 = vector.load %arg17[%c0_33, %c29] : memref<8x2304xf32, #tpu.memory_space<vmem>>, vector<8x2048xf32>
    %57 = arith.truncf %56 : vector<8x2048xf32> to vector<8x2048xbf16>
    %c40 = arith.constant 40 : index
    %c0_34 = arith.constant 0 : index
    %58 = vector.load %arg18[%c40, %c0_34] : memref<216x2048xbf16, #tpu.memory_space<vmem>>, vector<8x2048xbf16>
    tpu.vector_store %arg18[%c40, %c0_34], %57 {strides = array<i32>} : memref<216x2048xbf16, #tpu.memory_space<vmem>>, vector<8x2048xbf16>,
    %c0_35 = arith.constant 0 : index
    %c37 = arith.constant 37 : index
    %59 = vector.load %arg17[%c0_35, %c37] : memref<8x2304xf32, #tpu.memory_space<vmem>>, vector<8x2048xf32>
    %60 = arith.truncf %59 : vector<8x2048xf32> to vector<8x2048xbf16>
    %c48 = arith.constant 48 : index
    %c0_36 = arith.constant 0 : index
    %61 = vector.load %arg18[%c48, %c0_36] : memref<216x2048xbf16, #tpu.memory_space<vmem>>, vector<8x2048xbf16>
    tpu.vector_store %arg18[%c48, %c0_36], %60 {strides = array<i32>} : memref<216x2048xbf16, #tpu.memory_space<vmem>>, vector<8x2048xbf16>,
    %c0_37 = arith.constant 0 : index
    %c38 = arith.constant 38 : index
    %62 = vector.load %arg17[%c0_37, %c38] : memref<8x2304xf32, #tpu.memory_space<vmem>>, vector<8x2048xf32>
    %63 = arith.truncf %62 : vector<8x2048xf32> to vector<8x2048xbf16>
    %c56 = arith.constant 56 : index
    %c0_38 = arith.constant 0 : index
    %64 = vector.load %arg18[%c56, %c0_38] : memref<216x2048xbf16, #tpu.memory_space<vmem>>, vector<8x2048xbf16>
    tpu.vector_store %arg18[%c56, %c0_38], %63 {strides = array<i32>} : memref<216x2048xbf16, #tpu.memory_space<vmem>>, vector<8x2048xbf16>,
    %c0_39 = arith.constant 0 : index
    %c39 = arith.constant 39 : index
    %65 = vector.load %arg17[%c0_39, %c39] : memref<8x2304xf32, #tpu.memory_space<vmem>>, vector<8x2048xf32>
    %66 = arith.truncf %65 : vector<8x2048xf32> to vector<8x2048xbf16>
    %c64 = arith.constant 64 : index
    %c0_40 = arith.constant 0 : index
    %67 = vector.load %arg18[%c64, %c0_40] : memref<216x2048xbf16, #tpu.memory_space<vmem>>, vector<8x2048xbf16>
    tpu.vector_store %arg18[%c64, %c0_40], %66 {strides = array<i32>} : memref<216x2048xbf16, #tpu.memory_space<vmem>>, vector<8x2048xbf16>,
    %c0_41 = arith.constant 0 : index
    %c117 = arith.constant 117 : index
    %68 = vector.load %arg17[%c0_41, %c117] : memref<8x2304xf32, #tpu.memory_space<vmem>>, vector<8x2048xf32>
    %69 = arith.truncf %68 : vector<8x2048xf32> to vector<8x2048xbf16>
    %c72 = arith.constant 72 : index
    %c0_42 = arith.constant 0 : index
    %70 = vector.load %arg18[%c72, %c0_42] : memref<216x2048xbf16, #tpu.memory_space<vmem>>, vector<8x2048xbf16>
    tpu.vector_store %arg18[%c72, %c0_42], %69 {strides = array<i32>} : memref<216x2048xbf16, #tpu.memory_space<vmem>>, vector<8x2048xbf16>,
    %c0_43 = arith.constant 0 : index
    %c118 = arith.constant 118 : index
    %71 = vector.load %arg17[%c0_43, %c118] : memref<8x2304xf32, #tpu.memory_space<vmem>>, vector<8x2048xf32>
    %72 = arith.truncf %71 : vector<8x2048xf32> to vector<8x2048xbf16>
    %c80 = arith.constant 80 : index
    %c0_44 = arith.constant 0 : index
    %73 = vector.load %arg18[%c80, %c0_44] : memref<216x2048xbf16, #tpu.memory_space<vmem>>, vector<8x2048xbf16>
    tpu.vector_store %arg18[%c80, %c0_44], %72 {strides = array<i32>} : memref<216x2048xbf16, #tpu.memory_space<vmem>>, vector<8x2048xbf16>,
    %c0_45 = arith.constant 0 : index
    %c119 = arith.constant 119 : index
    %74 = vector.load %arg17[%c0_45, %c119] : memref<8x2304xf32, #tpu.memory_space<vmem>>, vector<8x2048xf32>
    %75 = arith.truncf %74 : vector<8x2048xf32> to vector<8x2048xbf16>
    %c88 = arith.constant 88 : index
    %c0_46 = arith.constant 0 : index
    %76 = vector.load %arg18[%c88, %c0_46] : memref<216x2048xbf16, #tpu.memory_space<vmem>>, vector<8x2048xbf16>
    tpu.vector_store %arg18[%c88, %c0_46], %75 {strides = array<i32>} : memref<216x2048xbf16, #tpu.memory_space<vmem>>, vector<8x2048xbf16>,
    %c0_47 = arith.constant 0 : index
    %c127 = arith.constant 127 : index
    %77 = vector.load %arg17[%c0_47, %c127] : memref<8x2304xf32, #tpu.memory_space<vmem>>, vector<8x2048xf32>
    %78 = arith.truncf %77 : vector<8x2048xf32> to vector<8x2048xbf16>
    %c96 = arith.constant 96 : index
    %c0_48 = arith.constant 0 : index
    %79 = vector.load %arg18[%c96, %c0_48] : memref<216x2048xbf16, #tpu.memory_space<vmem>>, vector<8x2048xbf16>
    tpu.vector_store %arg18[%c96, %c0_48], %78 {strides = array<i32>} : memref<216x2048xbf16, #tpu.memory_space<vmem>>, vector<8x2048xbf16>,
    %c0_49 = arith.constant 0 : index
    %c128_50 = arith.constant 128 : index
    %80 = vector.load %arg17[%c0_49, %c128_50] : memref<8x2304xf32, #tpu.memory_space<vmem>>, vector<8x2048xf32>
    %81 = arith.truncf %80 : vector<8x2048xf32> to vector<8x2048xbf16>
    %c104 = arith.constant 104 : index
    %c0_51 = arith.constant 0 : index
    %82 = vector.load %arg18[%c104, %c0_51] : memref<216x2048xbf16, #tpu.memory_space<vmem>>, vector<8x2048xbf16>
    tpu.vector_store %arg18[%c104, %c0_51], %81 {strides = array<i32>} : memref<216x2048xbf16, #tpu.memory_space<vmem>>, vector<8x2048xbf16>,
    %c0_52 = arith.constant 0 : index
    %c129 = arith.constant 129 : index
    %83 = vector.load %arg17[%c0_52, %c129] : memref<8x2304xf32, #tpu.memory_space<vmem>>, vector<8x2048xf32>
    %84 = arith.truncf %83 : vector<8x2048xf32> to vector<8x2048xbf16>
    %c112 = arith.constant 112 : index
    %c0_53 = arith.constant 0 : index
    %85 = vector.load %arg18[%c112, %c0_53] : memref<216x2048xbf16, #tpu.memory_space<vmem>>, vector<8x2048xbf16>
    tpu.vector_store %arg18[%c112, %c0_53], %84 {strides = array<i32>} : memref<216x2048xbf16, #tpu.memory_space<vmem>>, vector<8x2048xbf16>,
    %c0_54 = arith.constant 0 : index
    %c137 = arith.constant 137 : index
    %86 = vector.load %arg17[%c0_54, %c137] : memref<8x2304xf32, #tpu.memory_space<vmem>>, vector<8x2048xf32>
    %87 = arith.truncf %86 : vector<8x2048xf32> to vector<8x2048xbf16>
    %c120 = arith.constant 120 : index
    %c0_55 = arith.constant 0 : index
    %88 = vector.load %arg18[%c120, %c0_55] : memref<216x2048xbf16, #tpu.memory_space<vmem>>, vector<8x2048xbf16>
    tpu.vector_store %arg18[%c120, %c0_55], %87 {strides = array<i32>} : memref<216x2048xbf16, #tpu.memory_space<vmem>>, vector<8x2048xbf16>,
    %c0_56 = arith.constant 0 : index
    %c138 = arith.constant 138 : index
    %89 = vector.load %arg17[%c0_56, %c138] : memref<8x2304xf32, #tpu.memory_space<vmem>>, vector<8x2048xf32>
    %90 = arith.truncf %89 : vector<8x2048xf32> to vector<8x2048xbf16>
    %c128_57 = arith.constant 128 : index
    %c0_58 = arith.constant 0 : index
    %91 = vector.load %arg18[%c128_57, %c0_58] : memref<216x2048xbf16, #tpu.memory_space<vmem>>, vector<8x2048xbf16>
    tpu.vector_store %arg18[%c128_57, %c0_58], %90 {strides = array<i32>} : memref<216x2048xbf16, #tpu.memory_space<vmem>>, vector<8x2048xbf16>,
    %c0_59 = arith.constant 0 : index
    %c139 = arith.constant 139 : index
    %92 = vector.load %arg17[%c0_59, %c139] : memref<8x2304xf32, #tpu.memory_space<vmem>>, vector<8x2048xf32>
    %93 = arith.truncf %92 : vector<8x2048xf32> to vector<8x2048xbf16>
    %c136 = arith.constant 136 : index
    %c0_60 = arith.constant 0 : index
    %94 = vector.load %arg18[%c136, %c0_60] : memref<216x2048xbf16, #tpu.memory_space<vmem>>, vector<8x2048xbf16>
    tpu.vector_store %arg18[%c136, %c0_60], %93 {strides = array<i32>} : memref<216x2048xbf16, #tpu.memory_space<vmem>>, vector<8x2048xbf16>,
    %c0_61 = arith.constant 0 : index
    %c217 = arith.constant 217 : index
    %95 = vector.load %arg17[%c0_61, %c217] : memref<8x2304xf32, #tpu.memory_space<vmem>>, vector<8x2048xf32>
    %96 = arith.truncf %95 : vector<8x2048xf32> to vector<8x2048xbf16>
    %c144 = arith.constant 144 : index
    %c0_62 = arith.constant 0 : index
    %97 = vector.load %arg18[%c144, %c0_62] : memref<216x2048xbf16, #tpu.memory_space<vmem>>, vector<8x2048xbf16>
    tpu.vector_store %arg18[%c144, %c0_62], %96 {strides = array<i32>} : memref<216x2048xbf16, #tpu.memory_space<vmem>>, vector<8x2048xbf16>,
    %c0_63 = arith.constant 0 : index
    %c218 = arith.constant 218 : index
    %98 = vector.load %arg17[%c0_63, %c218] : memref<8x2304xf32, #tpu.memory_space<vmem>>, vector<8x2048xf32>
    %99 = arith.truncf %98 : vector<8x2048xf32> to vector<8x2048xbf16>
    %c152 = arith.constant 152 : index
    %c0_64 = arith.constant 0 : index
    %100 = vector.load %arg18[%c152, %c0_64] : memref<216x2048xbf16, #tpu.memory_space<vmem>>, vector<8x2048xbf16>
    tpu.vector_store %arg18[%c152, %c0_64], %99 {strides = array<i32>} : memref<216x2048xbf16, #tpu.memory_space<vmem>>, vector<8x2048xbf16>,
    %c0_65 = arith.constant 0 : index
    %c219 = arith.constant 219 : index
    %101 = vector.load %arg17[%c0_65, %c219] : memref<8x2304xf32, #tpu.memory_space<vmem>>, vector<8x2048xf32>
    %102 = arith.truncf %101 : vector<8x2048xf32> to vector<8x2048xbf16>
    %c160 = arith.constant 160 : index
    %c0_66 = arith.constant 0 : index
    %103 = vector.load %arg18[%c160, %c0_66] : memref<216x2048xbf16, #tpu.memory_space<vmem>>, vector<8x2048xbf16>
    tpu.vector_store %arg18[%c160, %c0_66], %102 {strides = array<i32>} : memref<216x2048xbf16, #tpu.memory_space<vmem>>, vector<8x2048xbf16>,
    %c0_67 = arith.constant 0 : index
    %c227 = arith.constant 227 : index
    %104 = vector.load %arg17[%c0_67, %c227] : memref<8x2304xf32, #tpu.memory_space<vmem>>, vector<8x2048xf32>
    %105 = arith.truncf %104 : vector<8x2048xf32> to vector<8x2048xbf16>
    %c168 = arith.constant 168 : index
    %c0_68 = arith.constant 0 : index
    %106 = vector.load %arg18[%c168, %c0_68] : memref<216x2048xbf16, #tpu.memory_space<vmem>>, vector<8x2048xbf16>
    tpu.vector_store %arg18[%c168, %c0_68], %105 {strides = array<i32>} : memref<216x2048xbf16, #tpu.memory_space<vmem>>, vector<8x2048xbf16>,
    %c0_69 = arith.constant 0 : index
    %c228 = arith.constant 228 : index
    %107 = vector.load %arg17[%c0_69, %c228] : memref<8x2304xf32, #tpu.memory_space<vmem>>, vector<8x2048xf32>
    %108 = arith.truncf %107 : vector<8x2048xf32> to vector<8x2048xbf16>
    %c176 = arith.constant 176 : index
    %c0_70 = arith.constant 0 : index
    %109 = vector.load %arg18[%c176, %c0_70] : memref<216x2048xbf16, #tpu.memory_space<vmem>>, vector<8x2048xbf16>
    tpu.vector_store %arg18[%c176, %c0_70], %108 {strides = array<i32>} : memref<216x2048xbf16, #tpu.memory_space<vmem>>, vector<8x2048xbf16>,
    %c0_71 = arith.constant 0 : index
    %c229 = arith.constant 229 : index
    %110 = vector.load %arg17[%c0_71, %c229] : memref<8x2304xf32, #tpu.memory_space<vmem>>, vector<8x2048xf32>
    %111 = arith.truncf %110 : vector<8x2048xf32> to vector<8x2048xbf16>
    %c184 = arith.constant 184 : index
    %c0_72 = arith.constant 0 : index
    %112 = vector.load %arg18[%c184, %c0_72] : memref<216x2048xbf16, #tpu.memory_space<vmem>>, vector<8x2048xbf16>
    tpu.vector_store %arg18[%c184, %c0_72], %111 {strides = array<i32>} : memref<216x2048xbf16, #tpu.memory_space<vmem>>, vector<8x2048xbf16>,
    %c0_73 = arith.constant 0 : index
    %c237 = arith.constant 237 : index
    %113 = vector.load %arg17[%c0_73, %c237] : memref<8x2304xf32, #tpu.memory_space<vmem>>, vector<8x2048xf32>
    %114 = arith.truncf %113 : vector<8x2048xf32> to vector<8x2048xbf16>
    %c192 = arith.constant 192 : index
    %c0_74 = arith.constant 0 : index
    %115 = vector.load %arg18[%c192, %c0_74] : memref<216x2048xbf16, #tpu.memory_space<vmem>>, vector<8x2048xbf16>
    tpu.vector_store %arg18[%c192, %c0_74], %114 {strides = array<i32>} : memref<216x2048xbf16, #tpu.memory_space<vmem>>, vector<8x2048xbf16>,
    %c0_75 = arith.constant 0 : index
    %c238 = arith.constant 238 : index
    %116 = vector.load %arg17[%c0_75, %c238] : memref<8x2304xf32, #tpu.memory_space<vmem>>, vector<8x2048xf32>
    %117 = arith.truncf %116 : vector<8x2048xf32> to vector<8x2048xbf16>
    %c200 = arith.constant 200 : index
    %c0_76 = arith.constant 0 : index
    %118 = vector.load %arg18[%c200, %c0_76] : memref<216x2048xbf16, #tpu.memory_space<vmem>>, vector<8x2048xbf16>
    tpu.vector_store %arg18[%c200, %c0_76], %117 {strides = array<i32>} : memref<216x2048xbf16, #tpu.memory_space<vmem>>, vector<8x2048xbf16>,
    %c0_77 = arith.constant 0 : index
    %c239 = arith.constant 239 : index
    %119 = vector.load %arg17[%c0_77, %c239] : memref<8x2304xf32, #tpu.memory_space<vmem>>, vector<8x2048xf32>
    %120 = arith.truncf %119 : vector<8x2048xf32> to vector<8x2048xbf16>
    %c208 = arith.constant 208 : index
    %c0_78 = arith.constant 0 : index
    %121 = vector.load %arg18[%c208, %c0_78] : memref<216x2048xbf16, #tpu.memory_space<vmem>>, vector<8x2048xbf16>
    tpu.vector_store %arg18[%c208, %c0_78], %120 {strides = array<i32>} : memref<216x2048xbf16, #tpu.memory_space<vmem>>, vector<8x2048xbf16>,
    %c0_79 = arith.constant 0 : index
    %c0_80 = arith.constant 0 : index
    %122 = vector.load %arg7[%c0_79, %c0_80] : memref<8x216xbf16, #tpu.memory_space<vmem>>, vector<8x216xbf16>
    %c0_81 = arith.constant 0 : index
    %c0_82 = arith.constant 0 : index
    %123 = vector.load %arg18[%c0_81, %c0_82] : memref<216x2048xbf16, #tpu.memory_space<vmem>>, vector<216x2048xbf16>
    %cst_83 = arith.constant dense<0.000000e+00> : vector<8x2048xf32>
    %124 = tpu.matmul %122, %123, %cst_83 {dimension_numbers = #tpu.dot_dimension_numbers<[1], [0], [0], [1], [0, 0, 1, 1], [], []>} : vector<8x216xbf16>, vector<216x2048xbf16>, vector<8x2048xf32> -> vector<8x2048xf32>
    %c0_84 = arith.constant 0 : index
    %c0_85 = arith.constant 0 : index
    %125 = vector.load %arg16[%c0_84, %c0_85] : memref<8x2048xf32, #tpu.memory_space<vmem>>, vector<8x2048xf32>
    tpu.vector_store %arg16[%c0_84, %c0_85], %124 {strides = array<i32>} : memref<8x2048xf32, #tpu.memory_space<vmem>>, vector<8x2048xf32>,
    %c0_86 = arith.constant 0 : index
    %c0_87 = arith.constant 0 : index
    %126 = vector.load %arg1[%c0_86, %c0_87] : memref<8x2048xf32, #tpu.memory_space<vmem>>, vector<8x2048xf32>
    %c0_88 = arith.constant 0 : index
    %c0_89 = arith.constant 0 : index
    %127 = vector.load %arg8[%c0_88, %c0_89] : memref<8x1xf32, #tpu.memory_space<vmem>>, vector<8x1xf32>
    %128 = vector.broadcast %11 : vector<8x1xf32> to vector<8x2048xf32>
    %129 = arith.subf %126, %128 : vector<8x2048xf32>
    %130 = vector.broadcast %127 : vector<8x1xf32> to vector<8x2048xf32>
    %131 = arith.mulf %130, %129 : vector<8x2048xf32>
    %132 = vector.broadcast %23 : vector<8x1xf32> to vector<8x2048xf32>
    %133 = arith.mulf %131, %132 : vector<8x2048xf32>
    %c0_90 = arith.constant 0 : index
    %c0_91 = arith.constant 0 : index
    %134 = vector.load %arg9[%c0_90, %c0_91] : memref<8x1xf32, #tpu.memory_space<vmem>>, vector<8x1xf32>
    %135 = vector.broadcast %134 : vector<8x1xf32> to vector<8x2048xf32>
    %136 = arith.addf %133, %135 : vector<8x2048xf32>
    %cst_92 = arith.constant 0.000000e+00 : f32
    %137 = vector.broadcast %cst_92 : f32 to vector<8x2048xf32>
    %138 = arith.maximumf %136, %137 : vector<8x2048xf32>
    %c0_93 = arith.constant 0 : index
    %c0_94 = arith.constant 0 : index
    %139 = vector.load %arg2[%c0_93, %c0_94] : memref<1x2048xf32, #tpu.memory_space<vmem>>, vector<1x2048xf32>
    %140 = vector.broadcast %139 : vector<1x2048xf32> to vector<8x2048xf32>
    %141 = arith.mulf %138, %140 : vector<8x2048xf32>
    %c0_95 = arith.constant 0 : index
    %c0_96 = arith.constant 0 : index
    %142 = vector.load %arg4[%c0_95, %c0_96] : memref<8x8xbf16, #tpu.memory_space<vmem>>, vector<8x8xbf16>
    %143 = arith.truncf %141 : vector<8x2048xf32> to vector<8x2048xbf16>
    %cst_97 = arith.constant dense<0.000000e+00> : vector<8x2048xf32>
    %144 = tpu.matmul %142, %143, %cst_97 {dimension_numbers = #tpu.dot_dimension_numbers<[1], [0], [0], [1], [0, 0, 1, 1], [], []>} : vector<8x8xbf16>, vector<8x2048xbf16>, vector<8x2048xf32> -> vector<8x2048xf32>
    %c0_98 = arith.constant 0 : index
    %c0_99 = arith.constant 0 : index
    %145 = vector.load %arg2[%c0_98, %c0_99] : memref<1x2048xf32, #tpu.memory_space<vmem>>, vector<1x2048xf32>
    %146 = vector.broadcast %145 : vector<1x2048xf32> to vector<8x2048xf32>
    %147 = arith.mulf %144, %146 : vector<8x2048xf32>
    %cst_100 = arith.constant dense<0.000000e+00> : vector<8xf32>
    %148 = vector.multi_reduction <add>, %147, %cst_100 [1] : vector<8x2048xf32> to vector<8xf32>
    %149 = vector.shape_cast %148 : vector<8xf32> to vector<8x1xf32>
    %cst_101 = arith.constant 1.024000e+03 : f32
    %150 = vector.broadcast %cst_101 : f32 to vector<8x1xf32>
    %151 = arith.divf %149, %150 : vector<8x1xf32>
    %152 = vector.broadcast %151 : vector<8x1xf32> to vector<8x2048xf32>
    %153 = arith.subf %144, %152 : vector<8x2048xf32>
    %154 = vector.broadcast %145 : vector<1x2048xf32> to vector<8x2048xf32>
    %155 = arith.mulf %153, %154 : vector<8x2048xf32>
    %156 = arith.mulf %155, %155 : vector<8x2048xf32>
    %cst_102 = arith.constant dense<0.000000e+00> : vector<8xf32>
    %157 = vector.multi_reduction <add>, %156, %cst_102 [1] : vector<8x2048xf32> to vector<8xf32>
    %158 = vector.shape_cast %157 : vector<8xf32> to vector<8x1xf32>
    %cst_103 = arith.constant 1.024000e+03 : f32
    %159 = vector.broadcast %cst_103 : f32 to vector<8x1xf32>
    %160 = arith.divf %158, %159 : vector<8x1xf32>
    %cst_104 = arith.constant 9.99999974E-6 : f32
    %161 = vector.broadcast %cst_104 : f32 to vector<8x1xf32>
    %162 = arith.addf %160, %161 : vector<8x1xf32>
    %163 = math.rsqrt %162 : vector<8x1xf32>
    %c0_105 = arith.constant 0 : index
    %c0_106 = arith.constant 0 : index
    %164 = vector.load %arg10[%c0_105, %c0_106] : memref<8x1xf32, #tpu.memory_space<vmem>>, vector<8x1xf32>
    %165 = vector.broadcast %151 : vector<8x1xf32> to vector<8x2048xf32>
    %166 = arith.subf %144, %165 : vector<8x2048xf32>
    %167 = vector.broadcast %164 : vector<8x1xf32> to vector<8x2048xf32>
    %168 = arith.mulf %167, %166 : vector<8x2048xf32>
    %169 = vector.broadcast %163 : vector<8x1xf32> to vector<8x2048xf32>
    %170 = arith.mulf %168, %169 : vector<8x2048xf32>
    %c0_107 = arith.constant 0 : index
    %c0_108 = arith.constant 0 : index
    %171 = vector.load %arg11[%c0_107, %c0_108] : memref<8x1xf32, #tpu.memory_space<vmem>>, vector<8x1xf32>
    %172 = vector.broadcast %171 : vector<8x1xf32> to vector<8x2048xf32>
    %173 = arith.addf %170, %172 : vector<8x2048xf32>
    %cst_109 = arith.constant 0.000000e+00 : f32
    %174 = vector.broadcast %cst_109 : f32 to vector<8x2048xf32>
    %175 = arith.maximumf %173, %174 : vector<8x2048xf32>
    %c0_110 = arith.constant 0 : index
    %c0_111 = arith.constant 0 : index
    %176 = vector.load %arg2[%c0_110, %c0_111] : memref<1x2048xf32, #tpu.memory_space<vmem>>, vector<1x2048xf32>
    %177 = vector.broadcast %176 : vector<1x2048xf32> to vector<8x2048xf32>
    %178 = arith.mulf %175, %177 : vector<8x2048xf32>
    %c0_112 = arith.constant 0 : index
    %c128_113 = arith.constant 128 : index
    %179 = vector.load %arg17[%c0_112, %c128_113] : memref<8x2304xf32, #tpu.memory_space<vmem>>, vector<8x2048xf32>
    tpu.vector_store %arg17[%c0_112, %c128_113], %178 {strides = array<i32>} : memref<8x2304xf32, #tpu.memory_space<vmem>>, vector<8x2048xf32>,
    %c0_114 = arith.constant 0 : index
    %c17_115 = arith.constant 17 : index
    %180 = vector.load %arg17[%c0_114, %c17_115] : memref<8x2304xf32, #tpu.memory_space<vmem>>, vector<8x2048xf32>
    %181 = arith.truncf %180 : vector<8x2048xf32> to vector<8x2048xbf16>
    %c0_116 = arith.constant 0 : index
    %c0_117 = arith.constant 0 : index
    %182 = vector.load %arg18[%c0_116, %c0_117] : memref<216x2048xbf16, #tpu.memory_space<vmem>>, vector<8x2048xbf16>
    tpu.vector_store %arg18[%c0_116, %c0_117], %181 {strides = array<i32>} : memref<216x2048xbf16, #tpu.memory_space<vmem>>, vector<8x2048xbf16>,
    %c0_118 = arith.constant 0 : index
    %c18_119 = arith.constant 18 : index
    %183 = vector.load %arg17[%c0_118, %c18_119] : memref<8x2304xf32, #tpu.memory_space<vmem>>, vector<8x2048xf32>
    %184 = arith.truncf %183 : vector<8x2048xf32> to vector<8x2048xbf16>
    %c8_120 = arith.constant 8 : index
    %c0_121 = arith.constant 0 : index
    %185 = vector.load %arg18[%c8_120, %c0_121] : memref<216x2048xbf16, #tpu.memory_space<vmem>>, vector<8x2048xbf16>
    tpu.vector_store %arg18[%c8_120, %c0_121], %184 {strides = array<i32>} : memref<216x2048xbf16, #tpu.memory_space<vmem>>, vector<8x2048xbf16>,
    %c0_122 = arith.constant 0 : index
    %c19_123 = arith.constant 19 : index
    %186 = vector.load %arg17[%c0_122, %c19_123] : memref<8x2304xf32, #tpu.memory_space<vmem>>, vector<8x2048xf32>
    %187 = arith.truncf %186 : vector<8x2048xf32> to vector<8x2048xbf16>
    %c16_124 = arith.constant 16 : index
    %c0_125 = arith.constant 0 : index
    %188 = vector.load %arg18[%c16_124, %c0_125] : memref<216x2048xbf16, #tpu.memory_space<vmem>>, vector<8x2048xbf16>
    tpu.vector_store %arg18[%c16_124, %c0_125], %187 {strides = array<i32>} : memref<216x2048xbf16, #tpu.memory_space<vmem>>, vector<8x2048xbf16>,
    %c0_126 = arith.constant 0 : index
    %c27_127 = arith.constant 27 : index
    %189 = vector.load %arg17[%c0_126, %c27_127] : memref<8x2304xf32, #tpu.memory_space<vmem>>, vector<8x2048xf32>
    %190 = arith.truncf %189 : vector<8x2048xf32> to vector<8x2048xbf16>
    %c24_128 = arith.constant 24 : index
    %c0_129 = arith.constant 0 : index
    %191 = vector.load %arg18[%c24_128, %c0_129] : memref<216x2048xbf16, #tpu.memory_space<vmem>>, vector<8x2048xbf16>
    tpu.vector_store %arg18[%c24_128, %c0_129], %190 {strides = array<i32>} : memref<216x2048xbf16, #tpu.memory_space<vmem>>, vector<8x2048xbf16>,
    %c0_130 = arith.constant 0 : index
    %c28_131 = arith.constant 28 : index
    %192 = vector.load %arg17[%c0_130, %c28_131] : memref<8x2304xf32, #tpu.memory_space<vmem>>, vector<8x2048xf32>
    %193 = arith.truncf %192 : vector<8x2048xf32> to vector<8x2048xbf16>
    %c32_132 = arith.constant 32 : index
    %c0_133 = arith.constant 0 : index
    %194 = vector.load %arg18[%c32_132, %c0_133] : memref<216x2048xbf16, #tpu.memory_space<vmem>>, vector<8x2048xbf16>
    tpu.vector_store %arg18[%c32_132, %c0_133], %193 {strides = array<i32>} : memref<216x2048xbf16, #tpu.memory_space<vmem>>, vector<8x2048xbf16>,
    %c0_134 = arith.constant 0 : index
    %c29_135 = arith.constant 29 : index
    %195 = vector.load %arg17[%c0_134, %c29_135] : memref<8x2304xf32, #tpu.memory_space<vmem>>, vector<8x2048xf32>
    %196 = arith.truncf %195 : vector<8x2048xf32> to vector<8x2048xbf16>
    %c40_136 = arith.constant 40 : index
    %c0_137 = arith.constant 0 : index
    %197 = vector.load %arg18[%c40_136, %c0_137] : memref<216x2048xbf16, #tpu.memory_space<vmem>>, vector<8x2048xbf16>
    tpu.vector_store %arg18[%c40_136, %c0_137], %196 {strides = array<i32>} : memref<216x2048xbf16, #tpu.memory_space<vmem>>, vector<8x2048xbf16>,
    %c0_138 = arith.constant 0 : index
    %c37_139 = arith.constant 37 : index
    %198 = vector.load %arg17[%c0_138, %c37_139] : memref<8x2304xf32, #tpu.memory_space<vmem>>, vector<8x2048xf32>
    %199 = arith.truncf %198 : vector<8x2048xf32> to vector<8x2048xbf16>
    %c48_140 = arith.constant 48 : index
    %c0_141 = arith.constant 0 : index
    %200 = vector.load %arg18[%c48_140, %c0_141] : memref<216x2048xbf16, #tpu.memory_space<vmem>>, vector<8x2048xbf16>
    tpu.vector_store %arg18[%c48_140, %c0_141], %199 {strides = array<i32>} : memref<216x2048xbf16, #tpu.memory_space<vmem>>, vector<8x2048xbf16>,
    %c0_142 = arith.constant 0 : index
    %c38_143 = arith.constant 38 : index
    %201 = vector.load %arg17[%c0_142, %c38_143] : memref<8x2304xf32, #tpu.memory_space<vmem>>, vector<8x2048xf32>
    %202 = arith.truncf %201 : vector<8x2048xf32> to vector<8x2048xbf16>
    %c56_144 = arith.constant 56 : index
    %c0_145 = arith.constant 0 : index
    %203 = vector.load %arg18[%c56_144, %c0_145] : memref<216x2048xbf16, #tpu.memory_space<vmem>>, vector<8x2048xbf16>
    tpu.vector_store %arg18[%c56_144, %c0_145], %202 {strides = array<i32>} : memref<216x2048xbf16, #tpu.memory_space<vmem>>, vector<8x2048xbf16>,
    %c0_146 = arith.constant 0 : index
    %c39_147 = arith.constant 39 : index
    %204 = vector.load %arg17[%c0_146, %c39_147] : memref<8x2304xf32, #tpu.memory_space<vmem>>, vector<8x2048xf32>
    %205 = arith.truncf %204 : vector<8x2048xf32> to vector<8x2048xbf16>
    %c64_148 = arith.constant 64 : index
    %c0_149 = arith.constant 0 : index
    %206 = vector.load %arg18[%c64_148, %c0_149] : memref<216x2048xbf16, #tpu.memory_space<vmem>>, vector<8x2048xbf16>
    tpu.vector_store %arg18[%c64_148, %c0_149], %205 {strides = array<i32>} : memref<216x2048xbf16, #tpu.memory_space<vmem>>, vector<8x2048xbf16>,
    %c0_150 = arith.constant 0 : index
    %c117_151 = arith.constant 117 : index
    %207 = vector.load %arg17[%c0_150, %c117_151] : memref<8x2304xf32, #tpu.memory_space<vmem>>, vector<8x2048xf32>
    %208 = arith.truncf %207 : vector<8x2048xf32> to vector<8x2048xbf16>
    %c72_152 = arith.constant 72 : index
    %c0_153 = arith.constant 0 : index
    %209 = vector.load %arg18[%c72_152, %c0_153] : memref<216x2048xbf16, #tpu.memory_space<vmem>>, vector<8x2048xbf16>
    tpu.vector_store %arg18[%c72_152, %c0_153], %208 {strides = array<i32>} : memref<216x2048xbf16, #tpu.memory_space<vmem>>, vector<8x2048xbf16>,
    %c0_154 = arith.constant 0 : index
    %c118_155 = arith.constant 118 : index
    %210 = vector.load %arg17[%c0_154, %c118_155] : memref<8x2304xf32, #tpu.memory_space<vmem>>, vector<8x2048xf32>
    %211 = arith.truncf %210 : vector<8x2048xf32> to vector<8x2048xbf16>
    %c80_156 = arith.constant 80 : index
    %c0_157 = arith.constant 0 : index
    %212 = vector.load %arg18[%c80_156, %c0_157] : memref<216x2048xbf16, #tpu.memory_space<vmem>>, vector<8x2048xbf16>
    tpu.vector_store %arg18[%c80_156, %c0_157], %211 {strides = array<i32>} : memref<216x2048xbf16, #tpu.memory_space<vmem>>, vector<8x2048xbf16>,
    %c0_158 = arith.constant 0 : index
    %c119_159 = arith.constant 119 : index
    %213 = vector.load %arg17[%c0_158, %c119_159] : memref<8x2304xf32, #tpu.memory_space<vmem>>, vector<8x2048xf32>
    %214 = arith.truncf %213 : vector<8x2048xf32> to vector<8x2048xbf16>
    %c88_160 = arith.constant 88 : index
    %c0_161 = arith.constant 0 : index
    %215 = vector.load %arg18[%c88_160, %c0_161] : memref<216x2048xbf16, #tpu.memory_space<vmem>>, vector<8x2048xbf16>
    tpu.vector_store %arg18[%c88_160, %c0_161], %214 {strides = array<i32>} : memref<216x2048xbf16, #tpu.memory_space<vmem>>, vector<8x2048xbf16>,
    %c0_162 = arith.constant 0 : index
    %c127_163 = arith.constant 127 : index
    %216 = vector.load %arg17[%c0_162, %c127_163] : memref<8x2304xf32, #tpu.memory_space<vmem>>, vector<8x2048xf32>
    %217 = arith.truncf %216 : vector<8x2048xf32> to vector<8x2048xbf16>
    %c96_164 = arith.constant 96 : index
    %c0_165 = arith.constant 0 : index
    %218 = vector.load %arg18[%c96_164, %c0_165] : memref<216x2048xbf16, #tpu.memory_space<vmem>>, vector<8x2048xbf16>
    tpu.vector_store %arg18[%c96_164, %c0_165], %217 {strides = array<i32>} : memref<216x2048xbf16, #tpu.memory_space<vmem>>, vector<8x2048xbf16>,
    %c0_166 = arith.constant 0 : index
    %c128_167 = arith.constant 128 : index
    %219 = vector.load %arg17[%c0_166, %c128_167] : memref<8x2304xf32, #tpu.memory_space<vmem>>, vector<8x2048xf32>
    %220 = arith.truncf %219 : vector<8x2048xf32> to vector<8x2048xbf16>
    %c104_168 = arith.constant 104 : index
    %c0_169 = arith.constant 0 : index
    %221 = vector.load %arg18[%c104_168, %c0_169] : memref<216x2048xbf16, #tpu.memory_space<vmem>>, vector<8x2048xbf16>
    tpu.vector_store %arg18[%c104_168, %c0_169], %220 {strides = array<i32>} : memref<216x2048xbf16, #tpu.memory_space<vmem>>, vector<8x2048xbf16>,
    %c0_170 = arith.constant 0 : index
    %c129_171 = arith.constant 129 : index
    %222 = vector.load %arg17[%c0_170, %c129_171] : memref<8x2304xf32, #tpu.memory_space<vmem>>, vector<8x2048xf32>
    %223 = arith.truncf %222 : vector<8x2048xf32> to vector<8x2048xbf16>
    %c112_172 = arith.constant 112 : index
    %c0_173 = arith.constant 0 : index
    %224 = vector.load %arg18[%c112_172, %c0_173] : memref<216x2048xbf16, #tpu.memory_space<vmem>>, vector<8x2048xbf16>
    tpu.vector_store %arg18[%c112_172, %c0_173], %223 {strides = array<i32>} : memref<216x2048xbf16, #tpu.memory_space<vmem>>, vector<8x2048xbf16>,
    %c0_174 = arith.constant 0 : index
    %c137_175 = arith.constant 137 : index
    %225 = vector.load %arg17[%c0_174, %c137_175] : memref<8x2304xf32, #tpu.memory_space<vmem>>, vector<8x2048xf32>
    %226 = arith.truncf %225 : vector<8x2048xf32> to vector<8x2048xbf16>
    %c120_176 = arith.constant 120 : index
    %c0_177 = arith.constant 0 : index
    %227 = vector.load %arg18[%c120_176, %c0_177] : memref<216x2048xbf16, #tpu.memory_space<vmem>>, vector<8x2048xbf16>
    tpu.vector_store %arg18[%c120_176, %c0_177], %226 {strides = array<i32>} : memref<216x2048xbf16, #tpu.memory_space<vmem>>, vector<8x2048xbf16>,
    %c0_178 = arith.constant 0 : index
    %c138_179 = arith.constant 138 : index
    %228 = vector.load %arg17[%c0_178, %c138_179] : memref<8x2304xf32, #tpu.memory_space<vmem>>, vector<8x2048xf32>
    %229 = arith.truncf %228 : vector<8x2048xf32> to vector<8x2048xbf16>
    %c128_180 = arith.constant 128 : index
    %c0_181 = arith.constant 0 : index
    %230 = vector.load %arg18[%c128_180, %c0_181] : memref<216x2048xbf16, #tpu.memory_space<vmem>>, vector<8x2048xbf16>
    tpu.vector_store %arg18[%c128_180, %c0_181], %229 {strides = array<i32>} : memref<216x2048xbf16, #tpu.memory_space<vmem>>, vector<8x2048xbf16>,
    %c0_182 = arith.constant 0 : index
    %c139_183 = arith.constant 139 : index
    %231 = vector.load %arg17[%c0_182, %c139_183] : memref<8x2304xf32, #tpu.memory_space<vmem>>, vector<8x2048xf32>
    %232 = arith.truncf %231 : vector<8x2048xf32> to vector<8x2048xbf16>
    %c136_184 = arith.constant 136 : index
    %c0_185 = arith.constant 0 : index
    %233 = vector.load %arg18[%c136_184, %c0_185] : memref<216x2048xbf16, #tpu.memory_space<vmem>>, vector<8x2048xbf16>
    tpu.vector_store %arg18[%c136_184, %c0_185], %232 {strides = array<i32>} : memref<216x2048xbf16, #tpu.memory_space<vmem>>, vector<8x2048xbf16>,
    %c0_186 = arith.constant 0 : index
    %c217_187 = arith.constant 217 : index
    %234 = vector.load %arg17[%c0_186, %c217_187] : memref<8x2304xf32, #tpu.memory_space<vmem>>, vector<8x2048xf32>
    %235 = arith.truncf %234 : vector<8x2048xf32> to vector<8x2048xbf16>
    %c144_188 = arith.constant 144 : index
    %c0_189 = arith.constant 0 : index
    %236 = vector.load %arg18[%c144_188, %c0_189] : memref<216x2048xbf16, #tpu.memory_space<vmem>>, vector<8x2048xbf16>
    tpu.vector_store %arg18[%c144_188, %c0_189], %235 {strides = array<i32>} : memref<216x2048xbf16, #tpu.memory_space<vmem>>, vector<8x2048xbf16>,
    %c0_190 = arith.constant 0 : index
    %c218_191 = arith.constant 218 : index
    %237 = vector.load %arg17[%c0_190, %c218_191] : memref<8x2304xf32, #tpu.memory_space<vmem>>, vector<8x2048xf32>
    %238 = arith.truncf %237 : vector<8x2048xf32> to vector<8x2048xbf16>
    %c152_192 = arith.constant 152 : index
    %c0_193 = arith.constant 0 : index
    %239 = vector.load %arg18[%c152_192, %c0_193] : memref<216x2048xbf16, #tpu.memory_space<vmem>>, vector<8x2048xbf16>
    tpu.vector_store %arg18[%c152_192, %c0_193], %238 {strides = array<i32>} : memref<216x2048xbf16, #tpu.memory_space<vmem>>, vector<8x2048xbf16>,
    %c0_194 = arith.constant 0 : index
    %c219_195 = arith.constant 219 : index
    %240 = vector.load %arg17[%c0_194, %c219_195] : memref<8x2304xf32, #tpu.memory_space<vmem>>, vector<8x2048xf32>
    %241 = arith.truncf %240 : vector<8x2048xf32> to vector<8x2048xbf16>
    %c160_196 = arith.constant 160 : index
    %c0_197 = arith.constant 0 : index
    %242 = vector.load %arg18[%c160_196, %c0_197] : memref<216x2048xbf16, #tpu.memory_space<vmem>>, vector<8x2048xbf16>
    tpu.vector_store %arg18[%c160_196, %c0_197], %241 {strides = array<i32>} : memref<216x2048xbf16, #tpu.memory_space<vmem>>, vector<8x2048xbf16>,
    %c0_198 = arith.constant 0 : index
    %c227_199 = arith.constant 227 : index
    %243 = vector.load %arg17[%c0_198, %c227_199] : memref<8x2304xf32, #tpu.memory_space<vmem>>, vector<8x2048xf32>
    %244 = arith.truncf %243 : vector<8x2048xf32> to vector<8x2048xbf16>
    %c168_200 = arith.constant 168 : index
    %c0_201 = arith.constant 0 : index
    %245 = vector.load %arg18[%c168_200, %c0_201] : memref<216x2048xbf16, #tpu.memory_space<vmem>>, vector<8x2048xbf16>
    tpu.vector_store %arg18[%c168_200, %c0_201], %244 {strides = array<i32>} : memref<216x2048xbf16, #tpu.memory_space<vmem>>, vector<8x2048xbf16>,
    %c0_202 = arith.constant 0 : index
    %c228_203 = arith.constant 228 : index
    %246 = vector.load %arg17[%c0_202, %c228_203] : memref<8x2304xf32, #tpu.memory_space<vmem>>, vector<8x2048xf32>
    %247 = arith.truncf %246 : vector<8x2048xf32> to vector<8x2048xbf16>
    %c176_204 = arith.constant 176 : index
    %c0_205 = arith.constant 0 : index
    %248 = vector.load %arg18[%c176_204, %c0_205] : memref<216x2048xbf16, #tpu.memory_space<vmem>>, vector<8x2048xbf16>
    tpu.vector_store %arg18[%c176_204, %c0_205], %247 {strides = array<i32>} : memref<216x2048xbf16, #tpu.memory_space<vmem>>, vector<8x2048xbf16>,
    %c0_206 = arith.constant 0 : index
    %c229_207 = arith.constant 229 : index
    %249 = vector.load %arg17[%c0_206, %c229_207] : memref<8x2304xf32, #tpu.memory_space<vmem>>, vector<8x2048xf32>
    %250 = arith.truncf %249 : vector<8x2048xf32> to vector<8x2048xbf16>
    %c184_208 = arith.constant 184 : index
    %c0_209 = arith.constant 0 : index
    %251 = vector.load %arg18[%c184_208, %c0_209] : memref<216x2048xbf16, #tpu.memory_space<vmem>>, vector<8x2048xbf16>
    tpu.vector_store %arg18[%c184_208, %c0_209], %250 {strides = array<i32>} : memref<216x2048xbf16, #tpu.memory_space<vmem>>, vector<8x2048xbf16>,
    %c0_210 = arith.constant 0 : index
    %c237_211 = arith.constant 237 : index
    %252 = vector.load %arg17[%c0_210, %c237_211] : memref<8x2304xf32, #tpu.memory_space<vmem>>, vector<8x2048xf32>
    %253 = arith.truncf %252 : vector<8x2048xf32> to vector<8x2048xbf16>
    %c192_212 = arith.constant 192 : index
    %c0_213 = arith.constant 0 : index
    %254 = vector.load %arg18[%c192_212, %c0_213] : memref<216x2048xbf16, #tpu.memory_space<vmem>>, vector<8x2048xbf16>
    tpu.vector_store %arg18[%c192_212, %c0_213], %253 {strides = array<i32>} : memref<216x2048xbf16, #tpu.memory_space<vmem>>, vector<8x2048xbf16>,
    %c0_214 = arith.constant 0 : index
    %c238_215 = arith.constant 238 : index
    %255 = vector.load %arg17[%c0_214, %c238_215] : memref<8x2304xf32, #tpu.memory_space<vmem>>, vector<8x2048xf32>
    %256 = arith.truncf %255 : vector<8x2048xf32> to vector<8x2048xbf16>
    %c200_216 = arith.constant 200 : index
    %c0_217 = arith.constant 0 : index
    %257 = vector.load %arg18[%c200_216, %c0_217] : memref<216x2048xbf16, #tpu.memory_space<vmem>>, vector<8x2048xbf16>
    tpu.vector_store %arg18[%c200_216, %c0_217], %256 {strides = array<i32>} : memref<216x2048xbf16, #tpu.memory_space<vmem>>, vector<8x2048xbf16>,
    %c0_218 = arith.constant 0 : index
    %c239_219 = arith.constant 239 : index
    %258 = vector.load %arg17[%c0_218, %c239_219] : memref<8x2304xf32, #tpu.memory_space<vmem>>, vector<8x2048xf32>
    %259 = arith.truncf %258 : vector<8x2048xf32> to vector<8x2048xbf16>
    %c208_220 = arith.constant 208 : index
    %c0_221 = arith.constant 0 : index
    %260 = vector.load %arg18[%c208_220, %c0_221] : memref<216x2048xbf16, #tpu.memory_space<vmem>>, vector<8x2048xbf16>
    tpu.vector_store %arg18[%c208_220, %c0_221], %259 {strides = array<i32>} : memref<216x2048xbf16, #tpu.memory_space<vmem>>, vector<8x2048xbf16>,
    %c0_222 = arith.constant 0 : index
    %c0_223 = arith.constant 0 : index
    %261 = vector.load %arg5[%c0_222, %c0_223] : memref<8x216xbf16, #tpu.memory_space<vmem>>, vector<8x216xbf16>
    %c0_224 = arith.constant 0 : index
    %c0_225 = arith.constant 0 : index
    %262 = vector.load %arg18[%c0_224, %c0_225] : memref<216x2048xbf16, #tpu.memory_space<vmem>>, vector<216x2048xbf16>
    %cst_226 = arith.constant dense<0.000000e+00> : vector<8x2048xf32>
    %263 = tpu.matmul %261, %262, %cst_226 {dimension_numbers = #tpu.dot_dimension_numbers<[1], [0], [0], [1], [0, 0, 1, 1], [], []>} : vector<8x216xbf16>, vector<216x2048xbf16>, vector<8x2048xf32> -> vector<8x2048xf32>
    %c0_227 = arith.constant 0 : index
    %c0_228 = arith.constant 0 : index
    %264 = vector.load %arg3[%c0_227, %c0_228] : memref<1x2048xf32, #tpu.memory_space<vmem>>, vector<1x2048xf32>
    %265 = vector.broadcast %264 : vector<1x2048xf32> to vector<8x2048xf32>
    %266 = arith.mulf %263, %265 : vector<8x2048xf32>
    %cst_229 = arith.constant dense<0.000000e+00> : vector<8xf32>
    %267 = vector.multi_reduction <add>, %266, %cst_229 [1] : vector<8x2048xf32> to vector<8xf32>
    %268 = vector.shape_cast %267 : vector<8xf32> to vector<8x1xf32>
    %cst_230 = arith.constant 1.024000e+03 : f32
    %269 = vector.broadcast %cst_230 : f32 to vector<8x1xf32>
    %270 = arith.divf %268, %269 : vector<8x1xf32>
    %271 = vector.broadcast %270 : vector<8x1xf32> to vector<8x2048xf32>
    %272 = arith.subf %263, %271 : vector<8x2048xf32>
    %273 = vector.broadcast %264 : vector<1x2048xf32> to vector<8x2048xf32>
    %274 = arith.mulf %272, %273 : vector<8x2048xf32>
    %275 = arith.mulf %274, %274 : vector<8x2048xf32>
    %cst_231 = arith.constant dense<0.000000e+00> : vector<8xf32>
    %276 = vector.multi_reduction <add>, %275, %cst_231 [1] : vector<8x2048xf32> to vector<8xf32>
    %277 = vector.shape_cast %276 : vector<8xf32> to vector<8x1xf32>
    %cst_232 = arith.constant 1.024000e+03 : f32
    %278 = vector.broadcast %cst_232 : f32 to vector<8x1xf32>
    %279 = arith.divf %277, %278 : vector<8x1xf32>
    %cst_233 = arith.constant 9.99999974E-6 : f32
    %280 = vector.broadcast %cst_233 : f32 to vector<8x1xf32>
    %281 = arith.addf %279, %280 : vector<8x1xf32>
    %282 = math.rsqrt %281 : vector<8x1xf32>
    %c0_234 = arith.constant 0 : index
    %c0_235 = arith.constant 0 : index
    %283 = vector.load %arg12[%c0_234, %c0_235] : memref<8x1xf32, #tpu.memory_space<vmem>>, vector<8x1xf32>
    %284 = vector.broadcast %270 : vector<8x1xf32> to vector<8x2048xf32>
    %285 = arith.subf %263, %284 : vector<8x2048xf32>
    %286 = vector.broadcast %283 : vector<8x1xf32> to vector<8x2048xf32>
    %287 = arith.mulf %286, %285 : vector<8x2048xf32>
    %288 = vector.broadcast %282 : vector<8x1xf32> to vector<8x2048xf32>
    %289 = arith.mulf %287, %288 : vector<8x2048xf32>
    %c0_236 = arith.constant 0 : index
    %c0_237 = arith.constant 0 : index
    %290 = vector.load %arg13[%c0_236, %c0_237] : memref<8x1xf32, #tpu.memory_space<vmem>>, vector<8x1xf32>
    %291 = vector.broadcast %290 : vector<8x1xf32> to vector<8x2048xf32>
    %292 = arith.addf %289, %291 : vector<8x2048xf32>
    %cst_238 = arith.constant 0.000000e+00 : f32
    %293 = vector.broadcast %cst_238 : f32 to vector<8x2048xf32>
    %294 = arith.maximumf %292, %293 : vector<8x2048xf32>
    %c0_239 = arith.constant 0 : index
    %c0_240 = arith.constant 0 : index
    %295 = vector.load %arg3[%c0_239, %c0_240] : memref<1x2048xf32, #tpu.memory_space<vmem>>, vector<1x2048xf32>
    %296 = vector.broadcast %295 : vector<1x2048xf32> to vector<8x2048xf32>
    %297 = arith.mulf %294, %296 : vector<8x2048xf32>
    %c0_241 = arith.constant 0 : index
    %c0_242 = arith.constant 0 : index
    %298 = vector.load %arg6[%c0_241, %c0_242] : memref<8x8xbf16, #tpu.memory_space<vmem>>, vector<8x8xbf16>
    %299 = arith.truncf %297 : vector<8x2048xf32> to vector<8x2048xbf16>
    %cst_243 = arith.constant dense<0.000000e+00> : vector<8x2048xf32>
    %300 = tpu.matmul %298, %299, %cst_243 {dimension_numbers = #tpu.dot_dimension_numbers<[1], [0], [0], [1], [0, 0, 1, 1], [], []>} : vector<8x8xbf16>, vector<8x2048xbf16>, vector<8x2048xf32> -> vector<8x2048xf32>
    %c0_244 = arith.constant 0 : index
    %c0_245 = arith.constant 0 : index
    %301 = vector.load %arg16[%c0_244, %c0_245] : memref<8x2048xf32, #tpu.memory_space<vmem>>, vector<8x2048xf32>
    %302 = arith.addf %301, %300 : vector<8x2048xf32>
    %c0_246 = arith.constant 0 : index
    %c0_247 = arith.constant 0 : index
    %303 = vector.load %arg16[%c0_246, %c0_247] : memref<8x2048xf32, #tpu.memory_space<vmem>>, vector<8x2048xf32>
    tpu.vector_store %arg16[%c0_246, %c0_247], %302 {strides = array<i32>} : memref<8x2048xf32, #tpu.memory_space<vmem>>, vector<8x2048xf32>,
    return
  }
  func.func @transform_0(%arg0: i32) -> (i32, i32) {
    %c0_i32 = arith.constant 0 : i32
    %c0_i32_0 = arith.constant 0 : i32
    %c0_i32_1 = arith.constant 0 : i32
    return %c0_i32, %c0_i32_0 : i32, i32
  }
  func.func @transform_1(%arg0: i32) -> (i32, i32) {
    %c0_i32 = arith.constant 0 : i32
    %c0_i32_0 = arith.constant 0 : i32
    %c0_i32_1 = arith.constant 0 : i32
    return %c0_i32, %c0_i32_0 : i32, i32
  }
  func.func @transform_2(%arg0: i32) -> (i32, i32) {
    %c0_i32 = arith.constant 0 : i32
    %c0_i32_0 = arith.constant 0 : i32
    %c0_i32_1 = arith.constant 0 : i32
    return %c0_i32, %c0_i32_0 : i32, i32
  }
  func.func @transform_3(%arg0: i32) -> (i32, i32) {
    %c0_i32 = arith.constant 0 : i32
    %c0_i32_0 = arith.constant 0 : i32
    %c0_i32_1 = arith.constant 0 : i32
    return %c0_i32, %c0_i32_0 : i32, i32
  }
  func.func @transform_4(%arg0: i32) -> (i32, i32) {
    %c0_i32 = arith.constant 0 : i32
    %c0_i32_0 = arith.constant 0 : i32
    %c0_i32_1 = arith.constant 0 : i32
    return %c0_i32, %c0_i32_0 : i32, i32
  }
  func.func @transform_5(%arg0: i32) -> (i32, i32) {
    %c0_i32 = arith.constant 0 : i32
    %c0_i32_0 = arith.constant 0 : i32
    %c0_i32_1 = arith.constant 0 : i32
    return %c0_i32, %c0_i32_0 : i32, i32
  }
  func.func @transform_6(%arg0: i32) -> (i32, i32) {
    %c0_i32 = arith.constant 0 : i32
    %c0_i32_0 = arith.constant 0 : i32
    %c0_i32_1 = arith.constant 0 : i32
    return %c0_i32, %c0_i32_0 : i32, i32
  }
  func.func @transform_7(%arg0: i32) -> (i32, i32) {
    %c0_i32 = arith.constant 0 : i32
    %c0_i32_0 = arith.constant 0 : i32
    %c0_i32_1 = arith.constant 0 : i32
    return %c0_i32, %c0_i32_0 : i32, i32
  }
  func.func @transform_8(%arg0: i32) -> (i32, i32) {
    %c0_i32 = arith.constant 0 : i32
    %c0_i32_0 = arith.constant 0 : i32
    %c0_i32_1 = arith.constant 0 : i32
    return %c0_i32, %c0_i32_0 : i32, i32
  }
  func.func @transform_9(%arg0: i32) -> (i32, i32) {
    %c0_i32 = arith.constant 0 : i32
    %c0_i32_0 = arith.constant 0 : i32
    %c0_i32_1 = arith.constant 0 : i32
    return %c0_i32, %c0_i32_0 : i32, i32
  }
  func.func @transform_10(%arg0: i32) -> (i32, i32) {
    %c0_i32 = arith.constant 0 : i32
    %c0_i32_0 = arith.constant 0 : i32
    %c0_i32_1 = arith.constant 0 : i32
    return %c0_i32, %c0_i32_0 : i32, i32
  }
  func.func @transform_11(%arg0: i32) -> (i32, i32) {
    %c0_i32 = arith.constant 0 : i32
    %c0_i32_0 = arith.constant 0 : i32
    %c0_i32_1 = arith.constant 0 : i32
    return %c0_i32, %c0_i32_0 : i32, i32
  }
  func.func @transform_12(%arg0: i32) -> (i32, i32) {
    %c0_i32 = arith.constant 0 : i32
    %c0_i32_0 = arith.constant 0 : i32
    %c0_i32_1 = arith.constant 0 : i32
    return %c0_i32, %c0_i32_0 : i32, i32
  }
  func.func @transform_13(%arg0: i32) -> (i32, i32) {
    %c0_i32 = arith.constant 0 : i32
    %c0_i32_0 = arith.constant 0 : i32
    %c0_i32_1 = arith.constant 0 : i32
    return %c0_i32, %c0_i32_0 : i32, i32
  }
  func.func @transform_14(%arg0: i32) -> (i32, i32) {
    %c0_i32 = arith.constant 0 : i32
    %c0_i32_0 = arith.constant 0 : i32
    %c0_i32_1 = arith.constant 0 : i32
    return %c0_i32, %c0_i32_0 : i32, i32
  }
  func.func @transform_15(%arg0: i32) -> (i32, i32) {
    %c0_i32 = arith.constant 0 : i32
    %c0_i32_0 = arith.constant 0 : i32
    %c0_i32_1 = arith.constant 0 : i32
    return %c0_i32, %c0_i32_0 : i32, i32
  }
}

</mosaic_0001>

<bundles_post_ra>
// kernel: bottleneck_forward.1
= control target key start
LH: loop header
LB: loop body
LE: loop exit
PB: predicated region body
PF: predicated region fallthrough
CT: control target
= control target key end

     0   :  { %v73_v0 = vlaneseq  ;;  %v19181_v1 = vmov 0   ;;  %s19254_s26 = smov 119   ;;  %s19263_s27 = smov 10   ;;  %vm468_vm0 = vcmask 1043456   ;;  %vm2339_vm1 = vcmask 1039360   ;;  %s19142_s1 = inlined_call_operand.vmem [shape: f32[1,2048], index: 1, kind: input, shape index: {}]   ;;  %s19143_s13 = inlined_call_operand.vmem [shape: f32[8,1], index: 13, kind: input, shape index: {}]   ;;  %s19144_s0 = inlined_call_operand.vmem [shape: f32[8,2048], index: 0, kind: input, shape index: {}]   ;;  %s19145_s14 = inlined_call_operand.vmem [shape: f32[8,1], index: 14, kind: input, shape index: {}]   ;;  %s19146_s6 = inlined_call_operand.vmem [shape: bf16[8,216], index: 6, kind: input, shape index: {}]   ;;  %s19147_s8 = inlined_call_operand.vmem [shape: f32[8,1], index: 8, kind: input, shape index: {}]   ;;  %s19148_s9 = inlined_call_operand.vmem [shape: f32[8,1], index: 9, kind: input, shape index: {}]   ;;  %s19149_s7 = inlined_call_operand.vmem [shape: f32[8,1], index: 7, kind: input, shape index: {}]   ;;  %s19150_s10 = inlined_call_operand.vmem [shape: f32[8,1], index: 10, kind: input, shape index: {}]   ;;  %s19151_s15 = inlined_call_operand.vmem [shape: f32[8,2048], index: 15, kind: output, shape index: {}]   ;;  %s19152_s3 = inlined_call_operand.vmem [shape: bf16[8,8], index: 3, kind: input, shape index: {}]   ;;  %s19153_s4 = inlined_call_operand.vmem [shape: bf16[8,216], index: 4, kind: input, shape index: {}]   ;;  %s19154_s2 = inlined_call_operand.vmem [shape: f32[1,2048], index: 2, kind: input, shape index: {}]   ;;  %s19155_s11 = inlined_call_operand.vmem [shape: f32[8,1], index: 11, kind: input, shape index: {}]   ;;  %s19156_s12 = inlined_call_operand.vmem [shape: f32[8,1], index: 12, kind: input, shape index: {}]   ;;  %s19157_s5 = inlined_call_operand.vmem [shape: bf16[8,8], index: 5, kind: input, shape index: {}]  }
   0x1   :  { %19403 = sst [smem:[#allocation16_spill]] %s19142_s1  ;;  %14075 = vset.pattern.permute.xlu1 %v19181_v1  ;;  %14076 = vset.pattern.permute.xlu0 %v19181_v1  ;;  %v69_v6 = vld [vmem:[%s19142_s1] sm:$0xff]  ;;  %v14228_v12 = vld [vmem:[%s19144_s0 + $0x8] sm:$0xff]  ;;  %v14238_v15 = vld [vmem:[%s19144_s0 + $0x10] sm:$0xff]  ;;  %s19212_s28 = smov 1   ;;  %vm2476_vm2 = vcmask 973824  }
   0x2   :  { %19404 = sst [smem:[#allocation17_spill]] %s19144_s0  ;;  %v74_v2 = vshrl.u32 %v73_v0, 7  ;;  %v256_v10 = vld [vmem:[%s19143_s13] sm:$0xff]  ;;  %v14252_v20 = vld [vmem:[%s19144_s0 + $0x18] sm:$0xff]  ;;  %v14276_v29 = vld [vmem:[%s19144_s0 + $0x28] sm:$0xff]  ;;  %s19203_s13 = smov 9  }
   0x3   :  { %19405 = sst [smem:[#allocation18_spill]] %s19152_s3  ;;  %v14223_v11 = vld [vmem:[%s19144_s0] sm:$0xff]  ;;  %259 = vperm.xlu1 %14075, %v256_v10   ;;  %v59_v33 = vld [vmem:[%s19144_s0 + $0x30] sm:$0xff]  ;;  %v70_v34 = vld [vmem:[%s19142_s1 + $0x8] sm:$0xff]  ;;  %s19196_s29 = smov 89   ;;  %vm2114_vm3 = vcmask 7168  }
   0x4   :  { %19406 = sst [smem:[#allocation19_spill]] %s19153_s4  ;;  %v14200_v3 = vsub.s32 0, %v74_v2  ;;  %v14202_v4 = vsub.s32 1, %v74_v2  ;;  %v14204_v5 = vsub.s32 2, %v74_v2  ;;  %v14215_v9 = vsub.s32 3, %v74_v2  ;;  %v14264_v24 = vld [vmem:[%s19144_s0 + $0x20] sm:$0xff] }
   0x5   :  { %19407 = sst [smem:[#allocation20_spill]] %s19154_s2  ;;  %v14233_v14 = vsub.s32 4, %v74_v2  ;;  %v14243_v17 = vsub.s32 5, %v74_v2  ;;  %v14257_v22 = vsub.s32 6, %v74_v2  ;;  %v14269_v26 = vsub.s32 7, %v74_v2  ;;  %v60_v38 = vld [vmem:[%s19144_s0 + $0x38] sm:$0xff] }
   0x6   :  { %19408 = sst [smem:[#allocation21_spill]] %s19155_s11  ;;  %19411 = vst [vmem:[#allocation4_spill] sm:$0xff] %v14200_v3  ;;  %19412 = vst [vmem:[#allocation5_spill] sm:$0xff] %v14202_v4  ;;  %v14210_v7 = vrot.slane %v69_v6, %v14200_v3  ;;  %v14213_v8 = vrot.slane %v69_v6, %v14202_v4  ;;  %v14231_v13 = vrot.slane %v69_v6, %v14204_v5  ;;  %v61_v42 = vld [vmem:[%s19144_s0 + $0x40] sm:$0xff]  ;;  %v62_v46 = vld [vmem:[%s19144_s0 + $0x48] sm:$0xff]  ;;  %s19210_s30 = smov 11  }
   0x7   :  { %19409 = sst [smem:[#allocation22_spill]] %s19156_s12  ;;  %19413 = vst [vmem:[#allocation6_spill] sm:$0xff] %v14204_v5  ;;  %19414 = vst [vmem:[#allocation7_spill] sm:$0xff] %v14215_v9  ;;  %v14241_v16 = vrot.slane %v69_v6, %v14215_v9  ;;  %v14255_v21 = vrot.slane %v69_v6, %v14233_v14  ;;  %v14267_v25 = vrot.slane %v69_v6, %v14243_v17  ;;  %v63_v50 = vld [vmem:[%s19144_s0 + $0x50] sm:$0xff]  ;;  %v64_v54 = vld [vmem:[%s19144_s0 + $0x58] sm:$0xff]  ;;  %s19164_s16 = smov 91  }
   0x8   :  { %19410 = sst [smem:[#allocation23_spill]] %s19157_s5  ;;  %19415 = vst [vmem:[#allocation8_spill] sm:$0xff] %v14233_v14  ;;  %19416 = vst [vmem:[#allocation9_spill] sm:$0xff] %v14243_v17  ;;  %v153_v18 = vmul.f32 %v14210_v7, %v14223_v11  ;;  %v154_v19 = vmul.f32 %v14213_v8, %v14228_v12  ;;  %v155_v23 = vmul.f32 %v14231_v13, %v14238_v15  ;;  %v65_v58 = vld [vmem:[%s19144_s0 + $0x60] sm:$0xff]  ;;  %v66_v62 = vld [vmem:[%s19144_s0 + $0x68] sm:$0xff]  ;;  %s19201_s17 = smov 90  }
   0x9   :  { %19417 = vst [vmem:[#allocation10_spill] sm:$0xff] %v14257_v22  ;;  %19418 = vst [vmem:[#allocation11_spill] sm:$0xff] %v14269_v26  ;;  %v156_v27 = vmul.f32 %v14241_v16, %v14252_v20  ;;  %v14279_v30 = vrot.slane %v69_v6, %v14257_v22  ;;  %v157_v31 = vmul.f32 %v14255_v21, %v14264_v24  ;;  %s19160_s18 = smov 100   ;;  %s19198_s19 = smov 99   ;;  %vm1840_vm4 = vcmask 80896  }
   0xa   :  { %v169_v28 = vadd.f32 %v154_v19, %v153_v18  ;;  %v14290_v35 = vrot.slane %v69_v6, %v14269_v26  ;;  %v158_v36 = vmul.f32 %v14267_v25, %v14276_v29  ;;  %v14298_v39 = vrot.slane %v70_v34, %v14200_v3  ;;  %v67_v6 = vld [vmem:[%s19144_s0 + $0x70] sm:$0xff]  ;;  %s19158_s20 = smov 109   ;;  %s19189_s21 = smov 101  }
   0xb   :  { %v159_v40 = vmul.f32 %v14279_v30, %v59_v33  ;;  %v14305_v43 = vrot.slane %v70_v34, %v14202_v4  ;;  %v14312_v47 = vrot.slane %v70_v34, %v14204_v5  ;;  %v14319_v51 = vrot.slane %v70_v34, %v14215_v9  ;;  %s19162_s22 = smov 111   ;;  %s19166_s23 = smov 110  }
   0xc   :  { %v170_v32 = vadd.f32 %v169_v28, %v155_v23  ;;  %v160_v44 = vmul.f32 %v14290_v35, %v60_v38  ;;  %v161_v48 = vmul.f32 %v14298_v39, %v61_v42  ;;  %v14326_v55 = vrot.slane %v70_v34, %v14233_v14  ;;  %v68_v23 = vld [vmem:[%s19144_s0 + $0x78] sm:$0xff]  ;;  %s19172_s24 = smov 17   ;;  %s19256_s25 = smov 19  }
   0xd   :  { %v162_v52 = vmul.f32 %v14305_v43, %v62_v46  ;;  %v163_v56 = vmul.f32 %v14312_v47, %v63_v50  ;;  %v14333_v59 = vrot.slane %v70_v34, %v14243_v17  ;;  %v164_v60 = vmul.f32 %v14319_v51, %v64_v54  ;;  %s19452_s5 = smov 19   ;;  %s19463_s12 = smov 29  }
   0xe   :  { %v171_v37 = vadd.f32 %v170_v32, %v156_v27  ;;  %v14340_v63 = vrot.slane %v70_v34, %v14257_v22  ;;  %v165_v0 = vmul.f32 %v14326_v55, %v65_v58  ;;  %v14347_v10 = vrot.slane %v70_v34, %v14269_v26  ;;  %v294_v34 = vld [vmem:[%s19145_s14] sm:$0xff]  ;;  %s19252_s14 = smov 127   ;;  %s19475_s11 = smov 117  }
   0xf   :  { %v166_v18 = vmul.f32 %v14333_v59, %v66_v62  ;;  %297 = vperm.xlu1 %14075, %v294_v34   ;;  %vm1977_vm5 = vcmask 72704   ;;  %vm19270_vm6 = vcmask 728064   ;;  %vm19269_vm7 = vcmask 89088   ;;  %s19483_s2 = smov 119   ;;  %s19484_s4 = smov 39  }
  0x10   :  { %v172_v41 = vadd.f32 %v171_v37, %v157_v31  ;;  %v167_v27 = vmul.f32 %v14340_v63, %v67_v6  ;;  %v168_v31 = vmul.f32 %v14347_v10, %v68_v23  ;;  %vm5318_vm8 = vcmask 719872   ;;  %s19490_s3 = smov 127   ;;  %s19491_s1 = smov 118  }
  0x11   :  { %vm19316_vm9 = vcmask 744448   ;;  %vm19315_vm10 = vcmask 736256   ;;  %vm19188_vm11 = vcmask 818176   ;;  %vm19222_vm12 = vcmask 809984   ;;  %s19495_s0 = smov 10  }
  0x12   :  { %v173_v45 = vadd.f32 %v172_v41, %v158_v36  ;;  %vm19209_vm13 = vcmask 891904   ;;  %vm19200_vm14 = vcmask 826368   ;;  %vm19207_vm15 = vcmask 908288  }
  0x14   :  { %v174_v49 = vadd.f32 %v173_v45, %v159_v40 }
  0x16   :  { %v175_v53 = vadd.f32 %v174_v49, %v160_v44 }
  0x18   :  { %v176_v57 = vadd.f32 %v175_v53, %v161_v48 }
  0x1a   :  { %v177_v61 = vadd.f32 %v176_v57, %v162_v52 }
  0x1c   :  { %v178_v2 = vadd.f32 %v177_v61, %v163_v56 }
  0x1e   :  { %v179_v19 = vadd.f32 %v178_v2, %v164_v60 }
  0x20   :  { %v180_v28 = vadd.f32 %v179_v19, %v165_v0 }
  0x22   :  { %v181_v32 = vadd.f32 %v180_v28, %v166_v18 }
  0x24   :  { %v182_v36 = vadd.f32 %v181_v32, %v167_v27 }
  0x26   :  { %v183_v37 = vadd.f32 %v182_v36, %v168_v31 }
  0x28   :  { %184 = vadd.xlane.f32.xlu0 %v183_v37 }
  0xb1   :  { %v185_v40 = vpop.xlane.xlu0 %184 }
  0xb2   :  { %v14358_v41 = vmul.f32 0.0009765625, %v185_v40 }
  0xb4   :  { %v14362_v44 = vsub.f32 %v14223_v11, %v14358_v41  ;;  %v14366_v45 = vsub.f32 %v14228_v12, %v14358_v41  ;;  %v14370_v48 = vsub.f32 %v14238_v15, %v14358_v41  ;;  %v14378_v53 = vsub.f32 %v14252_v20, %v14358_v41 }
  0xb5   :  { %v14382_v11 = vsub.f32 %v14264_v24, %v14358_v41  ;;  %v14388_v57 = vsub.f32 %v14276_v29, %v14358_v41  ;;  %v14393_v61 = vsub.f32 %v59_v33, %v14358_v41  ;;  %v195_v2 = vsub.f32 %v60_v38, %v14358_v41 }
  0xb6   :  { %v204_v49 = vmul.f32 %v14362_v44, %v14210_v7  ;;  %v205_v52 = vmul.f32 %v14366_v45, %v14213_v8  ;;  %v206_v12 = vmul.f32 %v14370_v48, %v14231_v13  ;;  %v207_v60 = vmul.f32 %v14378_v53, %v14241_v16 }
  0xb7   :  { %v208_v20 = vmul.f32 %v14382_v11, %v14255_v21  ;;  %v209_v18 = vmul.f32 %v14388_v57, %v14267_v25  ;;  %v196_v29 = vsub.f32 %v61_v42, %v14358_v41  ;;  %v210_v28 = vmul.f32 %v14393_v61, %v14279_v30 }
  0xb8   :  { %v220_v56 = vmul.f32 %v204_v49, %v204_v49  ;;  %v221_v15 = vmul.f32 %v205_v52, %v205_v52  ;;  %v222_v24 = vmul.f32 %v206_v12, %v206_v12  ;;  %v223_v19 = vmul.f32 %v207_v60, %v207_v60 }
  0xb9   :  { %v224_v31 = vmul.f32 %v208_v20, %v208_v20  ;;  %v197_v32 = vsub.f32 %v62_v46, %v14358_v41  ;;  %v211_v36 = vmul.f32 %v195_v2, %v14290_v35  ;;  %v225_v37 = vmul.f32 %v209_v18, %v209_v18 }
  0xba   :  { %v236_v0 = vadd.f32 %v221_v15, %v220_v56  ;;  %v198_v38 = vsub.f32 %v63_v50, %v14358_v41  ;;  %v212_v40 = vmul.f32 %v196_v29, %v14298_v39  ;;  %v226_v49 = vmul.f32 %v210_v28, %v210_v28 }
  0xbb   :  { %v199_v12 = vsub.f32 %v64_v54, %v14358_v41  ;;  %v213_v42 = vmul.f32 %v197_v32, %v14305_v43  ;;  %v227_v56 = vmul.f32 %v211_v36, %v211_v36  ;;  %v200_v60 = vsub.f32 %v65_v58, %v14358_v41 }
  0xbc   :  { %v237_v27 = vadd.f32 %v236_v0, %v222_v24  ;;  %v214_v46 = vmul.f32 %v198_v38, %v14312_v47  ;;  %v228_v20 = vmul.f32 %v212_v40, %v212_v40  ;;  %v201_v0 = vsub.f32 %v66_v62, %v14358_v41 }
  0xbd   :  { %v215_v50 = vmul.f32 %v199_v12, %v14319_v51  ;;  %v229_v18 = vmul.f32 %v213_v42, %v213_v42  ;;  %v216_v54 = vmul.f32 %v200_v60, %v14326_v55 }
  0xbe   :  { %v238_v33 = vadd.f32 %v237_v27, %v223_v19  ;;  %v202_v27 = vsub.f32 %v67_v6, %v14358_v41  ;;  %v230_v28 = vmul.f32 %v214_v46, %v214_v46  ;;  %v217_v58 = vmul.f32 %v201_v0, %v14333_v59 }
  0xbf   :  { %v231_v36 = vmul.f32 %v215_v50, %v215_v50  ;;  %v232_v40 = vmul.f32 %v216_v54, %v216_v54  ;;  %v260_v50 = vpop.permute.xlu1 %259 }
  0xc0   :  { %v239_v34 = vadd.f32 %v238_v33, %v224_v31  ;;  %v203_v33 = vsub.f32 %v68_v23, %v14358_v41  ;;  %v263_v54 = vmul.f32 %v260_v50, %v14366_v45  ;;  %v276_v45 = vmul.f32 %v260_v50, %v202_v27 }
  0xc2   :  { %v240_v52 = vadd.f32 %v239_v34, %v225_v37  ;;  %v218_v34 = vmul.f32 %v202_v27, %v14340_v63 }
  0xc3   :  { %v298_v27 = vpop.permute.xlu1 %297 }
  0xc4   :  { %v241_v15 = vadd.f32 %v240_v52, %v226_v49  ;;  %v219_v49 = vmul.f32 %v203_v33, %v14347_v10  ;;  %v233_v52 = vmul.f32 %v217_v58, %v217_v58  ;;  %v266_v58 = vmul.f32 %v260_v50, %v14382_v11 }
  0xc6   :  { %v242_v24 = vadd.f32 %v241_v15, %v227_v56  ;;  %v234_v56 = vmul.f32 %v218_v34, %v218_v34  ;;  %v235_v15 = vmul.f32 %v219_v49, %v219_v49  ;;  %v269_v34 = vmul.f32 %v260_v50, %v195_v2 }
  0xc7   :  { %v272_v49 = vmul.f32 %v260_v50, %v198_v38 }
  0xc8   :  { %v243_v19 = vadd.f32 %v242_v24, %v228_v20 }
  0xca   :  { %v244_v31 = vadd.f32 %v243_v19, %v229_v18  ;;  %v262_v19 = vmul.f32 %v260_v50, %v14362_v44  ;;  %v274_v44 = vmul.f32 %v260_v50, %v200_v60 }
  0xcc   :  { %v245_v37 = vadd.f32 %v244_v31, %v230_v28  ;;  %v264_v28 = vmul.f32 %v260_v50, %v14370_v48  ;;  %v265_v31 = vmul.f32 %v260_v50, %v14378_v53 }
  0xce   :  { %v246_v62 = vadd.f32 %v245_v37, %v231_v36  ;;  %v267_v36 = vmul.f32 %v260_v50, %v14388_v57  ;;  %v268_v37 = vmul.f32 %v260_v50, %v14393_v61 }
  0xd0   :  { %v247_v42 = vadd.f32 %v246_v62, %v232_v40  ;;  %v270_v40 = vmul.f32 %v260_v50, %v196_v29  ;;  %v271_v62 = vmul.f32 %v260_v50, %v197_v32 }
  0xd2   :  { %v248_v6 = vadd.f32 %v247_v42, %v233_v52  ;;  %v273_v52 = vmul.f32 %v260_v50, %v199_v12 }
  0xd4   :  { %v249_v20 = vadd.f32 %v248_v6, %v234_v56  ;;  %v275_v56 = vmul.f32 %v260_v50, %v201_v0  ;;  %v277_v6 = vmul.f32 %v260_v50, %v203_v33 }
  0xd6   :  { %v250_v46 = vadd.f32 %v249_v20, %v235_v15 }
  0xd8   :  { %251 = vadd.xlane.f32.xlu0 %v250_v46 }
 0x161   :  { %v252_v24 = vpop.xlane.xlu0 %251 }
 0x162   :  { %v253_v23 = vmul.f32 0.0009765625, %v252_v24 }
 0x164   :  { %v254_v18 = vadd.f32 1e-05, %v253_v23 }
 0x166   :  { %14081 = vrsqrt.f32 %v254_v18 }
 0x173   :  { %v14426_v42 = vpop.eup %14081 }
 0x174   :  { %19419 = vst [vmem:[#allocation12_spill] sm:$0xff] %v14426_v42  ;;  %v278_v48 = vmul.f32 %v14426_v42, %v262_v19  ;;  %v279_v53 = vmul.f32 %v14426_v42, %v263_v54  ;;  %v280_v11 = vmul.f32 %v14426_v42, %v264_v28  ;;  %v281_v57 = vmul.f32 %v14426_v42, %v265_v31 }
 0x175   :  { %v282_v61 = vmul.f32 %v14426_v42, %v266_v58  ;;  %v283_v2 = vmul.f32 %v14426_v42, %v267_v36  ;;  %v284_v29 = vmul.f32 %v14426_v42, %v268_v37  ;;  %v285_v32 = vmul.f32 %v14426_v42, %v269_v34 }
 0x176   :  { %v286_v38 = vmul.f32 %v14426_v42, %v270_v40  ;;  %v287_v12 = vmul.f32 %v14426_v42, %v271_v62  ;;  %v288_v60 = vmul.f32 %v14426_v42, %v272_v49  ;;  %v289_v0 = vmul.f32 %v14426_v42, %v273_v52 }
 0x177   :  { %v290_v33 = vmul.f32 %v14426_v42, %v274_v44  ;;  %v291_v15 = vmul.f32 %v14426_v42, %v275_v56  ;;  %v292_v20 = vmul.f32 %v14426_v42, %v276_v45  ;;  %v293_v46 = vmul.f32 %v14426_v42, %v277_v6 }
 0x178   :  { %v300_v24 = vadd.f32 %v298_v27, %v278_v48  ;;  %v301_v23 = vadd.f32 %v298_v27, %v279_v53  ;;  %v302_v18 = vadd.f32 %v298_v27, %v280_v11  ;;  %v303_v50 = vadd.f32 %v298_v27, %v281_v57 }
 0x179   :  { %v304_v19 = vadd.f32 %v298_v27, %v282_v61  ;;  %v305_v54 = vadd.f32 %v298_v27, %v283_v2  ;;  %v306_v28 = vadd.f32 %v298_v27, %v284_v29  ;;  %v307_v31 = vadd.f32 %v298_v27, %v285_v32 }
 0x17a   :  { %v308_v58 = vadd.f32 %v298_v27, %v286_v38  ;;  %v309_v36 = vadd.f32 %v298_v27, %v287_v12  ;;  %v310_v37 = vadd.f32 %v298_v27, %v288_v60  ;;  %v311_v34 = vadd.f32 %v298_v27, %v289_v0 }
 0x17b   :  { %v312_v40 = vadd.f32 %v298_v27, %v290_v33  ;;  %v313_v62 = vadd.f32 %v298_v27, %v291_v15  ;;  %v314_v49 = vadd.f32 %v298_v27, %v292_v20  ;;  %v315_v52 = vadd.f32 %v298_v27, %v293_v46 }
 0x17c   :  { %v316_v44 = vmax.f32 %v300_v24, 0.0  ;;  %v317_v56 = vmax.f32 %v301_v23, 0.0  ;;  %v318_v45 = vmax.f32 %v302_v18, 0.0  ;;  %v319_v6 = vmax.f32 %v303_v50, 0.0 }
 0x17d   :  { %v320_v48 = vmax.f32 %v304_v19, 0.0  ;;  %v321_v53 = vmax.f32 %v305_v54, 0.0  ;;  %v322_v11 = vmax.f32 %v306_v28, 0.0  ;;  %v323_v57 = vmax.f32 %v307_v31, 0.0 }
 0x17e   :  { %v324_v61 = vmax.f32 %v308_v58, 0.0  ;;  %v325_v2 = vmax.f32 %v309_v36, 0.0  ;;  %v326_v29 = vmax.f32 %v310_v37, 0.0  ;;  %v327_v32 = vmax.f32 %v311_v34, 0.0 }
 0x17f   :  { %v328_v38 = vmax.f32 %v312_v40, 0.0  ;;  %v329_v12 = vmax.f32 %v313_v62, 0.0  ;;  %v330_v60 = vmax.f32 %v314_v49, 0.0  ;;  %v331_v0 = vmax.f32 %v315_v52, 0.0 }
 0x180   :  { %v332_v33 = vmul.f32 %v316_v44, %v14210_v7  ;;  %v333_v27 = vmul.f32 %v317_v56, %v14213_v8  ;;  %v334_v15 = vmul.f32 %v318_v45, %v14231_v13  ;;  %v335_v20 = vmul.f32 %v319_v6, %v14241_v16 }
 0x181   :  { %v336_v46 = vmul.f32 %v320_v48, %v14255_v21  ;;  %v337_v24 = vmul.f32 %v321_v53, %v14267_v25  ;;  %v338_v23 = vmul.f32 %v322_v11, %v14279_v30  ;;  %v339_v18 = vmul.f32 %v323_v57, %v14290_v35 }
 0x182   :  { %v340_v50 = vmul.f32 %v324_v61, %v14298_v39  ;;  %v341_v19 = vmul.f32 %v325_v2, %v14305_v43  ;;  %v342_v7 = vmul.f32 %v326_v29, %v14312_v47  ;;  %v343_v8 = vmul.f32 %v327_v32, %v14319_v51 }
 0x183   :  { %v344_v13 = vmul.f32 %v328_v38, %v14326_v55  ;;  %v345_v16 = vmul.f32 %v329_v12, %v14333_v59  ;;  %v346_v21 = vmul.f32 %v330_v60, %v14340_v63  ;;  %v14460_v25 = vmul.f32 %v331_v0, %v14347_v10 }
 0x184   :  { %v14462_v30 = vpack.c.bf16 %v333_v27, %v332_v33  ;;  %v14464_v35 = vpack.c.bf16 %v335_v20, %v334_v15  ;;  %v14466_v39 = vpack.c.bf16 %v337_v24, %v336_v46  ;;  %v14468_v43 = vpack.c.bf16 %v339_v18, %v338_v23 }
 0x185   :  { %v14470_v47 = vpack.c.bf16 %v341_v19, %v340_v50  ;;  %v14472_v51 = vpack.c.bf16 %v343_v8, %v342_v7  ;;  %v14474_v55 = vpack.c.bf16 %v345_v16, %v344_v13  ;;  %v14477_v59 = vpack.c.bf16 %v14460_v25, %v346_v21 }
 0x186   :  { %2313 = vrot.lane.b32.xlu1 %v14464_v35, %s19252_s14  ;;  %2311 = vrot.lane.b32.xlu0 %v14462_v30, %s19252_s14  ;;  %v14483_v63 = vpack.c.bf16 %v334_v15, %v333_v27  ;;  %v14485_v10 = vpack.c.bf16 %v336_v46, %v335_v20  ;;  %v14487_v54 = vpack.c.bf16 %v338_v23, %v337_v24  ;;  %v19180_v37 = vmov 0.0  }
 0x187   :  { %v14489_v28 = vpack.c.bf16 %v340_v50, %v339_v18  ;;  %v14491_v31 = vpack.c.bf16 %v342_v7, %v341_v19  ;;  %v14493_v58 = vpack.c.bf16 %v344_v13, %v343_v8  ;;  %v14495_v36 = vpack.c.bf16 %v346_v21, %v345_v16 }
 0x188   :  { %v13562_v34 = vpack.c.bf16 %v332_v33, %v19180_v37 }
 0x18a   :  { %2448 = vrot.lane.b32.xlu1 %v14462_v30, %s19254_s26  ;;  %2452 = vrot.lane.b32.xlu0 %v14466_v39, %s19254_s26 }
 0x18e   :  { %2450 = vrot.lane.b32.xlu1 %v14464_v35, %s19254_s26  ;;  %1814 = vrot.lane.b32.xlu0 %v14483_v63, %s19263_s27 }
 0x192   :  { %1951 = vrot.lane.b32.xlu0 %v14483_v63, %s19203_s13  ;;  %2086 = vrot.lane.b32.xlu1 %v13562_v34, %s19212_s28 }
 0x196   :  { %1538 = vrot.lane.b32.xlu0 %v13562_v34, %s19196_s29  ;;  %2088 = vrot.lane.b32.xlu1 %v14483_v63, %s19212_s28 }
 0x19a   :  { %1675 = vrot.lane.b32.xlu0 %v13562_v34, %s19210_s30  ;;  %2315 = vrot.lane.b32.xlu1 %v14466_v39, %s19252_s14 }
 0x19e   :  { %1816 = vrot.lane.b32.xlu0 %v14485_v10, %s19263_s27  ;;  %1812 = vrot.lane.b32.xlu1 %v13562_v34, %s19263_s27 }
 0x1a2   :  { %1264 = vrot.lane.b32.xlu0 %v13562_v34, %s19164_s16  ;;  %1949 = vrot.lane.b32.xlu1 %v13562_v34, %s19203_s13 }
 0x1a6   :  { %1401 = vrot.lane.b32.xlu0 %v13562_v34, %s19201_s17  ;;  %2090 = vrot.lane.b32.xlu1 %v14485_v10, %s19212_s28 }
 0x1aa   :  { %1542 = vrot.lane.b32.xlu0 %v14485_v10, %s19196_s29  ;;  %1540 = vrot.lane.b32.xlu1 %v14483_v63, %s19196_s29 }
 0x1ae   :  { %990 = vrot.lane.b32.xlu0 %v13562_v34, %s19160_s18  ;;  %1677 = vrot.lane.b32.xlu1 %v14483_v63, %s19210_s30 }
 0x1b2   :  { %1127 = vrot.lane.b32.xlu0 %v13562_v34, %s19198_s19  ;;  %1953 = vrot.lane.b32.xlu1 %v14485_v10, %s19203_s13 }
 0x1b6   :  { %1268 = vrot.lane.b32.xlu0 %v14485_v10, %s19164_s16  ;;  %1266 = vrot.lane.b32.xlu1 %v14483_v63, %s19164_s16  ;;  %s19176_s16 = smov 37  }
 0x1ba   :  { %716 = vrot.lane.b32.xlu0 %v13562_v34, %s19158_s20  ;;  %1403 = vrot.lane.b32.xlu1 %v14483_v63, %s19201_s17 }
 0x1be   :  { %853 = vrot.lane.b32.xlu0 %v13562_v34, %s19189_s21  ;;  %1679 = vrot.lane.b32.xlu1 %v14485_v10, %s19210_s30 }
 0x1c2   :  { %994 = vrot.lane.b32.xlu0 %v14485_v10, %s19160_s18  ;;  %992 = vrot.lane.b32.xlu1 %v14483_v63, %s19160_s18  ;;  %s19174_s18 = smov 28  }
 0x1c6   :  { %441 = vrot.lane.b32.xlu0 %v13562_v34, %s19162_s22  ;;  %1129 = vrot.lane.b32.xlu1 %v14483_v63, %s19198_s19 }
 0x1ca   :  { %579 = vrot.lane.b32.xlu0 %v13562_v34, %s19166_s23  ;;  %1405 = vrot.lane.b32.xlu1 %v14485_v10, %s19201_s17 }
 0x1ce   :  { %720 = vrot.lane.b32.xlu0 %v14485_v10, %s19158_s20  ;;  %718 = vrot.lane.b32.xlu1 %v14483_v63, %s19158_s20  ;;  %s19168_s20 = smov 18  }
 0x1d2   :  { %445 = vrot.lane.b32.xlu0 %v14485_v10, %s19162_s22  ;;  %855 = vrot.lane.b32.xlu1 %v14483_v63, %s19189_s21 }
 0x1d6   :  { %3955 = vrot.lane.b32.xlu0 %v14462_v30, %s19172_s24  ;;  %1131 = vrot.lane.b32.xlu1 %v14485_v10, %s19198_s19 }
 0x1da   :  { %3681 = vrot.lane.b32.xlu0 %v14462_v30, %s19256_s25  ;;  %443 = vrot.lane.b32.xlu1 %v14483_v63, %s19162_s22  ;;  %s19170_s22 = smov 27  }
 0x1de   :  { %3818 = vrot.lane.b32.xlu0 %v14462_v30, %s19168_s20  ;;  %581 = vrot.lane.b32.xlu1 %v14483_v63, %s19166_s23 }
 0x1e2   :  { %3959 = vrot.lane.b32.xlu0 %v14466_v39, %s19172_s24  ;;  %857 = vrot.lane.b32.xlu1 %v14485_v10, %s19189_s21 }
 0x1e6   :  { %3409 = vrot.lane.b32.xlu0 %v14464_v35, %s19174_s18  ;;  %583 = vrot.lane.b32.xlu1 %v14485_v10, %s19166_s23  ;;  %s19219_s23 = smov 29  }
 0x1ea   :  { %3546 = vrot.lane.b32.xlu0 %v14464_v35, %s19170_s22  ;;  %3957 = vrot.lane.b32.xlu1 %v14464_v35, %s19172_s24  ;;  %s19249_s24 = smov 118  }
 0x1ee   :  { %3822 = vrot.lane.b32.xlu0 %v14466_v39, %s19168_s20  ;;  %3683 = vrot.lane.b32.xlu1 %v14464_v35, %s19256_s25 }
 0x1f2   :  { %3135 = vrot.lane.b32.xlu0 %v14464_v35, %s19176_s16  ;;  %3820 = vrot.lane.b32.xlu1 %v14464_v35, %s19168_s20  ;;  %s19238_s20 = smov 39  }
 0x1f6   :  { %3272 = vrot.lane.b32.xlu0 %v14464_v35, %s19219_s23  ;;  %3407 = vrot.lane.b32.xlu1 %v14462_v30, %s19174_s18 }
 0x1f8   :  { %v2314_v40 = vpop.permute.xlu1 %2313  ;;  %v2312_v62 = vpop.permute.xlu0 %2311 }
 0x1f9   :  { %v2330_v44 = vrot.slane %v2314_v40, 4  ;;  %v2329_v56 = vrot.slane %v2312_v62, 4 }
 0x1fa   :  { %3548 = vrot.lane.b32.xlu0 %v14466_v39, %s19170_s22  ;;  %3544 = vrot.lane.b32.xlu1 %v14462_v30, %s19170_s22  ;;  %s19178_s22 = smov 38  }
 0x1fb   :  { %v2338_v11 = vsel %vm468_vm0, %v2329_v56, %v2330_v44 }
 0x1fc   :  { %v2449_v49 = vpop.permute.xlu1 %2448  ;;  %v14601_v52 = vpop.permute.xlu0 %2452  ;;  %v2340_v29 = vsel %vm2339_vm1, %v2312_v62, %v2338_v11 }
 0x1fd   :  { %v2466_v48 = vrot.slane %v2449_v49, 4  ;;  %v19218_v15 = vrot.slane %v14601_v52, 4 }
 0x1fe   :  { %2861 = vrot.lane.b32.xlu0 %v14464_v35, %s19238_s20  ;;  %3685 = vrot.lane.b32.xlu1 %v14466_v39, %s19256_s25 }
 0x200   :  { %v2451_v45 = vpop.permute.xlu1 %2450  ;;  %v14607_v6 = vpop.permute.xlu0 %1814 }
 0x201   :  { %v2467_v53 = vrot.slane %v2451_v45, 4 }
 0x202   :  { %2998 = vrot.lane.b32.xlu0 %v14464_v35, %s19178_s22  ;;  %3133 = vrot.lane.b32.xlu1 %v14462_v30, %s19176_s16 }
 0x203   :  { %v2475_v57 = vsel %vm468_vm0, %v2466_v48, %v2467_v53  ;;  %v2478_v7 = vsel %vm468_vm0, %v2467_v53, %v19218_v15 }
 0x204   :  { %v14615_v61 = vpop.permute.xlu0 %1951  ;;  %v2087_v2 = vpop.permute.xlu1 %2086  ;;  %v2477_v32 = vsel %vm2476_vm2, %v2449_v49, %v2475_v57  ;;  %v2479_v63 = vsel %vm2476_vm2, %v2451_v45, %v2478_v7  ;;  %v1831_v49 = vrot.slane %v14607_v6, 4 }
 0x205   :  { %v12919_v38 = vcombine.high %v2340_v29, %v2477_v32  ;;  %v12918_v12 = vcombine.low %v2340_v29, %v2477_v32  ;;  %v2104_v33 = vrot.slane %v2087_v2, 4 }
 0x206   :  { %3274 = vrot.lane.b32.xlu0 %v14466_v39, %s19219_s23  ;;  %3270 = vrot.lane.b32.xlu1 %v14462_v30, %s19219_s23 }
 0x207   :  { %5371 = vmatprep.subr.bf16.mxu0 %v12919_v38 }
 0x208   :  { %5372 = vmatpush1.bf16.msra.mxu0 %v12918_v12  ;;  %v14623_v60 = vpop.permute.xlu0 %1538  ;;  %v2089_v0 = vpop.permute.xlu1 %2088 }
 0x209   :  { %v2105_v27 = vrot.slane %v2089_v0, 4 }
 0x20a   :  { %2587 = vrot.lane.b32.xlu0 %v14464_v35, %s19249_s24  ;;  %3411 = vrot.lane.b32.xlu1 %v14466_v39, %s19174_s18  ;;  %s19235_s18 = smov 117  }
 0x20b   :  { %v2113_v20 = vsel %vm468_vm0, %v2104_v33, %v2105_v27 }
 0x20c   :  { %v14631_v46 = vpop.permute.xlu0 %1675  ;;  %v14633_v24 = vpop.permute.xlu1 %2315  ;;  %v2115_v23 = vsel %vm2114_vm3, %v2087_v2, %v2113_v20 }
 0x20d   :  { %v19217_v18 = vrot.slane %v14633_v24, 4  ;;  %v12903_v50 = vcombine.high %v2115_v23, %v14462_v30  ;;  %v12902_v19 = vcombine.low %v2115_v23, %v14462_v30 }
 0x20e   :  { %2724 = vrot.lane.b32.xlu0 %v14464_v35, %s19235_s18  ;;  %2859 = vrot.lane.b32.xlu1 %v14462_v30, %s19238_s20 }
 0x20f   :  { %5373 = vmatprep.subr.bf16.mxu0 %v12903_v50  ;;  %v2341_v8 = vsel %vm468_vm0, %v2330_v44, %v19217_v18 }
 0x210   :  { %v14649_v13 = vpop.permute.xlu0 %1816  ;;  %5374 = vmatpush1.bf16.msra.mxu0 %v12902_v19  ;;  %v1813_v16 = vpop.permute.xlu1 %1812  ;;  %v2342_v21 = vsel %vm2339_vm1, %v2314_v40, %v2341_v8  ;;  %v1968_v40 = vrot.slane %v14615_v61, 4 }
 0x211   :  { %v1830_v10 = vrot.slane %v1813_v16, 4  ;;  %v12921_v34 = vcombine.high %v2342_v21, %v2479_v63  ;;  %v12920_v62 = vcombine.low %v2342_v21, %v2479_v63  ;;  %v19193_v63 = vrot.slane %v14649_v13, 4 }
 0x212   :  { %3000 = vrot.lane.b32.xlu0 %v14466_v39, %s19178_s22  ;;  %2996 = vrot.lane.b32.xlu1 %v14462_v30, %s19178_s22  ;;  %s19422_s22 = smov 100  }
 0x213   :  { %5412 = vmatprep.subr.bf16.mxu1 %v12921_v34  ;;  %v1839_v45 = vsel %vm468_vm0, %v1830_v10, %v1831_v49 }
 0x214   :  { %v14658_v44 = vpop.permute.xlu0 %1264  ;;  %5413 = vmatpush1.bf16.msra.mxu1 %v12920_v62  ;;  %v1950_v56 = vpop.permute.xlu1 %1949  ;;  %v1841_v11 = vsel %vm1840_vm4, %v1813_v16, %v1839_v45  ;;  %v14697_v16 = vld [vmem:[%s19146_s6] sm:$0xff]  ;;  %s19420_s6 = smov 91  }
 0x215   :  { %v1967_v48 = vrot.slane %v1950_v56, 4 }
 0x216   :  { %2454 = vrot.lane.b32.xlu0 %v14468_v43, %s19254_s26  ;;  %3137 = vrot.lane.b32.xlu1 %v14466_v39, %s19176_s16  ;;  %s19421_s16 = smov 110  }
 0x217   :  { %v1976_v53 = vsel %vm468_vm0, %v1967_v48, %v1968_v40 }
 0x218   :  { %v1978_v57 = vsel %vm1977_vm5, %v1950_v56, %v1976_v53  ;;  %v14669_v2 = vpop.permute.xlu0 %1401  ;;  %v14671_v29 = vpop.permute.xlu1 %2090 }
 0x219   :  { %v19194_v32 = vrot.slane %v14671_v29, 4  ;;  %v12887_v38 = vcombine.high %v1841_v11, %v1978_v57  ;;  %v12886_v12 = vcombine.low %v1841_v11, %v1978_v57 }
 0x21a   :  { %2726 = vrot.lane.b32.xlu0 %v14466_v39, %s19235_s18  ;;  %2585 = vrot.lane.b32.xlu1 %v14462_v30, %s19249_s24 }
 0x21b   :  { %5375 = vmatprep.subr.bf16.mxu0 %v12887_v38  ;;  %v2116_v33 = vsel %vm468_vm0, %v2105_v27, %v19194_v32  ;;  %v1556_v27 = vrot.slane %v14623_v60, 4 }
 0x21c   :  { %v14681_v20 = vpop.permute.xlu0 %1542  ;;  %5376 = vmatpush1.bf16.msra.mxu0 %v12886_v12  ;;  %v14683_v23 = vpop.permute.xlu1 %1540  ;;  %v2117_v50 = vsel %vm2114_vm3, %v2089_v0, %v2116_v33  ;;  %v1842_v12 = vsel %vm468_vm0, %v1831_v49, %v19193_v63 }
 0x21d   :  { %v1557_v19 = vrot.slane %v14683_v23, 4  ;;  %v12905_v7 = vcombine.high %v2117_v50, %v14464_v35  ;;  %v12904_v8 = vcombine.low %v2117_v50, %v14464_v35  ;;  %v14705_v35 = vcombine.high %v14697_v16, %v14697_v16 }
 0x21e   :  { %2319 = vrot.lane.b32.xlu0 %v14470_v47, %s19252_s14  ;;  %2722 = vrot.lane.b32.xlu1 %v14462_v30, %s19235_s18  ;;  %v1693_v30 = vrot.slane %v14631_v46, 4  ;;  %v1843_v50 = vsel %vm1840_vm4, %v14607_v6, %v1842_v12 }
 0x21f   :  { %5414 = vmatprep.subr.bf16.mxu1 %v12905_v7  ;;  %v1565_v34 = vsel %vm468_vm0, %v1556_v27, %v1557_v19  ;;  %13031 = vmatprep.mubr.msk.bf16.mxu0 %vm5318_vm8, %v14705_v35 }
 0x220   :  { %v14699_v0 = vpop.permute.xlu0 %990  ;;  %5415 = vmatpush1.bf16.msra.mxu1 %v12904_v8  ;;  %v14701_v21 = vpop.permute.xlu1 %1677  ;;  %13033 = vmatprep.mubr.msk.bf16.mxu1 %vm5318_vm8, %v14705_v35  ;;  %v1567_v48 = vsel %vm19270_vm6, %v14623_v60, %v1565_v34  ;;  %v19183_v34 = vrot.slane %v14681_v20, 4 }
 0x221   :  { %v1694_v10 = vrot.slane %v14701_v21, 4 }
 0x222   :  { %1818 = vrot.lane.b32.xlu0 %v14487_v54, %s19263_s27  ;;  %2863 = vrot.lane.b32.xlu1 %v14466_v39, %s19238_s20 }
 0x223   :  { %v1702_v62 = vsel %vm468_vm0, %v1693_v30, %v1694_v10 }
 0x224   :  { %v14722_v56 = vpop.permute.xlu0 %1127  ;;  %v14724_v45 = vpop.permute.xlu1 %1953  ;;  %v1704_v53 = vsel %vm19269_vm7, %v14631_v46, %v1702_v62 }
 0x225   :  { %v19187_v11 = vrot.slane %v14724_v45, 4  ;;  %v12871_v57 = vcombine.high %v1567_v48, %v1704_v53  ;;  %v12870_v38 = vcombine.low %v1567_v48, %v1704_v53 }
 0x226   :  { %2094 = vrot.lane.b32.xlu0 %v14489_v28, %s19212_s28  ;;  %2317 = vrot.lane.b32.xlu1 %v14468_v43, %s19252_s14 }
 0x227   :  { %5377 = vmatprep.subr.bf16.mxu0 %v12871_v57  ;;  %v1979_v60 = vsel %vm468_vm0, %v1968_v40, %v19187_v11  ;;  %v1282_v40 = vrot.slane %v14658_v44, 4 }
 0x228   :  { %v14741_v46 = vpop.permute.xlu0 %1268  ;;  %5378 = vmatpush1.bf16.msra.mxu0 %v12870_v38  ;;  %v14743_v33 = vpop.permute.xlu1 %1266  ;;  %v1980_v49 = vsel %vm1977_vm5, %v14615_v61, %v1979_v60  ;;  %v1419_v61 = vrot.slane %v14669_v2, 4 }
 0x229   :  { %v1283_v7 = vrot.slane %v14743_v33, 4  ;;  %v12889_v8 = vcombine.high %v1843_v50, %v1980_v49  ;;  %v12888_v27 = vcombine.low %v1843_v50, %v1980_v49  ;;  %v1568_v50 = vsel %vm468_vm0, %v1557_v19, %v19183_v34 }
 0x22a   :  { %1681 = vrot.lane.b32.xlu0 %v14487_v54, %s19210_s30  ;;  %2589 = vrot.lane.b32.xlu1 %v14466_v39, %s19249_s24 }
 0x22b   :  { %5416 = vmatprep.subr.bf16.mxu1 %v12889_v8  ;;  %v1291_v48 = vsel %vm468_vm0, %v1282_v40, %v1283_v7 }
 0x22c   :  { %v14755_v30 = vpop.permute.xlu0 %716  ;;  %5417 = vmatpush1.bf16.msra.mxu1 %v12888_v27  ;;  %v1404_v6 = vpop.permute.xlu1 %1403  ;;  %v1293_v12 = vsel %vm19316_vm9, %v14658_v44, %v1291_v48 }
 0x22d   :  { %v1420_v62 = vrot.slane %v1404_v6, 4 }
 0x22e   :  { %1957 = vrot.lane.b32.xlu0 %v14489_v28, %s19203_s13  ;;  %2092 = vrot.lane.b32.xlu1 %v14487_v54, %s19212_s28  ;;  %s19429_s28 = smov 28  }
 0x22f   :  { %v1428_v53 = vsel %vm468_vm0, %v1419_v61, %v1420_v62 }
 0x230   :  { %v14765_v57 = vpop.permute.xlu0 %853  ;;  %v14767_v38 = vpop.permute.xlu1 %1679  ;;  %v1430_v60 = vsel %vm19315_vm10, %v14669_v2, %v1428_v53  ;;  %v1569_v2 = vsel %vm19270_vm6, %v14683_v23, %v1568_v50  ;;  %v1008_v23 = vrot.slane %v14699_v0, 4  ;;  %v19184_v50 = vrot.slane %v14741_v46, 4 }
 0x231   :  { %v19186_v49 = vrot.slane %v14767_v38, 4  ;;  %v12855_v8 = vcombine.high %v1293_v12, %v1430_v60  ;;  %v12854_v27 = vcombine.low %v1293_v12, %v1430_v60 }
 0x232   :  { %1407 = vrot.lane.b32.xlu0 %v14487_v54, %s19201_s17  ;;  %2456 = vrot.lane.b32.xlu1 %v14470_v47, %s19254_s26 }
 0x233   :  { %5379 = vmatprep.subr.bf16.mxu0 %v12855_v8  ;;  %v1705_v44 = vsel %vm468_vm0, %v1694_v10, %v19186_v49 }
 0x234   :  { %v14788_v40 = vpop.permute.xlu0 %994  ;;  %5380 = vmatpush1.bf16.msra.mxu0 %v12854_v27  ;;  %v14790_v19 = vpop.permute.xlu1 %992  ;;  %v1706_v61 = vsel %vm19269_vm7, %v14701_v21, %v1705_v44  ;;  %v1145_v21 = vrot.slane %v14722_v56, 4 }
 0x235   :  { %v1009_v48 = vrot.slane %v14790_v19, 4  ;;  %v12873_v53 = vcombine.high %v1569_v2, %v1706_v61  ;;  %v12872_v12 = vcombine.low %v1569_v2, %v1706_v61 }
 0x236   :  { %1683 = vrot.lane.b32.xlu0 %v14489_v28, %s19210_s30  ;;  %1955 = vrot.lane.b32.xlu1 %v14487_v54, %s19203_s13  ;;  %s19427_s13 = smov 18   ;;  %s19428_s30 = smov 38  }
 0x237   :  { %5418 = vmatprep.subr.bf16.mxu1 %v12873_v53  ;;  %v1017_v27 = vsel %vm468_vm0, %v1008_v23, %v1009_v48  ;;  %v1294_v23 = vsel %vm468_vm0, %v1283_v7, %v19184_v50 }
 0x238   :  { %v14800_v10 = vpop.permute.xlu0 %441  ;;  %5419 = vmatpush1.bf16.msra.mxu1 %v12872_v12  ;;  %v1130_v60 = vpop.permute.xlu1 %1129  ;;  %v1019_v53 = vsel %vm19188_vm11, %v14699_v0, %v1017_v27 }
 0x239   :  { %v1146_v8 = vrot.slane %v1130_v60, 4 }
 0x23a   :  { %1133 = vrot.lane.b32.xlu0 %v14487_v54, %s19198_s19  ;;  %1544 = vrot.lane.b32.xlu1 %v14487_v54, %s19196_s29 }
 0x23b   :  { %v1154_v44 = vsel %vm468_vm0, %v1145_v21, %v1146_v8 }
 0x23c   :  { %v14810_v2 = vpop.permute.xlu0 %579  ;;  %v14812_v61 = vpop.permute.xlu1 %1405  ;;  %v1156_v12 = vsel %vm19222_vm12, %v14722_v56, %v1154_v44  ;;  %v1295_v56 = vsel %vm19316_vm9, %v14743_v33, %v1294_v23 }
 0x23d   :  { %v19185_v37 = vrot.slane %v14812_v61, 4  ;;  %v12839_v1 = vcombine.high %v1019_v53, %v1156_v12  ;;  %v12838_v34 = vcombine.low %v1019_v53, %v1156_v12 }
 0x23e   :  { %1409 = vrot.lane.b32.xlu0 %v14489_v28, %s19201_s17  ;;  %1820 = vrot.lane.b32.xlu1 %v14489_v28, %s19263_s27  ;;  %s19426_s17 = smov 27  }
 0x23f   :  { %5381 = vmatprep.subr.bf16.mxu0 %v12839_v1  ;;  %v1431_v0 = vsel %vm468_vm0, %v1420_v62, %v19185_v37  ;;  %v734_v1 = vrot.slane %v14755_v30, 4  ;;  %v19191_v62 = vrot.slane %v14788_v40, 4 }
 0x240   :  { %v14831_v21 = vpop.permute.xlu0 %720  ;;  %5382 = vmatpush1.bf16.msra.mxu0 %v12838_v34  ;;  %v14833_v7 = vpop.permute.xlu1 %718  ;;  %v1432_v27 = vsel %vm19315_vm10, %v1404_v6, %v1431_v0  ;;  %v871_v6 = vrot.slane %v14765_v57, 4 }
 0x241   :  { %v735_v44 = vrot.slane %v14833_v7, 4  ;;  %v12857_v53 = vcombine.high %v1295_v56, %v1432_v27  ;;  %v12856_v12 = vcombine.low %v1295_v56, %v1432_v27 }
 0x242   :  { %859 = vrot.lane.b32.xlu0 %v14487_v54, %s19189_s21  ;;  %1270 = vrot.lane.b32.xlu1 %v14487_v54, %s19420_s6 }
 0x243   :  { %5420 = vmatprep.subr.bf16.mxu1 %v12857_v53  ;;  %v743_v0 = vsel %vm468_vm0, %v734_v1, %v735_v44  ;;  %v1020_v1 = vsel %vm468_vm0, %v1009_v48, %v19191_v62 }
 0x244   :  { %v14842_v33 = vpop.permute.xlu0 %445  ;;  %5421 = vmatpush1.bf16.msra.mxu1 %v12856_v12  ;;  %v14844_v34 = vpop.permute.xlu1 %855  ;;  %v745_v12 = vsel %vm19209_vm13, %v14755_v30, %v743_v0 }
 0x245   :  { %v872_v23 = vrot.slane %v14844_v34, 4 }
 0x246   :  { %1135 = vrot.lane.b32.xlu0 %v14489_v28, %s19198_s19  ;;  %1546 = vrot.lane.b32.xlu1 %v14489_v28, %s19196_s29  ;;  %s19424_s29 = smov 17   ;;  %s19425_s19 = smov 111  }
 0x247   :  { %v880_v56 = vsel %vm468_vm0, %v871_v6, %v872_v23 }
 0x248   :  { %v14855_v27 = vpop.permute.xlu0 %3955  ;;  %v14857_v53 = vpop.permute.xlu1 %1131  ;;  %v882_v50 = vsel %vm19200_vm14, %v14765_v57, %v880_v56  ;;  %v1021_v57 = vsel %vm19188_vm11, %v14790_v19, %v1020_v1  ;;  %vm19206_vm11 = vcmask 900096  }
 0x249   :  { %v19192_v37 = vrot.slane %v14857_v53, 4  ;;  %v12823_v49 = vcombine.high %v745_v12, %v882_v50  ;;  %v12822_v11 = vcombine.low %v745_v12, %v882_v50 }
 0x24a   :  { %585 = vrot.lane.b32.xlu0 %v14487_v54, %s19421_s16  ;;  %996 = vrot.lane.b32.xlu1 %v14487_v54, %s19422_s22 }
 0x24b   :  { %5383 = vmatprep.subr.bf16.mxu0 %v12823_v49  ;;  %v1157_v30 = vsel %vm468_vm0, %v1146_v8, %v19192_v37  ;;  %v459_v49 = vrot.slane %v14800_v10, 4  ;;  %v19195_v8 = vrot.slane %v14831_v21, 4 }
 0x24c   :  { %v14876_v6 = vpop.permute.xlu0 %3681  ;;  %5384 = vmatpush1.bf16.msra.mxu0 %v12822_v11  ;;  %v444_v48 = vpop.permute.xlu1 %443  ;;  %v1158_v50 = vsel %vm19222_vm12, %v1130_v60, %v1157_v30  ;;  %v597_v60 = vrot.slane %v14810_v2, 4  ;;  %vm19240_vm12 = vcmask 236544  }
 0x24d   :  { %v460_v0 = vrot.slane %v444_v48, 4  ;;  %v12841_v56 = vcombine.high %v1021_v57, %v1158_v50  ;;  %v12840_v12 = vcombine.low %v1021_v57, %v1158_v50 }
 0x24e   :  { %861 = vrot.lane.b32.xlu0 %v14489_v28, %s19189_s21  ;;  %1272 = vrot.lane.b32.xlu1 %v14489_v28, %s19420_s6  ;;  %s19423_s21 = smov 109  }
 0x24f   :  { %5422 = vmatprep.subr.bf16.mxu1 %v12841_v56  ;;  %v469_v30 = vsel %vm468_vm0, %v459_v49, %v460_v0  ;;  %v746_v49 = vsel %vm468_vm0, %v735_v44, %v19195_v8 }
 0x250   :  { %v14884_v19 = vpop.permute.xlu0 %3818  ;;  %5423 = vmatpush1.bf16.msra.mxu1 %v12840_v12  ;;  %v582_v11 = vpop.permute.xlu1 %581  ;;  %v471_v12 = vsel %vm19207_vm15, %v14800_v10, %v469_v30 }
 0x251   :  { %v598_v1 = vrot.slane %v582_v11, 4 }
 0x252   :  { %587 = vrot.lane.b32.xlu0 %v14489_v28, %s19421_s16  ;;  %722 = vrot.lane.b32.xlu1 %v14487_v54, %s19423_s21 }
 0x253   :  { %v606_v57 = vsel %vm468_vm0, %v597_v60, %v598_v1  ;;  %v19214_v60 = vrot.slane %v14842_v33, 4 }
 0x254   :  { %v14894_v50 = vpop.permute.xlu0 %3959  ;;  %v14896_v56 = vpop.permute.xlu1 %857  ;;  %v608_v62 = vsel %vm19206_vm11, %v14810_v2, %v606_v57  ;;  %v747_v2 = vsel %vm19209_vm13, %v14833_v7, %v746_v49  ;;  %v3973_v7 = vrot.slane %v14855_v27, 4  ;;  %vm19237_vm13 = vcmask 220160  }
 0x255   :  { %v19216_v37 = vrot.slane %v14896_v56, 4  ;;  %v12807_v63 = vcombine.high %v471_v12, %v608_v62  ;;  %v12806_v32 = vcombine.low %v471_v12, %v608_v62  ;;  %v472_v57 = vsel %vm468_vm0, %v460_v0, %v19214_v60 }
 0x256   :  { %3687 = vrot.lane.b32.xlu0 %v14468_v43, %s19256_s25  ;;  %998 = vrot.lane.b32.xlu1 %v14489_v28, %s19422_s22 }
 0x257   :  { %5385 = vmatprep.subr.bf16.mxu0 %v12807_v63  ;;  %v883_v10 = vsel %vm468_vm0, %v872_v23, %v19216_v37 }
 0x258   :  { %v14916_v44 = vpop.permute.xlu0 %3409  ;;  %5386 = vmatpush1.bf16.msra.mxu0 %v12806_v32  ;;  %v14918_v62 = vpop.permute.xlu1 %583  ;;  %v884_v30 = vsel %vm19200_vm14, %v14844_v34, %v883_v10  ;;  %v473_v34 = vsel %vm19207_vm15, %v444_v48, %v472_v57  ;;  %vm19205_vm14 = vcmask 138240   ;;  %v19208_v10 = vrot.slane %v14894_v50, 4 }
 0x259   :  { %v19215_v63 = vrot.slane %v14918_v62, 4  ;;  %v12825_v12 = vcombine.high %v747_v2, %v884_v30  ;;  %v12824_v8 = vcombine.low %v747_v2, %v884_v30  ;;  %vm19230_vm15 = vcmask 228352  }
 0x25a   :  { %3963 = vrot.lane.b32.xlu0 %v14470_v47, %s19424_s29  ;;  %447 = vrot.lane.b32.xlu1 %v14487_v54, %s19425_s19 }
 0x25b   :  { %5424 = vmatprep.subr.bf16.mxu1 %v12825_v12  ;;  %v609_v32 = vsel %vm468_vm0, %v598_v1, %v19215_v63 }
 0x25c   :  { %v14935_v23 = vpop.permute.xlu0 %3546  ;;  %5425 = vmatpush1.bf16.msra.mxu1 %v12824_v8  ;;  %v3958_v0 = vpop.permute.xlu1 %3957  ;;  %v610_v49 = vsel %vm19206_vm11, %v582_v11, %v609_v32  ;;  %vm19229_vm11 = vcmask 154624  }
 0x25d   :  { %v3974_v2 = vrot.slane %v3958_v0, 4  ;;  %v12809_v54 = vcombine.high %v473_v34, %v610_v49  ;;  %v12808_v30 = vcombine.low %v473_v34, %v610_v49 }
 0x25e   :  { %3550 = vrot.lane.b32.xlu0 %v14468_v43, %s19426_s17  ;;  %724 = vrot.lane.b32.xlu1 %v14489_v28, %s19423_s21 }
 0x25f   :  { %v3982_v48 = vsel %vm468_vm0, %v3973_v7, %v3974_v2  ;;  %v3985_v8 = vsel %vm468_vm0, %v3974_v2, %v19208_v10  ;;  %5426 = vmatprep.subr.bf16.mxu1 %v12809_v54  ;;  %v3699_v2 = vrot.slane %v14876_v6, 4 }
 0x260   :  { %v3986_v11 = vsel %vm19205_vm14, %v3958_v0, %v3985_v8  ;;  %v14948_v1 = vpop.permute.xlu0 %3822  ;;  %5427 = vmatpush1.bf16.msra.mxu1 %v12808_v30  ;;  %v14950_v57 = vpop.permute.xlu1 %3683  ;;  %v3984_v12 = vsel %vm19205_vm14, %v14855_v27, %v3982_v48  ;;  %vm19221_vm14 = vcmask 146432   ;;  %v3836_v8 = vrot.slane %v14884_v19, 4 }
 0x261   :  { %v13017_v32 = vcombine.high %v3986_v11, %v3986_v11  ;;  %v3700_v34 = vrot.slane %v14950_v57, 4  ;;  %v13015_v49 = vcombine.high %v3984_v12, %v3984_v12  ;;  %v13014_v7 = vcombine.low %v3984_v12, %v3984_v12 }
 0x262   :  { %3826 = vrot.lane.b32.xlu0 %v14470_v47, %s19427_s13  ;;  %449 = vrot.lane.b32.xlu1 %v14489_v28, %s19425_s19  ;;  %v13016_v0 = vcombine.low %v3986_v11, %v3986_v11 }
 0x263   :  { %13030 = vmatprep.subr.msk.bf16.mxu0 %vm468_vm0, %v13015_v49  ;;  %13032 = vmatprep.subr.msk.bf16.mxu1 %vm468_vm0, %v13017_v32  ;;  %v5324_v27 = vsel %vm468_vm0, %v13014_v7, 0  ;;  %v3708_v11 = vsel %vm468_vm0, %v3699_v2, %v3700_v34 }
 0x264   :  { %v14962_v54 = vpop.permute.xlu0 %3135  ;;  %v5330_v30 = vsel %vm468_vm0, %v13016_v0, 0  ;;  %v3821_v48 = vpop.permute.xlu1 %3820  ;;  %5392 = vmatpush2.bf16.msra.mxu0 %v5324_v27  ;;  %v3710_v7 = vsel %vm19229_vm11, %v14876_v6, %v3708_v11  ;;  %v3563_v11 = vrot.slane %v14935_v23, 4 }
 0x265   :  { %5433 = vmatpush2.bf16.msra.mxu1 %v5330_v30  ;;  %v3837_v28 = vrot.slane %v3821_v48, 4 }
 0x266   :  { %3276 = vrot.lane.b32.xlu0 %v14468_v43, %s19219_s23  ;;  %3961 = vrot.lane.b32.xlu1 %v14468_v43, %s19424_s29 }
 0x267   :  { %v3845_v12 = vsel %vm468_vm0, %v3836_v8, %v3837_v28  ;;  %v3426_v8 = vrot.slane %v14916_v44, 4 }
 0x268   :  { %v14973_v32 = vpop.permute.xlu0 %3272  ;;  %v3408_v49 = vpop.permute.xlu1 %3407  ;;  %v3847_v0 = vsel %vm19221_vm14, %v14884_v19, %v3845_v12 }
 0x269   :  { %v3425_v27 = vrot.slane %v3408_v49, 4  ;;  %v12999_v2 = vcombine.high %v3710_v7, %v3847_v0  ;;  %v12998_v30 = vcombine.low %v3710_v7, %v3847_v0  ;;  %v19223_v7 = vrot.slane %v14948_v1, 4 }
 0x26a   :  { %3552 = vrot.lane.b32.xlu0 %v14470_v47, %s19426_s17  ;;  %3824 = vrot.lane.b32.xlu1 %v14468_v43, %s19427_s13 }
 0x26b   :  { %5393 = vmatprep.subr.bf16.mxu0 %v12999_v2  ;;  %v3434_v19 = vsel %vm468_vm0, %v3425_v27, %v3426_v8  ;;  %v3848_v27 = vsel %vm468_vm0, %v3837_v28, %v19223_v7 }
 0x26c   :  { %v14984_v10 = vpop.permute.xlu0 %3548  ;;  %5394 = vmatpush2.bf16.msra.mxu0 %v12998_v30  ;;  %v3545_v6 = vpop.permute.xlu1 %3544  ;;  %v3436_v2 = vsel %vm19230_vm15, %v3408_v49, %v3434_v19 }
 0x26d   :  { %v3562_v12 = vrot.slane %v3545_v6, 4  ;;  %v19431_v22 = vrot.slane %v14984_v10, 4 }
 0x26e   :  { %3002 = vrot.lane.b32.xlu0 %v14468_v43, %s19428_s30  ;;  %3413 = vrot.lane.b32.xlu1 %v14468_v43, %s19429_s28 }
 0x26f   :  { %v3571_v0 = vsel %vm468_vm0, %v3562_v12, %v3563_v11  ;;  %v3574_v42 = vsel %vm468_vm0, %v3563_v11, %v19431_v22 }
 0x270   :  { %v3573_v30 = vsel %vm19237_vm13, %v3545_v6, %v3571_v0  ;;  %v14996_v60 = vpop.permute.xlu0 %2861  ;;  %v14998_v63 = vpop.permute.xlu1 %3685  ;;  %v3849_v6 = vsel %vm19221_vm14, %v3821_v48, %v3848_v27  ;;  %vm3161_vm14 = vcmask 302080   ;;  %v3575_v22 = vsel %vm19237_vm13, %v14935_v23, %v3574_v42 }
 0x271   :  { %v19224_v37 = vrot.slane %v14998_v63, 4  ;;  %v12983_v18 = vcombine.high %v3436_v2, %v3573_v30  ;;  %v12982_v15 = vcombine.low %v3436_v2, %v3573_v30  ;;  %vm2613_vm13 = vcmask 965632  }
 0x272   :  { %3278 = vrot.lane.b32.xlu0 %v14470_v47, %s19219_s23  ;;  %3689 = vrot.lane.b32.xlu1 %v14470_v47, %s19256_s25  ;;  %s19430_s23 = smov 37   ;;  %s19441_s25 = smov 89  }
 0x273   :  { %5395 = vmatprep.subr.bf16.mxu0 %v12983_v18  ;;  %v3711_v49 = vsel %vm468_vm0, %v3700_v34, %v19224_v37  ;;  %v3152_v18 = vrot.slane %v14962_v54, 4 }
 0x274   :  { %v15012_v19 = vpop.permute.xlu0 %2998  ;;  %5396 = vmatpush2.bf16.msra.mxu0 %v12982_v15  ;;  %v3134_v28 = vpop.permute.xlu1 %3133  ;;  %v3712_v12 = vsel %vm19229_vm11, %v14950_v57, %v3711_v49  ;;  %v3289_v57 = vrot.slane %v14973_v32, 4  ;;  %vm2887_vm11 = vcmask 318464  }
 0x275   :  { %v3151_v0 = vrot.slane %v3134_v28, 4  ;;  %v13001_v2 = vcombine.high %v3712_v12, %v3849_v6  ;;  %v13000_v30 = vcombine.low %v3712_v12, %v3849_v6  ;;  %v3015_v42 = vrot.slane %v15012_v19, 4 }
 0x276   :  { %2728 = vrot.lane.b32.xlu0 %v14468_v43, %s19235_s18  ;;  %3139 = vrot.lane.b32.xlu1 %v14468_v43, %s19430_s23 }
 0x277   :  { %5434 = vmatprep.subr.bf16.mxu1 %v13001_v2  ;;  %v3160_v27 = vsel %vm468_vm0, %v3151_v0, %v3152_v18 }
 0x278   :  { %v15021_v34 = vpop.permute.xlu0 %3274  ;;  %5435 = vmatpush2.bf16.msra.mxu1 %v13000_v30  ;;  %v3271_v15 = vpop.permute.xlu1 %3270  ;;  %v3162_v12 = vsel %vm3161_vm14, %v3134_v28, %v3160_v27 }
 0x279   :  { %v3288_v49 = vrot.slane %v3271_v15, 4  ;;  %v19242_v23 = vrot.slane %v15021_v34, 4 }
 0x27a   :  { %3004 = vrot.lane.b32.xlu0 %v14470_v47, %s19428_s30  ;;  %3415 = vrot.lane.b32.xlu1 %v14470_v47, %s19429_s28 }
 0x27b   :  { %v3297_v6 = vsel %vm468_vm0, %v3288_v49, %v3289_v57  ;;  %v3300_v26 = vsel %vm468_vm0, %v3289_v57, %v19242_v23 }
 0x27c   :  { %v3299_v2 = vsel %vm19240_vm12, %v3271_v15, %v3297_v6  ;;  %v15033_v30 = vpop.permute.xlu0 %2587  ;;  %v15035_v7 = vpop.permute.xlu1 %3411  ;;  %v3301_v57 = vsel %vm19240_vm12, %v14973_v32, %v3300_v26  ;;  %vm2750_vm12 = vcmask 957440  }
 0x27d   :  { %v19231_v37 = vrot.slane %v15035_v7, 4  ;;  %v12967_v0 = vcombine.high %v3162_v12, %v3299_v2  ;;  %v12966_v48 = vcombine.low %v3162_v12, %v3299_v2 }
 0x27e   :  { %2458 = vrot.lane.b32.xlu0 %v14472_v51, %s19254_s26  ;;  %2865 = vrot.lane.b32.xlu1 %v14468_v43, %s19238_s20 }
 0x27f   :  { %5397 = vmatprep.subr.bf16.mxu0 %v12967_v0  ;;  %v3437_v28 = vsel %vm468_vm0, %v3426_v8, %v19231_v37  ;;  %v19232_v8 = vrot.slane %v14996_v60, 4 }
 0x280   :  { %v15048_v15 = vpop.permute.xlu0 %2724  ;;  %5398 = vmatpush2.bf16.msra.mxu0 %v12966_v48  ;;  %v2860_v27 = vpop.permute.xlu1 %2859  ;;  %v3438_v49 = vsel %vm19230_vm15, %v14916_v44, %v3437_v28  ;;  %vm3024_vm15 = vcmask 310272  }
 0x281   :  { %v2877_v11 = vrot.slane %v2860_v27, 4  ;;  %v12985_v6 = vcombine.high %v3438_v49, %v3575_v22  ;;  %v12984_v12 = vcombine.low %v3438_v49, %v3575_v22 }
 0x282   :  { %2730 = vrot.lane.b32.xlu0 %v14470_v47, %s19235_s18  ;;  %3141 = vrot.lane.b32.xlu1 %v14470_v47, %s19430_s23  ;;  %s19432_s18 = smov 1  }
 0x283   :  { %5436 = vmatprep.subr.bf16.mxu1 %v12985_v6  ;;  %v2886_v2 = vsel %vm468_vm0, %v2877_v11, %v19232_v8 }
 0x284   :  { %v15059_v48 = vpop.permute.xlu0 %3000  ;;  %5437 = vmatpush2.bf16.msra.mxu1 %v12984_v12  ;;  %v2997_v44 = vpop.permute.xlu1 %2996  ;;  %v2888_v49 = vsel %vm2887_vm11, %v2860_v27, %v2886_v2 }
 0x285   :  { %v3014_v0 = vrot.slane %v2997_v44, 4  ;;  %v19434_v9 = vrot.slane %v15059_v48, 4 }
 0x286   :  { %2323 = vrot.lane.b32.xlu0 %v14474_v55, %s19252_s14  ;;  %2591 = vrot.lane.b32.xlu1 %v14468_v43, %s19249_s24 }
 0x287   :  { %v3023_v28 = vsel %vm468_vm0, %v3014_v0, %v3015_v42  ;;  %v3026_v14 = vsel %vm468_vm0, %v3015_v42, %v19434_v9 }
 0x288   :  { %v3025_v22 = vsel %vm3024_vm15, %v2997_v44, %v3023_v28  ;;  %v15073_v6 = vpop.permute.xlu0 %2454  ;;  %v15075_v12 = vpop.permute.xlu1 %3137 }
 0x289   :  { %v19241_v37 = vrot.slane %v15075_v12, 4  ;;  %v12951_v11 = vcombine.high %v2888_v49, %v3025_v22  ;;  %v12950_v8 = vcombine.low %v2888_v49, %v3025_v22 }
 0x28a   :  { %1822 = vrot.lane.b32.xlu0 %v14491_v31, %s19263_s27  ;;  %2867 = vrot.lane.b32.xlu1 %v14470_v47, %s19238_s20  ;;  %s19433_s20 = smov 11  }
 0x28b   :  { %5399 = vmatprep.subr.bf16.mxu0 %v12951_v11  ;;  %v3163_v27 = vsel %vm468_vm0, %v3152_v18, %v19241_v37  ;;  %v2604_v18 = vrot.slane %v15033_v30, 4  ;;  %v2741_v11 = vrot.slane %v15048_v15, 4 }
 0x28c   :  { %v15088_v44 = vpop.permute.xlu0 %2726  ;;  %5400 = vmatpush2.bf16.msra.mxu0 %v12950_v8  ;;  %v2586_v2 = vpop.permute.xlu1 %2585  ;;  %v3164_v0 = vsel %vm3161_vm14, %v14962_v54, %v3163_v27 }
 0x28d   :  { %v2603_v28 = vrot.slane %v2586_v2, 4  ;;  %v12969_v49 = vcombine.high %v3164_v0, %v3301_v57  ;;  %v12968_v22 = vcombine.low %v3164_v0, %v3301_v57  ;;  %v2469_v57 = vrot.slane %v15073_v6, 4 }
 0x28e   :  { %2098 = vrot.lane.b32.xlu0 %v14493_v58, %s19432_s18  ;;  %2321 = vrot.lane.b32.xlu1 %v14472_v51, %s19252_s14  ;;  %s19438_s14 = smov 90  }
 0x28f   :  { %5438 = vmatprep.subr.bf16.mxu1 %v12969_v49  ;;  %v2612_v32 = vsel %vm468_vm0, %v2603_v28, %v2604_v18 }
 0x290   :  { %v15099_v8 = vpop.permute.xlu0 %2319  ;;  %5439 = vmatpush2.bf16.msra.mxu1 %v12968_v22  ;;  %v2723_v54 = vpop.permute.xlu1 %2722  ;;  %v2614_v49 = vsel %vm2613_vm13, %v2586_v2, %v2612_v32  ;;  %v19436_v2 = vrot.slane %v14996_v60, 4  ;;  %v15131_v32 = vcombine.low %v14697_v16, %v14697_v16 }
 0x291   :  { %v2740_v27 = vrot.slane %v2723_v54, 4 }
 0x292   :  { %1685 = vrot.lane.b32.xlu0 %v14491_v31, %s19433_s20  ;;  %2593 = vrot.lane.b32.xlu1 %v14470_v47, %s19249_s24  ;;  %s19435_s24 = smov 9  }
 0x293   :  { %v2749_v0 = vsel %vm468_vm0, %v2740_v27, %v2741_v11 }
 0x294   :  { %v2751_v22 = vsel %vm2750_vm12, %v2723_v54, %v2749_v0  ;;  %v15112_v37 = vpop.permute.xlu0 %1818  ;;  %v15114_v23 = vpop.permute.xlu1 %2863  ;;  %v19437_v0 = vrot.slane %v14601_v52, 4 }
 0x295   :  { %v19251_v28 = vrot.slane %v15114_v23, 4  ;;  %v12935_v26 = vcombine.high %v2614_v49, %v2751_v22  ;;  %v12934_v5 = vcombine.low %v2614_v49, %v2751_v22  ;;  %v19262_v22 = vrot.slane %v15088_v44, 4 }
 0x296   :  { %1961 = vrot.lane.b32.xlu0 %v14493_v58, %s19435_s24  ;;  %2096 = vrot.lane.b32.xlu1 %v14491_v31, %s19432_s18  ;;  %v2480_v49 = vsel %vm468_vm0, %v19437_v0, %v2469_v57 }
 0x297   :  { %5401 = vmatprep.subr.bf16.mxu0 %v12935_v26  ;;  %v2889_v54 = vsel %vm468_vm0, %v19436_v2, %v19251_v28  ;;  %v3027_v26 = vsel %vm3024_vm15, %v15012_v19, %v3026_v14 }
 0x298   :  { %v15133_v27 = vpop.permute.xlu0 %2094  ;;  %5402 = vmatpush2.bf16.msra.mxu0 %v12934_v5  ;;  %v2318_v9 = vpop.permute.xlu1 %2317  ;;  %v2890_v42 = vsel %vm2887_vm11, %v14996_v60, %v2889_v54  ;;  %v19439_v5 = vrot.slane %v14633_v24, 4 }
 0x299   :  { %v2332_v16 = vrot.slane %v2318_v9, 4  ;;  %v12953_v2 = vcombine.high %v2890_v42, %v3027_v26  ;;  %v12952_v28 = vcombine.low %v2890_v42, %v3027_v26  ;;  %v2481_v42 = vsel %vm2476_vm2, %v14601_v52, %v2480_v49 }
 0x29a   :  { %1411 = vrot.lane.b32.xlu0 %v14491_v31, %s19438_s14  ;;  %2460 = vrot.lane.b32.xlu1 %v14474_v55, %s19254_s26  ;;  %s19440_s26 = smov 99  }
 0x29b   :  { %5440 = vmatprep.subr.bf16.mxu1 %v12953_v2  ;;  %v2343_v14 = vsel %vm468_vm0, %v19439_v5, %v2332_v16  ;;  %5404 = vmatmul.mubr.bf16.vlgmr.msra.gmra.mxu0 %v15131_v32  ;;  %v2752_v5 = vsel %vm468_vm0, %v2741_v11, %v19262_v22 }
 0x29c   :  { %v15153_v60 = vpop.permute.xlu0 %1681  ;;  %5441 = vmatpush2.bf16.msra.mxu1 %v12952_v28  ;;  %v15155_v19 = vpop.permute.xlu1 %2589  ;;  %v2344_v54 = vsel %vm2339_vm1, %v14633_v24, %v2343_v14  ;;  %13035 = vmatprep.mubr.msk.bf16.mxu0 %vm5318_vm8, %v14705_v35  ;;  %v2753_v11 = vsel %vm2750_vm12, %v15048_v15, %v2752_v5 }
 0x29d   :  { %v19258_v26 = vrot.slane %v15155_v19, 4  ;;  %v12922_v0 = vcombine.low %v2344_v54, %v2481_v42  ;;  %v12923_v2 = vcombine.high %v2344_v54, %v2481_v42 }
 0x29e   :  { %1687 = vrot.lane.b32.xlu0 %v14493_v58, %s19433_s20  ;;  %1959 = vrot.lane.b32.xlu1 %v14491_v31, %s19435_s24 }
 0x29f   :  { %5453 = vmatprep.subr.bf16.mxu0 %v12923_v2  ;;  %v2615_v52 = vsel %vm468_vm0, %v2604_v18, %v19258_v26  ;;  %v19260_v18 = vrot.slane %v15099_v8, 4  ;;  %v19259_v2 = vrot.slane %v15133_v27, 4 }
 0x2a0   :  { %v15174_v24 = vpop.permute.xlu0 %1957  ;;  %5454 = vmatpush1.bf16.msra.mxu0 %v12922_v0  ;;  %v2093_v28 = vpop.permute.xlu1 %2092  ;;  %v2616_v49 = vsel %vm2613_vm13, %v15033_v30, %v2615_v52  ;;  %v19265_v0 = vrot.slane %v15112_v37, 4  ;;  %v19442_v30 = vrot.slane %v14671_v29, 4 }
 0x2a1   :  { %v2107_v14 = vrot.slane %v2093_v28, 4  ;;  %v12937_v54 = vcombine.high %v2616_v49, %v2753_v11  ;;  %v12936_v42 = vcombine.low %v2616_v49, %v2753_v11  ;;  %v2345_v11 = vsel %vm468_vm0, %v2332_v16, %v19260_v18 }
 0x2a2   :  { %1137 = vrot.lane.b32.xlu0 %v14491_v31, %s19440_s26  ;;  %1548 = vrot.lane.b32.xlu1 %v14491_v31, %s19441_s25 }
 0x2a3   :  { %5442 = vmatprep.subr.bf16.mxu1 %v12937_v54  ;;  %v2118_v15 = vsel %vm468_vm0, %v19442_v30, %v2107_v14  ;;  %v2120_v54 = vsel %vm468_vm0, %v2107_v14, %v19259_v2  ;;  %v19443_v14 = vrot.slane %v14649_v13, 4 }
 0x2a4   :  { %v15190_v5 = vpop.permute.xlu0 %1407  ;;  %5443 = vmatpush2.bf16.msra.mxu1 %v12936_v42  ;;  %v15192_v52 = vpop.permute.xlu1 %2456  ;;  %v2119_v49 = vsel %vm2114_vm3, %v14671_v29, %v2118_v15  ;;  %v2346_v15 = vsel %vm2339_vm1, %v2318_v9, %v2345_v11  ;;  %v2121_v2 = vsel %vm2114_vm3, %v2093_v28, %v2120_v54 }
 0x2a5   :  { %v19261_v26 = vrot.slane %v15192_v52, 4  ;;  %v12906_v30 = vcombine.low %v2119_v49, %v14466_v39  ;;  %v12907_v29 = vcombine.high %v2119_v49, %v14466_v39  ;;  %v1844_v42 = vsel %vm468_vm0, %v19443_v14, %v19265_v0 }
 0x2a6   :  { %1413 = vrot.lane.b32.xlu0 %v14493_v58, %s19438_s14  ;;  %1824 = vrot.lane.b32.xlu1 %v14493_v58, %s19263_s27  ;;  %s19444_s27 = smov 101   ;;  %v12909_v9 = vcombine.high %v2121_v2, %v14468_v43 }
 0x2a7   :  { %v2482_v16 = vsel %vm468_vm0, %v2469_v57, %v19261_v26  ;;  %5445 = vmatmul.mubr.bf16.vlgmr.msra.gmra.mxu1 %v15131_v32  ;;  %5455 = vmatprep.subr.bf16.mxu0 %v12907_v29  ;;  %v1696_v57 = vrot.slane %v15153_v60, 4 }
 0x2a8   :  { %v15222_v39 = vpop.permute.xlu0 %1683  ;;  %v1956_v49 = vpop.permute.xlu1 %1955  ;;  %v2483_v18 = vsel %vm2476_vm2, %v15073_v6, %v2482_v16  ;;  %13037 = vmatprep.mubr.msk.bf16.mxu1 %vm5318_vm8, %v14705_v35  ;;  %5456 = vmatpush1.bf16.msra.mxu0 %v12906_v30  ;;  %v19445_v6 = vrot.slane %v14724_v45, 4 }
 0x2a9   :  { %v1970_v26 = vrot.slane %v1956_v49, 4  ;;  %v12924_v22 = vcombine.low %v2346_v15, %v2483_v18  ;;  %v12925_v14 = vcombine.high %v2346_v15, %v2483_v18  ;;  %v1845_v18 = vsel %vm1840_vm4, %v14649_v13, %v1844_v42 }
 0x2aa   :  { %863 = vrot.lane.b32.xlu0 %v14491_v31, %s19444_s27  ;;  %1274 = vrot.lane.b32.xlu1 %v14491_v31, %s19420_s6  ;;  %v19266_v13 = vrot.slane %v15174_v24, 4  ;;  %v1422_v42 = vrot.slane %v15190_v5, 4 }
 0x2ab   :  { %5494 = vmatprep.subr.bf16.mxu1 %v12925_v14  ;;  %v1981_v28 = vsel %vm468_vm0, %v19445_v6, %v1970_v26  ;;  %v19446_v14 = vrot.slane %v14767_v38, 4  ;;  %v12908_v6 = vcombine.low %v2121_v2, %v14468_v43 }
 0x2ac   :  { %v15237_v11 = vpop.permute.xlu0 %1133  ;;  %5495 = vmatpush1.bf16.msra.mxu1 %v12924_v22  ;;  %v1545_v54 = vpop.permute.xlu1 %1544  ;;  %v1982_v30 = vsel %vm1977_vm5, %v14724_v45, %v1981_v28  ;;  %v19447_v45 = vrot.slane %v14681_v20, 4 }
 0x2ad   :  { %v1559_v29 = vrot.slane %v1545_v54, 4  ;;  %5496 = vmatprep.subr.bf16.mxu1 %v12909_v9  ;;  %v12890_v16 = vcombine.low %v1845_v18, %v1982_v30  ;;  %v12891_v15 = vcombine.high %v1845_v18, %v1982_v30  ;;  %v1707_v0 = vsel %vm468_vm0, %v19446_v14, %v1696_v57 }
 0x2ae   :  { %1139 = vrot.lane.b32.xlu0 %v14493_v58, %s19440_s26  ;;  %1550 = vrot.lane.b32.xlu1 %v14493_v58, %s19441_s25  ;;  %v1708_v28 = vsel %vm19269_vm7, %v14767_v38, %v1707_v0  ;;  %v1983_v18 = vsel %vm468_vm0, %v1970_v26, %v19266_v13  ;;  %v19267_v0 = vrot.slane %v15222_v39, 4 }
 0x2af   :  { %5457 = vmatprep.subr.bf16.mxu0 %v12891_v15  ;;  %v1570_v22 = vsel %vm468_vm0, %v19447_v45, %v1559_v29  ;;  %v1984_v26 = vsel %vm1977_vm5, %v1956_v49, %v1983_v18  ;;  %v19450_v49 = vrot.slane %v14741_v46, 4 }
 0x2b0   :  { %v15256_v9 = vpop.permute.xlu0 %1409  ;;  %5458 = vmatpush1.bf16.msra.mxu0 %v12890_v16  ;;  %5497 = vmatpush1.bf16.msra.mxu1 %v12908_v6  ;;  %v15258_v43 = vpop.permute.xlu1 %1820  ;;  %v1571_v2 = vsel %vm19270_vm6, %v14681_v20, %v1570_v22  ;;  %v19448_v20 = vrot.slane %v15112_v37, 4 }
 0x2b1   :  { %v19268_v30 = vrot.slane %v15258_v43, 4  ;;  %v12874_v15 = vcombine.low %v1571_v2, %v1708_v28  ;;  %v12875_v14 = vcombine.high %v1571_v2, %v1708_v28 }
 0x2b2   :  { %589 = vrot.lane.b32.xlu0 %v14491_v31, %s19421_s16  ;;  %1000 = vrot.lane.b32.xlu1 %v14491_v31, %s19422_s22 }
 0x2b3   :  { %5459 = vmatprep.subr.bf16.mxu0 %v12875_v14  ;;  %v1846_v38 = vsel %vm468_vm0, %v19448_v20, %v19268_v30  ;;  %v19449_v14 = vrot.slane %v14812_v61, 4 }
 0x2b4   :  { %v15279_v16 = vpop.permute.xlu0 %859  ;;  %5460 = vmatpush1.bf16.msra.mxu0 %v12874_v15  ;;  %v1271_v6 = vpop.permute.xlu1 %1270  ;;  %v1847_v45 = vsel %vm1840_vm4, %v15112_v37, %v1846_v38 }
 0x2b5   :  { %v1285_v22 = vrot.slane %v1271_v6, 4  ;;  %v12892_v2 = vcombine.low %v1847_v45, %v1984_v26  ;;  %v12893_v28 = vcombine.high %v1847_v45, %v1984_v26  ;;  %v1433_v20 = vsel %vm468_vm0, %v19449_v14, %v1422_v42 }
 0x2b6   :  { %865 = vrot.lane.b32.xlu0 %v14493_v58, %s19444_s27  ;;  %1276 = vrot.lane.b32.xlu1 %v14493_v58, %s19420_s6  ;;  %v1434_v26 = vsel %vm19315_vm10, %v14812_v61, %v1433_v20  ;;  %v1709_v45 = vsel %vm468_vm0, %v1696_v57, %v19267_v0  ;;  %v19271_v61 = vrot.slane %v15256_v9, 4 }
 0x2b7   :  { %5498 = vmatprep.subr.bf16.mxu1 %v12893_v28  ;;  %v1296_v37 = vsel %vm468_vm0, %v19450_v49, %v1285_v22  ;;  %v1148_v28 = vrot.slane %v15237_v11, 4 }
 0x2b8   :  { %v15295_v18 = vpop.permute.xlu0 %1135  ;;  %5499 = vmatpush1.bf16.msra.mxu1 %v12892_v2  ;;  %v15297_v15 = vpop.permute.xlu1 %1546  ;;  %v1297_v38 = vsel %vm19316_vm9, %v14741_v46, %v1296_v37  ;;  %v1710_v37 = vsel %vm19269_vm7, %v15153_v60, %v1709_v45  ;;  %vm19454_vm7 = vcmask 818176  }
 0x2b9   :  { %v1560_v14 = vrot.slane %v15297_v15, 4  ;;  %v12858_v49 = vcombine.low %v1297_v38, %v1434_v26  ;;  %v12859_v13 = vcombine.high %v1297_v38, %v1434_v26 }
 0x2ba   :  { %591 = vrot.lane.b32.xlu0 %v14493_v58, %s19421_s16  ;;  %726 = vrot.lane.b32.xlu1 %v14491_v31, %s19423_s21 }
 0x2bb   :  { %5461 = vmatprep.subr.bf16.mxu0 %v12859_v13  ;;  %v1572_v46 = vsel %vm468_vm0, %v1559_v29, %v1560_v14  ;;  %v19451_v13 = vrot.slane %v14857_v53, 4  ;;  %v19453_v29 = vrot.slane %v14788_v40, 4 }
 0x2bc   :  { %v15316_v57 = vpop.permute.xlu0 %585  ;;  %5462 = vmatpush1.bf16.msra.mxu0 %v12858_v49  ;;  %v997_v2 = vpop.permute.xlu1 %996  ;;  %v1573_v20 = vsel %vm19270_vm6, %v1545_v54, %v1572_v46  ;;  %vm19455_vm6 = vcmask 809984  }
 0x2bd   :  { %v1011_v38 = vrot.slane %v997_v2, 4  ;;  %v12876_v26 = vcombine.low %v1573_v20, %v1710_v37  ;;  %v12877_v0 = vcombine.high %v1573_v20, %v1710_v37  ;;  %v1159_v30 = vsel %vm468_vm0, %v19451_v13, %v1148_v28 }
 0x2be   :  { %3691 = vrot.lane.b32.xlu0 %v14472_v51, %s19452_s5  ;;  %1002 = vrot.lane.b32.xlu1 %v14493_v58, %s19422_s22  ;;  %v1160_v46 = vsel %vm19455_vm6, %v14857_v53, %v1159_v30  ;;  %v874_v20 = vrot.slane %v15279_v16, 4  ;;  %v19272_v53 = vrot.slane %v15295_v18, 4  ;;  %vm19458_vm6 = vcmask 891904  }
 0x2bf   :  { %5500 = vmatprep.subr.bf16.mxu1 %v12877_v0  ;;  %v1022_v54 = vsel %vm468_vm0, %v19453_v29, %v1011_v38  ;;  %v1435_v0 = vsel %vm468_vm0, %v1422_v42, %v19271_v61 }
 0x2c0   :  { %v15331_v49 = vpop.permute.xlu0 %861  ;;  %5501 = vmatpush1.bf16.msra.mxu1 %v12876_v26  ;;  %v15333_v60 = vpop.permute.xlu1 %1272  ;;  %v1023_v45 = vsel %vm19454_vm7, %v14788_v40, %v1022_v54  ;;  %v1436_v54 = vsel %vm19315_vm10, %v15190_v5, %v1435_v0  ;;  %vm19459_vm7 = vcmask 826368  }
 0x2c1   :  { %v1286_v37 = vrot.slane %v15333_v60, 4  ;;  %v12842_v13 = vcombine.low %v1023_v45, %v1160_v46  ;;  %v12843_v26 = vcombine.high %v1023_v45, %v1160_v46 }
 0x2c2   :  { %3967 = vrot.lane.b32.xlu0 %v14474_v55, %s19424_s29  ;;  %451 = vrot.lane.b32.xlu1 %v14491_v31, %s19425_s19  ;;  %v19456_v31 = vrot.slane %v14896_v56, 4 }
 0x2c3   :  { %5463 = vmatprep.subr.bf16.mxu0 %v12843_v26  ;;  %v1298_v40 = vsel %vm468_vm0, %v1285_v22, %v1286_v37  ;;  %v19457_v22 = vrot.slane %v14831_v21, 4 }
 0x2c4   :  { %v15354_v42 = vpop.permute.xlu0 %587  ;;  %5464 = vmatpush1.bf16.msra.mxu0 %v12842_v13  ;;  %v723_v30 = vpop.permute.xlu1 %722  ;;  %v1299_v29 = vsel %vm19316_vm9, %v1271_v6, %v1298_v40  ;;  %v885_v26 = vsel %vm468_vm0, %v19456_v31, %v874_v20 }
 0x2c5   :  { %v737_v45 = vrot.slane %v723_v30, 4  ;;  %v12860_v46 = vcombine.low %v1299_v29, %v1436_v54  ;;  %v12861_v61 = vcombine.high %v1299_v29, %v1436_v54  ;;  %v886_v40 = vsel %vm19459_vm7, %v14896_v56, %v885_v26 }
 0x2c6   :  { %3554 = vrot.lane.b32.xlu0 %v14472_v51, %s19426_s17  ;;  %728 = vrot.lane.b32.xlu1 %v14493_v58, %s19423_s21  ;;  %v1161_v29 = vsel %vm468_vm0, %v1148_v28, %v19272_v53  ;;  %v19277_v56 = vrot.slane %v15331_v49, 4  ;;  %vm19461_vm7 = vcmask 809984  }
 0x2c7   :  { %5502 = vmatprep.subr.bf16.mxu1 %v12861_v61  ;;  %v748_v6 = vsel %vm468_vm0, %v19457_v22, %v737_v45  ;;  %v600_v61 = vrot.slane %v15316_v57, 4 }
 0x2c8   :  { %v15369_v13 = vpop.permute.xlu0 %3687  ;;  %5503 = vmatpush1.bf16.msra.mxu1 %v12860_v46  ;;  %v15371_v5 = vpop.permute.xlu1 %998  ;;  %v749_v0 = vsel %vm19458_vm6, %v14831_v21, %v748_v6  ;;  %vm19460_vm6 = vcmask 818176   ;;  %v1162_v6 = vsel %vm19461_vm7, %v15237_v11, %v1161_v29  ;;  %vm19466_vm7 = vcmask 900096  }
 0x2c9   :  { %v19281_v54 = vrot.slane %v15371_v5, 4  ;;  %v12826_v31 = vcombine.low %v749_v0, %v886_v40  ;;  %v12827_v22 = vcombine.high %v749_v0, %v886_v40 }
 0x2ca   :  { %3830 = vrot.lane.b32.xlu0 %v14474_v55, %s19427_s13  ;;  %453 = vrot.lane.b32.xlu1 %v14493_v58, %s19425_s19  ;;  %v19462_v58 = vrot.slane %v14918_v62, 4 }
 0x2cb   :  { %5465 = vmatprep.subr.bf16.mxu0 %v12827_v22  ;;  %v1024_v21 = vsel %vm468_vm0, %v1011_v38, %v19281_v54  ;;  %v19464_v38 = vrot.slane %v14842_v33, 4  ;;  %v19322_v54 = vmov 0.0|0.0  }
 0x2cc   :  { %v15390_v28 = vpop.permute.xlu0 %3963  ;;  %5466 = vmatpush1.bf16.msra.mxu0 %v12826_v31  ;;  %v448_v46 = vpop.permute.xlu1 %447  ;;  %v1025_v26 = vsel %vm19460_vm6, %v997_v2, %v1024_v21  ;;  %v611_v22 = vsel %vm468_vm0, %v19462_v58, %v600_v61  ;;  %vm19465_vm6 = vcmask 908288  }
 0x2cd   :  { %v462_v0 = vrot.slane %v448_v46, 4  ;;  %v12844_v40 = vcombine.low %v1025_v26, %v1162_v6  ;;  %v12845_v53 = vcombine.high %v1025_v26, %v1162_v6  ;;  %v612_v21 = vsel %vm19466_vm7, %v14918_v62, %v611_v22 }
 0x2ce   :  { %3280 = vrot.lane.b32.xlu0 %v14472_v51, %s19463_s12  ;;  %3965 = vrot.lane.b32.xlu1 %v14472_v51, %s19424_s29  ;;  %v887_v26 = vsel %vm468_vm0, %v874_v20, %v19277_v56  ;;  %vm19468_vm7 = vcmask 826368  }
 0x2cf   :  { %5504 = vmatprep.subr.bf16.mxu1 %v12845_v53  ;;  %v474_v2 = vsel %vm468_vm0, %v19464_v38, %v462_v0  ;;  %v19274_v53 = vrot.slane %v15354_v42, 4  ;;  %v888_v22 = vsel %vm19468_vm7, %v15279_v16, %v887_v26  ;;  %v3702_v16 = vrot.slane %v15369_v13, 4 }
 0x2d0   :  { %v15405_v31 = vpop.permute.xlu0 %3550  ;;  %5505 = vmatpush1.bf16.msra.mxu1 %v12844_v40  ;;  %v15407_v11 = vpop.permute.xlu1 %724  ;;  %v475_v29 = vsel %vm19465_vm6, %v14842_v33, %v474_v2  ;;  %vm19467_vm6 = vcmask 891904   ;;  %vm19470_vm7 = vcmask 900096  }
 0x2d1   :  { %v19276_v6 = vrot.slane %v15407_v11, 4  ;;  %v12810_v58 = vcombine.low %v475_v29, %v612_v21  ;;  %v12811_v38 = vcombine.high %v475_v29, %v612_v21 }
 0x2d2   :  { %3556 = vrot.lane.b32.xlu0 %v14474_v55, %s19426_s17  ;;  %3828 = vrot.lane.b32.xlu1 %v14472_v51, %s19427_s13 }
 0x2d3   :  { %5467 = vmatprep.subr.bf16.mxu0 %v12811_v38  ;;  %v750_v33 = vsel %vm468_vm0, %v737_v45, %v19276_v6  ;;  %v613_v38 = vsel %vm468_vm0, %v600_v61, %v19274_v53 }
 0x2d4   :  { %v15425_v62 = vpop.permute.xlu0 %3826  ;;  %5468 = vmatpush1.bf16.msra.mxu0 %v12810_v58  ;;  %v15427_v20 = vpop.permute.xlu1 %449  ;;  %v751_v40 = vsel %vm19467_vm6, %v723_v30, %v750_v33  ;;  %vm19469_vm6 = vcmask 908288   ;;  %v614_v61 = vsel %vm19470_vm7, %v15316_v57, %v613_v38  ;;  %v19275_v33 = vrot.slane %v15390_v28, 4 }
 0x2d5   :  { %v19273_v2 = vrot.slane %v15427_v20, 4  ;;  %v12828_v29 = vcombine.low %v751_v40, %v888_v22  ;;  %v12829_v21 = vcombine.high %v751_v40, %v888_v22 }
 0x2d6   :  { %3006 = vrot.lane.b32.xlu0 %v14472_v51, %s19428_s30  ;;  %3417 = vrot.lane.b32.xlu1 %v14472_v51, %s19429_s28 }
 0x2d7   :  { %5506 = vmatprep.subr.bf16.mxu1 %v12829_v21  ;;  %v476_v30 = vsel %vm468_vm0, %v462_v0, %v19273_v2  ;;  %v19471_v0 = vrot.slane %v14894_v50, 4  ;;  %v3565_v2 = vrot.slane %v15405_v31, 4 }
 0x2d8   :  { %v15444_v45 = vpop.permute.xlu0 %3276  ;;  %5507 = vmatpush1.bf16.msra.mxu1 %v12828_v29  ;;  %v3962_v26 = vpop.permute.xlu1 %3961  ;;  %v477_v58 = vsel %vm19469_vm6, %v448_v46, %v476_v30  ;;  %vm19472_vm6 = vcmask 138240  }
 0x2d9   :  { %v3976_v40 = vrot.slane %v3962_v26, 4  ;;  %v12812_v22 = vcombine.low %v477_v58, %v614_v61  ;;  %v12813_v21 = vcombine.high %v477_v58, %v614_v61  ;;  %vm19473_vm7 = vmmov %vm19472_vm6  ;;  %v19474_v61 = vrot.slane %v14998_v63, 4 }
 0x2da   :  { %3282 = vrot.lane.b32.xlu0 %v14474_v55, %s19463_s12  ;;  %3693 = vrot.lane.b32.xlu1 %v14474_v55, %s19452_s5 }
 0x2db   :  { %v3987_v29 = vsel %vm468_vm0, %v19471_v0, %v3976_v40  ;;  %v3989_v46 = vsel %vm468_vm0, %v3976_v40, %v19275_v33  ;;  %5508 = vmatprep.subr.bf16.mxu1 %v12813_v21  ;;  %v3713_v0 = vsel %vm468_vm0, %v19474_v61, %v3702_v16 }
 0x2dc   :  { %v3990_v57 = vsel %vm19472_vm6, %v3962_v26, %v3989_v46  ;;  %v15461_v38 = vpop.permute.xlu0 %3552  ;;  %5509 = vmatpush1.bf16.msra.mxu1 %v12812_v22  ;;  %v3825_v30 = vpop.permute.xlu1 %3824  ;;  %v3988_v58 = vsel %vm19473_vm7, %v14894_v50, %v3987_v29  ;;  %v19476_v29 = vrot.slane %v14948_v1, 4  ;;  %vm19477_vm6 = vcmask 154624  }
 0x2dd   :  { %v13020_v53 = vcombine.low %v3990_v57, %v3990_v57  ;;  %v13021_v40 = vcombine.high %v3990_v57, %v3990_v57  ;;  %v3839_v21 = vrot.slane %v3825_v30, 4  ;;  %v13019_v26 = vcombine.high %v3988_v58, %v3988_v58 }
 0x2de   :  { %2732 = vrot.lane.b32.xlu0 %v14472_v51, %s19475_s11  ;;  %3143 = vrot.lane.b32.xlu1 %v14472_v51, %s19430_s23  ;;  %v13018_v22 = vcombine.low %v3988_v58, %v3988_v58  ;;  %v3714_v6 = vsel %vm19477_vm6, %v14998_v63, %v3713_v0  ;;  %vm19478_vm7 = vcmask 146432   ;;  %v19279_v63 = vrot.slane %v15425_v62, 4 }
 0x2df   :  { %13036 = vmatprep.subr.msk.bf16.mxu1 %vm468_vm0, %v13021_v40  ;;  %v5342_v50 = vsel %vm468_vm0, %v13020_v53, 0  ;;  %v3850_v46 = vsel %vm468_vm0, %v19476_v29, %v3839_v21  ;;  %13034 = vmatprep.subr.msk.bf16.mxu0 %vm468_vm0, %v13019_v26  ;;  %v19479_v26 = vrot.slane %v14984_v10, 4  ;;  %vm19481_vm6 = vcmask 228352  }
 0x2e0   :  { %v15481_v57 = vpop.permute.xlu0 %3002  ;;  %v5336_v61 = vsel %vm468_vm0, %v13018_v22, 0  ;;  %5515 = vmatpush2.bf16.msra.mxu1 %v5342_v50  ;;  %v3414_v33 = vpop.permute.xlu1 %3413  ;;  %v3851_v58 = vsel %vm19478_vm7, %v14948_v1, %v3850_v46  ;;  %v19480_v1 = vrot.slane %v15035_v7, 4  ;;  %vm19482_vm7 = vcmask 220160  }
 0x2e1   :  { %5474 = vmatpush2.bf16.msra.mxu0 %v5336_v61  ;;  %v3428_v53 = vrot.slane %v3414_v33, 4  ;;  %v13002_v40 = vcombine.low %v3714_v6, %v3851_v58  ;;  %v13003_v56 = vcombine.high %v3714_v6, %v3851_v58  ;;  %v3576_v29 = vsel %vm468_vm0, %v19479_v26, %v3565_v2 }
 0x2e2   :  { %3008 = vrot.lane.b32.xlu0 %v14474_v55, %s19428_s30  ;;  %3419 = vrot.lane.b32.xlu1 %v14474_v55, %s19429_s28  ;;  %v3291_v6 = vrot.slane %v15444_v45, 4  ;;  %v3577_v61 = vsel %vm19482_vm7, %v14984_v10, %v3576_v29  ;;  %vm19486_vm7 = vcmask 154624  }
 0x2e3   :  { %5475 = vmatprep.subr.bf16.mxu0 %v13003_v56  ;;  %v3439_v0 = vsel %vm468_vm0, %v19480_v1, %v3428_v53  ;;  %v3852_v56 = vsel %vm468_vm0, %v3839_v21, %v19279_v63 }
 0x2e4   :  { %v15502_v22 = vpop.permute.xlu0 %3278  ;;  %v15504_v50 = vpop.permute.xlu1 %3689  ;;  %v3440_v46 = vsel %vm19481_vm6, %v15035_v7, %v3439_v0  ;;  %vm19485_vm6 = vcmask 146432   ;;  %v19487_v0 = vrot.slane %v15021_v34, 4 }
 0x2e5   :  { %5476 = vmatpush2.bf16.msra.mxu0 %v13002_v40  ;;  %v19280_v58 = vrot.slane %v15504_v50, 4  ;;  %v12986_v26 = vcombine.low %v3440_v46, %v3577_v61  ;;  %v12987_v1 = vcombine.high %v3440_v46, %v3577_v61  ;;  %v3853_v7 = vsel %vm19485_vm6, %v3825_v30, %v3852_v56 }
 0x2e6   :  { %2462 = vrot.lane.b32.xlu0 %v14477_v59, %s19483_s2  ;;  %2869 = vrot.lane.b32.xlu1 %v14472_v51, %s19484_s4  ;;  %v3302_v46 = vsel %vm468_vm0, %v19487_v0, %v3291_v6  ;;  %v19284_v61 = vrot.slane %v15461_v38, 4  ;;  %v3017_v56 = vrot.slane %v15481_v57, 4  ;;  %vm19489_vm6 = vcmask 236544  }
 0x2e7   :  { %5477 = vmatprep.subr.bf16.mxu0 %v12987_v1  ;;  %v3715_v10 = vsel %vm468_vm0, %v3702_v16, %v19280_v58 }
 0x2e8   :  { %v15524_v21 = vpop.permute.xlu0 %2728  ;;  %v3140_v40 = vpop.permute.xlu1 %3139  ;;  %v3716_v29 = vsel %vm19486_vm7, %v15369_v13, %v3715_v10  ;;  %v19488_v13 = vrot.slane %v15075_v12, 4  ;;  %vm19492_vm7 = vcmask 228352  }
 0x2e9   :  { %5478 = vmatpush2.bf16.msra.mxu0 %v12986_v26  ;;  %v3154_v1 = vrot.slane %v3140_v40, 4  ;;  %v13004_v63 = vcombine.low %v3716_v29, %v3853_v7  ;;  %v13005_v16 = vcombine.high %v3716_v29, %v3853_v7  ;;  %v3303_v29 = vsel %vm19489_vm6, %v15021_v34, %v3302_v46 }
 0x2ea   :  { %2734 = vrot.lane.b32.xlu0 %v14474_v55, %s19475_s11  ;;  %3145 = vrot.lane.b32.xlu1 %v14474_v55, %s19430_s23  ;;  %vm19493_vm6 = vcmask 220160  }
 0x2eb   :  { %5516 = vmatprep.subr.bf16.mxu1 %v13005_v16  ;;  %v3165_v30 = vsel %vm468_vm0, %v19488_v13, %v3154_v1  ;;  %v3578_v13 = vsel %vm468_vm0, %v3565_v2, %v19284_v61 }
 0x2ec   :  { %v15542_v10 = vpop.permute.xlu0 %3004  ;;  %5517 = vmatpush2.bf16.msra.mxu1 %v13004_v63  ;;  %v15544_v26 = vpop.permute.xlu1 %3415  ;;  %v3166_v7 = vsel %vm3161_vm14, %v15075_v12, %v3165_v30  ;;  %v3579_v2 = vsel %vm19493_vm6, %v15405_v31, %v3578_v13  ;;  %v19494_v30 = vrot.slane %v15059_v48, 4  ;;  %v19496_v31 = vrot.slane %v15114_v23, 4 }
 0x2ed   :  { %v19287_v0 = vrot.slane %v15544_v26, 4  ;;  %v12970_v16 = vcombine.low %v3166_v7, %v3303_v29  ;;  %v12971_v58 = vcombine.high %v3166_v7, %v3303_v29  ;;  %vm19506_vm6 = vcmask 728064  }
 0x2ee   :  { %2327 = vrot.lane.b32.xlu0 %v19322_v54, %s19490_s3  ;;  %2595 = vrot.lane.b32.xlu1 %v14472_v51, %s19491_s1  ;;  %v3028_v7 = vsel %vm468_vm0, %v19494_v30, %v3017_v56 }
 0x2ef   :  { %5479 = vmatprep.subr.bf16.mxu0 %v12971_v58  ;;  %v3441_v34 = vsel %vm468_vm0, %v3428_v53, %v19287_v0  ;;  %v19288_v58 = vrot.slane %v15502_v22, 4  ;;  %v3029_v30 = vsel %vm3024_vm15, %v15059_v48, %v3028_v7 }
 0x2f0   :  { %v15563_v12 = vpop.permute.xlu0 %2458  ;;  %5480 = vmatpush2.bf16.msra.mxu0 %v12970_v16  ;;  %v2866_v63 = vpop.permute.xlu1 %2865  ;;  %v3442_v46 = vsel %vm19492_vm7, %v3414_v33, %v3441_v34  ;;  %v2743_v16 = vrot.slane %v15524_v21, 4  ;;  %vm19497_vm7 = vcmask 236544  }
 0x2f1   :  { %v2880_v29 = vrot.slane %v2866_v63, 4  ;;  %v12988_v61 = vcombine.low %v3442_v46, %v3579_v2  ;;  %v12989_v53 = vcombine.high %v3442_v46, %v3579_v2  ;;  %v15588_v46 = vpack.c.bf16 %v14460_v25, %v14460_v25 }
 0x2f2   :  { %1826 = vrot.lane.b32.xlu0 %v14495_v36, %s19495_s0  ;;  %2871 = vrot.lane.b32.xlu1 %v14474_v55, %s19484_s4 }
 0x2f3   :  { %5518 = vmatprep.subr.bf16.mxu1 %v12989_v53  ;;  %v2891_v33 = vsel %vm468_vm0, %v19496_v31, %v2880_v29 }
 0x2f4   :  { %v15582_v13 = vpop.permute.xlu0 %2730  ;;  %5519 = vmatpush2.bf16.msra.mxu1 %v12988_v61  ;;  %v15584_v34 = vpop.permute.xlu1 %3141  ;;  %v2892_v2 = vsel %vm2887_vm11, %v15114_v23, %v2891_v33  ;;  %v3304_v61 = vsel %vm468_vm0, %v3291_v6, %v19288_v58  ;;  %v19498_v33 = vrot.slane %v15088_v44, 4 }
 0x2f5   :  { %v19289_v53 = vrot.slane %v15584_v34, 4  ;;  %v12954_v31 = vcombine.low %v2892_v2, %v3029_v30  ;;  %v12955_v0 = vcombine.high %v2892_v2, %v3029_v30  ;;  %v3305_v6 = vsel %vm19497_vm7, %v15444_v45, %v3304_v61 }
 0x2f6   :  { %2102 = vrot.lane.b32.xlu0 %v15588_v46, %s19432_s18  ;;  %2325 = vrot.lane.b32.xlu1 %v14477_v59, %s19490_s3  ;;  %v2754_v2 = vsel %vm468_vm0, %v19498_v33, %v2743_v16  ;;  %v19499_v45 = vrot.slane %v15155_v19, 4  ;;  %vm19507_vm7 = vcmask 89088  }
 0x2f7   :  { %5481 = vmatprep.subr.bf16.mxu0 %v12955_v0  ;;  %v3167_v25 = vsel %vm468_vm0, %v3154_v1, %v19289_v53  ;;  %v19290_v0 = vrot.slane %v15542_v10, 4 }
 0x2f8   :  { %v15607_v48 = vpop.permute.xlu0 %2323  ;;  %5482 = vmatpush2.bf16.msra.mxu0 %v12954_v31  ;;  %v2592_v23 = vpop.permute.xlu1 %2591  ;;  %v3168_v7 = vsel %vm3161_vm14, %v3140_v40, %v3167_v25  ;;  %v2471_v31 = vrot.slane %v15563_v12, 4 }
 0x2f9   :  { %v2606_v30 = vrot.slane %v2592_v23, 4  ;;  %v12972_v58 = vcombine.low %v3168_v7, %v3305_v6  ;;  %v12973_v1 = vcombine.high %v3168_v7, %v3305_v6  ;;  %v2755_v6 = vsel %vm2750_vm12, %v15088_v44, %v2754_v2 }
 0x2fa   :  { %1689 = vrot.lane.b32.xlu0 %v14495_v36, %s19433_s20  ;;  %2597 = vrot.lane.b32.xlu1 %v14474_v55, %s19491_s1 }
 0x2fb   :  { %5520 = vmatprep.subr.bf16.mxu1 %v12973_v1  ;;  %v2617_v40 = vsel %vm468_vm0, %v19499_v45, %v2606_v30  ;;  %v3030_v45 = vsel %vm468_vm0, %v3017_v56, %v19290_v0 }
 0x2fc   :  { %v15626_v61 = vpop.permute.xlu0 %1822  ;;  %5521 = vmatpush2.bf16.msra.mxu1 %v12972_v58  ;;  %v15628_v25 = vpop.permute.xlu1 %2867  ;;  %v2618_v7 = vsel %vm2613_vm13, %v15155_v19, %v2617_v40  ;;  %v3031_v56 = vsel %vm3024_vm15, %v15481_v57, %v3030_v45  ;;  %v19500_v40 = vrot.slane %v15192_v52, 4  ;;  %v19501_v57 = vrot.slane %v15099_v8, 4 }
 0x2fd   :  { %v19296_v33 = vrot.slane %v15628_v25, 4  ;;  %v12938_v1 = vcombine.low %v2618_v7, %v2755_v6  ;;  %v12939_v53 = vcombine.high %v2618_v7, %v2755_v6 }
 0x2fe   :  { %1965 = vrot.lane.b32.xlu0 %v15588_v46, %s19435_s24  ;;  %2100 = vrot.lane.b32.xlu1 %v14495_v36, %s19432_s18  ;;  %v2484_v7 = vsel %vm468_vm0, %v19500_v40, %v2471_v31 }
 0x2ff   :  { %5483 = vmatprep.subr.bf16.mxu0 %v12939_v53  ;;  %v2893_v44 = vsel %vm468_vm0, %v2880_v29, %v19296_v33  ;;  %v19295_v53 = vrot.slane %v15582_v13, 4 }
 0x300   :  { %v15647_v19 = vpop.permute.xlu0 %2098  ;;  %5484 = vmatpush2.bf16.msra.mxu0 %v12938_v1  ;;  %v2322_v58 = vpop.permute.xlu1 %2321  ;;  %v2894_v2 = vsel %vm2887_vm11, %v2866_v63, %v2893_v44 }
 0x301   :  { %v2334_v6 = vrot.slane %v2322_v58, 4  ;;  %v12956_v0 = vcombine.low %v2894_v2, %v3031_v56  ;;  %v12957_v29 = vcombine.high %v2894_v2, %v3031_v56  ;;  %v2485_v2 = vsel %vm2476_vm2, %v15192_v52, %v2484_v7 }
 0x302   :  { %1415 = vrot.lane.b32.xlu0 %v14495_v36, %s19438_s14  ;;  %2464 = vrot.lane.b32.xlu1 %v19322_v54, %s19483_s2 }
 0x303   :  { %5522 = vmatprep.subr.bf16.mxu1 %v12957_v29  ;;  %v2347_v63 = vsel %vm468_vm0, %v19501_v57, %v2334_v6  ;;  %5486 = vmatmul.mubr.bf16.vlgmr.msra.gmra.mxu0 %v15131_v32 }
 0x304   :  { %v15666_v1 = vpop.permute.xlu0 %1685  ;;  %5523 = vmatpush2.bf16.msra.mxu1 %v12956_v0  ;;  %v15668_v45 = vpop.permute.xlu1 %2593  ;;  %v2348_v44 = vsel %vm2339_vm1, %v15099_v8, %v2347_v63  ;;  %13039 = vmatprep.mubr.msk.bf16.mxu0 %vm5318_vm8, %v14705_v35  ;;  %v2756_v0 = vsel %vm468_vm0, %v2743_v16, %v19295_v53 }
 0x305   :  { %v19291_v56 = vrot.slane %v15668_v45, 4  ;;  %v12926_v40 = vcombine.low %v2348_v44, %v2485_v2  ;;  %v12927_v29 = vcombine.high %v2348_v44, %v2485_v2  ;;  %v2757_v16 = vsel %vm2750_vm12, %v15524_v21, %v2756_v0 }
 0x306   :  { %1691 = vrot.lane.b32.xlu0 %v15588_v46, %s19433_s20  ;;  %1963 = vrot.lane.b32.xlu1 %v14495_v36, %s19435_s24 }
 0x307   :  { %5535 = vmatprep.subr.bf16.mxu0 %v12927_v29  ;;  %v2619_v8 = vsel %vm468_vm0, %v2606_v30, %v19291_v56  ;;  %v19293_v30 = vrot.slane %v15607_v48, 4  ;;  %v1835_v29 = vrot.slane %v15626_v61, 4 }
 0x308   :  { %v15689_v52 = vpop.permute.xlu0 %1961  ;;  %5536 = vmatpush1.bf16.msra.mxu0 %v12926_v40  ;;  %v2097_v7 = vpop.permute.xlu1 %2096  ;;  %v2620_v57 = vsel %vm2613_vm13, %v2592_v23, %v2619_v8  ;;  %v19292_v40 = vrot.slane %v15647_v19, 4  ;;  %v19502_v23 = vrot.slane %v15133_v27, 4 }
 0x309   :  { %v2109_v63 = vrot.slane %v2097_v7, 4  ;;  %v12940_v44 = vcombine.low %v2620_v57, %v2757_v16  ;;  %v12941_v2 = vcombine.high %v2620_v57, %v2757_v16  ;;  %v2349_v16 = vsel %vm468_vm0, %v2334_v6, %v19293_v30 }
 0x30a   :  { %1141 = vrot.lane.b32.xlu0 %v14495_v36, %s19440_s26  ;;  %1552 = vrot.lane.b32.xlu1 %v14495_v36, %s19441_s25 }
 0x30b   :  { %5524 = vmatprep.subr.bf16.mxu1 %v12941_v2  ;;  %v2122_v21 = vsel %vm468_vm0, %v19502_v23, %v2109_v63  ;;  %v2124_v2 = vsel %vm468_vm0, %v2109_v63, %v19292_v40  ;;  %v19503_v63 = vrot.slane %v15258_v43, 4 }
 0x30c   :  { %v15704_v0 = vpop.permute.xlu0 %1411  ;;  %5525 = vmatpush2.bf16.msra.mxu1 %v12940_v44  ;;  %v15706_v8 = vpop.permute.xlu1 %2460  ;;  %v2123_v57 = vsel %vm2114_vm3, %v15133_v27, %v2122_v21  ;;  %v2350_v21 = vsel %vm2339_vm1, %v2322_v58, %v2349_v16  ;;  %v2125_v40 = vsel %vm2114_vm3, %v2097_v7, %v2124_v2 }
 0x30d   :  { %v19294_v56 = vrot.slane %v15706_v8, 4  ;;  %v12910_v23 = vcombine.low %v2123_v57, %v14470_v47  ;;  %v12911_v27 = vcombine.high %v2123_v57, %v14470_v47  ;;  %v1848_v44 = vsel %vm468_vm0, %v19503_v63, %v1835_v29 }
 0x30e   :  { %1417 = vrot.lane.b32.xlu0 %v15588_v46, %s19438_s14  ;;  %1828 = vrot.lane.b32.xlu1 %v15588_v46, %s19495_s0  ;;  %v12913_v58 = vcombine.high %v2125_v40, %v14472_v51 }
 0x30f   :  { %v2486_v6 = vsel %vm468_vm0, %v2471_v31, %v19294_v56  ;;  %5527 = vmatmul.mubr.bf16.vlgmr.msra.gmra.mxu1 %v15131_v32  ;;  %5537 = vmatprep.subr.bf16.mxu0 %v12911_v27  ;;  %v1698_v31 = vrot.slane %v15666_v1, 4 }
 0x310   :  { %v15736_v47 = vpop.permute.xlu0 %1687  ;;  %v1960_v57 = vpop.permute.xlu1 %1959  ;;  %v2487_v30 = vsel %vm2476_vm2, %v15563_v12, %v2486_v6  ;;  %13041 = vmatprep.mubr.msk.bf16.mxu1 %vm5318_vm8, %v14705_v35  ;;  %5538 = vmatpush1.bf16.msra.mxu0 %v12910_v23  ;;  %v19504_v12 = vrot.slane %v15174_v24, 4 }
 0x311   :  { %v1972_v56 = vrot.slane %v1960_v57, 4  ;;  %v12928_v53 = vcombine.low %v2350_v21, %v2487_v30  ;;  %v12929_v63 = vcombine.high %v2350_v21, %v2487_v30  ;;  %v1849_v30 = vsel %vm1840_vm4, %v15258_v43, %v1848_v44 }
 0x312   :  { %867 = vrot.lane.b32.xlu0 %v14495_v36, %s19444_s27  ;;  %1278 = vrot.lane.b32.xlu1 %v14495_v36, %s19420_s6  ;;  %v1973_v43 = vrot.slane %v15689_v52, 4 }
 0x313   :  { %5576 = vmatprep.subr.bf16.mxu1 %v12929_v63  ;;  %v1985_v7 = vsel %vm468_vm0, %v19504_v12, %v1972_v56  ;;  %v19505_v63 = vrot.slane %v15222_v39, 4  ;;  %v12912_v12 = vcombine.low %v2125_v40, %v14472_v51 }
 0x314   :  { %v15751_v16 = vpop.permute.xlu0 %1137  ;;  %5577 = vmatpush1.bf16.msra.mxu1 %v12928_v53  ;;  %v1549_v2 = vpop.permute.xlu1 %1548  ;;  %v1986_v23 = vsel %vm1977_vm5, %v15174_v24, %v1985_v7  ;;  %v1424_v53 = vrot.slane %v15704_v0, 4  ;;  %v1987_v7 = vsel %vm468_vm0, %v1972_v56, %v1973_v43 }
 0x315   :  { %v1561_v27 = vrot.slane %v1549_v2, 4  ;;  %5578 = vmatprep.subr.bf16.mxu1 %v12913_v58  ;;  %v12894_v6 = vcombine.low %v1849_v30, %v1986_v23  ;;  %v12895_v21 = vcombine.high %v1849_v30, %v1986_v23  ;;  %v1711_v33 = vsel %vm468_vm0, %v19505_v63, %v1698_v31 }
 0x316   :  { %1143 = vrot.lane.b32.xlu0 %v15588_v46, %s19440_s26  ;;  %1554 = vrot.lane.b32.xlu1 %v15588_v46, %s19441_s25  ;;  %v1712_v58 = vsel %vm19507_vm7, %v15222_v39, %v1711_v33  ;;  %v1988_v33 = vsel %vm1977_vm5, %v1960_v57, %v1987_v7 }
 0x317   :  { %5539 = vmatprep.subr.bf16.mxu0 %v12895_v21  ;;  %v1574_v24 = vsel %vm468_vm0, %v1560_v14, %v1561_v27 }
 0x318   :  { %v15770_v44 = vpop.permute.xlu0 %1413  ;;  %5540 = vmatpush1.bf16.msra.mxu0 %v12894_v6  ;;  %5579 = vmatpush1.bf16.msra.mxu1 %v12912_v12  ;;  %v15772_v51 = vpop.permute.xlu1 %1824  ;;  %v1575_v40 = vsel %vm19506_vm6, %v15297_v15, %v1574_v24  ;;  %v1699_v15 = vrot.slane %v15736_v47, 4 }
 0x319   :  { %v1836_v14 = vrot.slane %v15772_v51, 4  ;;  %v12878_v30 = vcombine.low %v1575_v40, %v1712_v58  ;;  %v12879_v23 = vcombine.high %v1575_v40, %v1712_v58  ;;  %v19508_v40 = vrot.slane %v15256_v9, 4 }
 0x31a   :  { %593 = vrot.lane.b32.xlu0 %v14495_v36, %s19421_s16  ;;  %1004 = vrot.lane.b32.xlu1 %v14495_v36, %s19422_s22 }
 0x31b   :  { %5541 = vmatprep.subr.bf16.mxu0 %v12879_v23  ;;  %v1850_v39 = vsel %vm468_vm0, %v1835_v29, %v1836_v14  ;;  %v1437_v29 = vsel %vm468_vm0, %v19508_v40, %v1424_v53  ;;  %v1713_v23 = vsel %vm468_vm0, %v1698_v31, %v1699_v15 }
 0x31c   :  { %v15793_v56 = vpop.permute.xlu0 %863  ;;  %5542 = vmatpush1.bf16.msra.mxu0 %v12878_v30  ;;  %v1275_v6 = vpop.permute.xlu1 %1274  ;;  %v1851_v21 = vsel %vm1840_vm4, %v15626_v61, %v1850_v39  ;;  %v1438_v30 = vsel %vm19315_vm10, %v15256_v9, %v1437_v29  ;;  %v1150_v39 = vrot.slane %v15751_v16, 4  ;;  %v1714_v40 = vsel %vm19507_vm7, %v15666_v1, %v1713_v23 }
 0x31d   :  { %v1287_v63 = vrot.slane %v1275_v6, 4  ;;  %v12896_v12 = vcombine.low %v1851_v21, %v1988_v33  ;;  %v12897_v24 = vcombine.high %v1851_v21, %v1988_v33  ;;  %vm19512_vm7 = vcmask 809984  }
 0x31e   :  { %869 = vrot.lane.b32.xlu0 %v15588_v46, %s19444_s27  ;;  %1280 = vrot.lane.b32.xlu1 %v15588_v46, %s19420_s6 }
 0x31f   :  { %5580 = vmatprep.subr.bf16.mxu1 %v12897_v24  ;;  %v1300_v61 = vsel %vm468_vm0, %v1286_v37, %v1287_v63 }
 0x320   :  { %v15809_v57 = vpop.permute.xlu0 %1139  ;;  %5581 = vmatpush1.bf16.msra.mxu1 %v12896_v12  ;;  %v15811_v58 = vpop.permute.xlu1 %1550  ;;  %v1301_v7 = vsel %vm19316_vm9, %v15333_v60, %v1300_v61  ;;  %v19297_v60 = vrot.slane %v15770_v44, 4 }
 0x321   :  { %v1562_v33 = vrot.slane %v15811_v58, 4  ;;  %v12862_v37 = vcombine.low %v1301_v7, %v1438_v30  ;;  %v12863_v21 = vcombine.high %v1301_v7, %v1438_v30  ;;  %v19509_v30 = vrot.slane %v15295_v18, 4 }
 0x322   :  { %595 = vrot.lane.b32.xlu0 %v15588_v46, %s19421_s16  ;;  %730 = vrot.lane.b32.xlu1 %v14495_v36, %s19423_s21  ;;  %s19617_s16 = smov 118  }
 0x323   :  { %5543 = vmatprep.subr.bf16.mxu0 %v12863_v21  ;;  %v1576_v9 = vsel %vm468_vm0, %v1561_v27, %v1562_v33  ;;  %v1163_v21 = vsel %vm468_vm0, %v19509_v30, %v1150_v39  ;;  %v19510_v27 = vrot.slane %v15371_v5, 4 }
 0x324   :  { %v15830_v31 = vpop.permute.xlu0 %589  ;;  %5544 = vmatpush1.bf16.msra.mxu0 %v12862_v37  ;;  %v1001_v12 = vpop.permute.xlu1 %1000  ;;  %v1577_v24 = vsel %vm19506_vm6, %v1549_v2, %v1576_v9  ;;  %vm19511_vm6 = vcmask 818176   ;;  %v1164_v9 = vsel %vm19512_vm7, %v15295_v18, %v1163_v21  ;;  %vm19516_vm7 = vcmask 826368  }
 0x325   :  { %v1013_v29 = vrot.slane %v1001_v12, 4  ;;  %v12880_v61 = vcombine.low %v1577_v24, %v1714_v40  ;;  %v12881_v7 = vcombine.high %v1577_v24, %v1714_v40  ;;  %v1439_v24 = vsel %vm468_vm0, %v1424_v53, %v19297_v60 }
 0x326   :  { %3695 = vrot.lane.b32.xlu0 %v14477_v59, %s19452_s5  ;;  %1006 = vrot.lane.b32.xlu1 %v15588_v46, %s19422_s22  ;;  %v876_v40 = vrot.slane %v15793_v56, 4 }
 0x327   :  { %5582 = vmatprep.subr.bf16.mxu1 %v12881_v7  ;;  %v1026_v2 = vsel %vm468_vm0, %v19510_v27, %v1013_v29 }
 0x328   :  { %v15845_v37 = vpop.permute.xlu0 %865  ;;  %5583 = vmatpush1.bf16.msra.mxu1 %v12880_v61  ;;  %v15847_v1 = vpop.permute.xlu1 %1276  ;;  %v1027_v23 = vsel %vm19511_vm6, %v15371_v5, %v1026_v2  ;;  %v19298_v5 = vrot.slane %v15809_v57, 4  ;;  %v1440_v2 = vsel %vm19315_vm10, %v15704_v0, %v1439_v24  ;;  %vm19515_vm6 = vcmask 891904  }
 0x329   :  { %v1288_v7 = vrot.slane %v15847_v1, 4  ;;  %v12846_v30 = vcombine.low %v1027_v23, %v1164_v9  ;;  %v12847_v61 = vcombine.high %v1027_v23, %v1164_v9 }
 0x32a   :  { %3971 = vrot.lane.b32.xlu0 %v19322_v54, %s19424_s29  ;;  %455 = vrot.lane.b32.xlu1 %v14495_v36, %s19425_s19  ;;  %v19513_v36 = vrot.slane %v15331_v49, 4 }
 0x32b   :  { %5545 = vmatprep.subr.bf16.mxu0 %v12847_v61  ;;  %v1302_v18 = vsel %vm468_vm0, %v1287_v63, %v1288_v7  ;;  %v19514_v63 = vrot.slane %v15407_v11, 4 }
 0x32c   :  { %v15868_v53 = vpop.permute.xlu0 %591  ;;  %5546 = vmatpush1.bf16.msra.mxu0 %v12846_v30  ;;  %v727_v21 = vpop.permute.xlu1 %726  ;;  %v1303_v27 = vsel %vm19316_vm9, %v1275_v6, %v1302_v18  ;;  %v889_v61 = vsel %vm468_vm0, %v19513_v36, %v876_v40 }
 0x32d   :  { %v739_v23 = vrot.slane %v727_v21, 4  ;;  %v12864_v9 = vcombine.low %v1303_v27, %v1440_v2  ;;  %v12865_v60 = vcombine.high %v1303_v27, %v1440_v2  ;;  %v890_v18 = vsel %vm19516_vm7, %v15331_v49, %v889_v61 }
 0x32e   :  { %3558 = vrot.lane.b32.xlu0 %v14477_v59, %s19426_s17  ;;  %732 = vrot.lane.b32.xlu1 %v15588_v46, %s19423_s21  ;;  %v1165_v27 = vsel %vm468_vm0, %v1150_v39, %v19298_v5  ;;  %vm19518_vm7 = vcmask 809984  }
 0x32f   :  { %5584 = vmatprep.subr.bf16.mxu1 %v12865_v60  ;;  %v752_v6 = vsel %vm468_vm0, %v19514_v63, %v739_v23  ;;  %v602_v60 = vrot.slane %v15830_v31, 4 }
 0x330   :  { %v15883_v30 = vpop.permute.xlu0 %3691  ;;  %5585 = vmatpush1.bf16.msra.mxu1 %v12864_v9  ;;  %v15885_v0 = vpop.permute.xlu1 %1002  ;;  %v753_v24 = vsel %vm19515_vm6, %v15407_v11, %v752_v6  ;;  %v19305_v11 = vrot.slane %v15845_v37, 4  ;;  %vm19517_vm6 = vcmask 818176   ;;  %v1166_v6 = vsel %vm19518_vm7, %v15751_v16, %v1165_v27 }
 0x331   :  { %v19306_v2 = vrot.slane %v15885_v0, 4  ;;  %v12830_v36 = vcombine.low %v753_v24, %v890_v18  ;;  %v12831_v63 = vcombine.high %v753_v24, %v890_v18  ;;  %vm19522_vm7 = vcmask 900096  }
 0x332   :  { %3834 = vrot.lane.b32.xlu0 %v19322_v54, %s19427_s13  ;;  %457 = vrot.lane.b32.xlu1 %v15588_v46, %s19425_s19  ;;  %v19519_v46 = vrot.slane %v15354_v42, 4  ;;  %s19613_s19 = smov 110  }
 0x333   :  { %5547 = vmatprep.subr.bf16.mxu0 %v12831_v63  ;;  %v1028_v49 = vsel %vm468_vm0, %v1013_v29, %v19306_v2  ;;  %v19520_v29 = vrot.slane %v15427_v20, 4 }
 0x334   :  { %v15904_v39 = vpop.permute.xlu0 %3967  ;;  %5548 = vmatpush1.bf16.msra.mxu0 %v12830_v36  ;;  %v452_v9 = vpop.permute.xlu1 %451  ;;  %v1029_v61 = vsel %vm19517_vm6, %v1001_v12, %v1028_v49  ;;  %v615_v63 = vsel %vm468_vm0, %v19519_v46, %v602_v60  ;;  %vm19521_vm6 = vcmask 908288  }
 0x335   :  { %v464_v24 = vrot.slane %v452_v9, 4  ;;  %v12848_v18 = vcombine.low %v1029_v61, %v1166_v6  ;;  %v12849_v5 = vcombine.high %v1029_v61, %v1166_v6  ;;  %v616_v49 = vsel %vm19522_vm7, %v15354_v42, %v615_v63 }
 0x336   :  { %3284 = vrot.lane.b32.xlu0 %v14477_v59, %s19463_s12  ;;  %3969 = vrot.lane.b32.xlu1 %v14477_v59, %s19424_s29  ;;  %v891_v61 = vsel %vm468_vm0, %v876_v40, %v19305_v11  ;;  %vm19524_vm7 = vcmask 826368  }
 0x337   :  { %5586 = vmatprep.subr.bf16.mxu1 %v12849_v5  ;;  %v478_v12 = vsel %vm468_vm0, %v19520_v29, %v464_v24  ;;  %v19300_v5 = vrot.slane %v15868_v53, 4  ;;  %v892_v63 = vsel %vm19524_vm7, %v15793_v56, %v891_v61  ;;  %v3704_v56 = vrot.slane %v15883_v30, 4 }
 0x338   :  { %v15919_v36 = vpop.permute.xlu0 %3554  ;;  %5587 = vmatpush1.bf16.msra.mxu1 %v12848_v18  ;;  %v15921_v16 = vpop.permute.xlu1 %728  ;;  %v479_v27 = vsel %vm19521_vm6, %v15427_v20, %v478_v12  ;;  %vm19523_vm6 = vcmask 891904   ;;  %vm19526_vm7 = vcmask 900096  }
 0x339   :  { %v19302_v6 = vrot.slane %v15921_v16, 4  ;;  %v12814_v46 = vcombine.low %v479_v27, %v616_v49  ;;  %v12815_v29 = vcombine.high %v479_v27, %v616_v49 }
 0x33a   :  { %3560 = vrot.lane.b32.xlu0 %v19322_v54, %s19426_s17  ;;  %3832 = vrot.lane.b32.xlu1 %v14477_v59, %s19427_s13 }
 0x33b   :  { %5549 = vmatprep.subr.bf16.mxu0 %v12815_v29  ;;  %v754_v42 = vsel %vm468_vm0, %v739_v23, %v19302_v6  ;;  %v617_v29 = vsel %vm468_vm0, %v602_v60, %v19300_v5 }
 0x33c   :  { %v15939_v20 = vpop.permute.xlu0 %3830  ;;  %5550 = vmatpush1.bf16.msra.mxu0 %v12814_v46  ;;  %v15941_v40 = vpop.permute.xlu1 %453  ;;  %v755_v18 = vsel %vm19523_vm6, %v727_v21, %v754_v42  ;;  %vm19525_vm6 = vcmask 908288   ;;  %v618_v60 = vsel %vm19526_vm7, %v15830_v31, %v617_v29  ;;  %v19301_v42 = vrot.slane %v15904_v39, 4 }
 0x33d   :  { %v19299_v12 = vrot.slane %v15941_v40, 4  ;;  %v12832_v27 = vcombine.low %v755_v18, %v892_v63  ;;  %v12833_v49 = vcombine.high %v755_v18, %v892_v63 }
 0x33e   :  { %3010 = vrot.lane.b32.xlu0 %v14477_v59, %s19428_s30  ;;  %3421 = vrot.lane.b32.xlu1 %v14477_v59, %s19429_s28 }
 0x33f   :  { %5588 = vmatprep.subr.bf16.mxu1 %v12833_v49  ;;  %v480_v21 = vsel %vm468_vm0, %v464_v24, %v19299_v12  ;;  %v19527_v24 = vrot.slane %v15390_v28, 4  ;;  %v3567_v12 = vrot.slane %v15919_v36, 4 }
 0x340   :  { %v15958_v23 = vpop.permute.xlu0 %3280  ;;  %5589 = vmatpush1.bf16.msra.mxu1 %v12832_v27  ;;  %v3966_v61 = vpop.permute.xlu1 %3965  ;;  %v481_v46 = vsel %vm19525_vm6, %v452_v9, %v480_v21  ;;  %vm19528_vm6 = vcmask 138240  }
 0x341   :  { %v3978_v18 = vrot.slane %v3966_v61, 4  ;;  %v12816_v63 = vcombine.low %v481_v46, %v618_v60  ;;  %v12817_v49 = vcombine.high %v481_v46, %v618_v60  ;;  %vm19529_vm7 = vmmov %vm19528_vm6  ;;  %v19530_v60 = vrot.slane %v15504_v50, 4 }
 0x342   :  { %3286 = vrot.lane.b32.xlu0 %v19322_v54, %s19463_s12  ;;  %3697 = vrot.lane.b32.xlu1 %v19322_v54, %s19452_s5 }
 0x343   :  { %v3991_v27 = vsel %vm468_vm0, %v19527_v24, %v3978_v18  ;;  %v3993_v9 = vsel %vm468_vm0, %v3978_v18, %v19301_v42  ;;  %5590 = vmatprep.subr.bf16.mxu1 %v12817_v49  ;;  %v3717_v24 = vsel %vm468_vm0, %v19530_v60, %v3704_v56 }
 0x344   :  { %v3994_v31 = vsel %vm19528_vm6, %v3966_v61, %v3993_v9  ;;  %v15975_v29 = vpop.permute.xlu0 %3556  ;;  %5591 = vmatpush1.bf16.msra.mxu1 %v12816_v63  ;;  %v3829_v21 = vpop.permute.xlu1 %3828  ;;  %v3992_v46 = vsel %vm19529_vm7, %v15390_v28, %v3991_v27  ;;  %v19531_v27 = vrot.slane %v15425_v62, 4  ;;  %vm19532_vm6 = vcmask 154624  }
 0x345   :  { %v13024_v5 = vcombine.low %v3994_v31, %v3994_v31  ;;  %v13025_v18 = vcombine.high %v3994_v31, %v3994_v31  ;;  %v3841_v49 = vrot.slane %v3829_v21, 4  ;;  %v13023_v61 = vcombine.high %v3992_v46, %v3992_v46 }
 0x346   :  { %2599 = vrot.lane.b32.xlu0 %v14477_v59, %s19491_s1  ;;  %3147 = vrot.lane.b32.xlu1 %v14477_v59, %s19430_s23  ;;  %v13022_v63 = vcombine.low %v3992_v46, %v3992_v46  ;;  %v3718_v46 = vsel %vm19532_vm6, %v15504_v50, %v3717_v24  ;;  %vm19533_vm7 = vcmask 146432   ;;  %v19307_v50 = vrot.slane %v15939_v20, 4 }
 0x347   :  { %13040 = vmatprep.subr.msk.bf16.mxu1 %vm468_vm0, %v13025_v18  ;;  %v5354_v28 = vsel %vm468_vm0, %v13024_v5, 0  ;;  %v3854_v9 = vsel %vm468_vm0, %v19531_v27, %v3841_v49  ;;  %13038 = vmatprep.subr.msk.bf16.mxu0 %vm468_vm0, %v13023_v61  ;;  %v19534_v61 = vrot.slane %v15461_v38, 4  ;;  %vm19536_vm6 = vcmask 228352  }
 0x348   :  { %v15995_v31 = vpop.permute.xlu0 %3006  ;;  %v5348_v60 = vsel %vm468_vm0, %v13022_v63, 0  ;;  %5597 = vmatpush2.bf16.msra.mxu1 %v5354_v28  ;;  %v15998_v42 = vpop.permute.xlu1 %3417  ;;  %v3855_v18 = vsel %vm19533_vm7, %v15425_v62, %v3854_v9  ;;  %v19535_v62 = vrot.slane %v15544_v26, 4  ;;  %v5785_v28 = vld [vmem:[%s19147_s8] sm:$0xff]  ;;  %v3293_v9 = vrot.slane %v15958_v23, 4 }
 0x349   :  { %5556 = vmatpush2.bf16.msra.mxu0 %v5348_v60  ;;  %v3430_v5 = vrot.slane %v15998_v42, 4  ;;  %v13006_v6 = vcombine.low %v3718_v46, %v3855_v18  ;;  %v13007_v27 = vcombine.high %v3718_v46, %v3855_v18  ;;  %v3580_v63 = vsel %vm468_vm0, %v19534_v61, %v3567_v12 }
 0x34a   :  { %3423 = vrot.lane.b32.xlu1 %v19322_v54, %s19429_s28  ;;  %2875 = vrot.lane.b32.xlu0 %v19322_v54, %s19484_s4  ;;  %vm19537_vm7 = vcmask 220160   ;;  %v3856_v61 = vsel %vm468_vm0, %v3841_v49, %v19307_v50 }
 0x34b   :  { %5557 = vmatprep.subr.bf16.mxu0 %v13007_v27  ;;  %v3443_v24 = vsel %vm468_vm0, %v19535_v62, %v3430_v5  ;;  %v3581_v27 = vsel %vm19537_vm7, %v15461_v38, %v3580_v63  ;;  %vm19539_vm7 = vcmask 154624  }
 0x34c   :  { %v16022_v60 = vpop.permute.xlu0 %3282  ;;  %v16024_v46 = vpop.permute.xlu1 %3693  ;;  %v3444_v18 = vsel %vm19536_vm6, %v15544_v26, %v3443_v24  ;;  %v6422_v26 = vld [vmem:[%s19148_s9] sm:$0xff]  ;;  %vm19538_vm6 = vcmask 146432   ;;  %s19591_s9 = sld [smem:[#allocation16_spill]] }
 0x34d   :  { %5558 = vmatpush2.bf16.msra.mxu0 %v13006_v6  ;;  %v19308_v62 = vrot.slane %v16024_v46, 4  ;;  %v12990_v11 = vcombine.low %v3444_v18, %v3581_v27  ;;  %v12991_v2 = vcombine.high %v3444_v18, %v3581_v27  ;;  %v3857_v6 = vsel %vm19538_vm6, %v3829_v21, %v3856_v61 }
 0x34e   :  { %2873 = vrot.lane.b32.xlu1 %v14477_v59, %s19484_s4  ;;  %5788 = vperm.xlu0 %14076, %v5785_v28   ;;  %v19541_v21 = vrot.slane %v15584_v34, 4  ;;  %vm19542_vm6 = vcmask 236544  }
 0x34f   :  { %5559 = vmatprep.subr.bf16.mxu0 %v12991_v2  ;;  %v3719_v38 = vsel %vm468_vm0, %v3704_v56, %v19308_v62  ;;  %v19540_v2 = vrot.slane %v15502_v22, 4  ;;  %v3568_v56 = vrot.slane %v15975_v29, 4 }
 0x350   :  { %v16045_v49 = vpop.permute.xlu0 %2732  ;;  %v3144_v63 = vpop.permute.xlu1 %3143  ;;  %v3720_v24 = vsel %vm19539_vm7, %v15883_v30, %v3719_v38  ;;  %v5731_v30 = vld [vmem:[%s19149_s7] sm:$0xff]  ;;  %v3019_v38 = vrot.slane %v15995_v31, 4  ;;  %vm19543_vm7 = vcmask 228352  }
 0x351   :  { %v3306_v28 = vsel %vm468_vm0, %v19540_v2, %v3293_v9  ;;  %5560 = vmatpush2.bf16.msra.mxu0 %v12990_v11  ;;  %v3156_v18 = vrot.slane %v3144_v63, 4  ;;  %v13008_v27 = vcombine.low %v3720_v24, %v3857_v6  ;;  %v13009_v50 = vcombine.high %v3720_v24, %v3857_v6 }
 0x352   :  { %3149 = vrot.lane.b32.xlu1 %v19322_v54, %s19430_s23  ;;  %6425 = vperm.xlu0 %14076, %v6422_v26  }
 0x353   :  { %5598 = vmatprep.subr.bf16.mxu1 %v13009_v50  ;;  %v3169_v61 = vsel %vm468_vm0, %v19541_v21, %v3156_v18  ;;  %v3307_v50 = vsel %vm19542_vm6, %v15502_v22, %v3306_v28  ;;  %v3582_v21 = vsel %vm468_vm0, %v3567_v12, %v3568_v56  ;;  %vm19544_vm6 = vcmask 220160  }
 0x354   :  { %v16064_v2 = vpop.permute.xlu0 %3008  ;;  %5599 = vmatpush2.bf16.msra.mxu1 %v13008_v27  ;;  %v16066_v11 = vpop.permute.xlu1 %3419  ;;  %v3170_v6 = vsel %vm3161_vm14, %v15584_v34, %v3169_v61  ;;  %v3583_v61 = vsel %vm19544_vm6, %v15919_v36, %v3582_v21  ;;  %v19545_v12 = vrot.slane %v15542_v10, 4  ;;  %v19546_v36 = vrot.slane %v15628_v25, 4 }
 0x355   :  { %v19309_v26 = vrot.slane %v16066_v11, 4  ;;  %v12974_v24 = vcombine.low %v3170_v6, %v3307_v50  ;;  %v12975_v62 = vcombine.high %v3170_v6, %v3307_v50  ;;  %vm19553_vm6 = vcmask 728064  }
 0x356   :  { %5750 = vperm.xlu1 %14075, %v5731_v30   ;;  %8615 = vrot.lane.b32.xlu0 %v19322_v54, %s19483_s2  ;;  %v19311_v30 = vrot.slane %v16022_v60, 4 }
 0x357   :  { %5561 = vmatprep.subr.bf16.mxu0 %v12975_v62  ;;  %v3445_v34 = vsel %vm468_vm0, %v3430_v5, %v19309_v26  ;;  %v3032_v62 = vsel %vm468_vm0, %v19545_v12, %v3019_v38 }
 0x358   :  { %v16083_v22 = vpop.permute.xlu0 %2462  ;;  %5562 = vmatpush2.bf16.msra.mxu0 %v12974_v24  ;;  %v2870_v28 = vpop.permute.xlu1 %2869  ;;  %v3446_v27 = vsel %vm19543_vm7, %v15998_v42, %v3445_v34  ;;  %v2745_v24 = vrot.slane %v16045_v49, 4  ;;  %vm19547_vm7 = vcmask 236544  }
 0x359   :  { %v2882_v6 = vrot.slane %v2870_v28, 4  ;;  %v12992_v5 = vcombine.low %v3446_v27, %v3583_v61  ;;  %v12993_v50 = vcombine.high %v3446_v27, %v3583_v61  ;;  %v3033_v61 = vsel %vm3024_vm15, %v15542_v10, %v3032_v62 }
 0x35a   :  { %2736 = vrot.lane.b32.xlu1 %v14477_v59, %s19475_s11  ;;  %9839 = vrot.lane.b32.xlu0 %v19322_v54, %s19452_s5 }
 0x35b   :  { %5600 = vmatprep.subr.bf16.mxu1 %v12993_v50  ;;  %v2895_v42 = vsel %vm468_vm0, %v19546_v36, %v2882_v6  ;;  %v3308_v36 = vsel %vm468_vm0, %v3293_v9, %v19311_v30 }
 0x35c   :  { %v16103_v21 = vpop.permute.xlu0 %2734  ;;  %5601 = vmatpush2.bf16.msra.mxu1 %v12992_v5  ;;  %v16105_v34 = vpop.permute.xlu1 %3145  ;;  %v2896_v27 = vsel %vm2887_vm11, %v15628_v25, %v2895_v42  ;;  %v3309_v9 = vsel %vm19547_vm7, %v15958_v23, %v3308_v36  ;;  %v2473_v23 = vrot.slane %v16083_v22, 4  ;;  %vm19554_vm7 = vcmask 89088  }
 0x35d   :  { %v19310_v12 = vrot.slane %v16105_v34, 4  ;;  %v12958_v50 = vcombine.low %v2896_v27, %v3033_v61  ;;  %v12959_v26 = vcombine.high %v2896_v27, %v3033_v61 }
 0x35e   :  { %3012 = vrot.lane.b32.xlu1 %v19322_v54, %s19428_s30  ;;  %9567 = vrot.lane.b32.xlu0 %v19322_v54, %s19429_s28 }
 0x35f   :  { %5563 = vmatprep.subr.bf16.mxu0 %v12959_v26  ;;  %v3171_v25 = vsel %vm468_vm0, %v3156_v18, %v19310_v12  ;;  %v19548_v26 = vrot.slane %v15582_v13, 4  ;;  %v19313_v18 = vrot.slane %v16064_v2, 4 }
 0x360   :  { %v16124_v10 = vpop.permute.xlu0 %2327  ;;  %5564 = vmatpush2.bf16.msra.mxu0 %v12958_v50  ;;  %v2596_v62 = vpop.permute.xlu1 %2595  ;;  %v3172_v5 = vsel %vm3161_vm14, %v3144_v63, %v3171_v25  ;;  %v19549_v63 = vrot.slane %v15668_v45, 4 }
 0x361   :  { %v2758_v42 = vsel %vm468_vm0, %v19548_v26, %v2745_v24  ;;  %v2608_v27 = vrot.slane %v2596_v62, 4  ;;  %v12976_v61 = vcombine.low %v3172_v5, %v3309_v9  ;;  %v12977_v12 = vcombine.high %v3172_v5, %v3309_v9 }
 0x362   :  { %2601 = vrot.lane.b32.xlu1 %v19322_v54, %s19491_s1  ;;  %9295 = vrot.lane.b32.xlu0 %v19322_v54, %s19430_s23  ;;  %v3034_v30 = vsel %vm468_vm0, %v3019_v38, %v19313_v18  ;;  %s19619_s1 = sld [smem:[#allocation19_spill]] }
 0x363   :  { %5602 = vmatprep.subr.bf16.mxu1 %v12977_v12  ;;  %v2621_v50 = vsel %vm468_vm0, %v19549_v63, %v2608_v27  ;;  %v2759_v12 = vsel %vm2750_vm12, %v15582_v13, %v2758_v42 }
 0x364   :  { %v16143_v36 = vpop.permute.xlu0 %1826  ;;  %5603 = vmatpush2.bf16.msra.mxu1 %v12976_v61  ;;  %v16145_v25 = vpop.permute.xlu1 %2871  ;;  %v2622_v5 = vsel %vm2613_vm13, %v15668_v45, %v2621_v50  ;;  %v6460_v45 = vld [vmem:[%s19150_s10] sm:$0xff]  ;;  %v3035_v50 = vsel %vm3024_vm15, %v15995_v31, %v3034_v30  ;;  %s19612_s10 = smov 111  }
 0x365   :  { %v19312_v9 = vrot.slane %v16145_v25, 4  ;;  %v12942_v26 = vcombine.low %v2622_v5, %v2759_v12  ;;  %v12943_v63 = vcombine.high %v2622_v5, %v2759_v12  ;;  %v19550_v5 = vrot.slane %v15706_v8, 4 }
 0x366   :  { %2738 = vrot.lane.b32.xlu1 %v19322_v54, %s19475_s11  ;;  %9023 = vrot.lane.b32.xlu0 %v19322_v54, %s19484_s4  ;;  %s19589_s11 = sld [smem:[#allocation17_spill]]  ;;  %s19614_s4 = smov 29  }
 0x367   :  { %5565 = vmatprep.subr.bf16.mxu0 %v12943_v63  ;;  %v2897_v13 = vsel %vm468_vm0, %v2882_v6, %v19312_v9  ;;  %v2488_v12 = vsel %vm468_vm0, %v19550_v5, %v2473_v23  ;;  %v19314_v63 = vrot.slane %v16103_v21, 4 }
 0x368   :  { %v2103_v42 = vpop.permute.xlu0 %2102  ;;  %5566 = vmatpush2.bf16.msra.mxu0 %v12942_v26  ;;  %v2326_v61 = vpop.permute.xlu1 %2325  ;;  %v2898_v38 = vsel %vm2887_vm11, %v2870_v28, %v2897_v13  ;;  %v19551_v26 = vrot.slane %v15607_v48, 4  ;;  %v2489_v5 = vsel %vm2476_vm2, %v15706_v8, %v2488_v12 }
 0x369   :  { %v2336_v6 = vrot.slane %v2326_v61, 4  ;;  %v12960_v9 = vcombine.low %v2898_v38, %v3035_v50  ;;  %v12961_v18 = vcombine.high %v2898_v38, %v3035_v50 }
 0x36a   :  { %6463 = vperm.xlu1 %14075, %v6460_v45  }
 0x36b   :  { %5604 = vmatprep.subr.bf16.mxu1 %v12961_v18  ;;  %v2351_v28 = vsel %vm468_vm0, %v19551_v26, %v2336_v6  ;;  %5568 = vmatmul.mubr.bf16.vlgmr.msra.gmra.mxu0 %v15131_v32 }
 0x36c   :  { %v16180_v31 = vpop.permute.xlu0 %1689  ;;  %5605 = vmatpush2.bf16.msra.mxu1 %v12960_v9  ;;  %v16182_v30 = vpop.permute.xlu1 %2597  ;;  %v2352_v13 = vsel %vm2339_vm1, %v15607_v48, %v2351_v28  ;;  %13043 = vmatprep.mubr.msk.bf16.mxu0 %vm5318_vm8, %v14705_v35  ;;  %v2760_v9 = vsel %vm468_vm0, %v2745_v24, %v19314_v63  ;;  %v2337_v28 = vrot.slane %v16124_v10, 4 }
 0x36d   :  { %v2609_v18 = vrot.slane %v16182_v30, 4  ;;  %v12930_v45 = vcombine.low %v2352_v13, %v2489_v5  ;;  %v12931_v38 = vcombine.high %v2352_v13, %v2489_v5  ;;  %v2761_v26 = vsel %vm2750_vm12, %v16045_v49, %v2760_v9 }
 0x36e   :  { %8479 = vrot.lane.b32.xlu1 %v19322_v54, %s19490_s3  ;;  %v2353_v9 = vsel %vm468_vm0, %v2336_v6, %v2337_v28 }
 0x36f   :  { %5617 = vmatprep.subr.bf16.mxu0 %v12931_v38  ;;  %v2623_v48 = vsel %vm468_vm0, %v2608_v27, %v2609_v18  ;;  %v1837_v38 = vrot.slane %v16143_v36, 4  ;;  %v2112_v27 = vrot.slane %v2103_v42, 4 }
 0x370   :  { %v16201_v8 = vpop.permute.xlu0 %1965  ;;  %5618 = vmatpush1.bf16.msra.mxu0 %v12930_v45  ;;  %v2101_v50 = vpop.permute.xlu1 %2100  ;;  %v2624_v12 = vsel %vm2613_vm13, %v2596_v62, %v2623_v48  ;;  %v19552_v45 = vrot.slane %v15647_v19, 4 }
 0x371   :  { %v2111_v24 = vrot.slane %v2101_v50, 4  ;;  %v12944_v13 = vcombine.low %v2624_v12, %v2761_v26  ;;  %v12945_v5 = vcombine.high %v2624_v12, %v2761_v26 }
 0x372   :  { %10111 = vrot.lane.b32.xlu1 %v19322_v54, %s19424_s29 }
 0x373   :  { %5606 = vmatprep.subr.bf16.mxu1 %v12945_v5  ;;  %v2126_v63 = vsel %vm468_vm0, %v19552_v45, %v2111_v24  ;;  %v2128_v48 = vsel %vm468_vm0, %v2111_v24, %v2112_v27  ;;  %v5405_v45 = vpop.f32.mrf.mxu0 }
 0x374   :  { %v16213_v62 = vpop.permute.xlu0 %1415  ;;  %5607 = vmatpush2.bf16.msra.mxu1 %v12944_v13  ;;  %v2465_v49 = vpop.permute.xlu1 %2464  ;;  %v2127_v10 = vsel %vm2114_vm3, %v15647_v19, %v2126_v63  ;;  %v1852_v19 = vsel %vm468_vm0, %v1836_v14, %v1837_v38  ;;  %v2354_v63 = vsel %vm2339_vm1, %v2326_v61, %v2353_v9  ;;  %v2129_v6 = vsel %vm2114_vm3, %v2101_v50, %v2128_v48 }
 0x375   :  { %v2474_v12 = vrot.slane %v2465_v49, 4  ;;  %v12914_v26 = vcombine.low %v2127_v10, %v14474_v55  ;;  %v12915_v42 = vcombine.high %v2127_v10, %v14474_v55  ;;  %5699 = vst [vmem:[%s19151_s15] sm:$0xff] %v5405_v45  ;;  %v1853_v49 = vsel %vm1840_vm4, %v15772_v51, %v1852_v19  ;;  %v5446_v51 = vpop.f32.mrf.mxu1 }
 0x376   :  { %9975 = vrot.lane.b32.xlu1 %v19322_v54, %s19427_s13  ;;  %5701 = vst [vmem:[%s19151_s15 + $0x10] sm:$0xff] %v5446_v51 }
 0x377   :  { %v2490_v13 = vsel %vm468_vm0, %v2473_v23, %v2474_v12  ;;  %5609 = vmatmul.mubr.bf16.vlgmr.msra.gmra.mxu1 %v15131_v32  ;;  %5619 = vmatprep.subr.bf16.mxu0 %v12915_v42  ;;  %v1700_v23 = vrot.slane %v16180_v31, 4  ;;  %v12916_v42 = vcombine.low %v2129_v6, %v14477_v59 }
 0x378   :  { %v16234_v55 = vpop.permute.xlu0 %1691  ;;  %v1964_v28 = vpop.permute.xlu1 %1963  ;;  %v2491_v24 = vsel %vm2476_vm2, %v16083_v22, %v2490_v13  ;;  %13045 = vmatprep.mubr.msk.bf16.mxu1 %vm5318_vm8, %v14705_v35  ;;  %5620 = vmatpush1.bf16.msra.mxu0 %v12914_v26  ;;  %v12917_v22 = vcombine.high %v2129_v6, %v14477_v59  ;;  %v1426_v59 = vrot.slane %v16213_v62, 4 }
 0x379   :  { %v1974_v5 = vrot.slane %v1964_v28, 4  ;;  %v12932_v27 = vcombine.low %v2354_v63, %v2491_v24  ;;  %v12933_v14 = vcombine.high %v2354_v63, %v2491_v24  ;;  %v5407_v26 = vpop.f32.mrf.mxu0 }
 0x37a   :  { %9703 = vrot.lane.b32.xlu1 %v19322_v54, %s19426_s17  ;;  %5700 = vst [vmem:[%s19151_s15 + $0x8] sm:$0xff] %v5407_v26 }
 0x37b   :  { %5658 = vmatprep.subr.bf16.mxu1 %v12933_v14  ;;  %v1989_v35 = vsel %vm468_vm0, %v1973_v43, %v1974_v5  ;;  %v1715_v43 = vsel %vm468_vm0, %v1699_v15, %v1700_v23  ;;  %v5409_v19 = vpop.f32.mrf.mxu0 }
 0x37c   :  { %v16250_v61 = vpop.permute.xlu0 %1141  ;;  %5659 = vmatpush1.bf16.msra.mxu1 %v12932_v27  ;;  %v16252_v50 = vpop.permute.xlu1 %1552  ;;  %v1990_v10 = vsel %vm1977_vm5, %v15689_v52, %v1989_v35  ;;  %v1975_v52 = vrot.slane %v16201_v8, 4  ;;  %v1716_v8 = vsel %vm19554_vm7, %v15736_v47, %v1715_v43 }
 0x37d   :  { %v1563_v9 = vrot.slane %v16252_v50, 4  ;;  %5660 = vmatprep.subr.bf16.mxu1 %v12917_v22  ;;  %v12898_v48 = vcombine.low %v1853_v49, %v1990_v10  ;;  %v12899_v12 = vcombine.high %v1853_v49, %v1990_v10  ;;  %v5410_v45 = vpop.f32.mrf.mxu0  ;;  %v5448_v22 = vpop.f32.mrf.mxu1 }
 0x37e   :  { %9431 = vrot.lane.b32.xlu1 %v19322_v54, %s19463_s12  ;;  %v1991_v24 = vsel %vm468_vm0, %v1974_v5, %v1975_v52  ;;  %5702 = vst [vmem:[%s19151_s15 + $0x18] sm:$0xff] %v5448_v22  ;;  %v1701_v5 = vrot.slane %v16234_v55, 4  ;;  %s19604_s12 = sld [smem:[#allocation18_spill]] }
 0x37f   :  { %5621 = vmatprep.subr.bf16.mxu0 %v12899_v12  ;;  %v1578_v13 = vsel %vm468_vm0, %v1562_v33, %v1563_v9  ;;  %v5450_v47 = vpop.f32.mrf.mxu1  ;;  %v1992_v35 = vsel %vm1977_vm5, %v1964_v28, %v1991_v24 }
 0x380   :  { %v1418_v15 = vpop.permute.xlu0 %1417  ;;  %5622 = vmatpush1.bf16.msra.mxu0 %v12898_v48  ;;  %5661 = vmatpush1.bf16.msra.mxu1 %v12916_v42  ;;  %v1829_v63 = vpop.permute.xlu1 %1828  ;;  %v1579_v6 = vsel %vm19553_vm6, %v15811_v58, %v1578_v13  ;;  %v19555_v42 = vrot.slane %v15770_v44, 4  ;;  %v1717_v28 = vsel %vm468_vm0, %v1700_v23, %v1701_v5 }
 0x381   :  { %v1838_v33 = vrot.slane %v1829_v63, 4  ;;  %v12882_v27 = vcombine.low %v1579_v6, %v1716_v8  ;;  %v12883_v14 = vcombine.high %v1579_v6, %v1716_v8  ;;  %v5451_v51 = vpop.f32.mrf.mxu1  ;;  %v1152_v63 = vrot.slane %v16250_v61, 4 }
 0x382   :  { %9159 = vrot.lane.b32.xlu1 %v19322_v54, %s19428_s30 }
 0x383   :  { %v1854_v58 = vsel %vm468_vm0, %v1837_v38, %v1838_v33  ;;  %5623 = vmatprep.subr.bf16.mxu0 %v12883_v14  ;;  %v1441_v38 = vsel %vm468_vm0, %v19555_v42, %v1426_v59  ;;  %v1427_v33 = vrot.slane %v1418_v15, 4 }
 0x384   :  { %v16293_v49 = vpop.permute.xlu0 %867  ;;  %5624 = vmatpush1.bf16.msra.mxu0 %v12882_v27  ;;  %v1279_v10 = vpop.permute.xlu1 %1278  ;;  %v1855_v48 = vsel %vm1840_vm4, %v16143_v36, %v1854_v58  ;;  %v1442_v19 = vsel %vm19315_vm10, %v15770_v44, %v1441_v38  ;;  %v19556_v58 = vrot.slane %v15809_v57, 4 }
 0x385   :  { %v1289_v12 = vrot.slane %v1279_v10, 4  ;;  %v12900_v43 = vcombine.low %v1855_v48, %v1992_v35  ;;  %v12901_v26 = vcombine.high %v1855_v48, %v1992_v35  ;;  %v1443_v5 = vsel %vm468_vm0, %v1426_v59, %v1427_v33 }
 0x386   :  { %v1167_v47 = vsel %vm468_vm0, %v19556_v58, %v1152_v63 }
 0x387   :  { %5662 = vmatprep.subr.bf16.mxu1 %v12901_v26  ;;  %v1304_v55 = vsel %vm468_vm0, %v1288_v7, %v1289_v12 }
 0x388   :  { %v1144_v52 = vpop.permute.xlu0 %1143  ;;  %5663 = vmatpush1.bf16.msra.mxu1 %v12900_v43  ;;  %v1555_v36 = vpop.permute.xlu1 %1554  ;;  %v1305_v13 = vsel %vm19316_vm9, %v15847_v1, %v1304_v55  ;;  %v1718_v1 = vsel %vm19554_vm7, %v16180_v31, %v1717_v28  ;;  %vm19559_vm7 = vcmask 809984   ;;  %v878_v43 = vrot.slane %v16293_v49, 4 }
 0x389   :  { %v1564_v6 = vrot.slane %v1555_v36, 4  ;;  %v12866_v8 = vcombine.low %v1305_v13, %v1442_v19  ;;  %v12867_v24 = vcombine.high %v1305_v13, %v1442_v19  ;;  %v1168_v48 = vsel %vm19559_vm7, %v15809_v57, %v1167_v47 }
 0x38a   :  { %v1153_v55 = vrot.slane %v1144_v52, 4  ;;  %vm19563_vm7 = vcmask 826368  }
 0x38b   :  { %v1580_v7 = vsel %vm468_vm0, %v1563_v9, %v1564_v6  ;;  %5625 = vmatprep.subr.bf16.mxu0 %v12867_v24  ;;  %v19557_v9 = vrot.slane %v15885_v0, 4  ;;  %v19560_v6 = vrot.slane %v15845_v37, 4 }
 0x38c   :  { %v16312_v27 = vpop.permute.xlu0 %593  ;;  %5626 = vmatpush1.bf16.msra.mxu0 %v12866_v8  ;;  %v1005_v23 = vpop.permute.xlu1 %1004  ;;  %v1581_v14 = vsel %vm19553_vm6, %v16252_v50, %v1580_v7  ;;  %vm19558_vm6 = vcmask 818176   ;;  %v1169_v24 = vsel %vm468_vm0, %v1152_v63, %v1153_v55 }
 0x38d   :  { %v1015_v44 = vrot.slane %v1005_v23, 4  ;;  %v12884_v45 = vcombine.low %v1581_v14, %v1718_v1  ;;  %v12885_v22 = vcombine.high %v1581_v14, %v1718_v1  ;;  %v893_v8 = vsel %vm468_vm0, %v19560_v6, %v878_v43 }
 0x38e   :  { %v894_v33 = vsel %vm19563_vm7, %v15845_v37, %v893_v8  ;;  %v604_v14 = vrot.slane %v16312_v27, 4 }
 0x38f   :  { %5664 = vmatprep.subr.bf16.mxu1 %v12885_v22  ;;  %v1030_v15 = vsel %vm468_vm0, %v19557_v9, %v1015_v44 }
 0x390   :  { %v870_v35 = vpop.permute.xlu0 %869  ;;  %5665 = vmatpush1.bf16.msra.mxu1 %v12884_v45  ;;  %v1281_v50 = vpop.permute.xlu1 %1280  ;;  %v1031_v31 = vsel %vm19558_vm6, %v15885_v0, %v1030_v15  ;;  %v1444_v0 = vsel %vm19315_vm10, %v16213_v62, %v1443_v5  ;;  %vm19562_vm6 = vcmask 891904   ;;  %vm19564_vm10 = vcmask 818176  }
 0x391   :  { %v1290_v26 = vrot.slane %v1281_v50, 4  ;;  %v12850_v42 = vcombine.low %v1031_v31, %v1168_v48  ;;  %v12851_v38 = vcombine.high %v1031_v31, %v1168_v48  ;;  %v879_v47 = vrot.slane %v870_v35, 4 }
 0x392   :  { %v19566_v31 = vrot.slane %v15868_v53, 4 }
 0x393   :  { %v1306_v51 = vsel %vm468_vm0, %v1289_v12, %v1290_v26  ;;  %5627 = vmatprep.subr.bf16.mxu0 %v12851_v38  ;;  %v19561_v12 = vrot.slane %v15921_v16, 4  ;;  %v895_v26 = vsel %vm468_vm0, %v878_v43, %v879_v47 }
 0x394   :  { %v596_v28 = vpop.permute.xlu0 %595  ;;  %5628 = vmatpush1.bf16.msra.mxu0 %v12850_v42  ;;  %v731_v59 = vpop.permute.xlu1 %730  ;;  %v1307_v36 = vsel %vm19316_vm9, %v1279_v10, %v1306_v51  ;;  %vm19565_vm9 = vcmask 809984   ;;  %v619_v48 = vsel %vm468_vm0, %v19566_v31, %v604_v14  ;;  %v896_v6 = vsel %vm19563_vm7, %v16293_v49, %v895_v26 }
 0x395   :  { %v741_v13 = vrot.slane %v731_v59, 4  ;;  %v12868_v19 = vcombine.low %v1307_v36, %v1444_v0  ;;  %v12869_v57 = vcombine.high %v1307_v36, %v1444_v0  ;;  %v605_v51 = vrot.slane %v596_v28, 4 }
 0x397   :  { %5666 = vmatprep.subr.bf16.mxu1 %v12869_v57  ;;  %v756_v52 = vsel %vm468_vm0, %v19561_v12, %v741_v13  ;;  %v621_v8 = vsel %vm468_vm0, %v604_v14, %v605_v51 }
 0x398   :  { %v16341_v7 = vpop.permute.xlu0 %3695  ;;  %5667 = vmatpush1.bf16.msra.mxu1 %v12868_v19  ;;  %v1007_v10 = vpop.permute.xlu1 %1006  ;;  %v757_v62 = vsel %vm19562_vm6, %v15921_v16, %v756_v52  ;;  %v1170_v16 = vsel %vm19565_vm9, %v16250_v61, %v1169_v24  ;;  %vm19568_vm9 = vcmask 908288  }
 0x399   :  { %v1016_v1 = vrot.slane %v1007_v10, 4  ;;  %v12834_v45 = vcombine.low %v757_v62, %v894_v33  ;;  %v12835_v22 = vcombine.high %v757_v62, %v894_v33  ;;  %v3706_v62 = vrot.slane %v16341_v7, 4 }
 0x39b   :  { %v1032_v58 = vsel %vm468_vm0, %v1015_v44, %v1016_v1  ;;  %5629 = vmatprep.subr.bf16.mxu0 %v12835_v22  ;;  %v19567_v44 = vrot.slane %v15941_v40, 4  ;;  %v19570_v1 = vrot.slane %v15904_v39, 4 }
 0x39c   :  { %v3972_v63 = vpop.permute.xlu0 %3971  ;;  %5630 = vmatpush1.bf16.msra.mxu0 %v12834_v45  ;;  %v456_v9 = vpop.permute.xlu1 %455  ;;  %v1033_v15 = vsel %vm19564_vm10, %v1005_v23, %v1032_v58  ;;  %vm19569_vm10 = vcmask 900096  }
 0x39d   :  { %v466_v5 = vrot.slane %v456_v9, 4  ;;  %v12852_v50 = vcombine.low %v1033_v15, %v1170_v16  ;;  %v12853_v37 = vcombine.high %v1033_v15, %v1170_v16  ;;  %v620_v38 = vsel %vm19569_vm10, %v15868_v53, %v619_v48 }
 0x39e   :  { %v3981_v28 = vrot.slane %v3972_v63, 4 }
 0x39f   :  { %5668 = vmatprep.subr.bf16.mxu1 %v12853_v37  ;;  %v482_v35 = vsel %vm468_vm0, %v19567_v44, %v466_v5 }
 0x3a0   :  { %v16359_v42 = vpop.permute.xlu0 %3558  ;;  %5669 = vmatpush1.bf16.msra.mxu1 %v12852_v50  ;;  %v733_v23 = vpop.permute.xlu1 %732  ;;  %v483_v61 = vsel %vm19568_vm9, %v15941_v40, %v482_v35  ;;  %v19573_v50 = vrot.slane %v16024_v46, 4  ;;  %v19574_v35 = vrot.slane %v15939_v20, 4 }
 0x3a1   :  { %v742_v55 = vrot.slane %v733_v23, 4  ;;  %v12818_v36 = vcombine.low %v483_v61, %v620_v38  ;;  %v12819_v0 = vcombine.high %v483_v61, %v620_v38  ;;  %v3569_v58 = vrot.slane %v16359_v42, 4 }
 0x3a2   :  { %v3721_v37 = vsel %vm468_vm0, %v19573_v50, %v3706_v62 }
 0x3a3   :  { %v758_v19 = vsel %vm468_vm0, %v741_v13, %v742_v55  ;;  %5631 = vmatprep.subr.bf16.mxu0 %v12819_v0  ;;  %v3584_v51 = vsel %vm468_vm0, %v3568_v56, %v3569_v58 }
 0x3a4   :  { %5632 = vmatpush1.bf16.msra.mxu0 %v12818_v36  ;;  %v458_v57 = vpop.permute.xlu1 %457  ;;  %v759_v43 = vsel %vm19562_vm6, %v731_v59, %v758_v19  ;;  %v3835_v53 = vpop.permute.xlu0 %3834  ;;  %v622_v59 = vsel %vm19569_vm10, %v16312_v27, %v621_v8  ;;  %vm19571_vm6 = vcmask 138240   ;;  %vm19576_vm10 = vcmask 146432  }
 0x3a5   :  { %v467_v40 = vrot.slane %v458_v57, 4  ;;  %v12836_v12 = vcombine.low %v759_v43, %v896_v6  ;;  %v12837_v52 = vcombine.high %v759_v43, %v896_v6  ;;  %vm19572_vm7 = vmmov %vm19571_vm6  ;;  %v3844_v55 = vrot.slane %v3835_v53, 4 }
 0x3a6   :  { %v19577_v43 = vrot.slane %v16066_v11, 4 }
 0x3a7   :  { %v484_v24 = vsel %vm468_vm0, %v466_v5, %v467_v40  ;;  %5670 = vmatprep.subr.bf16.mxu1 %v12837_v52 }
 0x3a8   :  { %5671 = vmatpush1.bf16.msra.mxu1 %v12836_v12  ;;  %v3970_v13 = vpop.permute.xlu1 %3969  ;;  %v485_v10 = vsel %vm19568_vm9, %v456_v9, %v484_v24  ;;  %v16380_v47 = vpop.permute.xlu0 %3284  ;;  %vm19575_vm9 = vcmask 154624  }
 0x3a9   :  { %v3980_v49 = vrot.slane %v3970_v13, 4  ;;  %v12820_v33 = vcombine.low %v485_v10, %v622_v59  ;;  %v12821_v14 = vcombine.high %v485_v10, %v622_v59  ;;  %v3722_v61 = vsel %vm19575_vm9, %v16024_v46, %v3721_v37  ;;  %vm19580_vm9 = vmmov %vm19576_vm10 }
 0x3aa   :  { %v3295_v46 = vrot.slane %v16380_v47, 4  ;;  %v19582_v59 = vrot.slane %v16022_v60, 4 }
 0x3ab   :  { %v3995_v45 = vsel %vm468_vm0, %v19570_v1, %v3980_v49  ;;  %v3997_v22 = vsel %vm468_vm0, %v3980_v49, %v3981_v28  ;;  %5672 = vmatprep.subr.bf16.mxu1 %v12821_v14 }
 0x3ac   :  { %v3998_v63 = vsel %vm19571_vm6, %v3970_v13, %v3997_v22  ;;  %5673 = vmatpush1.bf16.msra.mxu1 %v12820_v33  ;;  %v3833_v27 = vpop.permute.xlu1 %3832  ;;  %v3996_v9 = vsel %vm19572_vm7, %v15904_v39, %v3995_v45  ;;  %v3561_v57 = vpop.permute.xlu0 %3560  ;;  %vm19578_vm6 = vcmask 228352   ;;  %vm19579_vm7 = vcmask 220160  }
 0x3ad   :  { %v13028_v15 = vcombine.low %v3998_v63, %v3998_v63  ;;  %v13029_v16 = vcombine.high %v3998_v63, %v3998_v63  ;;  %v3843_v5 = vrot.slane %v3833_v27, 4  ;;  %v13027_v31 = vcombine.high %v3996_v9, %v3996_v9 }
 0x3ae   :  { %v13026_v48 = vcombine.low %v3996_v9, %v3996_v9  ;;  %v3585_v56 = vsel %vm19579_vm7, %v15975_v29, %v3584_v51  ;;  %v3310_v29 = vsel %vm468_vm0, %v19582_v59, %v3295_v46  ;;  %v3570_v49 = vrot.slane %v3561_v57, 4 }
 0x3af   :  { %13044 = vmatprep.subr.msk.bf16.mxu1 %vm468_vm0, %v13029_v16  ;;  %v5366_v44 = vsel %vm468_vm0, %v13028_v15, 0  ;;  %v3858_v26 = vsel %vm468_vm0, %v19574_v35, %v3843_v5  ;;  %13042 = vmatprep.subr.msk.bf16.mxu0 %vm468_vm0, %v13027_v31  ;;  %v3860_v40 = vsel %vm468_vm0, %v3843_v5, %v3844_v55  ;;  %vm19585_vm7 = vcmask 228352  }
 0x3b0   :  { %v5360_v39 = vsel %vm468_vm0, %v13026_v48, 0  ;;  %5679 = vmatpush2.bf16.msra.mxu1 %v5366_v44  ;;  %v3422_v23 = vpop.permute.xlu1 %3421  ;;  %v3859_v38 = vsel %vm19576_vm10, %v15939_v20, %v3858_v26  ;;  %v3861_v24 = vsel %vm19580_vm9, %v3833_v27, %v3860_v40  ;;  %v16413_v13 = vpop.permute.xlu0 %3010  ;;  %vm19581_vm10 = vcmask 154624   ;;  %v5720_v40 = vld [vmem:[%s19589_s11 + $0x28] sm:$0xff] }
 0x3b1   :  { %5638 = vmatpush2.bf16.msra.mxu0 %v5360_v39  ;;  %v3432_v36 = vrot.slane %v3422_v23, 4  ;;  %v13010_v0 = vcombine.low %v3722_v61, %v3859_v38  ;;  %v13011_v19 = vcombine.high %v3722_v61, %v3859_v38  ;;  %v3021_v22 = vrot.slane %v16413_v13, 4 }
 0x3b2   :  { %v3586_v9 = vsel %vm468_vm0, %v3569_v58, %v3570_v49  ;;  %vm19586_vm9 = vcmask 220160   ;;  %v19588_v61 = vrot.slane %v16145_v25, 4  ;;  %v16498_v49 = vld [vmem:[%s19589_s11 + $0x68] sm:$0xff] }
 0x3b3   :  { %5639 = vmatprep.subr.bf16.mxu0 %v13011_v19  ;;  %v3447_v6 = vsel %vm468_vm0, %v19577_v43, %v3432_v36 }
 0x3b4   :  { %v3698_v8 = vpop.permute.xlu1 %3697  ;;  %v3448_v20 = vsel %vm19578_vm6, %v16066_v11, %v3447_v6  ;;  %vm19584_vm6 = vcmask 236544   ;;  %v3287_v50 = vpop.permute.xlu0 %3286 }
 0x3b5   :  { %5640 = vmatpush2.bf16.msra.mxu0 %v13010_v0  ;;  %v3707_v12 = vrot.slane %v3698_v8, 4  ;;  %v12994_v52 = vcombine.low %v3448_v20, %v3585_v56  ;;  %v12995_v53 = vcombine.high %v3448_v20, %v3585_v56  ;;  %v3311_v27 = vsel %vm19584_vm6, %v16022_v60, %v3310_v29  ;;  %v16493_v29 = vld [vmem:[%s19589_s11 + $0x40] sm:$0xff] }
 0x3b6   :  { %v19587_v60 = vrot.slane %v16064_v2, 4  ;;  %v3296_v44 = vrot.slane %v3287_v50, 4  ;;  %v16530_v50 = vld [vmem:[%s19589_s11 + $0x78] sm:$0xff] }
 0x3b7   :  { %v3723_v28 = vsel %vm468_vm0, %v3706_v62, %v3707_v12  ;;  %5641 = vmatprep.subr.bf16.mxu0 %v12995_v53  ;;  %v19583_v62 = vrot.slane %v16105_v34, 4  ;;  %v5719_v12 = vld [vmem:[%s19589_s11 + $0x20] sm:$0xff] }
 0x3b8   :  { %v3148_v10 = vpop.permute.xlu1 %3147  ;;  %v3724_v11 = vsel %vm19581_vm10, %v16341_v7, %v3723_v28  ;;  %v3036_v58 = vsel %vm468_vm0, %v19587_v60, %v3021_v22  ;;  %v16457_v6 = vpop.permute.xlu0 %2599  ;;  %vm19590_vm10 = vmmov %vm19584_vm6  ;;  %vm5940_vm6 = vcmask 64512  }
 0x3b9   :  { %5642 = vmatpush2.bf16.msra.mxu0 %v12994_v52  ;;  %v3158_v33 = vrot.slane %v3148_v10, 4  ;;  %v13012_v14 = vcombine.low %v3724_v11, %v3861_v24  ;;  %v13013_v1 = vcombine.high %v3724_v11, %v3861_v24  ;;  %v3037_v55 = vsel %vm3024_vm15, %v16064_v2, %v3036_v58  ;;  %v5716_v2 = vld [vmem:[%s19589_s11 + $0x8] sm:$0xff]  ;;  %v5718_v24 = vld [vmem:[%s19589_s11 + $0x18] sm:$0xff] }
 0x3ba   :  { %v5724_v52 = vld [vmem:[%s19589_s11 + $0x48] sm:$0xff]  ;;  %v2610_v59 = vrot.slane %v16457_v6, 4 }
 0x3bb   :  { %5680 = vmatprep.subr.bf16.mxu1 %v13013_v1  ;;  %v3173_v45 = vsel %vm468_vm0, %v19583_v62, %v3158_v33  ;;  %v5737_v62 = vsub.f32 %v5720_v40, %v14358_v41 }
 0x3bc   :  { %5681 = vmatpush2.bf16.msra.mxu1 %v13012_v14  ;;  %v3424_v63 = vpop.permute.xlu1 %3423  ;;  %v3174_v7 = vsel %vm3161_vm14, %v16105_v34, %v3173_v45  ;;  %v3587_v34 = vsel %vm19586_vm9, %v16359_v42, %v3586_v9  ;;  %v5733_v14 = vsub.f32 %v5716_v2, %v14358_v41  ;;  %v16511_v45 = vld [vmem:[%s19589_s11 + $0x58] sm:$0xff]  ;;  %v5736_v9 = vsub.f32 %v5719_v12, %v14358_v41 }
 0x3bd   :  { %v3433_v15 = vrot.slane %v3424_v63, 4  ;;  %v12978_v16 = vcombine.low %v3174_v7, %v3311_v27  ;;  %v12979_v5 = vcombine.high %v3174_v7, %v3311_v27  ;;  %v16516_v63 = vld [vmem:[%s19589_s11 + $0x60] sm:$0xff]  ;;  %v16521_v7 = vld [vmem:[%s19589_s11 + $0x50] sm:$0xff]  ;;  %v2876_v27 = vpop.permute.xlu0 %2875  ;;  %v2625_v58 = vsel %vm468_vm0, %v2609_v18, %v2610_v59 }
 0x3be   :  { %vm19621_vm9 = vcmask 89088  }
 0x3bf   :  { %v3449_v37 = vsel %vm468_vm0, %v3432_v36, %v3433_v15  ;;  %5643 = vmatprep.subr.bf16.mxu0 %v12979_v5  ;;  %v3312_v36 = vsel %vm468_vm0, %v3295_v46, %v3296_v44  ;;  %v5715_v46 = vld [vmem:[%s19589_s11] sm:$0xff]  ;;  %v5741_v15 = vsub.f32 %v5724_v52, %v14358_v41 }
 0x3c0   :  { %5644 = vmatpush2.bf16.msra.mxu0 %v12978_v16  ;;  %v16430_v31 = vpop.permute.xlu1 %2873  ;;  %v3450_v48 = vsel %vm19585_vm7, %v3422_v23, %v3449_v37  ;;  %v3313_v56 = vsel %vm19590_vm10, %v16380_v47, %v3312_v36  ;;  %v5717_v47 = vld [vmem:[%s19589_s11 + $0x10] sm:$0xff]  ;;  %v5732_v1 = vsub.f32 %v5715_v46, %v14358_v41  ;;  %v5735_v16 = vsub.f32 %v5718_v24, %v14358_v41  ;;  %v19592_v36 = vld [vmem:[#allocation8_spill] sm:$0xff] }
 0x3c1   :  { %v2884_v35 = vrot.slane %v16430_v31, 4  ;;  %v12996_v26 = vcombine.low %v3450_v48, %v3587_v34  ;;  %v12997_v39 = vcombine.high %v3450_v48, %v3587_v34  ;;  %v5734_v5 = vsub.f32 %v5717_v47, %v14358_v41 }
 0x3c2   :  { %v5740_v48 = vsub.f32 %v16493_v29, %v14358_v41  ;;  %v2626_v46 = vsel %vm2613_vm13, %v16182_v30, %v2625_v58  ;;  %v19600_v29 = vmov 0   ;;  %vm19620_vm7 = vcmask 728064  }
 0x3c3   :  { %5682 = vmatprep.subr.bf16.mxu1 %v12997_v39  ;;  %v2899_v23 = vsel %vm468_vm0, %v19588_v61, %v2884_v35  ;;  %v5487_v38 = vpop.f32.mrf.mxu0  ;;  %v2885_v61 = vrot.slane %v2876_v27, 4  ;;  %vm19622_vm10 = vcmask 744448  }
 0x3c4   :  { %5683 = vmatpush2.bf16.msra.mxu1 %v12996_v26  ;;  %v3150_v42 = vpop.permute.xlu1 %3149  ;;  %v2900_v51 = vsel %vm2887_vm11, %v16145_v25, %v2899_v23  ;;  %5703 = vst [vmem:[%s19151_s15 + $0x20] sm:$0xff] %v5487_v38  ;;  %v16554_v23 = vld [vmem:[%s19591_s9] sm:$0xff] }
 0x3c5   :  { %v3159_v0 = vrot.slane %v3150_v42, 4  ;;  %v12962_v19 = vcombine.low %v2900_v51, %v3037_v55  ;;  %v12963_v57 = vcombine.high %v2900_v51, %v3037_v55  ;;  %v5489_v43 = vpop.f32.mrf.mxu0  ;;  %v16558_v38 = vrot.slane %v16554_v23, %v14202_v4 }
 0x3c6   :  { %5704 = vst [vmem:[%s19151_s15 + $0x28] sm:$0xff] %v5489_v43  ;;  %v16562_v18 = vrot.slane %v16554_v23, %v14200_v3  ;;  %v16568_v55 = vrot.slane %v16554_v23, %v14243_v17  ;;  %v19593_v43 = vld [vmem:[#allocation7_spill] sm:$0xff]  ;;  %v2901_v47 = vsel %vm468_vm0, %v2884_v35, %v2885_v61 }
 0x3c7   :  { %v3175_v25 = vsel %vm468_vm0, %v3158_v33, %v3159_v0  ;;  %5645 = vmatprep.subr.bf16.mxu0 %v12963_v57  ;;  %v5491_v8 = vpop.f32.mrf.mxu0  ;;  %v16503_v33 = vld [vmem:[%s19589_s11 + $0x30] sm:$0xff]  ;;  %v16572_v0 = vrot.slane %v16554_v23, %v19592_v36  ;;  %v2902_v34 = vsel %vm2887_vm11, %v16430_v31, %v2901_v47 }
 0x3c8   :  { %5646 = vmatpush2.bf16.msra.mxu0 %v12962_v19  ;;  %v3176_v20 = vsel %vm3161_vm14, %v3148_v10, %v3175_v25  ;;  %v16487_v10 = vld [vmem:[%s19589_s11 + $0x38] sm:$0xff]  ;;  %v16577_v19 = vld [vmem:[%s19591_s9 + $0x8] sm:$0xff]  ;;  %v16585_v25 = vrot.slane %v16554_v23, %v19593_v43  ;;  %v19594_v8 = vld [vmem:[#allocation6_spill] sm:$0xff]  ;;  %s19616_s9 = smov 38  }
 0x3c9   :  { %v12980_v53 = vcombine.low %v3176_v20, %v3313_v56  ;;  %v12981_v28 = vcombine.high %v3176_v20, %v3313_v56  ;;  %v5492_v11 = vpop.f32.mrf.mxu0  ;;  %v5739_v37 = vsub.f32 %v16487_v10, %v14358_v41  ;;  %v16581_v57 = vrot.slane %v16577_v19, %v14202_v4  ;;  %v19595_v56 = vld [vmem:[#allocation11_spill] sm:$0xff]  ;;  %v16616_v10 = vpop.permute.xlu0 %5788 }
 0x3ca   :  { %v16596_v20 = vrot.slane %v16554_v23, %v19594_v8  ;;  %v16600_v40 = vrot.slane %v16554_v23, %v19595_v56  ;;  %v16604_v12 = vrot.slane %v16577_v19, %v14200_v3 }
 0x3cb   :  { %5684 = vmatprep.subr.bf16.mxu1 %v12981_v28 }
 0x3cc   :  { %5685 = vmatpush2.bf16.msra.mxu1 %v12980_v53 }
 0x3cf   :  { %v5528_v51 = vpop.f32.mrf.mxu1 }
 0x3d0   :  { %5705 = vst [vmem:[%s19151_s15 + $0x30] sm:$0xff] %v5528_v51 }
 0x3d1   :  { %v16590_v2 = vpop.permute.xlu1 %5750  ;;  %v5530_v52 = vpop.f32.mrf.mxu1 }
 0x3d2   :  { %v5754_v53 = vmul.f32 %v16590_v2, %v5733_v14  ;;  %v5753_v28 = vmul.f32 %v16590_v2, %v5732_v1  ;;  %v5758_v24 = vmul.f32 %v16590_v2, %v5737_v62  ;;  %v5757_v30 = vmul.f32 %v16590_v2, %v5736_v9  ;;  %5706 = vst [vmem:[%s19151_s15 + $0x38] sm:$0xff] %v5530_v52  ;;  %v19596_v62 = vld [vmem:[#allocation12_spill] sm:$0xff] }
 0x3d3   :  { %v5762_v11 = vmul.f32 %v16590_v2, %v5741_v15  ;;  %v5756_v14 = vmul.f32 %v16590_v2, %v5735_v16  ;;  %v5755_v1 = vmul.f32 %v16590_v2, %v5734_v5  ;;  %v5532_v27 = vpop.f32.mrf.mxu1  ;;  %v5760_v16 = vmul.f32 %v16590_v2, %v5739_v37 }
 0x3d4   :  { %v5770_v58 = vmul.f32 %v19596_v62, %v5754_v53  ;;  %v5769_v9 = vmul.f32 %v19596_v62, %v5753_v28  ;;  %v5774_v51 = vmul.f32 %v19596_v62, %v5758_v24  ;;  %v5773_v52 = vmul.f32 %v19596_v62, %v5757_v30 }
 0x3d5   :  { %v16625_v54 = vpop.permute.xlu1 %2736  ;;  %v5778_v35 = vmul.f32 %v19596_v62, %v5762_v11  ;;  %v5772_v61 = vmul.f32 %v19596_v62, %v5756_v14  ;;  %v5771_v15 = vmul.f32 %v19596_v62, %v5755_v1  ;;  %v5533_v5 = vpop.f32.mrf.mxu1  ;;  %v19597_v37 = vrot.slane %v16103_v21, 4 }
 0x3d6   :  { %v2747_v27 = vrot.slane %v16625_v54, 4  ;;  %v5792_v53 = vadd.f32 %v16616_v10, %v5770_v58  ;;  %v5791_v28 = vadd.f32 %v16616_v10, %v5769_v9  ;;  %v5796_v24 = vadd.f32 %v16616_v10, %v5774_v51 }
 0x3d7   :  { %v5795_v30 = vadd.f32 %v16616_v10, %v5773_v52  ;;  %v5800_v42 = vadd.f32 %v16616_v10, %v5778_v35  ;;  %v5794_v11 = vadd.f32 %v16616_v10, %v5772_v61  ;;  %v5793_v14 = vadd.f32 %v16616_v10, %v5771_v15 }
 0x3d8   :  { %v2762_v1 = vsel %vm468_vm0, %v19597_v37, %v2747_v27  ;;  %v5808_v5 = vmax.f32 %v5792_v53, 0.0  ;;  %v5807_v58 = vmax.f32 %v5791_v28, 0.0  ;;  %v5812_v39 = vmax.f32 %v5796_v24, 0.0 }
 0x3d9   :  { %v3013_v9 = vpop.permute.xlu1 %3012  ;;  %v2763_v51 = vsel %vm2750_vm12, %v16103_v21, %v2762_v1  ;;  %v5811_v52 = vmax.f32 %v5795_v30, 0.0  ;;  %v5816_v26 = vmax.f32 %v5800_v42, 0.0  ;;  %v5810_v35 = vmax.f32 %v5794_v11, 0.0 }
 0x3da   :  { %v3022_v44 = vrot.slane %v3013_v9, 4  ;;  %v12946_v61 = vcombine.low %v2626_v46, %v2763_v51  ;;  %v12947_v60 = vcombine.high %v2626_v46, %v2763_v51  ;;  %v5908_v15 = vmul.f32 %v16558_v38, %v5808_v5 }
 0x3db   :  { %v5907_v37 = vmul.f32 %v16562_v18, %v5807_v58  ;;  %v5912_v53 = vmul.f32 %v16568_v55, %v5812_v39  ;;  %v16652_v28 = vmul.f32 %v16572_v0, %v5811_v52  ;;  %v5809_v24 = vmax.f32 %v5793_v14, 0.0 }
 0x3dc   :  { %v3038_v21 = vsel %vm468_vm0, %v3021_v22, %v3022_v44  ;;  %5647 = vmatprep.subr.bf16.mxu0 %v12947_v60  ;;  %v5925_v42 = vpack.c.bf16 %v5908_v15, %v5908_v15  ;;  %v5776_v46 = vmul.f32 %v19596_v62, %v5760_v16  ;;  %v16661_v39 = vmul.f32 %v16581_v57, %v5816_v26  ;;  %v19598_v26 = vld [vmem:[#allocation10_spill] sm:$0xff] }
 0x3dd   :  { %5648 = vmatpush2.bf16.msra.mxu0 %v12946_v61  ;;  %v2602_v30 = vpop.permute.xlu1 %2601  ;;  %v3039_v31 = vsel %vm3024_vm15, %v16413_v13, %v3038_v21  ;;  %v5924_v47 = vpack.c.bf16 %v5907_v37, %v5907_v37  ;;  %v16664_v11 = vmul.f32 %v16585_v25, %v5810_v35  ;;  %v16669_v44 = vrot.slane %v16577_v19, %v14243_v17 }
 0x3de   :  { %v2611_v1 = vrot.slane %v2602_v30, 4  ;;  %13046 = vmatprep.subr.msk.bf16.mxu0 %vm468_vm0, %v5925_v42  ;;  %v12964_v22 = vcombine.low %v2902_v34, %v3039_v31  ;;  %v12965_v60 = vcombine.high %v2902_v34, %v3039_v31  ;;  %v5929_v16 = vpack.c.bf16 %v5912_v53, %v5912_v53 }
 0x3df   :  { %v5928_v13 = vpack.c.bf16 %v16652_v28, %v16652_v28  ;;  %v5909_v14 = vmul.f32 %v16596_v20, %v5809_v24  ;;  %v16676_v5 = vrot.slane %v16554_v23, %v19598_v26  ;;  %v5945_v34 = vsel %vm468_vm0, %v5924_v47, 0 }
 0x3e0   :  { %v2627_v58 = vsel %vm468_vm0, %v2610_v59, %v2611_v1  ;;  %5650 = vmatmul.mubr.bf16.vlgmr.msra.gmra.mxu0 %v15131_v32  ;;  %5686 = vmatprep.subr.bf16.mxu1 %v12965_v60  ;;  %v5798_v9 = vadd.f32 %v16616_v10, %v5776_v46  ;;  %v5761_v51 = vmul.f32 %v16590_v2, %v5740_v48 }
 0x3e1   :  { %5687 = vmatpush2.bf16.msra.mxu1 %v12964_v22  ;;  %6007 = vmatpush1.bf16.msra.mxu0 %v5945_v34  ;;  %v2739_v23 = vpop.permute.xlu1 %2738  ;;  %v5933_v52 = vpack.c.bf16 %v16661_v39, %v16661_v39  ;;  %v5927_v59 = vpack.c.bf16 %v16664_v11, %v16664_v11  ;;  %v19599_v35 = vsub.f32 %v16498_v49, %v14358_v41 }
 0x3e2   :  { %v2748_v15 = vrot.slane %v2739_v23, 4  ;;  %13050 = vmatprep.subr.msk.bf16.mxu0 %vm468_vm0, %v5929_v16  ;;  %6024 = vmatprep.mubr.bf16.mxu0 %v19600_v29  ;;  %v5814_v48 = vmax.f32 %v5798_v9, 0.0  ;;  %v5777_v37 = vmul.f32 %v19596_v62, %v5761_v51  ;;  %v19601_v53 = vsub.f32 %v16503_v33, %v14358_v41 }
 0x3e3   :  { %v5766_v61 = vmul.f32 %v16590_v2, %v19599_v35  ;;  %v2628_v21 = vsel %vm2613_vm13, %v16457_v6, %v2627_v58  ;;  %v19602_v42 = vsub.f32 %v16511_v45, %v14358_v41  ;;  %v19603_v46 = vsub.f32 %v16516_v63, %v14358_v41  ;;  %v16724_v45 = vld [vmem:[%s19604_s12] sm:$0xf]  ;;  %s19615_s12 = smov 39  }
 0x3e4   :  { %v5759_v28 = vmul.f32 %v16590_v2, %v19601_v53  ;;  %v2764_v33 = vsel %vm468_vm0, %v2747_v27, %v2748_v15  ;;  %v5926_v31 = vpack.c.bf16 %v5909_v14, %v5909_v14  ;;  %v5799_v47 = vadd.f32 %v16616_v10, %v5777_v37 }
 0x3e5   :  { %v5782_v49 = vmul.f32 %v19596_v62, %v5766_v61  ;;  %v5764_v24 = vmul.f32 %v16590_v2, %v19602_v42  ;;  %v5765_v30 = vmul.f32 %v16590_v2, %v19603_v46  ;;  %v2765_v39 = vsel %vm2750_vm12, %v16625_v54, %v2764_v33  ;;  %v5729_v54 = vld [vmem:[%s19589_s11 + $0x70] sm:$0xff]  ;;  %s19618_s11 = smov 117  }
 0x3e6   :  { %v5775_v6 = vmul.f32 %v19596_v62, %v5759_v28  ;;  %v12948_v27 = vcombine.low %v2628_v21, %v2765_v39  ;;  %v12949_v22 = vcombine.high %v2628_v21, %v2765_v39  ;;  %v5914_v60 = vmul.f32 %v16600_v40, %v5814_v48 }
 0x3e7   :  { %v5804_v63 = vadd.f32 %v16616_v10, %v5782_v49  ;;  %v5780_v11 = vmul.f32 %v19596_v62, %v5764_v24  ;;  %v5781_v1 = vmul.f32 %v19596_v62, %v5765_v30  ;;  %v5815_v16 = vmax.f32 %v5799_v47, 0.0 }
 0x3e8   :  { %v5797_v58 = vadd.f32 %v16616_v10, %v5775_v6  ;;  %5688 = vmatprep.subr.bf16.mxu1 %v12949_v22  ;;  %13047 = vmatmul.mubr.msk.bf16.vlgmr.msra.gmra.mxu0 %vm5940_vm6, %v16724_v45  ;;  %v5957_v51 = vsel %vm468_vm0, %v5928_v13, 0  ;;  %v19605_v35 = vsub.f32 %v16521_v7, %v14358_v41  ;;  %v19606_v15 = vsub.f32 %v16530_v50, %v14358_v41 }
 0x3e9   :  { %v5820_v14 = vmax.f32 %v5804_v63, 0.0  ;;  %v5802_v34 = vadd.f32 %v16616_v10, %v5780_v11  ;;  %v5803_v9 = vadd.f32 %v16616_v10, %v5781_v1  ;;  %v5915_v23 = vmul.f32 %v16604_v12, %v5815_v16  ;;  %6089 = vmatpush1.bf16.msra.mxu0 %v5957_v51  ;;  %5689 = vmatpush2.bf16.msra.mxu1 %v12948_v27 }
 0x3ea   :  { %v5763_v61 = vmul.f32 %v16590_v2, %v19605_v35  ;;  %v5768_v48 = vmul.f32 %v16590_v2, %v19606_v15  ;;  %v5813_v37 = vmax.f32 %v5797_v58, 0.0  ;;  %v16750_v53 = vrot.slane %v16577_v19, %v19593_v43  ;;  %13054 = vmatprep.subr.msk.bf16.mxu0 %vm468_vm0, %v5933_v52  ;;  %13048 = vmatprep.subr.msk.bf16.mxu1 %vm468_vm0, %v5927_v59 }
 0x3eb   :  { %v5746_v13 = vsub.f32 %v5729_v54, %v14358_v41  ;;  %v5951_v7 = vsel %vm468_vm0, %v5926_v31, 0  ;;  %v5931_v28 = vpack.c.bf16 %v5914_v60, %v5914_v60  ;;  %v16758_v50 = vrot.slane %v16577_v19, %v19592_v36  ;;  %6106 = vmatprep.mubr.bf16.mxu0 %v19600_v29 }
 0x3ec   :  { %v5779_v21 = vmul.f32 %v19596_v62, %v5763_v61  ;;  %v5932_v49 = vpack.c.bf16 %v5915_v23, %v5915_v23  ;;  %v5920_v42 = vmul.f32 %v16669_v44, %v5820_v14  ;;  %v5818_v24 = vmax.f32 %v5802_v34, 0.0  ;;  %5691 = vmatmul.mubr.bf16.vlgmr.msra.gmra.mxu1 %v15131_v32 }
 0x3ed   :  { %v5819_v41 = vmax.f32 %v5803_v9, 0.0  ;;  %v5913_v52 = vmul.f32 %v16676_v5, %v5813_v37  ;;  %v5784_v46 = vmul.f32 %v19596_v62, %v5768_v48  ;;  %v5767_v30 = vmul.f32 %v16590_v2, %v5746_v13  ;;  %6048 = vmatpush1.bf16.msra.mxu1 %v5951_v7  ;;  %6065 = vmatprep.mubr.bf16.mxu1 %v19600_v29 }
 0x3ee   :  { %v5801_v59 = vadd.f32 %v16616_v10, %v5779_v21  ;;  %13052 = vmatprep.subr.msk.bf16.mxu1 %vm468_vm0, %v5931_v28  ;;  %v16772_v33 = vrot.slane %v16577_v19, %v19594_v8  ;;  %v5969_v31 = vsel %vm468_vm0, %v5932_v49, 0  ;;  %v5937_v32 = vpack.c.bf16 %v5920_v42, %v5920_v42 }
 0x3ef   :  { %v5918_v47 = vmul.f32 %v16750_v53, %v5818_v24  ;;  %v5919_v6 = vmul.f32 %v16758_v50, %v5819_v41  ;;  %v5930_v2 = vpack.c.bf16 %v5913_v52, %v5913_v52  ;;  %v5806_v63 = vadd.f32 %v16616_v10, %v5784_v46 }
 0x3f0   :  { %13051 = vmatmul.mubr.msk.bf16.vlgmr.msra.gmra.mxu0 %vm5940_vm6, %v16724_v45  ;;  %v5817_v39 = vmax.f32 %v5801_v59, 0.0  ;;  %v5783_v11 = vmul.f32 %v19596_v62, %v5767_v30  ;;  %v16785_v22 = vrot.slane %v16577_v19, %v19595_v56  ;;  %v16796_v14 = vrot.slane %v16577_v19, %v19598_v26 }
 0x3f1   :  { %6171 = vmatpush1.bf16.msra.mxu0 %v5969_v31  ;;  %6188 = vmatprep.mubr.bf16.mxu0 %v19600_v29  ;;  %v5935_v1 = vpack.c.bf16 %v5918_v47, %v5918_v47  ;;  %v5936_v27 = vpack.c.bf16 %v5919_v6, %v5919_v6  ;;  %v5963_v60 = vsel %vm468_vm0, %v5930_v2, 0  ;;  %v5822_v54 = vmax.f32 %v5806_v63, 0.0 }
 0x3f2   :  { %13058 = vmatprep.subr.msk.bf16.mxu0 %vm468_vm0, %v5937_v32  ;;  %v5917_v16 = vmul.f32 %v16772_v33, %v5817_v39  ;;  %v5805_v62 = vadd.f32 %v16616_v10, %v5783_v11 }
 0x3f3   :  { %v5981_v58 = vsel %vm468_vm0, %v5936_v27, 0  ;;  %v5922_v9 = vmul.f32 %v16785_v22, %v5822_v54 }
 0x3f4   :  { %13049 = vmatmul.mubr.msk.bf16.vlgmr.msra.gmra.mxu1 %vm5940_vm6, %v16724_v45  ;;  %v5934_v34 = vpack.c.bf16 %v5917_v16, %v5917_v16  ;;  %v5821_v51 = vmax.f32 %v5805_v62, 0.0 }
 0x3f5   :  { %6130 = vmatpush1.bf16.msra.mxu1 %v5963_v60  ;;  %6147 = vmatprep.mubr.bf16.mxu1 %v19600_v29  ;;  %v5939_v23 = vpack.c.bf16 %v5922_v9, %v5922_v9 }
 0x3f6   :  { %13056 = vmatprep.subr.msk.bf16.mxu1 %vm468_vm0, %v5935_v1  ;;  %v5975_v10 = vsel %vm468_vm0, %v5934_v34, 0  ;;  %v5921_v19 = vmul.f32 %v16796_v14, %v5821_v51 }
 0x3f8   :  { %13055 = vmatmul.mubr.msk.bf16.vlgmr.msra.gmra.mxu0 %vm5940_vm6, %v16724_v45  ;;  %v5938_v35 = vpack.c.bf16 %v5921_v19, %v5921_v19 }
 0x3f9   :  { %6253 = vmatpush1.bf16.msra.mxu0 %v5981_v58  ;;  %6270 = vmatprep.mubr.bf16.mxu0 %v19600_v29 }
 0x3fa   :  { %v5987_v61 = vsel %vm468_vm0, %v5938_v35, 0 }
 0x3fc   :  { %13053 = vmatmul.mubr.msk.bf16.vlgmr.msra.gmra.mxu1 %vm5940_vm6, %v16724_v45 }
 0x3fd   :  { %6212 = vmatpush1.bf16.msra.mxu1 %v5975_v10  ;;  %6229 = vmatprep.mubr.bf16.mxu1 %v19600_v29 }
 0x3fe   :  { %13060 = vmatprep.subr.msk.bf16.mxu1 %vm468_vm0, %v5939_v23 }
 0x400   :  { %13059 = vmatmul.mubr.msk.bf16.vlgmr.msra.gmra.mxu0 %vm5940_vm6, %v16724_v45 }
 0x404   :  { %13057 = vmatmul.mubr.msk.bf16.vlgmr.msra.gmra.mxu1 %vm5940_vm6, %v16724_v45 }
 0x405   :  { %6294 = vmatpush1.bf16.msra.mxu1 %v5987_v61  ;;  %6311 = vmatprep.mubr.bf16.mxu1 %v19600_v29 }
 0x40c   :  { %13061 = vmatmul.mubr.msk.bf16.vlgmr.msra.gmra.mxu1 %vm5940_vm6, %v16724_v45 }
 0x42b   :  { %v5569_v15 = vpop.f32.mrf.mxu0 }
 0x42c   :  { %5707 = vst [vmem:[%s19151_s15 + $0x40] sm:$0xff] %v5569_v15 }
 0x42d   :  { %v5571_v48 = vpop.f32.mrf.mxu0 }
 0x42e   :  { %5708 = vst [vmem:[%s19151_s15 + $0x48] sm:$0xff] %v5571_v48 }
 0x42f   :  { %v5573_v37 = vpop.f32.mrf.mxu0 }
 0x431   :  { %v5574_v13 = vpop.f32.mrf.mxu0 }
 0x437   :  { %v5610_v7 = vpop.f32.mrf.mxu1 }
 0x438   :  { %5709 = vst [vmem:[%s19151_s15 + $0x50] sm:$0xff] %v5610_v7 }
 0x439   :  { %v5612_v28 = vpop.f32.mrf.mxu1 }
 0x43a   :  { %5710 = vst [vmem:[%s19151_s15 + $0x58] sm:$0xff] %v5612_v28 }
 0x43b   :  { %v5614_v45 = vpop.f32.mrf.mxu1 }
 0x43d   :  { %v5615_v21 = vpop.f32.mrf.mxu1 }
 0x4a0   :  { %v5651_v49 = vpop.f32.mrf.mxu0 }
 0x4a1   :  { %5711 = vst [vmem:[%s19151_s15 + $0x60] sm:$0xff] %v5651_v49 }
 0x4a2   :  { %v5653_v42 = vpop.f32.mrf.mxu0 }
 0x4a3   :  { %5712 = vst [vmem:[%s19151_s15 + $0x68] sm:$0xff] %v5653_v42 }
 0x4a4   :  { %v5655_v24 = vpop.f32.mrf.mxu0 }
 0x4a6   :  { %v5656_v41 = vpop.f32.mrf.mxu0 }
 0x4a8   :  { %v16835_v52 = vpop.f32.mrf.mxu0 }
 0x4a9   :  { %v6320_v2 = vmul.f32 %v16835_v52, %v16562_v18 }
 0x4aa   :  { %v16837_v59 = vpop.f32.mrf.mxu0 }
 0x4ab   :  { %v6321_v39 = vmul.f32 %v16837_v59, %v16558_v38 }
 0x4ac   :  { %v5692_v46 = vpop.f32.mrf.mxu1  ;;  %v6030_v30 = vpop.f32.mrf.mxu0 }
 0x4ad   :  { %5713 = vst [vmem:[%s19151_s15 + $0x70] sm:$0xff] %v5692_v46  ;;  %v6336_v60 = vadd.f32 %v6321_v39, %v6320_v2 }
 0x4ae   :  { %v5694_v31 = vpop.f32.mrf.mxu1  ;;  %v6031_v32 = vpop.f32.mrf.mxu0 }
 0x4af   :  { %5714 = vst [vmem:[%s19151_s15 + $0x78] sm:$0xff] %v5694_v31 }
 0x4b0   :  { %v5696_v47 = vpop.f32.mrf.mxu1  ;;  %v16845_v6 = vpop.f32.mrf.mxu0 }
 0x4b1   :  { %v6324_v58 = vmul.f32 %v16845_v6, %v16572_v0 }
 0x4b2   :  { %v5697_v63 = vpop.f32.mrf.mxu1  ;;  %v16851_v11 = vpop.f32.mrf.mxu0 }
 0x4b3   :  { %v6325_v61 = vmul.f32 %v16851_v11, %v16568_v55 }
 0x4b4   :  { %v16853_v1 = vpop.f32.mrf.mxu1  ;;  %v6112_v27 = vpop.f32.mrf.mxu0 }
 0x4b5   :  { %v6322_v16 = vmul.f32 %v16853_v1, %v16596_v20 }
 0x4b6   :  { %v16857_v54 = vpop.f32.mrf.mxu1  ;;  %v6113_v62 = vpop.f32.mrf.mxu0 }
 0x4b7   :  { %v6337_v34 = vadd.f32 %v6336_v60, %v6322_v16  ;;  %v6323_v9 = vmul.f32 %v16857_v54, %v16585_v25 }
 0x4b8   :  { %v6071_v51 = vpop.f32.mrf.mxu1  ;;  %v16863_v10 = vpop.f32.mrf.mxu0 }
 0x4b9   :  { %v6338_v23 = vadd.f32 %v6337_v34, %v6323_v9  ;;  %v6328_v21 = vmul.f32 %v16863_v10, %v16604_v12 }
 0x4ba   :  { %v6072_v19 = vpop.f32.mrf.mxu1  ;;  %v16865_v35 = vpop.f32.mrf.mxu0 }
 0x4bb   :  { %v6339_v15 = vadd.f32 %v6338_v23, %v6324_v58  ;;  %v6329_v32 = vmul.f32 %v16865_v35, %v16581_v57 }
 0x4bc   :  { %v6149_v48 = vpop.f32.mrf.mxu1  ;;  %v6194_v37 = vpop.f32.mrf.mxu0 }
 0x4bd   :  { %v6326_v13 = vmul.f32 %v6149_v48, %v16676_v5  ;;  %v6340_v7 = vadd.f32 %v6339_v15, %v6325_v61 }
 0x4be   :  { %v6151_v28 = vpop.f32.mrf.mxu1  ;;  %v6195_v45 = vpop.f32.mrf.mxu0 }
 0x4bf   :  { %v6341_v49 = vadd.f32 %v6340_v7, %v6326_v13  ;;  %v6327_v42 = vmul.f32 %v6151_v28, %v16600_v40 }
 0x4c0   :  { %v6153_v24 = vpop.f32.mrf.mxu1  ;;  %v16873_v41 = vpop.f32.mrf.mxu0 }
 0x4c1   :  { %v6342_v46 = vadd.f32 %v6341_v49, %v6327_v42  ;;  %v6332_v62 = vmul.f32 %v16873_v41, %v16758_v50 }
 0x4c2   :  { %v6154_v30 = vpop.f32.mrf.mxu1  ;;  %v16875_v31 = vpop.f32.mrf.mxu0 }
 0x4c3   :  { %v6343_v47 = vadd.f32 %v6342_v46, %v6328_v21  ;;  %v6333_v19 = vmul.f32 %v16875_v31, %v16669_v44  ;;  %v16890_v46 = vpop.permute.xlu0 %6425 }
 0x4c4   :  { %v6231_v2 = vpop.f32.mrf.mxu1  ;;  %v6276_v39 = vpop.f32.mrf.mxu0 }
 0x4c5   :  { %v6330_v63 = vmul.f32 %v6231_v2, %v16772_v33  ;;  %v6344_v27 = vadd.f32 %v6343_v47, %v6329_v32 }
 0x4c6   :  { %v6233_v60 = vpop.f32.mrf.mxu1  ;;  %v6277_v16 = vpop.f32.mrf.mxu0 }
 0x4c7   :  { %v6345_v58 = vadd.f32 %v6344_v27, %v6330_v63  ;;  %v6331_v34 = vmul.f32 %v6233_v60, %v16750_v53  ;;  %v16892_v30 = vpop.permute.xlu0 %8615 }
 0x4c8   :  { %v6235_v9 = vpop.f32.mrf.mxu1 }
 0x4c9   :  { %v6346_v51 = vadd.f32 %v6345_v58, %v6331_v34 }
 0x4ca   :  { %v6236_v23 = vpop.f32.mrf.mxu1 }
 0x4cb   :  { %v6347_v61 = vadd.f32 %v6346_v51, %v6332_v62  ;;  %v16894_v32 = vpop.permute.xlu0 %9839 }
 0x4cc   :  { %v6313_v15 = vpop.f32.mrf.mxu1 }
 0x4cd   :  { %v6334_v37 = vmul.f32 %v6313_v15, %v16796_v14  ;;  %v6348_v13 = vadd.f32 %v6347_v61, %v6333_v19 }
 0x4ce   :  { %v16886_v7 = vpop.f32.mrf.mxu1 }
 0x4cf   :  { %v6349_v45 = vadd.f32 %v6348_v13, %v6334_v37  ;;  %v6335_v21 = vmul.f32 %v16886_v7, %v16785_v22  ;;  %v16896_v47 = vpop.permute.xlu0 %9567 }
 0x4d0   :  { %v6317_v49 = vpop.f32.mrf.mxu1 }
 0x4d1   :  { %v6350_v42 = vadd.f32 %v6349_v45, %v6335_v21 }
 0x4d2   :  { %v6318_v24 = vpop.f32.mrf.mxu1 }
 0x4d3   :  { %6351 = vadd.xlane.f32.xlu0 %v6350_v42  ;;  %v16898_v39 = vpop.permute.xlu0 %9295 }
 0x4d7   :  { %v16900_v63 = vpop.permute.xlu0 %9023 }
 0x4d8   :  { %19607 = vst [vmem:[#allocation12_spill] sm:$0xff] %v16900_v63 }
 0x55c   :  { %v6352_v27 = vpop.xlane.xlu0 %6351 }
 0x55d   :  { %v6353_v16 = vmul.f32 0.0009765625, %v6352_v27 }
 0x55f   :  { %v16903_v62 = vsub.f32 %v16835_v52, %v6353_v16  ;;  %v16906_v58 = vsub.f32 %v16837_v59, %v6353_v16  ;;  %v16909_v34 = vsub.f32 %v16853_v1, %v6353_v16  ;;  %v16916_v23 = vsub.f32 %v16857_v54, %v6353_v16 }
 0x560   :  { %v16919_v19 = vsub.f32 %v16845_v6, %v6353_v16  ;;  %v16924_v1 = vsub.f32 %v16851_v11, %v6353_v16  ;;  %v16928_v13 = vsub.f32 %v6149_v48, %v6353_v16  ;;  %v16932_v6 = vsub.f32 %v6151_v28, %v6353_v16 }
 0x561   :  { %v6370_v9 = vmul.f32 %v16903_v62, %v16562_v18  ;;  %v6371_v51 = vmul.f32 %v16906_v58, %v16558_v38  ;;  %v6372_v52 = vmul.f32 %v16909_v34, %v16596_v20  ;;  %v6373_v37 = vmul.f32 %v16916_v23, %v16585_v25 }
 0x562   :  { %v6374_v54 = vmul.f32 %v16919_v19, %v16572_v0  ;;  %v6375_v49 = vmul.f32 %v16924_v1, %v16568_v55  ;;  %v16937_v11 = vsub.f32 %v16863_v10, %v6353_v16  ;;  %v6376_v27 = vmul.f32 %v16928_v13, %v16676_v5 }
 0x563   :  { %v6386_v59 = vmul.f32 %v6370_v9, %v6370_v9  ;;  %v6387_v61 = vmul.f32 %v6371_v51, %v6371_v51  ;;  %v6388_v45 = vmul.f32 %v6372_v52, %v6372_v52  ;;  %v6389_v42 = vmul.f32 %v6373_v37, %v6373_v37 }
 0x564   :  { %v6390_v48 = vmul.f32 %v6374_v54, %v6374_v54  ;;  %v6363_v51 = vsub.f32 %v16865_v35, %v6353_v16  ;;  %v6377_v52 = vmul.f32 %v16932_v6, %v16600_v40  ;;  %v6391_v28 = vmul.f32 %v6375_v49, %v6375_v49 }
 0x565   :  { %v6402_v21 = vadd.f32 %v6387_v61, %v6386_v59  ;;  %v6364_v61 = vsub.f32 %v6231_v2, %v6353_v16  ;;  %v6378_v37 = vmul.f32 %v16937_v11, %v16604_v12  ;;  %v6365_v10 = vsub.f32 %v6233_v60, %v6353_v16 }
 0x566   :  { %v6379_v56 = vmul.f32 %v6363_v51, %v16581_v57  ;;  %v6393_v26 = vmul.f32 %v6377_v52, %v6377_v52  ;;  %v6366_v54 = vsub.f32 %v16873_v41, %v6353_v16  ;;  %v6367_v49 = vsub.f32 %v16875_v31, %v6353_v16 }
 0x567   :  { %v6403_v24 = vadd.f32 %v6402_v21, %v6388_v45  ;;  %v6392_v45 = vmul.f32 %v6376_v27, %v6376_v27  ;;  %v6380_v35 = vmul.f32 %v6364_v61, %v16772_v33  ;;  %v6381_v2 = vmul.f32 %v6365_v10, %v16750_v53 }
 0x568   :  { %v6368_v36 = vsub.f32 %v6313_v15, %v6353_v16  ;;  %v6382_v27 = vmul.f32 %v6366_v54, %v16758_v50  ;;  %v6369_v52 = vsub.f32 %v16886_v7, %v6353_v16 }
 0x569   :  { %v6404_v9 = vadd.f32 %v6403_v24, %v6389_v42  ;;  %v6394_v42 = vmul.f32 %v6378_v37, %v6378_v37  ;;  %v6396_v60 = vmul.f32 %v6380_v35, %v6380_v35  ;;  %v6397_v41 = vmul.f32 %v6381_v2, %v6381_v2 }
 0x56a   :  { %v6384_v37 = vmul.f32 %v6368_v36, %v16796_v14  ;;  %v6385_v31 = vmul.f32 %v6369_v52, %v16785_v22 }
 0x56b   :  { %v6405_v59 = vadd.f32 %v6404_v9, %v6390_v48  ;;  %v6395_v48 = vmul.f32 %v6379_v56, %v6379_v56 }
 0x56d   :  { %v6406_v21 = vadd.f32 %v6405_v59, %v6391_v28  ;;  %v6383_v59 = vmul.f32 %v6367_v49, %v16669_v44 }
 0x56f   :  { %v6407_v17 = vadd.f32 %v6406_v21, %v6392_v45  ;;  %v6399_v21 = vmul.f32 %v6383_v59, %v6383_v59 }
 0x571   :  { %v6408_v24 = vadd.f32 %v6407_v17, %v6393_v26  ;;  %v6398_v17 = vmul.f32 %v6382_v27, %v6382_v27 }
 0x573   :  { %v6409_v9 = vadd.f32 %v6408_v24, %v6394_v42  ;;  %v6400_v42 = vmul.f32 %v6384_v37, %v6384_v37  ;;  %v6401_v24 = vmul.f32 %v6385_v31, %v6385_v31  ;;  %v6430_v37 = vmul.f32 %v16890_v46, %v16909_v34 }
 0x574   :  { %v6433_v31 = vmul.f32 %v16890_v46, %v16924_v1  ;;  %v6437_v34 = vmul.f32 %v16890_v46, %v6363_v51  ;;  %v6441_v1 = vmul.f32 %v16890_v46, %v6367_v49 }
 0x575   :  { %v6410_v28 = vadd.f32 %v6409_v9, %v6395_v48  ;;  %v16956_v48 = vpop.permute.xlu1 %6463 }
 0x577   :  { %v6411_v45 = vadd.f32 %v6410_v28, %v6396_v60 }
 0x579   :  { %v6412_v26 = vadd.f32 %v6411_v45, %v6397_v41  ;;  %v16958_v7 = vpop.permute.xlu1 %8479  ;;  %v6429_v45 = vmul.f32 %v16890_v46, %v16906_v58  ;;  %v6436_v58 = vmul.f32 %v16890_v46, %v16937_v11 }
 0x57b   :  { %v6413_v56 = vadd.f32 %v6412_v26, %v6398_v17  ;;  %v6431_v17 = vmul.f32 %v16890_v46, %v16916_v23  ;;  %v6432_v26 = vmul.f32 %v16890_v46, %v16919_v19  ;;  %v6439_v23 = vmul.f32 %v16890_v46, %v6365_v10 }
 0x57c   :  { %v6440_v19 = vmul.f32 %v16890_v46, %v6366_v54 }
 0x57d   :  { %v6414_v15 = vadd.f32 %v6413_v56, %v6399_v21  ;;  %v16960_v16 = vpop.permute.xlu1 %10111  ;;  %v6434_v21 = vmul.f32 %v16890_v46, %v16928_v13  ;;  %v6438_v56 = vmul.f32 %v16890_v46, %v6364_v61  ;;  %v6443_v13 = vmul.f32 %v16890_v46, %v6369_v52 }
 0x57f   :  { %v6415_v43 = vadd.f32 %v6414_v15, %v6400_v42  ;;  %v6442_v15 = vmul.f32 %v16890_v46, %v6368_v36 }
 0x581   :  { %v6416_v35 = vadd.f32 %v6415_v43, %v6401_v24  ;;  %v16962_v2 = vpop.permute.xlu1 %9975  ;;  %v6428_v43 = vmul.f32 %v16890_v46, %v16903_v62  ;;  %v6435_v62 = vmul.f32 %v16890_v46, %v16932_v6 }
 0x583   :  { %6417 = vadd.xlane.f32.xlu1 %v6416_v35 }
 0x585   :  { %v16964_v9 = vpop.permute.xlu1 %9703 }
 0x586   :  { %19608 = vst [vmem:[#allocation13_spill] sm:$0xff] %v16964_v9 }
 0x589   :  { %v16966_v27 = vpop.permute.xlu1 %9431 }
 0x58a   :  { %19609 = vst [vmem:[#allocation14_spill] sm:$0xff] %v16966_v27 }
 0x58d   :  { %v16968_v60 = vpop.permute.xlu1 %9159 }
 0x58e   :  { %19610 = vst [vmem:[#allocation15_spill] sm:$0xff] %v16968_v60 }
 0x60c   :  { %v6418_v28 = vpop.xlane.xlu1 %6417 }
 0x60d   :  { %v6419_v59 = vmul.f32 0.0009765625, %v6418_v28 }
 0x60f   :  { %v6420_v41 = vadd.f32 1e-05, %v6419_v59 }
 0x611   :  { %14083 = vrsqrt.f32 %v6420_v41 }
 0x61e   :  { %v14084_v42 = vpop.eup %14083 }
 0x61f   :  { %v6446_v24 = vmul.f32 %v14084_v42, %v6430_v37  ;;  %v6447_v6 = vmul.f32 %v14084_v42, %v6431_v17  ;;  %v6444_v35 = vmul.f32 %v14084_v42, %v6428_v43  ;;  %v6445_v28 = vmul.f32 %v14084_v42, %v6429_v45 }
 0x620   :  { %v6448_v11 = vmul.f32 %v14084_v42, %v6432_v26  ;;  %v6449_v59 = vmul.f32 %v14084_v42, %v6433_v31  ;;  %v6450_v51 = vmul.f32 %v14084_v42, %v6434_v21  ;;  %v6451_v41 = vmul.f32 %v14084_v42, %v6435_v62 }
 0x621   :  { %v6468_v61 = vadd.f32 %v16956_v48, %v6446_v24  ;;  %v6469_v10 = vadd.f32 %v16956_v48, %v6447_v6  ;;  %v6466_v54 = vadd.f32 %v16956_v48, %v6444_v35  ;;  %v6467_v49 = vadd.f32 %v16956_v48, %v6445_v28 }
 0x622   :  { %v6470_v36 = vadd.f32 %v16956_v48, %v6448_v11  ;;  %v6471_v46 = vadd.f32 %v16956_v48, %v6449_v59  ;;  %v6472_v52 = vadd.f32 %v16956_v48, %v6450_v51  ;;  %v6473_v43 = vadd.f32 %v16956_v48, %v6451_v41 }
 0x623   :  { %v6484_v45 = vmax.f32 %v6468_v61, 0.0  ;;  %v6485_v37 = vmax.f32 %v6469_v10, 0.0  ;;  %v6482_v17 = vmax.f32 %v6466_v54, 0.0  ;;  %v6483_v26 = vmax.f32 %v6467_v49, 0.0 }
 0x624   :  { %v6486_v31 = vmax.f32 %v6470_v36, 0.0  ;;  %v6487_v21 = vmax.f32 %v6471_v46, 0.0  ;;  %v6488_v62 = vmax.f32 %v6472_v52, 0.0  ;;  %v6489_v24 = vmax.f32 %v6473_v43, 0.0 }
 0x625   :  { %v6500_v6 = vmul.f32 %v6484_v45, %v16596_v20  ;;  %v6501_v35 = vmul.f32 %v6485_v37, %v16585_v25  ;;  %v6498_v28 = vmul.f32 %v6482_v17, %v16562_v18  ;;  %v6499_v11 = vmul.f32 %v6483_v26, %v16558_v38 }
 0x626   :  { %v6502_v59 = vmul.f32 %v6486_v31, %v16572_v0  ;;  %v6503_v51 = vmul.f32 %v6487_v21, %v16568_v55  ;;  %v6504_v41 = vmul.f32 %v6488_v62, %v16676_v5  ;;  %v6505_v61 = vmul.f32 %v6489_v24, %v16600_v40 }
 0x627   :  { %v17011_v10 = vpack.c.bf16 %v6501_v35, %v6500_v6  ;;  %v17013_v54 = vpack.c.bf16 %v6499_v11, %v6498_v28  ;;  %v17015_v49 = vpack.c.bf16 %v6500_v6, %v6499_v11  ;;  %v19611_v20 = vmov 0.0  }
 0x628   :  { %v17018_v25 = vpack.c.bf16 %v6498_v28, %v19611_v20  ;;  %v17020_v18 = vpack.c.bf16 %v6503_v51, %v6502_v59  ;;  %v17022_v38 = vpack.c.bf16 %v6502_v59, %v6501_v35  ;;  %v17024_v0 = vpack.c.bf16 %v6505_v61, %v6504_v41 }
 0x629   :  { %v6452_v55 = vmul.f32 %v14084_v42, %v6436_v58  ;;  %8465 = vrot.lane.b32.xlu1 %v17011_v10, %s19490_s3  ;;  %8463 = vrot.lane.b32.xlu0 %v17013_v54, %s19490_s3  ;;  %v6453_v40 = vmul.f32 %v14084_v42, %v6437_v34  ;;  %v17030_v5 = vpack.c.bf16 %v6504_v41, %v6503_v51 }
 0x62a   :  { %v6454_v36 = vmul.f32 %v14084_v42, %v6438_v56  ;;  %v6455_v52 = vmul.f32 %v14084_v42, %v6439_v23  ;;  %v6456_v43 = vmul.f32 %v14084_v42, %v6440_v19  ;;  %v6457_v45 = vmul.f32 %v14084_v42, %v6441_v1 }
 0x62b   :  { %v6474_v46 = vadd.f32 %v16956_v48, %v6452_v55  ;;  %v6475_v37 = vadd.f32 %v16956_v48, %v6453_v40  ;;  %v6458_v58 = vmul.f32 %v14084_v42, %v6442_v15  ;;  %v6459_v26 = vmul.f32 %v14084_v42, %v6443_v13 }
 0x62c   :  { %v6476_v17 = vadd.f32 %v16956_v48, %v6454_v36  ;;  %v6477_v21 = vadd.f32 %v16956_v48, %v6455_v52  ;;  %v6478_v62 = vadd.f32 %v16956_v48, %v6456_v43  ;;  %v6479_v34 = vadd.f32 %v16956_v48, %v6457_v45 }
 0x62d   :  { %v6490_v31 = vmax.f32 %v6474_v46, 0.0  ;;  %8601 = vrot.lane.b32.xlu1 %v17011_v10, %s19483_s2  ;;  %8599 = vrot.lane.b32.xlu0 %v17013_v54, %s19483_s2  ;;  %v6491_v56 = vmax.f32 %v6475_v37, 0.0  ;;  %v6480_v19 = vadd.f32 %v16956_v48, %v6458_v58  ;;  %v6481_v1 = vadd.f32 %v16956_v48, %v6459_v26 }
 0x62e   :  { %v6492_v23 = vmax.f32 %v6476_v17, 0.0  ;;  %v6493_v15 = vmax.f32 %v6477_v21, 0.0  ;;  %v6494_v13 = vmax.f32 %v6478_v62, 0.0  ;;  %v6495_v24 = vmax.f32 %v6479_v34, 0.0 }
 0x62f   :  { %v6506_v42 = vmul.f32 %v6490_v31, %v16604_v12  ;;  %v6507_v6 = vmul.f32 %v6491_v56, %v16581_v57  ;;  %v6496_v28 = vmax.f32 %v6480_v19, 0.0  ;;  %v6497_v11 = vmax.f32 %v6481_v1, 0.0 }
 0x630   :  { %v6508_v35 = vmul.f32 %v6492_v23, %v16772_v33  ;;  %v6509_v51 = vmul.f32 %v6493_v15, %v16750_v53  ;;  %v6510_v41 = vmul.f32 %v6494_v13, %v16758_v50  ;;  %v6511_v20 = vmul.f32 %v6495_v24, %v16669_v44 }
 0x631   :  { %v17047_v59 = vpack.c.bf16 %v6506_v42, %v6505_v61  ;;  %8241 = vrot.lane.b32.xlu1 %v17015_v49, %s19432_s18  ;;  %8239 = vrot.lane.b32.xlu0 %v17018_v25, %s19432_s18  ;;  %v17056_v12 = vpack.c.bf16 %v6507_v6, %v6506_v42  ;;  %v6512_v33 = vmul.f32 %v6496_v28, %v16796_v14 }
 0x632   :  { %v17058_v57 = vpack.c.bf16 %v6508_v35, %v6507_v6  ;;  %v17061_v48 = vpack.c.bf16 %v6509_v51, %v6508_v35  ;;  %v17063_v61 = vpack.c.bf16 %v6511_v20, %v6510_v41  ;;  %v17065_v53 = vpack.c.bf16 %v6510_v41, %v6509_v51 }
 0x633   :  { %v17068_v44 = vmul.f32 %v6497_v11, %v16785_v22  ;;  %v17070_v50 = vpack.c.bf16 %v6512_v33, %v6511_v20 }
 0x635   :  { %v17073_v55 = vpack.c.bf16 %v17068_v44, %v6512_v33  ;;  %8603 = vrot.lane.b32.xlu1 %v17020_v18, %s19483_s2  ;;  %8467 = vrot.lane.b32.xlu0 %v17020_v18, %s19490_s3 }
 0x639   :  { %7969 = vrot.lane.b32.xlu1 %v17015_v49, %s19495_s0  ;;  %7967 = vrot.lane.b32.xlu0 %v17018_v25, %s19495_s0 }
 0x63d   :  { %8105 = vrot.lane.b32.xlu1 %v17015_v49, %s19435_s24  ;;  %8103 = vrot.lane.b32.xlu0 %v17018_v25, %s19435_s24 }
 0x641   :  { %7695 = vrot.lane.b32.xlu1 %v17018_v25, %s19441_s25  ;;  %8243 = vrot.lane.b32.xlu0 %v17022_v38, %s19432_s18 }
 0x645   :  { %7831 = vrot.lane.b32.xlu1 %v17018_v25, %s19433_s20  ;;  %7697 = vrot.lane.b32.xlu0 %v17015_v49, %s19441_s25 }
 0x649   :  { %7971 = vrot.lane.b32.xlu1 %v17022_v38, %s19495_s0  ;;  %7833 = vrot.lane.b32.xlu0 %v17015_v49, %s19433_s20 }
 0x64d   :  { %7423 = vrot.lane.b32.xlu1 %v17018_v25, %s19420_s6  ;;  %8107 = vrot.lane.b32.xlu0 %v17022_v38, %s19435_s24 }
 0x651   :  { %7559 = vrot.lane.b32.xlu1 %v17018_v25, %s19438_s14  ;;  %7425 = vrot.lane.b32.xlu0 %v17015_v49, %s19420_s6 }
 0x655   :  { %7699 = vrot.lane.b32.xlu1 %v17022_v38, %s19441_s25  ;;  %7561 = vrot.lane.b32.xlu0 %v17015_v49, %s19438_s14 }
 0x659   :  { %7151 = vrot.lane.b32.xlu1 %v17018_v25, %s19422_s22  ;;  %7835 = vrot.lane.b32.xlu0 %v17022_v38, %s19433_s20 }
 0x65d   :  { %7287 = vrot.lane.b32.xlu1 %v17018_v25, %s19440_s26  ;;  %7153 = vrot.lane.b32.xlu0 %v17015_v49, %s19422_s22 }
 0x661   :  { %7427 = vrot.lane.b32.xlu1 %v17022_v38, %s19420_s6  ;;  %7289 = vrot.lane.b32.xlu0 %v17015_v49, %s19440_s26 }
 0x665   :  { %6879 = vrot.lane.b32.xlu1 %v17018_v25, %s19423_s21  ;;  %7563 = vrot.lane.b32.xlu0 %v17022_v38, %s19438_s14 }
 0x669   :  { %7015 = vrot.lane.b32.xlu1 %v17018_v25, %s19444_s27  ;;  %6881 = vrot.lane.b32.xlu0 %v17015_v49, %s19423_s21 }
 0x66d   :  { %7155 = vrot.lane.b32.xlu1 %v17022_v38, %s19422_s22  ;;  %7017 = vrot.lane.b32.xlu0 %v17015_v49, %s19444_s27 }
 0x671   :  { %6607 = vrot.lane.b32.xlu1 %v17018_v25, %s19612_s10  ;;  %7291 = vrot.lane.b32.xlu0 %v17022_v38, %s19440_s26 }
 0x675   :  { %6743 = vrot.lane.b32.xlu1 %v17018_v25, %s19613_s19  ;;  %6609 = vrot.lane.b32.xlu0 %v17015_v49, %s19612_s10 }
 0x679   :  { %6883 = vrot.lane.b32.xlu1 %v17022_v38, %s19423_s21  ;;  %6745 = vrot.lane.b32.xlu0 %v17015_v49, %s19613_s19 }
 0x67d   :  { %6611 = vrot.lane.b32.xlu1 %v17022_v38, %s19612_s10  ;;  %7019 = vrot.lane.b32.xlu0 %v17022_v38, %s19444_s27 }
 0x681   :  { %10095 = vrot.lane.b32.xlu1 %v17013_v54, %s19424_s29  ;;  %6747 = vrot.lane.b32.xlu0 %v17022_v38, %s19613_s19 }
 0x685   :  { %9823 = vrot.lane.b32.xlu1 %v17013_v54, %s19452_s5  ;;  %10097 = vrot.lane.b32.xlu0 %v17011_v10, %s19424_s29 }
 0x689   :  { %9959 = vrot.lane.b32.xlu1 %v17013_v54, %s19427_s13  ;;  %9825 = vrot.lane.b32.xlu0 %v17011_v10, %s19452_s5 }
 0x68d   :  { %10099 = vrot.lane.b32.xlu1 %v17020_v18, %s19424_s29  ;;  %9961 = vrot.lane.b32.xlu0 %v17011_v10, %s19427_s13 }
 0x691   :  { %9553 = vrot.lane.b32.xlu1 %v17011_v10, %s19429_s28  ;;  %9551 = vrot.lane.b32.xlu0 %v17013_v54, %s19429_s28 }
 0x695   :  { %9689 = vrot.lane.b32.xlu1 %v17011_v10, %s19426_s17  ;;  %9687 = vrot.lane.b32.xlu0 %v17013_v54, %s19426_s17 }
 0x699   :  { %9963 = vrot.lane.b32.xlu1 %v17020_v18, %s19427_s13  ;;  %9827 = vrot.lane.b32.xlu0 %v17020_v18, %s19452_s5 }
 0x69b   :  { %v8466_v22 = vpop.permute.xlu1 %8465  ;;  %v8464_v14 = vpop.permute.xlu0 %8463 }
 0x69c   :  { %v8482_v49 = vrot.slane %v8466_v22, 4  ;;  %v8481_v25 = vrot.slane %v8464_v14, 4 }
 0x69d   :  { %9281 = vrot.lane.b32.xlu1 %v17011_v10, %s19430_s23  ;;  %9279 = vrot.lane.b32.xlu0 %v17013_v54, %s19430_s23 }
 0x69e   :  { %v8490_v36 = vsel %vm468_vm0, %v8481_v25, %v8482_v49 }
 0x69f   :  { %v8602_v38 = vpop.permute.xlu1 %8601  ;;  %v8600_v40 = vpop.permute.xlu0 %8599  ;;  %v8491_v45 = vsel %vm2339_vm1, %v8464_v14, %v8490_v36 }
 0x6a0   :  { %v8618_v46 = vrot.slane %v8602_v38, 4  ;;  %v8617_v52 = vrot.slane %v8600_v40, 4 }
 0x6a1   :  { %9417 = vrot.lane.b32.xlu1 %v17011_v10, %s19614_s4  ;;  %9415 = vrot.lane.b32.xlu0 %v17013_v54, %s19614_s4 }
 0x6a2   :  { %v8626_v43 = vsel %vm468_vm0, %v8617_v52, %v8618_v46 }
 0x6a3   :  { %v8627_v37 = vsel %vm2476_vm2, %v8600_v40, %v8626_v43  ;;  %v8242_v17 = vpop.permute.xlu1 %8241  ;;  %v8240_v58 = vpop.permute.xlu0 %8239 }
 0x6a4   :  { %v13418_v26 = vcombine.low %v8491_v45, %v8627_v37  ;;  %v8258_v31 = vrot.slane %v8242_v17, 4  ;;  %v8257_v21 = vrot.slane %v8240_v58, 4  ;;  %v13419_v62 = vcombine.high %v8491_v45, %v8627_v37 }
 0x6a5   :  { %9691 = vrot.lane.b32.xlu1 %v17020_v18, %s19426_s17  ;;  %9555 = vrot.lane.b32.xlu0 %v17020_v18, %s19429_s28 }
 0x6a6   :  { %v8266_v34 = vsel %vm468_vm0, %v8257_v21, %v8258_v31  ;;  %11508 = vmatprep.subr.bf16.mxu0 %v13419_v62 }
 0x6a7   :  { %v8267_v56 = vsel %vm2114_vm3, %v8240_v58, %v8266_v34  ;;  %v17197_v23 = vpop.permute.xlu1 %8603  ;;  %11509 = vmatpush1.bf16.msra.mxu0 %v13418_v26  ;;  %v17199_v19 = vpop.permute.xlu0 %8467 }
 0x6a8   :  { %v13402_v1 = vcombine.low %v8267_v56, %v17013_v54  ;;  %v19339_v42 = vrot.slane %v17197_v23, 4  ;;  %v19340_v15 = vrot.slane %v17199_v19, 4  ;;  %v13403_v13 = vcombine.high %v8267_v56, %v17013_v54 }
 0x6a9   :  { %9009 = vrot.lane.b32.xlu1 %v17011_v10, %s19615_s12  ;;  %9007 = vrot.lane.b32.xlu0 %v17013_v54, %s19615_s12 }
 0x6aa   :  { %11510 = vmatprep.subr.bf16.mxu0 %v13403_v13  ;;  %v8492_v24 = vsel %vm468_vm0, %v8482_v49, %v19340_v15  ;;  %v8628_v6 = vsel %vm468_vm0, %v8618_v46, %v19339_v42 }
 0x6ab   :  { %v17215_v35 = vpop.permute.xlu1 %7969  ;;  %11511 = vmatpush1.bf16.msra.mxu0 %v13402_v1  ;;  %v7968_v28 = vpop.permute.xlu0 %7967  ;;  %v8493_v11 = vsel %vm2339_vm1, %v8466_v22, %v8492_v24  ;;  %v8629_v51 = vsel %vm2476_vm2, %v8602_v38, %v8628_v6 }
 0x6ac   :  { %v7986_v41 = vrot.slane %v17215_v35, 4  ;;  %v7985_v20 = vrot.slane %v7968_v28, 4  ;;  %v13420_v33 = vcombine.low %v8493_v11, %v8629_v51  ;;  %v13421_v14 = vcombine.high %v8493_v11, %v8629_v51 }
 0x6ad   :  { %9145 = vrot.lane.b32.xlu1 %v17011_v10, %s19616_s9  ;;  %9143 = vrot.lane.b32.xlu0 %v17013_v54, %s19616_s9 }
 0x6ae   :  { %11549 = vmatprep.subr.bf16.mxu1 %v13421_v14  ;;  %v7994_v22 = vsel %vm468_vm0, %v7985_v20, %v7986_v41 }
 0x6af   :  { %v17224_v49 = vpop.permute.xlu1 %8105  ;;  %11550 = vmatpush1.bf16.msra.mxu1 %v13420_v33  ;;  %v8104_v25 = vpop.permute.xlu0 %8103  ;;  %v7995_v46 = vsel %vm1840_vm4, %v7968_v28, %v7994_v22 }
 0x6b0   :  { %v8122_v38 = vrot.slane %v17224_v49, 4  ;;  %v8121_v40 = vrot.slane %v8104_v25, 4 }
 0x6b1   :  { %9419 = vrot.lane.b32.xlu1 %v17020_v18, %s19614_s4  ;;  %9283 = vrot.lane.b32.xlu0 %v17020_v18, %s19430_s23 }
 0x6b2   :  { %v8130_v36 = vsel %vm468_vm0, %v8121_v40, %v8122_v38 }
 0x6b3   :  { %v8131_v52 = vsel %vm1977_vm5, %v8104_v25, %v8130_v36  ;;  %v7696_v43 = vpop.permute.xlu1 %7695  ;;  %v17235_v45 = vpop.permute.xlu0 %8243 }
 0x6b4   :  { %v13386_v37 = vcombine.low %v7995_v46, %v8131_v52  ;;  %v19338_v58 = vrot.slane %v17235_v45, 4  ;;  %v13387_v26 = vcombine.high %v7995_v46, %v8131_v52  ;;  %v7713_v6 = vrot.slane %v7696_v43, 4 }
 0x6b5   :  { %8737 = vrot.lane.b32.xlu1 %v17011_v10, %s19617_s16  ;;  %8735 = vrot.lane.b32.xlu0 %v17013_v54, %s19617_s16 }
 0x6b6   :  { %11512 = vmatprep.subr.bf16.mxu0 %v13387_v26  ;;  %v8268_v21 = vsel %vm468_vm0, %v8258_v31, %v19338_v58  ;;  %v17258_v31 = vld [vmem:[%s19619_s1] sm:$0xff] }
 0x6b7   :  { %v7832_v62 = vpop.permute.xlu1 %7831  ;;  %11513 = vmatpush1.bf16.msra.mxu0 %v13386_v37  ;;  %v17245_v34 = vpop.permute.xlu0 %7697  ;;  %v8269_v56 = vsel %vm2114_vm3, %v8242_v17, %v8268_v21  ;;  %v17264_v11 = vcombine.high %v17258_v31, %v17258_v31 }
 0x6b8   :  { %v7714_v1 = vrot.slane %v17245_v34, 4  ;;  %v13404_v13 = vcombine.low %v8269_v56, %v17011_v10  ;;  %v13405_v24 = vcombine.high %v8269_v56, %v17011_v10  ;;  %v7849_v51 = vrot.slane %v7832_v62, 4 }
 0x6b9   :  { %8873 = vrot.lane.b32.xlu1 %v17011_v10, %s19618_s11  ;;  %8871 = vrot.lane.b32.xlu0 %v17013_v54, %s19618_s11 }
 0x6ba   :  { %11551 = vmatprep.subr.bf16.mxu1 %v13405_v24  ;;  %v7722_v54 = vsel %vm468_vm0, %v7713_v6, %v7714_v1  ;;  %13531 = vmatprep.mubr.msk.bf16.mxu0 %vm5318_vm8, %v17264_v11 }
 0x6bb   :  { %v17260_v17 = vpop.permute.xlu1 %7971  ;;  %11552 = vmatpush1.bf16.msra.mxu1 %v13404_v13  ;;  %v7834_v28 = vpop.permute.xlu0 %7833  ;;  %13533 = vmatprep.mubr.msk.bf16.mxu1 %vm5318_vm8, %v17264_v11  ;;  %v7723_v22 = vsel %vm19620_vm7, %v7696_v43, %v7722_v54  ;;  %vm19623_vm7 = vcmask 736256  }
 0x6bc   :  { %v19335_v10 = vrot.slane %v17260_v17, 4  ;;  %v7850_v20 = vrot.slane %v7834_v28, 4 }
 0x6bd   :  { %9147 = vrot.lane.b32.xlu1 %v17020_v18, %s19616_s9  ;;  %9011 = vrot.lane.b32.xlu0 %v17020_v18, %s19615_s12 }
 0x6be   :  { %v7858_v33 = vsel %vm468_vm0, %v7849_v51, %v7850_v20  ;;  %v7996_v37 = vsel %vm468_vm0, %v7986_v41, %v19335_v10 }
 0x6bf   :  { %v7424_v14 = vpop.permute.xlu1 %7423  ;;  %v17279_v25 = vpop.permute.xlu0 %8107  ;;  %v7859_v40 = vsel %vm19621_vm9, %v7832_v62, %v7858_v33  ;;  %v7997_v62 = vsel %vm1840_vm4, %v17215_v35, %v7996_v37  ;;  %vm19624_vm9 = vcmask 728064  }
 0x6c0   :  { %v19334_v36 = vrot.slane %v17279_v25, 4  ;;  %v13370_v46 = vcombine.low %v7723_v22, %v7859_v40  ;;  %v13371_v52 = vcombine.high %v7723_v22, %v7859_v40 }
 0x6c1   :  { %8605 = vrot.lane.b32.xlu1 %v17024_v0, %s19483_s2  ;;  %8469 = vrot.lane.b32.xlu0 %v17024_v0, %s19490_s3 }
 0x6c2   :  { %11514 = vmatprep.subr.bf16.mxu0 %v13371_v52  ;;  %v8132_v43 = vsel %vm468_vm0, %v8122_v38, %v19334_v36  ;;  %v7441_v38 = vrot.slane %v7424_v14, 4 }
 0x6c3   :  { %v7560_v26 = vpop.permute.xlu1 %7559  ;;  %11515 = vmatpush1.bf16.msra.mxu0 %v13370_v46  ;;  %v17294_v21 = vpop.permute.xlu0 %7425  ;;  %v8133_v41 = vsel %vm1977_vm5, %v17224_v49, %v8132_v43 }
 0x6c4   :  { %v7442_v56 = vrot.slane %v17294_v21, 4  ;;  %v13388_v13 = vcombine.low %v7997_v62, %v8133_v41  ;;  %v13389_v24 = vcombine.high %v7997_v62, %v8133_v41  ;;  %v7577_v35 = vrot.slane %v7560_v26, 4 }
 0x6c5   :  { %8875 = vrot.lane.b32.xlu1 %v17020_v18, %s19618_s11  ;;  %8739 = vrot.lane.b32.xlu0 %v17020_v18, %s19617_s16 }
 0x6c6   :  { %11553 = vmatprep.subr.bf16.mxu1 %v13389_v24  ;;  %v7450_v33 = vsel %vm468_vm0, %v7441_v38, %v7442_v56 }
 0x6c7   :  { %v17305_v6 = vpop.permute.xlu1 %7699  ;;  %11554 = vmatpush1.bf16.msra.mxu1 %v13388_v13  ;;  %v7562_v51 = vpop.permute.xlu0 %7561  ;;  %v7451_v52 = vsel %vm19622_vm10, %v7424_v14, %v7450_v33  ;;  %vm19625_vm10 = vcmask 89088  }
 0x6c8   :  { %v19331_v54 = vrot.slane %v17305_v6, 4  ;;  %v7578_v49 = vrot.slane %v7562_v51, 4 }
 0x6c9   :  { %8471 = vrot.lane.b32.xlu1 %v17056_v12, %s19490_s3  ;;  %8245 = vrot.lane.b32.xlu0 %v17030_v5, %s19432_s18 }
 0x6ca   :  { %v7586_v22 = vsel %vm468_vm0, %v7577_v35, %v7578_v49  ;;  %v7724_v13 = vsel %vm468_vm0, %v7714_v1, %v19331_v54 }
 0x6cb   :  { %v7152_v40 = vpop.permute.xlu1 %7151  ;;  %v17314_v46 = vpop.permute.xlu0 %7835  ;;  %v7587_v37 = vsel %vm19623_vm7, %v7560_v26, %v7586_v22  ;;  %v7725_v38 = vsel %vm19624_vm9, %v17245_v34, %v7724_v13  ;;  %vm19626_vm7 = vcmask 818176   ;;  %vm19627_vm9 = vcmask 809984  }
 0x6cc   :  { %v19330_v43 = vrot.slane %v17314_v46, 4  ;;  %v13354_v62 = vcombine.low %v7451_v52, %v7587_v37  ;;  %v13355_v41 = vcombine.high %v7451_v52, %v7587_v37 }
 0x6cd   :  { %7973 = vrot.lane.b32.xlu1 %v17030_v5, %s19495_s0  ;;  %8607 = vrot.lane.b32.xlu0 %v17056_v12, %s19483_s2 }
 0x6ce   :  { %11516 = vmatprep.subr.bf16.mxu0 %v13355_v41  ;;  %v7860_v14 = vsel %vm468_vm0, %v7850_v20, %v19330_v43  ;;  %v7169_v20 = vrot.slane %v7152_v40, 4 }
 0x6cf   :  { %v7288_v26 = vpop.permute.xlu1 %7287  ;;  %11517 = vmatpush1.bf16.msra.mxu0 %v13354_v62  ;;  %v17331_v24 = vpop.permute.xlu0 %7153  ;;  %v7861_v1 = vsel %vm19625_vm10, %v7834_v28, %v7860_v14  ;;  %vm19628_vm10 = vcmask 744448  }
 0x6d0   :  { %v7170_v35 = vrot.slane %v17331_v24, 4  ;;  %v13372_v33 = vcombine.low %v7725_v38, %v7861_v1  ;;  %v13373_v22 = vcombine.high %v7725_v38, %v7861_v1  ;;  %v7305_v62 = vrot.slane %v7288_v26, 4 }
 0x6d1   :  { %8247 = vrot.lane.b32.xlu1 %v17047_v59, %s19432_s18  ;;  %8109 = vrot.lane.b32.xlu0 %v17030_v5, %s19435_s24 }
 0x6d2   :  { %11555 = vmatprep.subr.bf16.mxu1 %v13373_v22  ;;  %v7178_v41 = vsel %vm468_vm0, %v7169_v20, %v7170_v35 }
 0x6d3   :  { %v17341_v52 = vpop.permute.xlu1 %7427  ;;  %11556 = vmatpush1.bf16.msra.mxu1 %v13372_v33  ;;  %v7290_v37 = vpop.permute.xlu0 %7289  ;;  %v7179_v1 = vsel %vm19626_vm7, %v7152_v40, %v7178_v41  ;;  %vm19629_vm7 = vcmask 736256  }
 0x6d4   :  { %v19333_v34 = vrot.slane %v17341_v52, 4  ;;  %v7306_v28 = vrot.slane %v7290_v37, 4 }
 0x6d5   :  { %7837 = vrot.lane.b32.xlu1 %v17030_v5, %s19433_s20  ;;  %7701 = vrot.lane.b32.xlu0 %v17030_v5, %s19441_s25 }
 0x6d6   :  { %v7314_v13 = vsel %vm468_vm0, %v7305_v62, %v7306_v28  ;;  %v7452_v20 = vsel %vm468_vm0, %v7442_v56, %v19333_v34 }
 0x6d7   :  { %v6880_v14 = vpop.permute.xlu1 %6879  ;;  %v17350_v38 = vpop.permute.xlu0 %7563  ;;  %v7315_v33 = vsel %vm19627_vm9, %v7288_v26, %v7314_v13  ;;  %v7453_v41 = vsel %vm19628_vm10, %v17294_v21, %v7452_v20  ;;  %vm19630_vm9 = vcmask 891904   ;;  %vm19631_vm10 = vcmask 826368  }
 0x6d8   :  { %v19332_v22 = vrot.slane %v17350_v38, 4  ;;  %v13338_v43 = vcombine.low %v7179_v1, %v7315_v33  ;;  %v13339_v54 = vcombine.high %v7179_v1, %v7315_v33 }
 0x6d9   :  { %8111 = vrot.lane.b32.xlu1 %v17047_v59, %s19435_s24  ;;  %7975 = vrot.lane.b32.xlu0 %v17047_v59, %s19495_s0 }
 0x6da   :  { %11518 = vmatprep.subr.bf16.mxu0 %v13339_v54  ;;  %v7588_v40 = vsel %vm468_vm0, %v7578_v49, %v19332_v22  ;;  %v6897_v54 = vrot.slane %v6880_v14, 4 }
 0x6db   :  { %v7016_v26 = vpop.permute.xlu1 %7015  ;;  %11519 = vmatpush1.bf16.msra.mxu0 %v13338_v43  ;;  %v17365_v62 = vpop.permute.xlu0 %6881  ;;  %v7589_v56 = vsel %vm19629_vm7, %v7562_v51, %v7588_v40  ;;  %vm19632_vm7 = vcmask 818176  }
 0x6dc   :  { %v6898_v13 = vrot.slane %v17365_v62, 4  ;;  %v13356_v1 = vcombine.low %v7453_v41, %v7589_v56  ;;  %v13357_v33 = vcombine.high %v7453_v41, %v7589_v56  ;;  %v7033_v22 = vrot.slane %v7016_v26, 4 }
 0x6dd   :  { %7565 = vrot.lane.b32.xlu1 %v17030_v5, %s19438_s14  ;;  %7429 = vrot.lane.b32.xlu0 %v17030_v5, %s19420_s6 }
 0x6de   :  { %11557 = vmatprep.subr.bf16.mxu1 %v13357_v33  ;;  %v6906_v20 = vsel %vm468_vm0, %v6897_v54, %v6898_v13 }
 0x6df   :  { %v17375_v49 = vpop.permute.xlu1 %7155  ;;  %11558 = vmatpush1.bf16.msra.mxu1 %v13356_v1  ;;  %v7018_v43 = vpop.permute.xlu0 %7017  ;;  %v6907_v1 = vsel %vm19630_vm9, %v6880_v14, %v6906_v20  ;;  %vm19633_vm9 = vcmask 809984  }
 0x6e0   :  { %v19337_v21 = vrot.slane %v17375_v49, 4  ;;  %v7034_v51 = vrot.slane %v7018_v43, 4 }
 0x6e1   :  { %7839 = vrot.lane.b32.xlu1 %v17047_v59, %s19433_s20  ;;  %7703 = vrot.lane.b32.xlu0 %v17047_v59, %s19441_s25 }
 0x6e2   :  { %v7042_v40 = vsel %vm468_vm0, %v7033_v22, %v7034_v51  ;;  %v7180_v54 = vsel %vm468_vm0, %v7170_v35, %v19337_v21 }
 0x6e3   :  { %v6608_v41 = vpop.permute.xlu1 %6607  ;;  %v17384_v56 = vpop.permute.xlu0 %7291  ;;  %v7043_v33 = vsel %vm19631_vm10, %v7016_v26, %v7042_v40  ;;  %v7181_v20 = vsel %vm19632_vm7, %v17331_v24, %v7180_v54  ;;  %vm19634_vm10 = vcmask 908288   ;;  %vm19635_vm7 = vcmask 900096  }
 0x6e4   :  { %v19336_v34 = vrot.slane %v17384_v56, 4  ;;  %v13322_v36 = vcombine.low %v6907_v1, %v7043_v33  ;;  %v13323_v10 = vcombine.high %v6907_v1, %v7043_v33 }
 0x6e5   :  { %7293 = vrot.lane.b32.xlu1 %v17030_v5, %s19440_s26  ;;  %7157 = vrot.lane.b32.xlu0 %v17030_v5, %s19422_s22 }
 0x6e6   :  { %11520 = vmatprep.subr.bf16.mxu0 %v13323_v10  ;;  %v7316_v14 = vsel %vm468_vm0, %v7306_v28, %v19336_v34  ;;  %v6625_v10 = vrot.slane %v6608_v41, 4 }
 0x6e7   :  { %v6744_v22 = vpop.permute.xlu1 %6743  ;;  %11521 = vmatpush1.bf16.msra.mxu0 %v13322_v36  ;;  %v6610_v26 = vpop.permute.xlu0 %6609  ;;  %v7317_v40 = vsel %vm19633_vm9, %v7290_v37, %v7316_v14  ;;  %vm19636_vm9 = vcmask 891904  }
 0x6e8   :  { %v6626_v35 = vrot.slane %v6610_v26, 4  ;;  %v13340_v1 = vcombine.low %v7181_v20, %v7317_v40  ;;  %v13341_v33 = vcombine.high %v7181_v20, %v7317_v40  ;;  %v6761_v34 = vrot.slane %v6744_v22, 4 }
 0x6e9   :  { %7567 = vrot.lane.b32.xlu1 %v17047_v59, %s19438_s14  ;;  %7431 = vrot.lane.b32.xlu0 %v17047_v59, %s19420_s6 }
 0x6ea   :  { %11559 = vmatprep.subr.bf16.mxu1 %v13341_v33  ;;  %v6634_v37 = vsel %vm468_vm0, %v6625_v10, %v6626_v35 }
 0x6eb   :  { %v17406_v28 = vpop.permute.xlu1 %6883  ;;  %11560 = vmatpush1.bf16.msra.mxu1 %v13340_v1  ;;  %v6746_v36 = vpop.permute.xlu0 %6745  ;;  %v6635_v1 = vsel %vm19634_vm10, %v6608_v41, %v6634_v37  ;;  %vm19637_vm10 = vcmask 826368  }
 0x6ec   :  { %v19344_v24 = vrot.slane %v17406_v28, 4  ;;  %v6762_v54 = vrot.slane %v6746_v36, 4 }
 0x6ed   :  { %7021 = vrot.lane.b32.xlu1 %v17030_v5, %s19444_s27  ;;  %6885 = vrot.lane.b32.xlu0 %v17030_v5, %s19423_s21 }
 0x6ee   :  { %v6770_v14 = vsel %vm468_vm0, %v6761_v34, %v6762_v54  ;;  %v6908_v10 = vsel %vm468_vm0, %v6898_v13, %v19344_v24 }
 0x6ef   :  { %v17415_v20 = vpop.permute.xlu1 %6611  ;;  %v17417_v40 = vpop.permute.xlu0 %7019  ;;  %v6771_v33 = vsel %vm19635_vm7, %v6744_v22, %v6770_v14  ;;  %v6909_v22 = vsel %vm19636_vm9, %v17365_v62, %v6908_v10  ;;  %vm19638_vm7 = vcmask 908288   ;;  %vm19639_vm9 = vcmask 900096  }
 0x6f0   :  { %v19342_v21 = vrot.slane %v17415_v20, 4  ;;  %v19343_v58 = vrot.slane %v17417_v40, 4  ;;  %v13306_v42 = vcombine.low %v6635_v1, %v6771_v33  ;;  %v13307_v15 = vcombine.high %v6635_v1, %v6771_v33 }
 0x6f1   :  { %7295 = vrot.lane.b32.xlu1 %v17047_v59, %s19440_s26  ;;  %7159 = vrot.lane.b32.xlu0 %v17047_v59, %s19422_s22 }
 0x6f2   :  { %11522 = vmatprep.subr.bf16.mxu0 %v13307_v15  ;;  %v7044_v34 = vsel %vm468_vm0, %v7034_v51, %v19343_v58  ;;  %v6636_v15 = vsel %vm468_vm0, %v6626_v35, %v19342_v21 }
 0x6f3   :  { %v10096_v41 = vpop.permute.xlu1 %10095  ;;  %11523 = vmatpush1.bf16.msra.mxu0 %v13306_v42  ;;  %v17433_v13 = vpop.permute.xlu0 %6747  ;;  %v7045_v37 = vsel %vm19637_vm10, %v7018_v43, %v7044_v34  ;;  %v6637_v51 = vsel %vm19638_vm7, %v6610_v26, %v6636_v15  ;;  %vm19640_vm10 = vcmask 138240   ;;  %vm19641_vm7 = vcmask 154624  }
 0x6f4   :  { %v19341_v14 = vrot.slane %v17433_v13, 4  ;;  %v13324_v1 = vcombine.low %v6909_v22, %v7045_v37  ;;  %v13325_v33 = vcombine.high %v6909_v22, %v7045_v37  ;;  %v10113_v34 = vrot.slane %v10096_v41, 4 }
 0x6f5   :  { %6749 = vrot.lane.b32.xlu1 %v17030_v5, %s19613_s19  ;;  %6613 = vrot.lane.b32.xlu0 %v17030_v5, %s19612_s10 }
 0x6f6   :  { %11561 = vmatprep.subr.bf16.mxu1 %v13325_v33  ;;  %v6772_v42 = vsel %vm468_vm0, %v6762_v54, %v19341_v14 }
 0x6f7   :  { %v9824_v62 = vpop.permute.xlu1 %9823  ;;  %11562 = vmatpush1.bf16.msra.mxu1 %v13324_v1  ;;  %v10098_v43 = vpop.permute.xlu0 %10097  ;;  %v6773_v10 = vsel %vm19639_vm9, %v6746_v36, %v6772_v42  ;;  %vm19642_vm9 = vcmask 146432  }
 0x6f8   :  { %v10114_v35 = vrot.slane %v10098_v43, 4  ;;  %v13308_v22 = vcombine.low %v6637_v51, %v6773_v10  ;;  %v13309_v37 = vcombine.high %v6637_v51, %v6773_v10  ;;  %v9841_v42 = vrot.slane %v9824_v62, 4 }
 0x6f9   :  { %7023 = vrot.lane.b32.xlu1 %v17047_v59, %s19444_s27  ;;  %6887 = vrot.lane.b32.xlu0 %v17047_v59, %s19423_s21 }
 0x6fa   :  { %v10122_v5 = vsel %vm468_vm0, %v10113_v34, %v10114_v35  ;;  %11563 = vmatprep.subr.bf16.mxu1 %v13309_v37 }
 0x6fb   :  { %v9960_v54 = vpop.permute.xlu1 %9959  ;;  %11564 = vmatpush1.bf16.msra.mxu1 %v13308_v22  ;;  %v17456_v1 = vpop.permute.xlu0 %9825  ;;  %v10123_v26 = vsel %vm19640_vm10, %v10096_v41, %v10122_v5 }
 0x6fc   :  { %v9842_v36 = vrot.slane %v17456_v1, 4  ;;  %v13515_v33 = vcombine.high %v10123_v26, %v10123_v26  ;;  %v13514_v15 = vcombine.low %v10123_v26, %v10123_v26  ;;  %v9977_v41 = vrot.slane %v9960_v54, 4 }
 0x6fd   :  { %6751 = vrot.lane.b32.xlu1 %v17047_v59, %s19613_s19  ;;  %6615 = vrot.lane.b32.xlu0 %v17047_v59, %s19612_s10 }
 0x6fe   :  { %13530 = vmatprep.subr.msk.bf16.mxu0 %vm468_vm0, %v13515_v33  ;;  %v11461_v51 = vsel %vm468_vm0, %v13514_v15, 0  ;;  %v9850_v5 = vsel %vm468_vm0, %v9841_v42, %v9842_v36 }
 0x6ff   :  { %v17466_v10 = vpop.permute.xlu1 %10099  ;;  %11529 = vmatpush2.bf16.msra.mxu0 %v11461_v51  ;;  %v9962_v34 = vpop.permute.xlu0 %9961  ;;  %v9851_v51 = vsel %vm19641_vm7, %v9824_v62, %v9850_v5  ;;  %vm19643_vm7 = vcmask 228352  }
 0x700   :  { %v19346_v22 = vrot.slane %v17466_v10, 4  ;;  %v9978_v37 = vrot.slane %v9962_v34, 4 }
 0x701   :  { %9829 = vrot.lane.b32.xlu1 %v17024_v0, %s19452_s5  ;;  %10101 = vrot.lane.b32.xlu0 %v17024_v0, %s19424_s29 }
 0x702   :  { %v10124_v59 = vsel %vm468_vm0, %v10114_v35, %v19346_v22  ;;  %v9986_v26 = vsel %vm468_vm0, %v9977_v41, %v9978_v37 }
 0x703   :  { %v17478_v33 = vpop.permute.xlu1 %9553  ;;  %v9552_v15 = vpop.permute.xlu0 %9551  ;;  %v9987_v14 = vsel %vm19642_vm9, %v9960_v54, %v9986_v26  ;;  %v10125_v42 = vsel %vm19640_vm10, %v10098_v43, %v10124_v59  ;;  %vm19644_vm9 = vcmask 220160   ;;  %vm19645_vm10 = vcmask 154624  }
 0x704   :  { %v19347_v21 = vrot.slane %v17478_v33, 4  ;;  %v9569_v58 = vrot.slane %v9552_v15, 4  ;;  %v13498_v24 = vcombine.low %v9851_v51, %v9987_v14  ;;  %v13499_v8 = vcombine.high %v9851_v51, %v9987_v14 }
 0x705   :  { %10103 = vrot.lane.b32.xlu1 %v17056_v12, %s19424_s29  ;;  %9965 = vrot.lane.b32.xlu0 %v17024_v0, %s19427_s13  ;;  %v13517_v35 = vcombine.high %v10125_v42, %v10125_v42  ;;  %v13516_v41 = vcombine.low %v10125_v42, %v10125_v42 }
 0x706   :  { %11530 = vmatprep.subr.bf16.mxu0 %v13499_v8  ;;  %v9578_v14 = vsel %vm468_vm0, %v9569_v58, %v19347_v21 }
 0x707   :  { %13532 = vmatprep.subr.msk.bf16.mxu1 %vm468_vm0, %v13517_v35  ;;  %v17489_v62 = vpop.permute.xlu1 %9689  ;;  %11531 = vmatpush2.bf16.msra.mxu0 %v13498_v24  ;;  %v11467_v43 = vsel %vm468_vm0, %v13516_v41, 0  ;;  %v9688_v54 = vpop.permute.xlu0 %9687  ;;  %v9579_v24 = vsel %vm19643_vm7, %v9552_v15, %v9578_v14  ;;  %vm19646_vm7 = vcmask 146432  }
 0x708   :  { %v9706_v5 = vrot.slane %v17489_v62, 4  ;;  %11570 = vmatpush2.bf16.msra.mxu1 %v11467_v43  ;;  %v9705_v59 = vrot.slane %v9688_v54, 4 }
 0x709   :  { %9693 = vrot.lane.b32.xlu1 %v17024_v0, %s19426_s17  ;;  %9557 = vrot.lane.b32.xlu0 %v17024_v0, %s19429_s28 }
 0x70a   :  { %v9714_v8 = vsel %vm468_vm0, %v9705_v59, %v9706_v5 }
 0x70b   :  { %v9715_v26 = vsel %vm19644_vm9, %v9688_v54, %v9714_v8  ;;  %v17503_v51 = vpop.permute.xlu1 %9963  ;;  %v17505_v42 = vpop.permute.xlu0 %9827  ;;  %vm19647_vm9 = vcmask 236544  }
 0x70c   :  { %v13482_v58 = vcombine.low %v9579_v24, %v9715_v26  ;;  %v19348_v35 = vrot.slane %v17503_v51, 4  ;;  %v19349_v41 = vrot.slane %v17505_v42, 4  ;;  %v13483_v43 = vcombine.high %v9579_v24, %v9715_v26 }
 0x70d   :  { %9967 = vrot.lane.b32.xlu1 %v17056_v12, %s19427_s13  ;;  %9831 = vrot.lane.b32.xlu0 %v17056_v12, %s19452_s5 }
 0x70e   :  { %11532 = vmatprep.subr.bf16.mxu0 %v13483_v43  ;;  %v9852_v15 = vsel %vm468_vm0, %v9842_v36, %v19349_v41  ;;  %v9988_v54 = vsel %vm468_vm0, %v9978_v37, %v19348_v35 }
 0x70f   :  { %v17519_v14 = vpop.permute.xlu1 %9281  ;;  %11533 = vmatpush2.bf16.msra.mxu0 %v13482_v58  ;;  %v9280_v59 = vpop.permute.xlu0 %9279  ;;  %v9853_v8 = vsel %vm19645_vm10, %v17456_v1, %v9852_v15  ;;  %v9989_v24 = vsel %vm19646_vm7, %v9962_v34, %v9988_v54  ;;  %vm19649_vm10 = vcmask 228352   ;;  %vm19650_vm7 = vcmask 220160  }
 0x710   :  { %v9298_v26 = vrot.slane %v17519_v14, 4  ;;  %v9297_v43 = vrot.slane %v9280_v59, 4  ;;  %v13500_v22 = vcombine.low %v9853_v8, %v9989_v24  ;;  %v13501_v21 = vcombine.high %v9853_v8, %v9989_v24 }
 0x711   :  { %9421 = vrot.lane.b32.xlu1 %v17024_v0, %s19614_s4  ;;  %9285 = vrot.lane.b32.xlu0 %v17024_v0, %s19430_s23 }
 0x712   :  { %11571 = vmatprep.subr.bf16.mxu1 %v13501_v21  ;;  %v9306_v58 = vsel %vm468_vm0, %v9297_v43, %v9298_v26 }
 0x713   :  { %v9418_v36 = vpop.permute.xlu1 %9417  ;;  %11572 = vmatpush2.bf16.msra.mxu1 %v13500_v22  ;;  %v9416_v37 = vpop.permute.xlu0 %9415  ;;  %v9307_v54 = vsel %vm3161_vm14, %v9280_v59, %v9306_v58  ;;  %v19648_v59 = vrot.slane %v17478_v33, 4 }
 0x714   :  { %v9434_v1 = vrot.slane %v9418_v36, 4  ;;  %v9433_v15 = vrot.slane %v9416_v37, 4 }
 0x715   :  { %9695 = vrot.lane.b32.xlu1 %v17056_v12, %s19426_s17  ;;  %9559 = vrot.lane.b32.xlu0 %v17056_v12, %s19429_s28 }
 0x716   :  { %v9442_v34 = vsel %vm468_vm0, %v9433_v15, %v9434_v1 }
 0x717   :  { %v9443_v8 = vsel %vm19647_vm9, %v9416_v37, %v9442_v34  ;;  %v17537_v21 = vpop.permute.xlu1 %9691  ;;  %v17539_v22 = vpop.permute.xlu0 %9555 }
 0x718   :  { %v13466_v24 = vcombine.low %v9307_v54, %v9443_v8  ;;  %v19355_v43 = vrot.slane %v17537_v21, 4  ;;  %v19356_v35 = vrot.slane %v17539_v22, 4  ;;  %v13467_v41 = vcombine.high %v9307_v54, %v9443_v8 }
 0x719   :  { %9149 = vrot.lane.b32.xlu1 %v17024_v0, %s19616_s9  ;;  %9013 = vrot.lane.b32.xlu0 %v17024_v0, %s19615_s12 }
 0x71a   :  { %11534 = vmatprep.subr.bf16.mxu0 %v13467_v41  ;;  %v9580_v37 = vsel %vm468_vm0, %v19648_v59, %v19356_v35  ;;  %v9716_v58 = vsel %vm468_vm0, %v9706_v5, %v19355_v43 }
 0x71b   :  { %v17555_v15 = vpop.permute.xlu1 %9009  ;;  %11535 = vmatpush2.bf16.msra.mxu0 %v13466_v24  ;;  %v9008_v34 = vpop.permute.xlu0 %9007  ;;  %v9581_v54 = vsel %vm19649_vm10, %v17478_v33, %v9580_v37  ;;  %v9717_v41 = vsel %vm19650_vm7, %v17489_v62, %v9716_v58  ;;  %vm19658_vm10 = vcmask 728064   ;;  %vm19659_vm7 = vcmask 89088  }
 0x71c   :  { %v9026_v8 = vrot.slane %v17555_v15, 4  ;;  %v9025_v4 = vrot.slane %v9008_v34, 4  ;;  %v13484_v3 = vcombine.low %v9581_v54, %v9717_v41  ;;  %v13485_v29 = vcombine.high %v9581_v54, %v9717_v41 }
 0x71d   :  { %9423 = vrot.lane.b32.xlu1 %v17056_v12, %s19614_s4  ;;  %9287 = vrot.lane.b32.xlu0 %v17056_v12, %s19430_s23 }
 0x71e   :  { %11573 = vmatprep.subr.bf16.mxu1 %v13485_v29  ;;  %v9034_v33 = vsel %vm468_vm0, %v9025_v4, %v9026_v8 }
 0x71f   :  { %v9146_v5 = vpop.permute.xlu1 %9145  ;;  %11574 = vmatpush2.bf16.msra.mxu1 %v13484_v3  ;;  %v9144_v24 = vpop.permute.xlu0 %9143  ;;  %v9035_v58 = vsel %vm2887_vm11, %v9008_v34, %v9034_v33 }
 0x720   :  { %v9162_v59 = vrot.slane %v9146_v5, 4  ;;  %v9161_v37 = vrot.slane %v9144_v24, 4 }
 0x721   :  { %8877 = vrot.lane.b32.xlu1 %v17024_v0, %s19618_s11  ;;  %8741 = vrot.lane.b32.xlu0 %v17024_v0, %s19617_s16 }
 0x722   :  { %v9170_v62 = vsel %vm468_vm0, %v9161_v37, %v9162_v59 }
 0x723   :  { %v9171_v54 = vsel %vm3024_vm15, %v9144_v24, %v9170_v62  ;;  %v17574_v29 = vpop.permute.xlu1 %9419  ;;  %v17576_v3 = vpop.permute.xlu0 %9283 }
 0x724   :  { %v13450_v41 = vcombine.low %v9035_v58, %v9171_v54  ;;  %v19357_v4 = vrot.slane %v17574_v29, 4  ;;  %v19358_v43 = vrot.slane %v17576_v3, 4  ;;  %v13451_v35 = vcombine.high %v9035_v58, %v9171_v54 }
 0x725   :  { %9151 = vrot.lane.b32.xlu1 %v17056_v12, %s19616_s9  ;;  %9015 = vrot.lane.b32.xlu0 %v17056_v12, %s19615_s12 }
 0x726   :  { %11536 = vmatprep.subr.bf16.mxu0 %v13451_v35  ;;  %v9308_v34 = vsel %vm468_vm0, %v9298_v26, %v19358_v43  ;;  %v9444_v24 = vsel %vm468_vm0, %v9434_v1, %v19357_v4 }
 0x727   :  { %v17590_v33 = vpop.permute.xlu1 %8737  ;;  %11537 = vmatpush2.bf16.msra.mxu0 %v13450_v41  ;;  %v8736_v37 = vpop.permute.xlu0 %8735  ;;  %v9309_v62 = vsel %vm3161_vm14, %v17519_v14, %v9308_v34  ;;  %v9445_v58 = vsel %vm19647_vm9, %v9418_v36, %v9444_v24  ;;  %vm19662_vm9 = vcmask 744448  }
 0x728   :  { %v8754_v54 = vrot.slane %v17590_v33, 4  ;;  %v8753_v35 = vrot.slane %v8736_v37, 4  ;;  %v13468_v63 = vcombine.low %v9309_v62, %v9445_v58  ;;  %v13469_v60 = vcombine.high %v9309_v62, %v9445_v58 }
 0x729   :  { %8609 = vrot.lane.b32.xlu1 %v17061_v48, %s19483_s2  ;;  %8473 = vrot.lane.b32.xlu0 %v17061_v48, %s19490_s3 }
 0x72a   :  { %11575 = vmatprep.subr.bf16.mxu1 %v13469_v60  ;;  %v8762_v41 = vsel %vm468_vm0, %v8753_v35, %v8754_v54 }
 0x72b   :  { %v8874_v26 = vpop.permute.xlu1 %8873  ;;  %11576 = vmatpush2.bf16.msra.mxu1 %v13468_v63  ;;  %v8872_v1 = vpop.permute.xlu0 %8871  ;;  %v8763_v24 = vsel %vm2613_vm13, %v8736_v37, %v8762_v41  ;;  %v17626_v41 = vcombine.low %v17258_v31, %v17258_v31  ;;  %v19651_v31 = vrot.slane %v17199_v19, 4 }
 0x72c   :  { %v8890_v14 = vrot.slane %v8874_v26, 4  ;;  %v8889_v34 = vrot.slane %v8872_v1, 4 }
 0x72d   :  { %8879 = vrot.lane.b32.xlu1 %v17056_v12, %s19618_s11  ;;  %8743 = vrot.lane.b32.xlu0 %v17056_v12, %s19617_s16 }
 0x72e   :  { %v8898_v36 = vsel %vm468_vm0, %v8889_v34, %v8890_v14 }
 0x72f   :  { %v8899_v62 = vsel %vm2750_vm12, %v8872_v1, %v8898_v36  ;;  %v17608_v60 = vpop.permute.xlu1 %9147  ;;  %v17610_v63 = vpop.permute.xlu0 %9011 }
 0x730   :  { %v13434_v58 = vcombine.low %v8763_v24, %v8899_v62  ;;  %v19359_v35 = vrot.slane %v17608_v60, 4  ;;  %v19360_v4 = vrot.slane %v17610_v63, 4  ;;  %v13435_v43 = vcombine.high %v8763_v24, %v8899_v62 }
 0x731   :  { %8475 = vrot.lane.b32.xlu1 %v17063_v61, %s19490_s3  ;;  %8249 = vrot.lane.b32.xlu0 %v17058_v57, %s19432_s18 }
 0x732   :  { %11538 = vmatprep.subr.bf16.mxu0 %v13435_v43  ;;  %v9036_v37 = vsel %vm468_vm0, %v9026_v8, %v19360_v4  ;;  %v9172_v1 = vsel %vm468_vm0, %v9162_v59, %v19359_v35 }
 0x733   :  { %v8606_v34 = vpop.permute.xlu1 %8605  ;;  %11539 = vmatpush2.bf16.msra.mxu0 %v13434_v58  ;;  %v8470_v36 = vpop.permute.xlu0 %8469  ;;  %v9037_v24 = vsel %vm2887_vm11, %v17555_v15, %v9036_v37  ;;  %v9173_v43 = vsel %vm3024_vm15, %v9146_v5, %v9172_v1  ;;  %v19652_v58 = vrot.slane %v17197_v23, 4 }
 0x734   :  { %v8620_v62 = vrot.slane %v8606_v34, 4  ;;  %v8484_v27 = vrot.slane %v8470_v36, 4  ;;  %v13452_v9 = vcombine.low %v9037_v24, %v9173_v43  ;;  %v13453_v8 = vcombine.high %v9037_v24, %v9173_v43 }
 0x735   :  { %7977 = vrot.lane.b32.xlu1 %v17058_v57, %s19495_s0  ;;  %8611 = vrot.lane.b32.xlu0 %v17063_v61, %s19483_s2 }
 0x736   :  { %11577 = vmatprep.subr.bf16.mxu1 %v13453_v8  ;;  %v8494_v59 = vsel %vm468_vm0, %v19651_v31, %v8484_v27  ;;  %v8630_v15 = vsel %vm468_vm0, %v19652_v58, %v8620_v62  ;;  %11541 = vmatmul.mubr.bf16.vlgmr.msra.gmra.mxu0 %v17626_v41 }
 0x737   :  { %v17642_v5 = vpop.permute.xlu1 %8875  ;;  %11578 = vmatpush2.bf16.msra.mxu1 %v13452_v9  ;;  %v17644_v37 = vpop.permute.xlu0 %8739  ;;  %v8495_v1 = vsel %vm2339_vm1, %v17199_v19, %v8494_v59  ;;  %v8631_v24 = vsel %vm2476_vm2, %v17197_v23, %v8630_v15  ;;  %13535 = vmatprep.mubr.msk.bf16.mxu0 %vm5318_vm8, %v17264_v11 }
 0x738   :  { %v19363_v43 = vrot.slane %v17642_v5, 4  ;;  %v19364_v8 = vrot.slane %v17644_v37, 4  ;;  %v13422_v31 = vcombine.low %v8495_v1, %v8631_v24  ;;  %v13423_v58 = vcombine.high %v8495_v1, %v8631_v24 }
 0x739   :  { %8251 = vrot.lane.b32.xlu1 %v17065_v53, %s19432_s18  ;;  %8113 = vrot.lane.b32.xlu0 %v17058_v57, %s19435_s24 }
 0x73a   :  { %11590 = vmatprep.subr.bf16.mxu0 %v13423_v58  ;;  %v8764_v9 = vsel %vm468_vm0, %v8754_v54, %v19364_v8  ;;  %v8900_v23 = vsel %vm468_vm0, %v8890_v14, %v19363_v43  ;;  %v19653_v54 = vrot.slane %v17235_v45, 4 }
 0x73b   :  { %v17664_v19 = vpop.permute.xlu1 %8471  ;;  %11591 = vmatpush1.bf16.msra.mxu0 %v13422_v31  ;;  %v8246_v59 = vpop.permute.xlu0 %8245  ;;  %v8765_v15 = vsel %vm2613_vm13, %v17590_v33, %v8764_v9  ;;  %v8901_v1 = vsel %vm2750_vm12, %v8874_v26, %v8900_v23 }
 0x73c   :  { %v19361_v24 = vrot.slane %v17664_v19, 4  ;;  %v8260_v58 = vrot.slane %v8246_v59, 4  ;;  %v13436_v35 = vcombine.low %v8765_v15, %v8901_v1  ;;  %v13437_v4 = vcombine.high %v8765_v15, %v8901_v1 }
 0x73d   :  { %7841 = vrot.lane.b32.xlu1 %v17058_v57, %s19433_s20  ;;  %7705 = vrot.lane.b32.xlu0 %v17058_v57, %s19441_s25 }
 0x73e   :  { %11579 = vmatprep.subr.bf16.mxu1 %v13437_v4  ;;  %v8270_v14 = vsel %vm468_vm0, %v19653_v54, %v8260_v58  ;;  %v8496_v9 = vsel %vm468_vm0, %v8484_v27, %v19361_v24 }
 0x73f   :  { %v17677_v31 = vpop.permute.xlu1 %7973  ;;  %11580 = vmatpush2.bf16.msra.mxu1 %v13436_v35  ;;  %v17679_v33 = vpop.permute.xlu0 %8607  ;;  %v8271_v26 = vsel %vm2114_vm3, %v17235_v45, %v8270_v14  ;;  %v8497_v54 = vsel %vm2339_vm1, %v8470_v36, %v8496_v9  ;;  %v19654_v14 = vrot.slane %v17260_v17, 4 }
 0x740   :  { %v7988_v23 = vrot.slane %v17677_v31, 4  ;;  %v19362_v4 = vrot.slane %v17679_v33, 4  ;;  %v13406_v15 = vcombine.low %v8271_v26, %v17020_v18  ;;  %v13407_v1 = vcombine.high %v8271_v26, %v17020_v18 }
 0x741   :  { %8115 = vrot.lane.b32.xlu1 %v17065_v53, %s19435_s24  ;;  %7979 = vrot.lane.b32.xlu0 %v17065_v53, %s19495_s0 }
 0x742   :  { %11592 = vmatprep.subr.bf16.mxu0 %v13407_v1  ;;  %v8632_v45 = vsel %vm468_vm0, %v8620_v62, %v19362_v4  ;;  %11582 = vmatmul.mubr.bf16.vlgmr.msra.gmra.mxu1 %v17626_v41  ;;  %v7998_v26 = vsel %vm468_vm0, %v19654_v14, %v7988_v23 }
 0x743   :  { %v17698_v27 = vpop.permute.xlu1 %8247  ;;  %11593 = vmatpush1.bf16.msra.mxu0 %v13406_v15  ;;  %v8110_v35 = vpop.permute.xlu0 %8109  ;;  %v8633_v18 = vsel %vm2476_vm2, %v8606_v34, %v8632_v45  ;;  %13537 = vmatprep.mubr.msk.bf16.mxu1 %vm5318_vm8, %v17264_v11  ;;  %v19655_v34 = vrot.slane %v17279_v25, 4 }
 0x744   :  { %v8261_v1 = vrot.slane %v17698_v27, 4  ;;  %v8124_v62 = vrot.slane %v8110_v35, 4  ;;  %v13424_v24 = vcombine.low %v8497_v54, %v8633_v18  ;;  %v13425_v4 = vcombine.high %v8497_v54, %v8633_v18 }
 0x745   :  { %7569 = vrot.lane.b32.xlu1 %v17058_v57, %s19438_s14  ;;  %7433 = vrot.lane.b32.xlu0 %v17058_v57, %s19420_s6  ;;  %v7999_v54 = vsel %vm1840_vm4, %v17260_v17, %v7998_v26 }
 0x746   :  { %11631 = vmatprep.subr.bf16.mxu1 %v13425_v4  ;;  %v8134_v36 = vsel %vm468_vm0, %v19655_v34, %v8124_v62  ;;  %v8272_v9 = vsel %vm468_vm0, %v8260_v58, %v8261_v1  ;;  %v19657_v58 = vrot.slane %v17314_v46, 4 }
 0x747   :  { %v17718_v15 = vpop.permute.xlu1 %7837  ;;  %11632 = vmatpush1.bf16.msra.mxu1 %v13424_v24  ;;  %v17720_v45 = vpop.permute.xlu0 %7701  ;;  %v8135_v18 = vsel %vm1977_vm5, %v17279_v25, %v8134_v36  ;;  %v8273_v4 = vsel %vm2114_vm3, %v8246_v59, %v8272_v9  ;;  %v19656_v25 = vrot.slane %v17305_v6, 4 }
 0x748   :  { %v7852_v14 = vrot.slane %v17718_v15, 4  ;;  %v7716_v34 = vrot.slane %v17720_v45, 4  ;;  %v13390_v43 = vcombine.low %v7999_v54, %v8135_v18  ;;  %v13391_v8 = vcombine.high %v7999_v54, %v8135_v18 }
 0x749   :  { %7843 = vrot.lane.b32.xlu1 %v17065_v53, %s19433_s20  ;;  %7707 = vrot.lane.b32.xlu0 %v17065_v53, %s19441_s25  ;;  %v13408_v24 = vcombine.low %v8273_v4, %v17024_v0  ;;  %v13409_v17 = vcombine.high %v8273_v4, %v17024_v0 }
 0x74a   :  { %11594 = vmatprep.subr.bf16.mxu0 %v13391_v8  ;;  %v7726_v59 = vsel %vm468_vm0, %v19656_v25, %v7716_v34  ;;  %v7862_v26 = vsel %vm468_vm0, %v19657_v58, %v7852_v14 }
 0x74b   :  { %11633 = vmatprep.subr.bf16.mxu1 %v13409_v17  ;;  %v17741_v36 = vpop.permute.xlu1 %8111  ;;  %11595 = vmatpush1.bf16.msra.mxu0 %v13390_v43  ;;  %v17743_v9 = vpop.permute.xlu0 %7975  ;;  %v7727_v54 = vsel %vm19658_vm10, %v17305_v6, %v7726_v59  ;;  %v7863_v0 = vsel %vm19659_vm7, %v17314_v46, %v7862_v26  ;;  %vm19663_vm10 = vcmask 736256   ;;  %vm19664_vm7 = vcmask 728064  }
 0x74c   :  { %v19365_v8 = vrot.slane %v17741_v36, 4  ;;  %11634 = vmatpush1.bf16.msra.mxu1 %v13408_v24  ;;  %v7989_v18 = vrot.slane %v17743_v9, 4  ;;  %v13374_v4 = vcombine.low %v7727_v54, %v7863_v0  ;;  %v13375_v25 = vcombine.high %v7727_v54, %v7863_v0 }
 0x74d   :  { %7297 = vrot.lane.b32.xlu1 %v17058_v57, %s19440_s26  ;;  %7161 = vrot.lane.b32.xlu0 %v17058_v57, %s19422_s22 }
 0x74e   :  { %11596 = vmatprep.subr.bf16.mxu0 %v13375_v25  ;;  %v8000_v6 = vsel %vm468_vm0, %v7988_v23, %v7989_v18  ;;  %v8136_v46 = vsel %vm468_vm0, %v8124_v62, %v19365_v8  ;;  %v19660_v23 = vrot.slane %v17341_v52, 4 }
 0x74f   :  { %v7566_v43 = vpop.permute.xlu1 %7565  ;;  %11597 = vmatpush1.bf16.msra.mxu0 %v13374_v4  ;;  %v7430_v24 = vpop.permute.xlu0 %7429  ;;  %v8001_v17 = vsel %vm1840_vm4, %v17677_v31, %v8000_v6  ;;  %v8137_v59 = vsel %vm1977_vm5, %v8110_v35, %v8136_v46  ;;  %v19661_v4 = vrot.slane %v17350_v38, 4 }
 0x750   :  { %v7580_v58 = vrot.slane %v7566_v43, 4  ;;  %v7444_v26 = vrot.slane %v7430_v24, 4  ;;  %v13392_v54 = vcombine.low %v8001_v17, %v8137_v59  ;;  %v13393_v0 = vcombine.high %v8001_v17, %v8137_v59 }
 0x751   :  { %7571 = vrot.lane.b32.xlu1 %v17065_v53, %s19438_s14  ;;  %7435 = vrot.lane.b32.xlu0 %v17065_v53, %s19420_s6 }
 0x752   :  { %11635 = vmatprep.subr.bf16.mxu1 %v13393_v0  ;;  %v7454_v62 = vsel %vm468_vm0, %v19660_v23, %v7444_v26  ;;  %v7590_v31 = vsel %vm468_vm0, %v19661_v4, %v7580_v58 }
 0x753   :  { %v17774_v35 = vpop.permute.xlu1 %7839  ;;  %11636 = vmatpush1.bf16.msra.mxu1 %v13392_v54  ;;  %v17776_v25 = vpop.permute.xlu0 %7703  ;;  %v7455_v6 = vsel %vm19662_vm9, %v17341_v52, %v7454_v62  ;;  %v7591_v46 = vsel %vm19663_vm10, %v17350_v38, %v7590_v31  ;;  %vm19665_vm9 = vcmask 89088   ;;  %vm19668_vm10 = vcmask 818176  }
 0x754   :  { %v19367_v17 = vrot.slane %v17774_v35, 4  ;;  %v19366_v59 = vrot.slane %v17776_v25, 4  ;;  %v13358_v0 = vcombine.low %v7455_v6, %v7591_v46  ;;  %v13359_v23 = vcombine.high %v7455_v6, %v7591_v46 }
 0x755   :  { %7025 = vrot.lane.b32.xlu1 %v17058_v57, %s19444_s27  ;;  %6889 = vrot.lane.b32.xlu0 %v17058_v57, %s19423_s21 }
 0x756   :  { %11598 = vmatprep.subr.bf16.mxu0 %v13359_v23  ;;  %v7728_v52 = vsel %vm468_vm0, %v7716_v34, %v19366_v59  ;;  %v7864_v38 = vsel %vm468_vm0, %v7852_v14, %v19367_v17  ;;  %v19666_v14 = vrot.slane %v17375_v49, 4 }
 0x757   :  { %v7294_v54 = vpop.permute.xlu1 %7293  ;;  %11599 = vmatpush1.bf16.msra.mxu0 %v13358_v0  ;;  %v7158_v62 = vpop.permute.xlu0 %7157  ;;  %v7729_v4 = vsel %vm19664_vm7, %v17720_v45, %v7728_v52  ;;  %v7865_v31 = vsel %vm19665_vm9, %v17718_v15, %v7864_v38  ;;  %v19667_v45 = vrot.slane %v17384_v56, 4  ;;  %vm19669_vm7 = vcmask 809984  }
 0x758   :  { %v7308_v6 = vrot.slane %v7294_v54, 4  ;;  %v7172_v46 = vrot.slane %v7158_v62, 4  ;;  %v13376_v23 = vcombine.low %v7729_v4, %v7865_v31  ;;  %v13377_v8 = vcombine.high %v7729_v4, %v7865_v31 }
 0x759   :  { %7299 = vrot.lane.b32.xlu1 %v17065_v53, %s19440_s26  ;;  %7163 = vrot.lane.b32.xlu0 %v17065_v53, %s19422_s22  ;;  %vm19670_vm9 = vcmask 744448  }
 0x75a   :  { %11637 = vmatprep.subr.bf16.mxu1 %v13377_v8  ;;  %v7182_v34 = vsel %vm468_vm0, %v19666_v14, %v7172_v46  ;;  %v7318_v0 = vsel %vm468_vm0, %v19667_v45, %v7308_v6 }
 0x75b   :  { %v17808_v15 = vpop.permute.xlu1 %7567  ;;  %11638 = vmatpush1.bf16.msra.mxu1 %v13376_v23  ;;  %v17810_v52 = vpop.permute.xlu0 %7431  ;;  %v7183_v38 = vsel %vm19668_vm10, %v17375_v49, %v7182_v34  ;;  %v7319_v4 = vsel %vm19669_vm7, %v17384_v56, %v7318_v0  ;;  %vm19671_vm10 = vcmask 736256   ;;  %vm19674_vm7 = vcmask 891904  }
 0x75c   :  { %v7581_v8 = vrot.slane %v17808_v15, 4  ;;  %v19368_v31 = vrot.slane %v17810_v52, 4  ;;  %v13342_v14 = vcombine.low %v7183_v38, %v7319_v4  ;;  %v13343_v59 = vcombine.high %v7183_v38, %v7319_v4 }
 0x75d   :  { %6753 = vrot.lane.b32.xlu1 %v17058_v57, %s19613_s19  ;;  %6617 = vrot.lane.b32.xlu0 %v17058_v57, %s19612_s10 }
 0x75e   :  { %11600 = vmatprep.subr.bf16.mxu0 %v13343_v59  ;;  %v7456_v49 = vsel %vm468_vm0, %v7444_v26, %v19368_v31  ;;  %v7592_v56 = vsel %vm468_vm0, %v7580_v58, %v7581_v8  ;;  %v19672_v58 = vrot.slane %v17406_v28, 4  ;;  %v19673_v59 = vrot.slane %v17417_v40, 4 }
 0x75f   :  { %v7022_v23 = vpop.permute.xlu1 %7021  ;;  %11601 = vmatpush1.bf16.msra.mxu0 %v13342_v14  ;;  %v6886_v34 = vpop.permute.xlu0 %6885  ;;  %v7457_v45 = vsel %vm19670_vm9, %v7430_v24, %v7456_v49  ;;  %v7593_v0 = vsel %vm19671_vm10, %v7566_v43, %v7592_v56  ;;  %vm19675_vm9 = vcmask 826368   ;;  %vm19676_vm10 = vcmask 818176  }
 0x760   :  { %v7036_v38 = vrot.slane %v7022_v23, 4  ;;  %v6900_v4 = vrot.slane %v6886_v34, 4  ;;  %v13360_v17 = vcombine.low %v7457_v45, %v7593_v0  ;;  %v13361_v57 = vcombine.high %v7457_v45, %v7593_v0 }
 0x761   :  { %7027 = vrot.lane.b32.xlu1 %v17065_v53, %s19444_s27  ;;  %6891 = vrot.lane.b32.xlu0 %v17065_v53, %s19423_s21 }
 0x762   :  { %11639 = vmatprep.subr.bf16.mxu1 %v13361_v57  ;;  %v6910_v26 = vsel %vm468_vm0, %v19672_v58, %v6900_v4  ;;  %v7046_v24 = vsel %vm468_vm0, %v19673_v59, %v7036_v38 }
 0x763   :  { %v17840_v43 = vpop.permute.xlu1 %7295  ;;  %11640 = vmatpush1.bf16.msra.mxu1 %v13360_v17  ;;  %v17842_v14 = vpop.permute.xlu0 %7159  ;;  %v6911_v49 = vsel %vm19674_vm7, %v17406_v28, %v6910_v26  ;;  %v7047_v56 = vsel %vm19675_vm9, %v17417_v40, %v7046_v24  ;;  %vm19677_vm7 = vcmask 809984   ;;  %vm19680_vm9 = vcmask 908288  }
 0x764   :  { %v19383_v45 = vrot.slane %v17840_v43, 4  ;;  %v19369_v0 = vrot.slane %v17842_v14, 4  ;;  %v13326_v57 = vcombine.low %v6911_v49, %v7047_v56  ;;  %v13327_v58 = vcombine.high %v6911_v49, %v7047_v56 }
 0x765   :  { %6755 = vrot.lane.b32.xlu1 %v17065_v53, %s19613_s19  ;;  %6619 = vrot.lane.b32.xlu0 %v17065_v53, %s19612_s10 }
 0x766   :  { %11602 = vmatprep.subr.bf16.mxu0 %v13327_v58  ;;  %v7184_v28 = vsel %vm468_vm0, %v7172_v46, %v19369_v0  ;;  %v7320_v40 = vsel %vm468_vm0, %v7308_v6, %v19383_v45  ;;  %v19678_v6 = vrot.slane %v17415_v20, 4 }
 0x767   :  { %v6750_v17 = vpop.permute.xlu1 %6749  ;;  %11603 = vmatpush1.bf16.msra.mxu0 %v13326_v57  ;;  %v6614_v26 = vpop.permute.xlu0 %6613  ;;  %v7185_v59 = vsel %vm19676_vm10, %v7158_v62, %v7184_v28  ;;  %v7321_v24 = vsel %vm19677_vm7, %v7294_v54, %v7320_v40  ;;  %v19679_v57 = vrot.slane %v17433_v13, 4  ;;  %vm19681_vm10 = vcmask 900096  }
 0x768   :  { %v6764_v49 = vrot.slane %v6750_v17, 4  ;;  %v6628_v56 = vrot.slane %v6614_v26, 4  ;;  %v13344_v31 = vcombine.low %v7185_v59, %v7321_v24  ;;  %v13345_v53 = vcombine.high %v7185_v59, %v7321_v24 }
 0x769   :  { %9833 = vrot.lane.b32.xlu1 %v17061_v48, %s19452_s5  ;;  %10105 = vrot.lane.b32.xlu0 %v17061_v48, %s19424_s29  ;;  %vm19682_vm7 = vcmask 891904  }
 0x76a   :  { %11641 = vmatprep.subr.bf16.mxu1 %v13345_v53  ;;  %v6638_v46 = vsel %vm468_vm0, %v19678_v6, %v6628_v56  ;;  %v6774_v62 = vsel %vm468_vm0, %v19679_v57, %v6764_v49 }
 0x76b   :  { %v17872_v54 = vpop.permute.xlu1 %7023  ;;  %11642 = vmatpush1.bf16.msra.mxu1 %v13344_v31  ;;  %v17874_v58 = vpop.permute.xlu0 %6887  ;;  %v6639_v28 = vsel %vm19680_vm9, %v17415_v20, %v6638_v46  ;;  %v6775_v40 = vsel %vm19681_vm10, %v17433_v13, %v6774_v62  ;;  %vm19683_vm9 = vcmask 826368   ;;  %vm19684_vm10 = vcmask 908288  }
 0x76c   :  { %v19374_v59 = vrot.slane %v17872_v54, 4  ;;  %v19372_v24 = vrot.slane %v17874_v58, 4  ;;  %v13310_v53 = vcombine.low %v6639_v28, %v6775_v40  ;;  %v13311_v6 = vcombine.high %v6639_v28, %v6775_v40 }
 0x76d   :  { %10107 = vrot.lane.b32.xlu1 %v17063_v61, %s19424_s29  ;;  %9969 = vrot.lane.b32.xlu0 %v17061_v48, %s19427_s13 }
 0x76e   :  { %11604 = vmatprep.subr.bf16.mxu0 %v13311_v6  ;;  %v6912_v20 = vsel %vm468_vm0, %v6900_v4, %v19372_v24  ;;  %v7048_v13 = vsel %vm468_vm0, %v7036_v38, %v19374_v59 }
 0x76f   :  { %v17892_v31 = vpop.permute.xlu1 %6751  ;;  %11605 = vmatpush1.bf16.msra.mxu0 %v13310_v53  ;;  %v17894_v46 = vpop.permute.xlu0 %6615  ;;  %v6913_v57 = vsel %vm19682_vm7, %v6886_v34, %v6912_v20  ;;  %v7049_v62 = vsel %vm19683_vm9, %v7022_v23, %v7048_v13  ;;  %vm19685_vm7 = vcmask 900096   ;;  %vm19687_vm9 = vcmask 138240  }
 0x770   :  { %v19371_v28 = vrot.slane %v17892_v31, 4  ;;  %v19370_v40 = vrot.slane %v17894_v46, 4  ;;  %v13328_v6 = vcombine.low %v6913_v57, %v7049_v62  ;;  %v13329_v0 = vcombine.high %v6913_v57, %v7049_v62 }
 0x771   :  { %9697 = vrot.lane.b32.xlu1 %v17061_v48, %s19426_s17  ;;  %9561 = vrot.lane.b32.xlu0 %v17061_v48, %s19429_s28 }
 0x772   :  { %11643 = vmatprep.subr.bf16.mxu1 %v13329_v0  ;;  %v6640_v38 = vsel %vm468_vm0, %v6628_v56, %v19370_v40  ;;  %v6776_v23 = vsel %vm468_vm0, %v6764_v49, %v19371_v28  ;;  %v19686_v49 = vrot.slane %v17466_v10, 4 }
 0x773   :  { %v17910_v34 = vpop.permute.xlu1 %9829  ;;  %11644 = vmatpush1.bf16.msra.mxu1 %v13328_v6  ;;  %v10102_v4 = vpop.permute.xlu0 %10101  ;;  %v6641_v53 = vsel %vm19684_vm10, %v6614_v26, %v6640_v38  ;;  %v6777_v20 = vsel %vm19685_vm7, %v6750_v17, %v6776_v23  ;;  %v19688_v38 = vrot.slane %v17505_v42, 4  ;;  %vm19690_vm10 = vcmask 154624  }
 0x774   :  { %v9844_v13 = vrot.slane %v17910_v34, 4  ;;  %v10116_v57 = vrot.slane %v10102_v4, 4  ;;  %v13312_v0 = vcombine.low %v6641_v53, %v6777_v20  ;;  %v13313_v62 = vcombine.high %v6641_v53, %v6777_v20 }
 0x775   :  { %9971 = vrot.lane.b32.xlu1 %v17063_v61, %s19427_s13  ;;  %9835 = vrot.lane.b32.xlu0 %v17063_v61, %s19452_s5  ;;  %vm19691_vm7 = vcmask 146432  }
 0x776   :  { %v10126_v56 = vsel %vm468_vm0, %v19686_v49, %v10116_v57  ;;  %11645 = vmatprep.subr.bf16.mxu1 %v13313_v62  ;;  %v9854_v23 = vsel %vm468_vm0, %v19688_v38, %v9844_v13  ;;  %v19689_v62 = vrot.slane %v17503_v51, 4 }
 0x777   :  { %v17922_v6 = vpop.permute.xlu1 %10103  ;;  %11646 = vmatpush1.bf16.msra.mxu1 %v13312_v0  ;;  %v9966_v17 = vpop.permute.xlu0 %9965  ;;  %v10127_v26 = vsel %vm19687_vm9, %v17466_v10, %v10126_v56  ;;  %v9855_v38 = vsel %vm19690_vm10, %v17505_v42, %v9854_v23  ;;  %v19692_v42 = vrot.slane %v17539_v22, 4  ;;  %vm19694_vm10 = vcmask 228352  }
 0x778   :  { %v19373_v53 = vrot.slane %v17922_v6, 4  ;;  %v9980_v20 = vrot.slane %v9966_v17, 4  ;;  %v13519_v40 = vcombine.high %v10127_v26, %v10127_v26  ;;  %v13518_v28 = vcombine.low %v10127_v26, %v10127_v26 }
 0x779   :  { %9425 = vrot.lane.b32.xlu1 %v17061_v48, %s19614_s4  ;;  %9289 = vrot.lane.b32.xlu0 %v17061_v48, %s19430_s23 }
 0x77a   :  { %v10128_v0 = vsel %vm468_vm0, %v10116_v57, %v19373_v53  ;;  %13534 = vmatprep.subr.msk.bf16.mxu0 %vm468_vm0, %v13519_v40  ;;  %v11473_v10 = vsel %vm468_vm0, %v13518_v28, 0  ;;  %v9990_v49 = vsel %vm468_vm0, %v19689_v62, %v9980_v20 }
 0x77b   :  { %v17942_v56 = vpop.permute.xlu1 %9693  ;;  %11611 = vmatpush2.bf16.msra.mxu0 %v11473_v10  ;;  %v17944_v26 = vpop.permute.xlu0 %9557  ;;  %v9991_v24 = vsel %vm19691_vm7, %v17503_v51, %v9990_v49  ;;  %v10129_v57 = vsel %vm19687_vm9, %v10102_v4, %v10128_v0  ;;  %v19693_v4 = vrot.slane %v17537_v21, 4  ;;  %vm19695_vm7 = vcmask 220160  }
 0x77c   :  { %v9708_v40 = vrot.slane %v17942_v56, 4  ;;  %v9572_v28 = vrot.slane %v17944_v26, 4  ;;  %v13502_v53 = vcombine.low %v9855_v38, %v9991_v24  ;;  %v13503_v59 = vcombine.high %v9855_v38, %v9991_v24 }
 0x77d   :  { %9699 = vrot.lane.b32.xlu1 %v17063_v61, %s19426_s17  ;;  %9563 = vrot.lane.b32.xlu0 %v17063_v61, %s19429_s28  ;;  %v13521_v10 = vcombine.high %v10129_v57, %v10129_v57  ;;  %v13520_v62 = vcombine.low %v10129_v57, %v10129_v57  ;;  %vm19696_vm9 = vcmask 154624  }
 0x77e   :  { %11612 = vmatprep.subr.bf16.mxu0 %v13503_v59  ;;  %v9582_v51 = vsel %vm468_vm0, %v19692_v42, %v9572_v28  ;;  %v9718_v23 = vsel %vm468_vm0, %v19693_v4, %v9708_v40 }
 0x77f   :  { %13536 = vmatprep.subr.msk.bf16.mxu1 %vm468_vm0, %v13521_v10  ;;  %v17964_v24 = vpop.permute.xlu1 %9967  ;;  %11613 = vmatpush2.bf16.msra.mxu0 %v13502_v53  ;;  %v11479_v0 = vsel %vm468_vm0, %v13520_v62, 0  ;;  %v17967_v49 = vpop.permute.xlu0 %9831  ;;  %v9583_v59 = vsel %vm19694_vm10, %v17539_v22, %v9582_v51  ;;  %v9719_v38 = vsel %vm19695_vm7, %v17537_v21, %v9718_v23  ;;  %vm19697_vm10 = vcmask 146432  }
 0x780   :  { %v19375_v57 = vrot.slane %v17964_v24, 4  ;;  %11652 = vmatpush2.bf16.msra.mxu1 %v11479_v0  ;;  %v19376_v42 = vrot.slane %v17967_v49, 4  ;;  %v13486_v4 = vcombine.low %v9583_v59, %v9719_v38  ;;  %v13487_v10 = vcombine.high %v9583_v59, %v9719_v38 }
 0x781   :  { %9153 = vrot.lane.b32.xlu1 %v17061_v48, %s19616_s9  ;;  %9017 = vrot.lane.b32.xlu0 %v17061_v48, %s19615_s12  ;;  %vm19700_vm7 = vcmask 236544  }
 0x782   :  { %11614 = vmatprep.subr.bf16.mxu0 %v13487_v10  ;;  %v9856_v22 = vsel %vm468_vm0, %v9844_v13, %v19376_v42  ;;  %v9992_v21 = vsel %vm468_vm0, %v9980_v20, %v19375_v57  ;;  %v19698_v13 = vrot.slane %v17576_v3, 4 }
 0x783   :  { %v9422_v53 = vpop.permute.xlu1 %9421  ;;  %11615 = vmatpush2.bf16.msra.mxu0 %v13486_v4  ;;  %v9286_v62 = vpop.permute.xlu0 %9285  ;;  %v9857_v51 = vsel %vm19696_vm9, %v17910_v34, %v9856_v22  ;;  %v9993_v23 = vsel %vm19697_vm10, %v9966_v17, %v9992_v21  ;;  %v19699_v4 = vrot.slane %v17574_v29, 4  ;;  %vm19701_vm9 = vcmask 228352  }
 0x784   :  { %v9436_v0 = vrot.slane %v9422_v53, 4  ;;  %v9300_v59 = vrot.slane %v9286_v62, 4  ;;  %v13504_v38 = vcombine.low %v9857_v51, %v9993_v23  ;;  %v13505_v10 = vcombine.high %v9857_v51, %v9993_v23 }
 0x785   :  { %9427 = vrot.lane.b32.xlu1 %v17063_v61, %s19614_s4  ;;  %9291 = vrot.lane.b32.xlu0 %v17063_v61, %s19430_s23  ;;  %vm19702_vm10 = vcmask 220160  }
 0x786   :  { %11653 = vmatprep.subr.bf16.mxu1 %v13505_v10  ;;  %v9310_v20 = vsel %vm468_vm0, %v19698_v13, %v9300_v59  ;;  %v9446_v34 = vsel %vm468_vm0, %v19699_v4, %v9436_v0 }
 0x787   :  { %v17998_v17 = vpop.permute.xlu1 %9695  ;;  %11654 = vmatpush2.bf16.msra.mxu1 %v13504_v38  ;;  %v18000_v22 = vpop.permute.xlu0 %9559  ;;  %v9311_v21 = vsel %vm3161_vm14, %v17576_v3, %v9310_v20  ;;  %v9447_v51 = vsel %vm19700_vm7, %v17574_v29, %v9446_v34 }
 0x788   :  { %v19378_v23 = vrot.slane %v17998_v17, 4  ;;  %v19377_v10 = vrot.slane %v18000_v22, 4  ;;  %v13470_v13 = vcombine.low %v9311_v21, %v9447_v51  ;;  %v13471_v57 = vcombine.high %v9311_v21, %v9447_v51 }
 0x789   :  { %8881 = vrot.lane.b32.xlu1 %v17061_v48, %s19618_s11  ;;  %8745 = vrot.lane.b32.xlu0 %v17061_v48, %s19617_s16 }
 0x78a   :  { %11616 = vmatprep.subr.bf16.mxu0 %v13471_v57  ;;  %v9584_v3 = vsel %vm468_vm0, %v9572_v28, %v19377_v10  ;;  %v9720_v29 = vsel %vm468_vm0, %v9708_v40, %v19378_v23  ;;  %v19703_v40 = vrot.slane %v17610_v63, 4 }
 0x78b   :  { %v9150_v38 = vpop.permute.xlu1 %9149  ;;  %11617 = vmatpush2.bf16.msra.mxu0 %v13470_v13  ;;  %v9014_v20 = vpop.permute.xlu0 %9013  ;;  %v9585_v4 = vsel %vm19701_vm9, %v17944_v26, %v9584_v3  ;;  %v9721_v34 = vsel %vm19702_vm10, %v17942_v56, %v9720_v29  ;;  %v19704_v26 = vrot.slane %v17608_v60, 4  ;;  %vm19712_vm9 = vcmask 728064  }
 0x78c   :  { %v9164_v21 = vrot.slane %v9150_v38, 4  ;;  %v9028_v51 = vrot.slane %v9014_v20, 4  ;;  %v13488_v57 = vcombine.low %v9585_v4, %v9721_v34  ;;  %v13489_v42 = vcombine.high %v9585_v4, %v9721_v34 }
 0x78d   :  { %9155 = vrot.lane.b32.xlu1 %v17063_v61, %s19616_s9  ;;  %9019 = vrot.lane.b32.xlu0 %v17063_v61, %s19615_s12  ;;  %vm19713_vm10 = vcmask 89088  }
 0x78e   :  { %11655 = vmatprep.subr.bf16.mxu1 %v13489_v42  ;;  %v9038_v28 = vsel %vm468_vm0, %v19703_v40, %v9028_v51  ;;  %v9174_v13 = vsel %vm468_vm0, %v19704_v26, %v9164_v21 }
 0x78f   :  { %v18032_v56 = vpop.permute.xlu1 %9423  ;;  %11656 = vmatpush2.bf16.msra.mxu1 %v13488_v57  ;;  %v18034_v3 = vpop.permute.xlu0 %9287  ;;  %v9039_v29 = vsel %vm2887_vm11, %v17610_v63, %v9038_v28  ;;  %v9175_v4 = vsel %vm3024_vm15, %v17608_v60, %v9174_v13 }
 0x790   :  { %v19382_v42 = vrot.slane %v18032_v56, 4  ;;  %v19379_v34 = vrot.slane %v18034_v3, 4  ;;  %v13454_v40 = vcombine.low %v9039_v29, %v9175_v4  ;;  %v13455_v10 = vcombine.high %v9039_v29, %v9175_v4 }
 0x791   :  { %8613 = vrot.lane.b32.xlu1 %v17073_v55, %s19483_s2  ;;  %8477 = vrot.lane.b32.xlu0 %v17073_v55, %s19490_s3  ;;  %s19815_s3 = sld [smem:[#allocation20_spill]] }
 0x792   :  { %11618 = vmatprep.subr.bf16.mxu0 %v13455_v10  ;;  %v9312_v63 = vsel %vm468_vm0, %v9300_v59, %v19379_v34  ;;  %v9448_v60 = vsel %vm468_vm0, %v9436_v0, %v19382_v42  ;;  %v19705_v0 = vrot.slane %v17644_v37, 4 }
 0x793   :  { %v18052_v57 = vpop.permute.xlu1 %8877  ;;  %11619 = vmatpush2.bf16.msra.mxu0 %v13454_v40  ;;  %v8742_v28 = vpop.permute.xlu0 %8741  ;;  %v9313_v26 = vsel %vm3161_vm14, %v9286_v62, %v9312_v63  ;;  %v9449_v13 = vsel %vm19700_vm7, %v9422_v53, %v9448_v60  ;;  %v19706_v62 = vrot.slane %v17642_v5, 4  ;;  %vm19715_vm7 = vcmask 744448  }
 0x794   :  { %v8892_v29 = vrot.slane %v18052_v57, 4  ;;  %v8756_v4 = vrot.slane %v8742_v28, 4  ;;  %v13472_v10 = vcombine.low %v9313_v26, %v9449_v13  ;;  %v13473_v23 = vcombine.high %v9313_v26, %v9449_v13 }
 0x795   :  { %8883 = vrot.lane.b32.xlu1 %v17063_v61, %s19618_s11  ;;  %8747 = vrot.lane.b32.xlu0 %v17063_v61, %s19617_s16 }
 0x796   :  { %11657 = vmatprep.subr.bf16.mxu1 %v13473_v23  ;;  %v8766_v59 = vsel %vm468_vm0, %v19705_v0, %v8756_v4  ;;  %v8902_v53 = vsel %vm468_vm0, %v19706_v62, %v8892_v29  ;;  %v18091_v62 = vpack.c.bf16 %v17068_v44, %v17068_v44 }
 0x797   :  { %v18067_v40 = vpop.permute.xlu1 %9151  ;;  %11658 = vmatpush2.bf16.msra.mxu1 %v13472_v10  ;;  %v18069_v63 = vpop.permute.xlu0 %9015  ;;  %v8767_v60 = vsel %vm2613_vm13, %v17644_v37, %v8766_v59  ;;  %v8903_v26 = vsel %vm2750_vm12, %v17642_v5, %v8902_v53 }
 0x798   :  { %v19381_v23 = vrot.slane %v18067_v40, 4  ;;  %v19380_v13 = vrot.slane %v18069_v63, 4  ;;  %v13438_v0 = vcombine.low %v8767_v60, %v8903_v26  ;;  %v13439_v34 = vcombine.high %v8767_v60, %v8903_v26 }
 0x799   :  { %7981 = vrot.lane.b32.xlu1 %v17070_v50, %s19495_s0  ;;  %8253 = vrot.lane.b32.xlu0 %v17070_v50, %s19432_s18 }
 0x79a   :  { %11620 = vmatprep.subr.bf16.mxu0 %v13439_v34  ;;  %v9040_v37 = vsel %vm468_vm0, %v9028_v51, %v19380_v13  ;;  %v9176_v5 = vsel %vm468_vm0, %v9164_v21, %v19381_v23  ;;  %v19707_v21 = vrot.slane %v17679_v33, 4 }
 0x79b   :  { %v18087_v10 = vpop.permute.xlu1 %8609  ;;  %11621 = vmatpush2.bf16.msra.mxu0 %v13438_v0  ;;  %v8474_v59 = vpop.permute.xlu0 %8473  ;;  %v9041_v53 = vsel %vm2887_vm11, %v9014_v20, %v9040_v37  ;;  %v9177_v34 = vsel %vm3024_vm15, %v9150_v38, %v9176_v5  ;;  %v19708_v20 = vrot.slane %v17664_v19, 4 }
 0x79c   :  { %v8622_v60 = vrot.slane %v18087_v10, 4  ;;  %v8486_v26 = vrot.slane %v8474_v59, 4  ;;  %v13456_v51 = vcombine.low %v9041_v53, %v9177_v34  ;;  %v13457_v13 = vcombine.high %v9041_v53, %v9177_v34 }
 0x79d   :  { %8255 = vrot.lane.b32.xlu1 %v18091_v62, %s19432_s18  ;;  %8117 = vrot.lane.b32.xlu0 %v17070_v50, %s19435_s24 }
 0x79e   :  { %v8634_v44 = vsel %vm468_vm0, %v19707_v21, %v8622_v60  ;;  %11659 = vmatprep.subr.bf16.mxu1 %v13457_v13  ;;  %v8498_v38 = vsel %vm468_vm0, %v19708_v20, %v8486_v26  ;;  %11623 = vmatmul.mubr.bf16.vlgmr.msra.gmra.mxu0 %v17626_v41 }
 0x79f   :  { %v18107_v0 = vpop.permute.xlu1 %8879  ;;  %11660 = vmatpush2.bf16.msra.mxu1 %v13456_v51  ;;  %v18109_v37 = vpop.permute.xlu0 %8743  ;;  %v8499_v5 = vsel %vm2339_vm1, %v17664_v19, %v8498_v38  ;;  %v8635_v53 = vsel %vm2476_vm2, %v17679_v33, %v8634_v44  ;;  %13539 = vmatprep.mubr.msk.bf16.mxu0 %vm5318_vm8, %v17264_v11 }
 0x7a0   :  { %v8893_v13 = vrot.slane %v18107_v0, 4  ;;  %v8757_v34 = vrot.slane %v18109_v37, 4  ;;  %v13426_v21 = vcombine.low %v8499_v5, %v8635_v53  ;;  %v13427_v20 = vcombine.high %v8499_v5, %v8635_v53 }
 0x7a1   :  { %7845 = vrot.lane.b32.xlu1 %v17070_v50, %s19433_s20  ;;  %7709 = vrot.lane.b32.xlu0 %v17070_v50, %s19441_s25 }
 0x7a2   :  { %v8904_v19 = vsel %vm468_vm0, %v8892_v29, %v8893_v13  ;;  %v8768_v33 = vsel %vm468_vm0, %v8756_v4, %v8757_v34  ;;  %11672 = vmatprep.subr.bf16.mxu0 %v13427_v20 }
 0x7a3   :  { %v18129_v51 = vpop.permute.xlu1 %8475  ;;  %11673 = vmatpush1.bf16.msra.mxu0 %v13426_v21  ;;  %v8250_v44 = vpop.permute.xlu0 %8249  ;;  %v8769_v38 = vsel %vm2613_vm13, %v8742_v28, %v8768_v33  ;;  %v8905_v5 = vsel %vm2750_vm12, %v18052_v57, %v8904_v19 }
 0x7a4   :  { %v8487_v53 = vrot.slane %v18129_v51, 4  ;;  %v8262_v23 = vrot.slane %v8250_v44, 4  ;;  %v13440_v42 = vcombine.low %v8769_v38, %v8905_v5  ;;  %v13441_v45 = vcombine.high %v8769_v38, %v8905_v5 }
 0x7a5   :  { %8119 = vrot.lane.b32.xlu1 %v18091_v62, %s19435_s24  ;;  %7983 = vrot.lane.b32.xlu0 %v18091_v62, %s19495_s0 }
 0x7a6   :  { %v8274_v29 = vsel %vm468_vm0, %v8261_v1, %v8262_v23  ;;  %11661 = vmatprep.subr.bf16.mxu1 %v13441_v45  ;;  %v8500_v57 = vsel %vm468_vm0, %v8486_v26, %v8487_v53 }
 0x7a7   :  { %v18145_v28 = vpop.permute.xlu1 %7977  ;;  %11662 = vmatpush2.bf16.msra.mxu1 %v13440_v42  ;;  %v18147_v4 = vpop.permute.xlu0 %8611  ;;  %v8275_v21 = vsel %vm2114_vm3, %v17698_v27, %v8274_v29  ;;  %v8501_v26 = vsel %vm2339_vm1, %v8474_v59, %v8500_v57 }
 0x7a8   :  { %v7990_v20 = vrot.slane %v18145_v28, 4  ;;  %v8623_v19 = vrot.slane %v18147_v4, 4  ;;  %v13410_v33 = vcombine.low %v8275_v21, %v17056_v12  ;;  %v13411_v1 = vcombine.high %v8275_v21, %v17056_v12 }
 0x7a9   :  { %7573 = vrot.lane.b32.xlu1 %v17070_v50, %s19438_s14  ;;  %7437 = vrot.lane.b32.xlu0 %v17070_v50, %s19420_s6 }
 0x7aa   :  { %v8636_v45 = vsel %vm468_vm0, %v8622_v60, %v8623_v19  ;;  %11674 = vmatprep.subr.bf16.mxu0 %v13411_v1  ;;  %11664 = vmatmul.mubr.bf16.vlgmr.msra.gmra.mxu1 %v17626_v41  ;;  %v8002_v27 = vsel %vm468_vm0, %v7989_v18, %v7990_v20 }
 0x7ab   :  { %v18166_v42 = vpop.permute.xlu1 %8251  ;;  %11675 = vmatpush1.bf16.msra.mxu0 %v13410_v33  ;;  %v8114_v12 = vpop.permute.xlu0 %8113  ;;  %v8637_v38 = vsel %vm2476_vm2, %v18087_v10, %v8636_v45  ;;  %13541 = vmatprep.mubr.msk.bf16.mxu1 %vm5318_vm8, %v17264_v11  ;;  %v19709_v10 = vrot.slane %v17741_v36, 4  ;;  %v8003_v1 = vsel %vm1840_vm4, %v17743_v9, %v8002_v27  ;;  %v19711_v27 = vrot.slane %v17776_v25, 4 }
 0x7ac   :  { %v19384_v60 = vrot.slane %v18166_v42, 4  ;;  %v8126_v5 = vrot.slane %v8114_v12, 4  ;;  %v13428_v29 = vcombine.low %v8501_v26, %v8637_v38  ;;  %v13429_v21 = vcombine.high %v8501_v26, %v8637_v38 }
 0x7ad   :  { %7847 = vrot.lane.b32.xlu1 %v18091_v62, %s19433_s20  ;;  %7711 = vrot.lane.b32.xlu0 %v18091_v62, %s19441_s25 }
 0x7ae   :  { %v8276_v18 = vsel %vm468_vm0, %v8262_v23, %v19384_v60  ;;  %v8138_v59 = vsel %vm468_vm0, %v19709_v10, %v8126_v5  ;;  %11713 = vmatprep.subr.bf16.mxu1 %v13429_v21 }
 0x7af   :  { %v18184_v57 = vpop.permute.xlu1 %7841  ;;  %11714 = vmatpush1.bf16.msra.mxu1 %v13428_v29  ;;  %v18186_v33 = vpop.permute.xlu0 %7705  ;;  %v8139_v45 = vsel %vm1977_vm5, %v17741_v36, %v8138_v59  ;;  %v8277_v26 = vsel %vm2114_vm3, %v8250_v44, %v8276_v18  ;;  %v19710_v36 = vrot.slane %v17774_v35, 4 }
 0x7b0   :  { %v7854_v23 = vrot.slane %v18184_v57, 4  ;;  %v7718_v38 = vrot.slane %v18186_v33, 4  ;;  %v13394_v60 = vcombine.low %v8003_v1, %v8139_v45  ;;  %v13395_v10 = vcombine.high %v8003_v1, %v8139_v45 }
 0x7b1   :  { %7301 = vrot.lane.b32.xlu1 %v17070_v50, %s19440_s26  ;;  %7165 = vrot.lane.b32.xlu0 %v17070_v50, %s19422_s22  ;;  %v13412_v29 = vcombine.low %v8277_v26, %v17061_v48  ;;  %v13413_v9 = vcombine.high %v8277_v26, %v17061_v48 }
 0x7b2   :  { %v7866_v44 = vsel %vm468_vm0, %v19710_v36, %v7854_v23  ;;  %v7730_v21 = vsel %vm468_vm0, %v19711_v27, %v7718_v38  ;;  %11676 = vmatprep.subr.bf16.mxu0 %v13395_v10 }
 0x7b3   :  { %11715 = vmatprep.subr.bf16.mxu1 %v13413_v9  ;;  %v18207_v18 = vpop.permute.xlu1 %8115  ;;  %11677 = vmatpush1.bf16.msra.mxu0 %v13394_v60  ;;  %v18209_v59 = vpop.permute.xlu0 %7979  ;;  %v7731_v1 = vsel %vm19712_vm9, %v17776_v25, %v7730_v21  ;;  %v7867_v48 = vsel %vm19713_vm10, %v17774_v35, %v7866_v44  ;;  %vm19716_vm9 = vcmask 736256   ;;  %vm19717_vm10 = vcmask 728064  }
 0x7b4   :  { %v19385_v45 = vrot.slane %v18207_v18, 4  ;;  %11716 = vmatpush1.bf16.msra.mxu1 %v13412_v29  ;;  %v19401_v26 = vrot.slane %v18209_v59, 4  ;;  %v13378_v36 = vcombine.low %v7731_v1, %v7867_v48  ;;  %v13379_v27 = vcombine.high %v7731_v1, %v7867_v48 }
 0x7b5   :  { %7575 = vrot.lane.b32.xlu1 %v18091_v62, %s19438_s14  ;;  %7439 = vrot.lane.b32.xlu0 %v18091_v62, %s19420_s6 }
 0x7b6   :  { %v8140_v25 = vsel %vm468_vm0, %v8126_v5, %v19385_v45  ;;  %v8004_v35 = vsel %vm468_vm0, %v7990_v20, %v19401_v26  ;;  %11678 = vmatprep.subr.bf16.mxu0 %v13379_v27  ;;  %v19714_v5 = vrot.slane %v17810_v52, 4 }
 0x7b7   :  { %v7570_v60 = vpop.permute.xlu1 %7569  ;;  %11679 = vmatpush1.bf16.msra.mxu0 %v13378_v36  ;;  %v7434_v10 = vpop.permute.xlu0 %7433  ;;  %v8005_v29 = vsel %vm1840_vm4, %v18145_v28, %v8004_v35  ;;  %v8141_v9 = vsel %vm1977_vm5, %v8114_v12, %v8140_v25 }
 0x7b8   :  { %v7582_v44 = vrot.slane %v7570_v60, 4  ;;  %v7446_v21 = vrot.slane %v7434_v10, 4  ;;  %v13396_v1 = vcombine.low %v8005_v29, %v8141_v9  ;;  %v13397_v48 = vcombine.high %v8005_v29, %v8141_v9 }
 0x7b9   :  { %7029 = vrot.lane.b32.xlu1 %v17070_v50, %s19444_s27  ;;  %6893 = vrot.lane.b32.xlu0 %v17070_v50, %s19423_s21 }
 0x7ba   :  { %v7594_v20 = vsel %vm468_vm0, %v7581_v8, %v7582_v44  ;;  %v7458_v28 = vsel %vm468_vm0, %v19714_v5, %v7446_v21  ;;  %11717 = vmatprep.subr.bf16.mxu1 %v13397_v48 }
 0x7bb   :  { %v18240_v12 = vpop.permute.xlu1 %7843  ;;  %11718 = vmatpush1.bf16.msra.mxu1 %v13396_v1  ;;  %v18242_v36 = vpop.permute.xlu0 %7707  ;;  %v7459_v27 = vsel %vm19715_vm7, %v17810_v52, %v7458_v28  ;;  %v7595_v25 = vsel %vm19716_vm9, %v17808_v15, %v7594_v20  ;;  %vm19718_vm7 = vcmask 89088   ;;  %vm19721_vm9 = vcmask 818176  }
 0x7bc   :  { %v19396_v35 = vrot.slane %v18240_v12, 4  ;;  %v19386_v8 = vrot.slane %v18242_v36, 4  ;;  %v13362_v29 = vcombine.low %v7459_v27, %v7595_v25  ;;  %v13363_v9 = vcombine.high %v7459_v27, %v7595_v25 }
 0x7bd   :  { %7303 = vrot.lane.b32.xlu1 %v18091_v62, %s19440_s26  ;;  %7167 = vrot.lane.b32.xlu0 %v18091_v62, %s19422_s22 }
 0x7be   :  { %v7868_v1 = vsel %vm468_vm0, %v7854_v23, %v19396_v35  ;;  %v7732_v15 = vsel %vm468_vm0, %v7718_v38, %v19386_v8  ;;  %11680 = vmatprep.subr.bf16.mxu0 %v13363_v9  ;;  %v19719_v23 = vrot.slane %v17840_v43, 4 }
 0x7bf   :  { %v7298_v52 = vpop.permute.xlu1 %7297  ;;  %11681 = vmatpush1.bf16.msra.mxu0 %v13362_v29  ;;  %v7162_v48 = vpop.permute.xlu0 %7161  ;;  %v7733_v20 = vsel %vm19717_vm10, %v18186_v33, %v7732_v15  ;;  %v7869_v5 = vsel %vm19718_vm7, %v18184_v57, %v7868_v1  ;;  %v19720_v29 = vrot.slane %v17842_v14, 4  ;;  %vm19722_vm10 = vcmask 809984  }
 0x7c0   :  { %v7310_v28 = vrot.slane %v7298_v52, 4  ;;  %v7174_v27 = vrot.slane %v7162_v48, 4  ;;  %v13380_v25 = vcombine.low %v7733_v20, %v7869_v5  ;;  %v13381_v45 = vcombine.high %v7733_v20, %v7869_v5 }
 0x7c1   :  { %6757 = vrot.lane.b32.xlu1 %v17070_v50, %s19613_s19  ;;  %6621 = vrot.lane.b32.xlu0 %v17070_v50, %s19612_s10  ;;  %vm19723_vm7 = vcmask 744448  }
 0x7c2   :  { %v7322_v38 = vsel %vm468_vm0, %v19719_v23, %v7310_v28  ;;  %v7186_v33 = vsel %vm468_vm0, %v19720_v29, %v7174_v27  ;;  %11719 = vmatprep.subr.bf16.mxu1 %v13381_v45 }
 0x7c3   :  { %v18274_v57 = vpop.permute.xlu1 %7571  ;;  %11720 = vmatpush1.bf16.msra.mxu1 %v13380_v25  ;;  %v18276_v9 = vpop.permute.xlu0 %7435  ;;  %v7187_v1 = vsel %vm19721_vm9, %v17842_v14, %v7186_v33  ;;  %v7323_v50 = vsel %vm19722_vm10, %v17840_v43, %v7322_v38  ;;  %vm19724_vm9 = vcmask 736256   ;;  %vm19727_vm10 = vcmask 891904  }
 0x7c4   :  { %v19395_v15 = vrot.slane %v18274_v57, 4  ;;  %v19387_v20 = vrot.slane %v18276_v9, 4  ;;  %v13346_v5 = vcombine.low %v7187_v1, %v7323_v50  ;;  %v13347_v23 = vcombine.high %v7187_v1, %v7323_v50 }
 0x7c5   :  { %7031 = vrot.lane.b32.xlu1 %v18091_v62, %s19444_s27  ;;  %6895 = vrot.lane.b32.xlu0 %v18091_v62, %s19423_s21  ;;  %s19826_s21 = sld [smem:[#allocation23_spill]] }
 0x7c6   :  { %v7596_v45 = vsel %vm468_vm0, %v7582_v44, %v19395_v15  ;;  %v7460_v43 = vsel %vm468_vm0, %v7446_v21, %v19387_v20  ;;  %11682 = vmatprep.subr.bf16.mxu0 %v13347_v23  ;;  %v19725_v44 = vrot.slane %v17872_v54, 4 }
 0x7c7   :  { %v7026_v14 = vpop.permute.xlu1 %7025  ;;  %11683 = vmatpush1.bf16.msra.mxu0 %v13346_v5  ;;  %v6890_v25 = vpop.permute.xlu0 %6889  ;;  %v7461_v38 = vsel %vm19723_vm7, %v7434_v10, %v7460_v43  ;;  %v7597_v29 = vsel %vm19724_vm9, %v7570_v60, %v7596_v45  ;;  %v19726_v5 = vrot.slane %v17874_v58, 4  ;;  %vm19728_vm7 = vcmask 826368  }
 0x7c8   :  { %v7038_v33 = vrot.slane %v7026_v14, 4  ;;  %v6902_v1 = vrot.slane %v6890_v25, 4  ;;  %v13364_v50 = vcombine.low %v7461_v38, %v7597_v29  ;;  %v13365_v8 = vcombine.high %v7461_v38, %v7597_v29 }
 0x7c9   :  { %6759 = vrot.lane.b32.xlu1 %v18091_v62, %s19613_s19  ;;  %6623 = vrot.lane.b32.xlu0 %v18091_v62, %s19612_s10  ;;  %vm19729_vm9 = vcmask 818176  }
 0x7ca   :  { %v7050_v21 = vsel %vm468_vm0, %v19725_v44, %v7038_v33  ;;  %v6914_v10 = vsel %vm468_vm0, %v19726_v5, %v6902_v1  ;;  %11721 = vmatprep.subr.bf16.mxu1 %v13365_v8 }
 0x7cb   :  { %v18306_v60 = vpop.permute.xlu1 %7299  ;;  %11722 = vmatpush1.bf16.msra.mxu1 %v13364_v50  ;;  %v18308_v23 = vpop.permute.xlu0 %7163  ;;  %v6915_v45 = vsel %vm19727_vm10, %v17874_v58, %v6914_v10  ;;  %v7051_v62 = vsel %vm19728_vm7, %v17872_v54, %v7050_v21  ;;  %vm19730_vm10 = vcmask 809984   ;;  %vm19733_vm7 = vcmask 908288  }
 0x7cc   :  { %v19393_v43 = vrot.slane %v18306_v60, 4  ;;  %v19388_v38 = vrot.slane %v18308_v23, 4  ;;  %v13330_v29 = vcombine.low %v6915_v45, %v7051_v62  ;;  %v13331_v44 = vcombine.high %v6915_v45, %v7051_v62 }
 0x7cd   :  { %9837 = vrot.lane.b32.xlu1 %v17073_v55, %s19452_s5  ;;  %10109 = vrot.lane.b32.xlu0 %v17073_v55, %s19424_s29 }
 0x7ce   :  { %v7324_v8 = vsel %vm468_vm0, %v7310_v28, %v19393_v43  ;;  %v7188_v54 = vsel %vm468_vm0, %v7174_v27, %v19388_v38  ;;  %11684 = vmatprep.subr.bf16.mxu0 %v13331_v44  ;;  %v19731_v28 = vrot.slane %v17892_v31, 4 }
 0x7cf   :  { %v6754_v58 = vpop.permute.xlu1 %6753  ;;  %11685 = vmatpush1.bf16.msra.mxu0 %v13330_v29  ;;  %v6618_v50 = vpop.permute.xlu0 %6617  ;;  %v7189_v21 = vsel %vm19729_vm9, %v7162_v48, %v7188_v54  ;;  %v7325_v5 = vsel %vm19730_vm10, %v7298_v52, %v7324_v8  ;;  %v19732_v29 = vrot.slane %v17894_v46, 4  ;;  %vm19734_vm9 = vcmask 900096  }
 0x7d0   :  { %v6766_v10 = vrot.slane %v6754_v58, 4  ;;  %v6630_v45 = vrot.slane %v6618_v50, 4  ;;  %v13348_v62 = vcombine.low %v7189_v21, %v7325_v5  ;;  %v13349_v20 = vcombine.high %v7189_v21, %v7325_v5 }
 0x7d1   :  { %9701 = vrot.lane.b32.xlu1 %v17073_v55, %s19426_s17  ;;  %9973 = vrot.lane.b32.xlu0 %v17073_v55, %s19427_s13  ;;  %vm19735_vm10 = vcmask 891904   ;;  %s19824_s13 = sld [smem:[#allocation21_spill]] }
 0x7d2   :  { %v6778_v27 = vsel %vm468_vm0, %v19731_v28, %v6766_v10  ;;  %v6642_v48 = vsel %vm468_vm0, %v19732_v29, %v6630_v45  ;;  %11723 = vmatprep.subr.bf16.mxu1 %v13349_v20  ;;  %s19825_s17 = sld [smem:[#allocation22_spill]] }
 0x7d3   :  { %v18338_v52 = vpop.permute.xlu1 %7027  ;;  %11724 = vmatpush1.bf16.msra.mxu1 %v13348_v62  ;;  %v18340_v44 = vpop.permute.xlu0 %6891  ;;  %v6643_v8 = vsel %vm19733_vm7, %v17894_v46, %v6642_v48  ;;  %v6779_v54 = vsel %vm19734_vm9, %v17892_v31, %v6778_v27  ;;  %vm19736_vm7 = vcmask 826368   ;;  %vm19737_vm9 = vcmask 908288  }
 0x7d4   :  { %v19392_v21 = vrot.slane %v18338_v52, 4  ;;  %v19389_v5 = vrot.slane %v18340_v44, 4  ;;  %v13314_v28 = vcombine.low %v6643_v8, %v6779_v54  ;;  %v13315_v38 = vcombine.high %v6643_v8, %v6779_v54 }
 0x7d5   :  { %9429 = vrot.lane.b32.xlu1 %v17073_v55, %s19614_s4  ;;  %9565 = vrot.lane.b32.xlu0 %v17073_v55, %s19429_s28 }
 0x7d6   :  { %v7052_v20 = vsel %vm468_vm0, %v7038_v33, %v19392_v21  ;;  %v6916_v31 = vsel %vm468_vm0, %v6902_v1, %v19389_v5  ;;  %11686 = vmatprep.subr.bf16.mxu0 %v13315_v38 }
 0x7d7   :  { %v18358_v46 = vpop.permute.xlu1 %6755  ;;  %11687 = vmatpush1.bf16.msra.mxu0 %v13314_v28  ;;  %v18360_v62 = vpop.permute.xlu0 %6619  ;;  %v6917_v27 = vsel %vm19735_vm10, %v6890_v25, %v6916_v31  ;;  %v7053_v29 = vsel %vm19736_vm7, %v7026_v14, %v7052_v20  ;;  %vm19738_vm10 = vcmask 900096   ;;  %vm19741_vm7 = vcmask 138240  }
 0x7d8   :  { %v19391_v48 = vrot.slane %v18358_v46, 4  ;;  %v19390_v8 = vrot.slane %v18360_v62, 4  ;;  %v13332_v54 = vcombine.low %v6917_v27, %v7053_v29  ;;  %v13333_v33 = vcombine.high %v6917_v27, %v7053_v29 }
 0x7d9   :  { %9157 = vrot.lane.b32.xlu1 %v17073_v55, %s19616_s9  ;;  %9293 = vrot.lane.b32.xlu0 %v17073_v55, %s19430_s23 }
 0x7da   :  { %v6780_v1 = vsel %vm468_vm0, %v6766_v10, %v19391_v48  ;;  %v6644_v14 = vsel %vm468_vm0, %v6630_v45, %v19390_v8  ;;  %11725 = vmatprep.subr.bf16.mxu1 %v13333_v33  ;;  %v19739_v10 = vrot.slane %v17922_v6, 4  ;;  %v19742_v48 = vmov 0.0|0.0  }
 0x7db   :  { %v18376_v25 = vpop.permute.xlu1 %9833  ;;  %11726 = vmatpush1.bf16.msra.mxu1 %v13332_v54  ;;  %v10106_v38 = vpop.permute.xlu0 %10105  ;;  %v6645_v28 = vsel %vm19737_vm9, %v6618_v50, %v6644_v14  ;;  %v6781_v20 = vsel %vm19738_vm10, %v6754_v58, %v6780_v1  ;;  %v19740_v50 = vrot.slane %v17967_v49, 4  ;;  %vm19744_vm9 = vcmask 154624  }
 0x7dc   :  { %v9846_v31 = vrot.slane %v18376_v25, 4  ;;  %v10118_v27 = vrot.slane %v10106_v38, 4  ;;  %v13316_v29 = vcombine.low %v6645_v28, %v6781_v20  ;;  %v13317_v5 = vcombine.high %v6645_v28, %v6781_v20 }
 0x7dd   :  { %8885 = vrot.lane.b32.xlu1 %v17073_v55, %s19618_s11  ;;  %9021 = vrot.lane.b32.xlu0 %v17073_v55, %s19615_s12  ;;  %vm19745_vm10 = vcmask 146432  }
 0x7de   :  { %v10130_v45 = vsel %vm468_vm0, %v19739_v10, %v10118_v27  ;;  %11727 = vmatprep.subr.bf16.mxu1 %v13317_v5  ;;  %v9858_v58 = vsel %vm468_vm0, %v19740_v50, %v9846_v31 }
 0x7df   :  { %v18391_v54 = vpop.permute.xlu1 %10107  ;;  %11728 = vmatpush1.bf16.msra.mxu1 %v13316_v29  ;;  %v9970_v33 = vpop.permute.xlu0 %9969  ;;  %v10131_v1 = vsel %vm19741_vm7, %v17922_v6, %v10130_v45  ;;  %v19743_v29 = vrot.slane %v17964_v24, 4 }
 0x7e0   :  { %v19394_v14 = vrot.slane %v18391_v54, 4  ;;  %v9982_v28 = vrot.slane %v9970_v33, 4  ;;  %v13523_v20 = vcombine.high %v10131_v1, %v10131_v1  ;;  %v13522_v8 = vcombine.low %v10131_v1, %v10131_v1 }
 0x7e1   :  { %8887 = vrot.lane.b32.xlu1 %v19742_v48, %s19618_s11  ;;  %8749 = vrot.lane.b32.xlu0 %v17073_v55, %s19617_s16  ;;  %v9859_v1 = vsel %vm19744_vm9, %v17967_v49, %v9858_v58  ;;  %v19747_v49 = vrot.slane %v18000_v22, 4  ;;  %vm19748_vm9 = vcmask 228352  }
 0x7e2   :  { %v10132_v5 = vsel %vm468_vm0, %v10118_v27, %v19394_v14  ;;  %v9994_v10 = vsel %vm468_vm0, %v19743_v29, %v9982_v28  ;;  %13538 = vmatprep.subr.msk.bf16.mxu0 %vm468_vm0, %v13523_v20  ;;  %v11485_v6 = vsel %vm468_vm0, %v13522_v8, 0  ;;  %v19746_v29 = vrot.slane %v17998_v17, 4 }
 0x7e3   :  { %v9698_v45 = vpop.permute.xlu1 %9697  ;;  %11693 = vmatpush2.bf16.msra.mxu0 %v11485_v6  ;;  %v9562_v50 = vpop.permute.xlu0 %9561  ;;  %v9995_v21 = vsel %vm19745_vm10, %v17964_v24, %v9994_v10  ;;  %v10133_v43 = vsel %vm19741_vm7, %v10106_v38, %v10132_v5  ;;  %vm19749_vm10 = vcmask 220160   ;;  %vm19750_vm7 = vcmask 154624  }
 0x7e4   :  { %v9710_v27 = vrot.slane %v9698_v45, 4  ;;  %v9574_v14 = vrot.slane %v9562_v50, 4  ;;  %v13506_v15 = vcombine.low %v9859_v1, %v9995_v21  ;;  %v13507_v35 = vcombine.high %v9859_v1, %v9995_v21 }
 0x7e5   :  { %8751 = vrot.lane.b32.xlu0 %v19742_v48, %s19617_s16  ;;  %v13525_v20 = vcombine.high %v10133_v43, %v10133_v43  ;;  %v13524_v8 = vcombine.low %v10133_v43, %v10133_v43 }
 0x7e6   :  { %v9722_v6 = vsel %vm468_vm0, %v19746_v29, %v9710_v27  ;;  %v9586_v58 = vsel %vm468_vm0, %v19747_v49, %v9574_v14  ;;  %11694 = vmatprep.subr.bf16.mxu0 %v13507_v35 }
 0x7e7   :  { %13540 = vmatprep.subr.msk.bf16.mxu1 %vm468_vm0, %v13525_v20  ;;  %v18422_v24 = vpop.permute.xlu1 %9971  ;;  %11695 = vmatpush2.bf16.msra.mxu0 %v13506_v15  ;;  %v11491_v21 = vsel %vm468_vm0, %v13524_v8, 0  ;;  %v18425_v38 = vpop.permute.xlu0 %9835  ;;  %v9587_v43 = vsel %vm19748_vm9, %v18000_v22, %v9586_v58  ;;  %v9723_v48 = vsel %vm19749_vm10, %v17998_v17, %v9722_v6  ;;  %vm19751_vm9 = vcmask 146432  }
 0x7e8   :  { %v19397_v5 = vrot.slane %v18422_v24, 4  ;;  %11734 = vmatpush2.bf16.msra.mxu1 %v11491_v21  ;;  %v19400_v35 = vrot.slane %v18425_v38, 4  ;;  %v13490_v10 = vcombine.low %v9587_v43, %v9723_v48  ;;  %v13491_v1 = vcombine.high %v9587_v43, %v9723_v48 }
 0x7e9   :  { %v19752_v43 = vrot.slane %v18032_v56, 4  ;;  %v19753_v48 = vrot.slane %v18034_v3, 4  ;;  %vm19754_vm10 = vcmask 236544  }
 0x7ea   :  { %v9996_v15 = vsel %vm468_vm0, %v9982_v28, %v19397_v5  ;;  %v9860_v20 = vsel %vm468_vm0, %v9846_v31, %v19400_v35  ;;  %11696 = vmatprep.subr.bf16.mxu0 %v13491_v1 }
 0x7eb   :  { %v9426_v22 = vpop.permute.xlu1 %9425  ;;  %11697 = vmatpush2.bf16.msra.mxu0 %v13490_v10  ;;  %v9290_v8 = vpop.permute.xlu0 %9289  ;;  %v9861_v17 = vsel %vm19750_vm7, %v18376_v25, %v9860_v20  ;;  %v9997_v29 = vsel %vm19751_vm9, %v9970_v33, %v9996_v15  ;;  %vm19755_vm7 = vcmask 228352   ;;  %vm19756_vm9 = vcmask 220160  }
 0x7ec   :  { %v9438_v6 = vrot.slane %v9426_v22, 4  ;;  %v9302_v49 = vrot.slane %v9290_v8, 4  ;;  %v13508_v58 = vcombine.low %v9861_v17, %v9997_v29  ;;  %v13509_v21 = vcombine.high %v9861_v17, %v9997_v29 }
 0x7ee   :  { %v9450_v28 = vsel %vm468_vm0, %v19752_v43, %v9438_v6  ;;  %v9314_v31 = vsel %vm468_vm0, %v19753_v48, %v9302_v49  ;;  %11735 = vmatprep.subr.bf16.mxu1 %v13509_v21 }
 0x7ef   :  { %v18448_v10 = vpop.permute.xlu1 %9699  ;;  %11736 = vmatpush2.bf16.msra.mxu1 %v13508_v58  ;;  %v18450_v1 = vpop.permute.xlu0 %9563  ;;  %v9315_v25 = vsel %vm3161_vm14, %v18034_v3, %v9314_v31  ;;  %v9451_v33 = vsel %vm19754_vm10, %v18032_v56, %v9450_v28 }
 0x7f0   :  { %v19398_v15 = vrot.slane %v18448_v10, 4  ;;  %v19399_v20 = vrot.slane %v18450_v1, 4  ;;  %v13474_v17 = vcombine.low %v9315_v25, %v9451_v33  ;;  %v13475_v29 = vcombine.high %v9315_v25, %v9451_v33 }
 0x7f1   :  { %v19757_v33 = vrot.slane %v18067_v40, 4 }
 0x7f2   :  { %v9724_v21 = vsel %vm468_vm0, %v9710_v27, %v19398_v15  ;;  %v9588_v58 = vsel %vm468_vm0, %v9574_v14, %v19399_v20  ;;  %11698 = vmatprep.subr.bf16.mxu0 %v13475_v29  ;;  %v19758_v15 = vrot.slane %v18069_v63, 4 }
 0x7f3   :  { %v9154_v43 = vpop.permute.xlu1 %9153  ;;  %11699 = vmatpush2.bf16.msra.mxu0 %v13474_v17  ;;  %v9018_v3 = vpop.permute.xlu0 %9017  ;;  %v9589_v56 = vsel %vm19755_vm7, %v9562_v50, %v9588_v58  ;;  %v9725_v28 = vsel %vm19756_vm9, %v9698_v45, %v9724_v21  ;;  %vm19774_vm7 = vcmask 818176   ;;  %vm19775_vm9 = vcmask 809984  }
 0x7f4   :  { %v9166_v48 = vrot.slane %v9154_v43, 4  ;;  %v9030_v31 = vrot.slane %v9018_v3, 4  ;;  %v13492_v5 = vcombine.low %v9589_v56, %v9725_v28  ;;  %v13493_v25 = vcombine.high %v9589_v56, %v9725_v28 }
 0x7f6   :  { %v9178_v27 = vsel %vm468_vm0, %v19757_v33, %v9166_v48  ;;  %v9042_v14 = vsel %vm468_vm0, %v19758_v15, %v9030_v31  ;;  %11737 = vmatprep.subr.bf16.mxu1 %v13493_v25  ;;  %v18472_v29 = vpop.f32.mrf.mxu0 }
 0x7f7   :  { %v18474_v17 = vpop.permute.xlu1 %9427  ;;  %11738 = vmatpush2.bf16.msra.mxu1 %v13492_v5  ;;  %v18476_v50 = vpop.permute.xlu0 %9291  ;;  %v9043_v45 = vsel %vm2887_vm11, %v18069_v63, %v9042_v14  ;;  %v9179_v21 = vsel %vm3024_vm15, %v18067_v40, %v9178_v27 }
 0x7f8   :  { %v9439_v58 = vrot.slane %v18474_v17, 4  ;;  %v19402_v56 = vrot.slane %v18476_v50, 4  ;;  %v13458_v28 = vcombine.low %v9043_v45, %v9179_v21  ;;  %v13459_v15 = vcombine.high %v9043_v45, %v9179_v21  ;;  %v18484_v25 = vpop.f32.mrf.mxu0 }
 0x7fa   :  { %v9452_v5 = vsel %vm468_vm0, %v9438_v6, %v9439_v58  ;;  %v9316_v33 = vsel %vm468_vm0, %v9302_v49, %v19402_v56  ;;  %11700 = vmatprep.subr.bf16.mxu0 %v13459_v15  ;;  %v11546_v63 = vpop.f32.mrf.mxu0 }
 0x7fb   :  { %v18492_v14 = vpop.permute.xlu1 %8881  ;;  %11701 = vmatpush2.bf16.msra.mxu0 %v13458_v28  ;;  %v8746_v40 = vpop.permute.xlu0 %8745  ;;  %v9317_v27 = vsel %vm3161_vm14, %v9290_v8, %v9316_v33  ;;  %v9453_v45 = vsel %vm19754_vm10, %v9426_v22, %v9452_v5 }
 0x7fc   :  { %v8894_v21 = vrot.slane %v18492_v14, 4  ;;  %v8758_v20 = vrot.slane %v8746_v40, 4  ;;  %v13476_v35 = vcombine.low %v9317_v27, %v9453_v45  ;;  %v13477_v26 = vcombine.high %v9317_v27, %v9453_v45  ;;  %v11547_v6 = vpop.f32.mrf.mxu0 }
 0x7fe   :  { %v8906_v49 = vsel %vm468_vm0, %v8893_v13, %v8894_v21  ;;  %v8770_v15 = vsel %vm468_vm0, %v8757_v34, %v8758_v20  ;;  %11739 = vmatprep.subr.bf16.mxu1 %v13477_v26 }
 0x7ff   :  { %v18503_v28 = vpop.permute.xlu1 %9155  ;;  %11740 = vmatpush2.bf16.msra.mxu1 %v13476_v35  ;;  %v18505_v8 = vpop.permute.xlu0 %9019  ;;  %v8771_v22 = vsel %vm2613_vm13, %v18109_v37, %v8770_v15  ;;  %v8907_v5 = vsel %vm2750_vm12, %v18107_v0, %v8906_v49 }
 0x800   :  { %v9167_v33 = vrot.slane %v18503_v28, 4  ;;  %v9031_v13 = vrot.slane %v18505_v8, 4  ;;  %v13442_v63 = vcombine.low %v8771_v22, %v8907_v5  ;;  %v13443_v27 = vcombine.high %v8771_v22, %v8907_v5 }
 0x802   :  { %v9180_v34 = vsel %vm468_vm0, %v9166_v48, %v9167_v33  ;;  %v9044_v26 = vsel %vm468_vm0, %v9030_v31, %v9031_v13  ;;  %11702 = vmatprep.subr.bf16.mxu0 %v13443_v27  ;;  %v18519_v35 = vpop.f32.mrf.mxu1  ;;  %v8625_v48 = vrot.slane %v16892_v30, 4  ;;  %v8489_v31 = vrot.slane %v16958_v7, 4 }
 0x803   :  { %v8614_v37 = vpop.permute.xlu1 %8613  ;;  %11703 = vmatpush2.bf16.msra.mxu0 %v13442_v63  ;;  %v8478_v0 = vpop.permute.xlu0 %8477  ;;  %v9045_v45 = vsel %vm2887_vm11, %v9018_v3, %v9044_v26  ;;  %v9181_v6 = vsel %vm3024_vm15, %v9154_v43, %v9180_v34 }
 0x804   :  { %v8624_v49 = vrot.slane %v8614_v37, 4  ;;  %v8488_v15 = vrot.slane %v8478_v0, 4  ;;  %v13460_v22 = vcombine.low %v9045_v45, %v9181_v6  ;;  %v13461_v5 = vcombine.high %v9045_v45, %v9181_v6  ;;  %v18523_v56 = vpop.f32.mrf.mxu1 }
 0x806   :  { %v8638_v27 = vsel %vm468_vm0, %v8623_v19, %v8624_v49  ;;  %v8502_v3 = vsel %vm468_vm0, %v8487_v53, %v8488_v15  ;;  %11705 = vmatmul.mubr.bf16.vlgmr.msra.gmra.mxu0 %v17626_v41  ;;  %v11587_v43 = vpop.f32.mrf.mxu1  ;;  %11741 = vmatprep.subr.bf16.mxu1 %v13461_v5  ;;  %v8640_v19 = vsel %vm468_vm0, %v8624_v49, %v8625_v48 }
 0x807   :  { %v18534_v63 = vpop.permute.xlu1 %8883  ;;  %v18536_v34 = vpop.permute.xlu0 %8747  ;;  %v8503_v30 = vsel %vm2339_vm1, %v18129_v51, %v8502_v3  ;;  %v8639_v7 = vsel %vm2476_vm2, %v18147_v4, %v8638_v27  ;;  %v8504_v26 = vsel %vm468_vm0, %v8488_v15, %v8489_v31  ;;  %11742 = vmatpush2.bf16.msra.mxu1 %v13460_v22  ;;  %13543 = vmatprep.mubr.msk.bf16.mxu0 %vm5318_vm8, %v17264_v11 }
 0x808   :  { %v8895_v53 = vrot.slane %v18534_v63, 4  ;;  %v8759_v45 = vrot.slane %v18536_v34, 4  ;;  %v11588_v6 = vpop.f32.mrf.mxu1  ;;  %v13430_v5 = vcombine.low %v8503_v30, %v8639_v7  ;;  %v13431_v43 = vcombine.high %v8503_v30, %v8639_v7 }
 0x809   :  { %v8641_v49 = vsel %vm2476_vm2, %v8614_v37, %v8640_v19  ;;  %v8505_v15 = vsel %vm2339_vm1, %v8478_v0, %v8504_v26  ;;  %v19760_v0 = vrot.slane %v18209_v59, 4  ;;  %vm19764_vm1 = vcmask 728064  }
 0x80a   :  { %v8908_v51 = vsel %vm468_vm0, %v8894_v21, %v8895_v53  ;;  %v8772_v4 = vsel %vm468_vm0, %v8758_v20, %v8759_v45  ;;  %11754 = vmatprep.subr.bf16.mxu0 %v13431_v43  ;;  %v13433_v6 = vcombine.high %v8505_v15, %v8641_v49  ;;  %v19759_v20 = vrot.slane %v18166_v42, 4 }
 0x80b   :  { %v7982_v22 = vpop.permute.xlu1 %7981  ;;  %v8254_v48 = vpop.permute.xlu0 %8253  ;;  %v8773_v31 = vsel %vm2613_vm13, %v8746_v40, %v8772_v4  ;;  %v8909_v27 = vsel %vm2750_vm12, %v18492_v14, %v8908_v51  ;;  %11755 = vmatpush1.bf16.msra.mxu0 %v13430_v5  ;;  %vm19765_vm2 = vcmask 89088  }
 0x80c   :  { %v7992_v3 = vrot.slane %v7982_v22, 4  ;;  %v8264_v30 = vrot.slane %v8254_v48, 4  ;;  %v13444_v21 = vcombine.low %v8773_v31, %v8909_v27  ;;  %v13445_v7 = vcombine.high %v8773_v31, %v8909_v27 }
 0x80d   :  { %v13432_v31 = vcombine.low %v8505_v15, %v8641_v49 }
 0x80e   :  { %v8278_v37 = vsel %vm468_vm0, %v19759_v20, %v8264_v30  ;;  %11743 = vmatprep.subr.bf16.mxu1 %v13445_v7  ;;  %v8006_v19 = vsel %vm468_vm0, %v19760_v0, %v7992_v3  ;;  %v19761_v7 = vrot.slane %v18207_v18, 4 }
 0x80f   :  { %v8256_v26 = vpop.permute.xlu1 %8255  ;;  %11744 = vmatpush2.bf16.msra.mxu1 %v13444_v21  ;;  %v8118_v40 = vpop.permute.xlu0 %8117  ;;  %v8279_v14 = vsel %vm2114_vm3, %v18166_v42, %v8278_v37 }
 0x810   :  { %v8265_v5 = vrot.slane %v8256_v26, 4  ;;  %v8128_v43 = vrot.slane %v8118_v40, 4  ;;  %11795 = vmatprep.subr.bf16.mxu1 %v13433_v6  ;;  %v13414_v51 = vcombine.low %v8279_v14, %v17063_v61  ;;  %v13415_v4 = vcombine.high %v8279_v14, %v17063_v61 }
 0x811   :  { %v8007_v6 = vsel %vm1840_vm4, %v18209_v59, %v8006_v19  ;;  %v19763_v19 = vrot.slane %v18242_v36, 4 }
 0x812   :  { %v8280_v27 = vsel %vm468_vm0, %v8264_v30, %v8265_v5  ;;  %v8142_v20 = vsel %vm468_vm0, %v19761_v7, %v8128_v43  ;;  %11746 = vmatmul.mubr.bf16.vlgmr.msra.gmra.mxu1 %v17626_v41  ;;  %11756 = vmatprep.subr.bf16.mxu0 %v13415_v4  ;;  %v19762_v5 = vrot.slane %v18240_v12, 4 }
 0x813   :  { %v7846_v21 = vpop.permute.xlu1 %7845  ;;  %11757 = vmatpush1.bf16.msra.mxu0 %v13414_v51  ;;  %11796 = vmatpush1.bf16.msra.mxu1 %v13432_v31  ;;  %v7710_v42 = vpop.permute.xlu0 %7709  ;;  %v8143_v61 = vsel %vm1977_vm5, %v18207_v18, %v8142_v20  ;;  %v8281_v49 = vsel %vm2114_vm3, %v8254_v48, %v8280_v27  ;;  %vm19768_vm3 = vcmask 744448  }
 0x814   :  { %v7856_v15 = vrot.slane %v7846_v21, 4  ;;  %v7720_v30 = vrot.slane %v7710_v42, 4  ;;  %v13398_v37 = vcombine.low %v8007_v6, %v8143_v61  ;;  %v13399_v0 = vcombine.high %v8007_v6, %v8143_v61  ;;  %13545 = vmatprep.mubr.msk.bf16.mxu1 %vm5318_vm8, %v17264_v11  ;;  %vm19771_vm8 = vmmov %vm19765_vm2 }
 0x815   :  { %v13416_v26 = vcombine.low %v8281_v49, %v17073_v55  ;;  %v13417_v14 = vcombine.high %v8281_v49, %v17073_v55  ;;  %vm19776_vm10 = vmmov %vm19768_vm3 }
 0x816   :  { %v7870_v59 = vsel %vm468_vm0, %v19762_v5, %v7856_v15  ;;  %v7734_v18 = vsel %vm468_vm0, %v19763_v19, %v7720_v30  ;;  %11758 = vmatprep.subr.bf16.mxu0 %v13399_v0 }
 0x817   :  { %11797 = vmatprep.subr.bf16.mxu1 %v13417_v14  ;;  %v8120_v48 = vpop.permute.xlu1 %8119  ;;  %11759 = vmatpush1.bf16.msra.mxu0 %v13398_v37  ;;  %v7984_v51 = vpop.permute.xlu0 %7983  ;;  %v7735_v11 = vsel %vm19764_vm1, %v18242_v36, %v7734_v18  ;;  %v7871_v4 = vsel %vm19765_vm2, %v18240_v12, %v7870_v59  ;;  %vm19780_vm2 = vcmask 891904  }
 0x818   :  { %v8129_v55 = vrot.slane %v8120_v48, 4  ;;  %11798 = vmatpush1.bf16.msra.mxu1 %v13416_v26  ;;  %v7993_v31 = vrot.slane %v7984_v51, 4  ;;  %v13382_v27 = vcombine.low %v7735_v11, %v7871_v4  ;;  %v13383_v7 = vcombine.high %v7735_v11, %v7871_v4 }
 0x819   :  { %v19766_v26 = vrot.slane %v18274_v57, 4 }
 0x81a   :  { %v8144_v20 = vsel %vm468_vm0, %v8128_v43, %v8129_v55  ;;  %v8008_v6 = vsel %vm468_vm0, %v7992_v3, %v7993_v31  ;;  %11760 = vmatprep.subr.bf16.mxu0 %v13383_v7  ;;  %v19767_v43 = vrot.slane %v18276_v9, 4 }
 0x81b   :  { %v7574_v61 = vpop.permute.xlu1 %7573  ;;  %11761 = vmatpush1.bf16.msra.mxu0 %v13382_v27  ;;  %v7438_v49 = vpop.permute.xlu0 %7437  ;;  %v8009_v37 = vsel %vm1840_vm4, %v7982_v22, %v8008_v6  ;;  %v8145_v36 = vsel %vm1977_vm5, %v8118_v40, %v8144_v20  ;;  %vm19769_vm4 = vcmask 736256   ;;  %vm19770_vm5 = vmmov %vm19764_vm1 }
 0x81c   :  { %v7584_v0 = vrot.slane %v7574_v61, 4  ;;  %v7448_v14 = vrot.slane %v7438_v49, 4  ;;  %v13400_v12 = vcombine.low %v8009_v37, %v8145_v36  ;;  %v13401_v5 = vcombine.high %v8009_v37, %v8145_v36  ;;  %vm19777_vm1 = vmmov %vm19769_vm4 }
 0x81e   :  { %v7598_v59 = vsel %vm468_vm0, %v19766_v26, %v7584_v0  ;;  %v7462_v3 = vsel %vm468_vm0, %v19767_v43, %v7448_v14  ;;  %11799 = vmatprep.subr.bf16.mxu1 %v13401_v5 }
 0x81f   :  { %v7848_v19 = vpop.permute.xlu1 %7847  ;;  %11800 = vmatpush1.bf16.msra.mxu1 %v13400_v12  ;;  %v7712_v18 = vpop.permute.xlu0 %7711  ;;  %v7463_v22 = vsel %vm19768_vm3, %v18276_v9, %v7462_v3  ;;  %v7599_v40 = vsel %vm19769_vm4, %v18274_v57, %v7598_v59  ;;  %v19772_v12 = vrot.slane %v18306_v60, 4  ;;  %vm19781_vm3 = vcmask 826368   ;;  %vm19782_vm4 = vmmov %vm19774_vm7 }
 0x820   :  { %v7857_v48 = vrot.slane %v7848_v19, 4  ;;  %v7721_v51 = vrot.slane %v7712_v18, 4  ;;  %v13366_v11 = vcombine.low %v7463_v22, %v7599_v40  ;;  %v13367_v4 = vcombine.high %v7463_v22, %v7599_v40 }
 0x822   :  { %v7872_v55 = vsel %vm468_vm0, %v7856_v15, %v7857_v48  ;;  %v7736_v31 = vsel %vm468_vm0, %v7720_v30, %v7721_v51  ;;  %11762 = vmatprep.subr.bf16.mxu0 %v13367_v4  ;;  %v19773_v15 = vrot.slane %v18308_v23, 4 }
 0x823   :  { %v7302_v27 = vpop.permute.xlu1 %7301  ;;  %11763 = vmatpush1.bf16.msra.mxu0 %v13366_v11  ;;  %v7166_v7 = vpop.permute.xlu0 %7165  ;;  %v7737_v20 = vsel %vm19770_vm5, %v7710_v42, %v7736_v31  ;;  %v7873_v6 = vsel %vm19771_vm8, %v7846_v21, %v7872_v55  ;;  %vm19783_vm5 = vmmov %vm19775_vm9  ;;  %vm19786_vm8 = vcmask 908288  }
 0x824   :  { %v7312_v9 = vrot.slane %v7302_v27, 4  ;;  %v7176_v37 = vrot.slane %v7166_v7, 4  ;;  %v13384_v36 = vcombine.low %v7737_v20, %v7873_v6  ;;  %v13385_v57 = vcombine.high %v7737_v20, %v7873_v6 }
 0x825   :  { %v19778_v20 = vrot.slane %v18338_v52, 4 }
 0x826   :  { %v7326_v5 = vsel %vm468_vm0, %v19772_v12, %v7312_v9  ;;  %v7190_v30 = vsel %vm468_vm0, %v19773_v15, %v7176_v37  ;;  %11801 = vmatprep.subr.bf16.mxu1 %v13385_v57 }
 0x827   :  { %v7576_v26 = vpop.permute.xlu1 %7575  ;;  %11802 = vmatpush1.bf16.msra.mxu1 %v13384_v36  ;;  %v7440_v59 = vpop.permute.xlu0 %7439  ;;  %v7191_v42 = vsel %vm19774_vm7, %v18308_v23, %v7190_v30  ;;  %v7327_v21 = vsel %vm19775_vm9, %v18306_v60, %v7326_v5  ;;  %vm19787_vm7 = vcmask 900096   ;;  %vm19788_vm9 = vmmov %vm19780_vm2 }
 0x828   :  { %v7585_v43 = vrot.slane %v7576_v26, 4  ;;  %v7449_v3 = vrot.slane %v7440_v59, 4  ;;  %v13350_v19 = vcombine.low %v7191_v42, %v7327_v21  ;;  %v13351_v18 = vcombine.high %v7191_v42, %v7327_v21 }
 0x82a   :  { %v7600_v22 = vsel %vm468_vm0, %v7584_v0, %v7585_v43  ;;  %v7464_v40 = vsel %vm468_vm0, %v7448_v14, %v7449_v3  ;;  %11764 = vmatprep.subr.bf16.mxu0 %v13351_v18  ;;  %v19779_v0 = vrot.slane %v18340_v44, 4 }
 0x82b   :  { %v7030_v48 = vpop.permute.xlu1 %7029  ;;  %11765 = vmatpush1.bf16.msra.mxu0 %v13350_v19  ;;  %v6894_v51 = vpop.permute.xlu0 %6893  ;;  %v7465_v11 = vsel %vm19776_vm10, %v7438_v49, %v7464_v40  ;;  %v7601_v4 = vsel %vm19777_vm1, %v7574_v61, %v7600_v22  ;;  %v19784_v22 = vrot.slane %v18358_v46, 4  ;;  %vm19789_vm10 = vmmov %vm19781_vm3 }
 0x82c   :  { %v7040_v23 = vrot.slane %v7030_v48, 4  ;;  %v6904_v55 = vrot.slane %v6894_v51, 4  ;;  %v13368_v31 = vcombine.low %v7465_v11, %v7601_v4  ;;  %v13369_v60 = vcombine.high %v7465_v11, %v7601_v4  ;;  %vm19790_vm1 = vmmov %vm19786_vm8 }
 0x82e   :  { %v7054_v6 = vsel %vm468_vm0, %v19778_v20, %v7040_v23  ;;  %v6918_v14 = vsel %vm468_vm0, %v19779_v0, %v6904_v55  ;;  %11803 = vmatprep.subr.bf16.mxu1 %v13369_v60 }
 0x82f   :  { %v7304_v36 = vpop.permute.xlu1 %7303  ;;  %11804 = vmatpush1.bf16.msra.mxu1 %v13368_v31  ;;  %v7168_v57 = vpop.permute.xlu0 %7167  ;;  %v6919_v49 = vsel %vm19780_vm2, %v18340_v44, %v6918_v14  ;;  %v7055_v61 = vsel %vm19781_vm3, %v18338_v52, %v7054_v6  ;;  %vm19791_vm2 = vmmov %vm19787_vm7  ;;  %vm19793_vm3 = vcmask 138240  }
 0x830   :  { %v7313_v12 = vrot.slane %v7304_v36, 4  ;;  %v7177_v5 = vrot.slane %v7168_v57, 4  ;;  %v13334_v15 = vcombine.low %v6919_v49, %v7055_v61  ;;  %v13335_v30 = vcombine.high %v6919_v49, %v7055_v61 }
 0x832   :  { %v7328_v26 = vsel %vm468_vm0, %v7312_v9, %v7313_v12  ;;  %v7192_v59 = vsel %vm468_vm0, %v7176_v37, %v7177_v5  ;;  %11766 = vmatprep.subr.bf16.mxu0 %v13335_v30  ;;  %v19785_v9 = vrot.slane %v18360_v62, 4 }
 0x833   :  { %v6758_v42 = vpop.permute.xlu1 %6757  ;;  %11767 = vmatpush1.bf16.msra.mxu0 %v13334_v15  ;;  %v6622_v21 = vpop.permute.xlu0 %6621  ;;  %v7193_v43 = vsel %vm19782_vm4, %v7166_v7, %v7192_v59  ;;  %v7329_v3 = vsel %vm19783_vm5, %v7302_v27, %v7328_v26  ;;  %vm19794_vm4 = vmmov %vm19793_vm3  ;;  %vm19797_vm5 = vcmask 154624  }
 0x834   :  { %v6768_v44 = vrot.slane %v6758_v42, 4  ;;  %v6632_v19 = vrot.slane %v6622_v21, 4  ;;  %v13352_v18 = vcombine.low %v7193_v43, %v7329_v3  ;;  %v13353_v52 = vcombine.high %v7193_v43, %v7329_v3 }
 0x836   :  { %v6782_v40 = vsel %vm468_vm0, %v19784_v22, %v6768_v44  ;;  %v6646_v37 = vsel %vm468_vm0, %v19785_v9, %v6632_v19  ;;  %11805 = vmatprep.subr.bf16.mxu1 %v13353_v52  ;;  %v9849_v52 = vrot.slane %v16894_v32, 4 }
 0x837   :  { %v7032_v11 = vpop.permute.xlu1 %7031  ;;  %11806 = vmatpush1.bf16.msra.mxu1 %v13352_v18  ;;  %v6896_v4 = vpop.permute.xlu0 %6895  ;;  %v6647_v7 = vsel %vm19786_vm8, %v18360_v62, %v6646_v37  ;;  %v6783_v27 = vsel %vm19787_vm7, %v18358_v46, %v6782_v40  ;;  %v9985_v40 = vrot.slane %v16962_v2, 4  ;;  %vm19799_vm8 = vcmask 146432   ;;  %vm19802_vm7 = vmmov %vm19797_vm5 }
 0x838   :  { %v7041_v31 = vrot.slane %v7032_v11, 4  ;;  %v6905_v60 = vrot.slane %v6896_v4, 4  ;;  %v13318_v20 = vcombine.low %v6647_v7, %v6783_v27  ;;  %v13319_v6 = vcombine.high %v6647_v7, %v6783_v27 }
 0x839   :  { %v9305_v27 = vrot.slane %v16898_v39, 4 }
 0x83a   :  { %v7056_v0 = vsel %vm468_vm0, %v7040_v23, %v7041_v31  ;;  %v6920_v14 = vsel %vm468_vm0, %v6904_v55, %v6905_v60  ;;  %11768 = vmatprep.subr.bf16.mxu0 %v13319_v6  ;;  %v10121_v23 = vrot.slane %v16960_v16, 4  ;;  %v19795_v31 = vld [vmem:[#allocation13_spill] sm:$0xff]  ;;  %v19796_v6 = vrot.slane %v18425_v38, 4 }
 0x83b   :  { %v6760_v36 = vpop.permute.xlu1 %6759  ;;  %11769 = vmatpush1.bf16.msra.mxu0 %v13318_v20  ;;  %v6624_v57 = vpop.permute.xlu0 %6623  ;;  %v6921_v49 = vsel %vm19788_vm9, %v6894_v51, %v6920_v14  ;;  %v7057_v61 = vsel %vm19789_vm10, %v7030_v48, %v7056_v0  ;;  %v9713_v60 = vrot.slane %v19795_v31, 4  ;;  %vm19803_vm9 = vmmov %vm19799_vm8  ;;  %vm19805_vm10 = vcmask 220160  }
 0x83c   :  { %v6769_v62 = vrot.slane %v6760_v36, 4  ;;  %v6633_v12 = vrot.slane %v6624_v57, 4  ;;  %v13336_v5 = vcombine.low %v6921_v49, %v7057_v61  ;;  %v13337_v46 = vcombine.high %v6921_v49, %v7057_v61 }
 0x83d   :  { %v19798_v36 = vrot.slane %v18422_v24, 4 }
 0x83e   :  { %v6784_v15 = vsel %vm468_vm0, %v6768_v44, %v6769_v62  ;;  %v6648_v30 = vsel %vm468_vm0, %v6632_v19, %v6633_v12  ;;  %11807 = vmatprep.subr.bf16.mxu1 %v13337_v46  ;;  %v9577_v44 = vrot.slane %v16896_v47, 4  ;;  %v19792_v19 = vrot.slane %v18391_v54, 4 }
 0x83f   :  { %v9838_v55 = vpop.permute.xlu1 %9837  ;;  %11808 = vmatpush1.bf16.msra.mxu1 %v13336_v5  ;;  %v10110_v26 = vpop.permute.xlu0 %10109  ;;  %v6649_v59 = vsel %vm19790_vm1, %v6622_v21, %v6648_v30  ;;  %v6785_v51 = vsel %vm19791_vm2, %v6758_v42, %v6784_v15  ;;  %vm19807_vm1 = vcmask 228352  }
 0x840   :  { %v9848_v43 = vrot.slane %v9838_v55, 4  ;;  %v10120_v48 = vrot.slane %v10110_v26, 4  ;;  %v13320_v3 = vcombine.low %v6649_v59, %v6785_v51  ;;  %v13321_v18 = vcombine.high %v6649_v59, %v6785_v51  ;;  %v19801_v59 = vld [vmem:[#allocation15_spill] sm:$0xff]  ;;  %vm19809_vm2 = vmmov %vm19807_vm1 }
 0x841   :  { %v9169_v51 = vrot.slane %v19801_v59, 4 }
 0x842   :  { %v10134_v22 = vsel %vm468_vm0, %v19792_v19, %v10120_v48  ;;  %v10136_v16 = vsel %vm468_vm0, %v10120_v48, %v10121_v23  ;;  %11809 = vmatprep.subr.bf16.mxu1 %v13321_v18  ;;  %v9864_v21 = vsel %vm468_vm0, %v9848_v43, %v9849_v52  ;;  %v9862_v0 = vsel %vm468_vm0, %v19796_v6, %v9848_v43 }
 0x843   :  { %v10137_v42 = vsel %vm19793_vm3, %v10110_v26, %v10136_v16  ;;  %v9702_v9 = vpop.permute.xlu1 %9701  ;;  %11810 = vmatpush1.bf16.msra.mxu1 %v13320_v3  ;;  %v9974_v37 = vpop.permute.xlu0 %9973  ;;  %v10135_v32 = vsel %vm19794_vm4, %v18391_v54, %v10134_v22  ;;  %v9865_v14 = vsel %vm19797_vm5, %v9838_v55, %v9864_v21  ;;  %v19800_v55 = vld [vmem:[#allocation14_spill] sm:$0xff]  ;;  %v9863_v43 = vsel %vm19802_vm7, %v18425_v38, %v9862_v0  ;;  %vm19810_vm3 = vmmov %vm19805_vm10 }
 0x844   :  { %v13528_v47 = vcombine.low %v10137_v42, %v10137_v42  ;;  %v13529_v11 = vcombine.high %v10137_v42, %v10137_v42  ;;  %v9712_v4 = vrot.slane %v9702_v9, 4  ;;  %v9984_v7 = vrot.slane %v9974_v37, 4 }
 0x845   :  { %v13527_v20 = vcombine.high %v10135_v32, %v10135_v32  ;;  %v13526_v2 = vcombine.low %v10135_v32, %v10135_v32  ;;  %v9441_v26 = vrot.slane %v19800_v55, 4  ;;  %v19804_v3 = vrot.slane %v18448_v10, 4 }
 0x846   :  { %v9998_v54 = vsel %vm468_vm0, %v19798_v36, %v9984_v7  ;;  %v10000_v57 = vsel %vm468_vm0, %v9984_v7, %v9985_v40  ;;  %13544 = vmatprep.subr.msk.bf16.mxu1 %vm468_vm0, %v13529_v11  ;;  %v9728_v39 = vsel %vm468_vm0, %v9712_v4, %v9713_v60  ;;  %v11503_v12 = vsel %vm468_vm0, %v13528_v47, 0 }
 0x847   :  { %v10001_v49 = vsel %vm19799_vm8, %v9974_v37, %v10000_v57  ;;  %13542 = vmatprep.subr.msk.bf16.mxu0 %vm468_vm0, %v13527_v20  ;;  %v9430_v61 = vpop.permute.xlu1 %9429  ;;  %v11497_v62 = vsel %vm468_vm0, %v13526_v2, 0  ;;  %v9566_v5 = vpop.permute.xlu0 %9565  ;;  %11816 = vmatpush2.bf16.msra.mxu1 %v11503_v12  ;;  %v9999_v48 = vsel %vm19803_vm9, %v18422_v24, %v9998_v54  ;;  %v9726_v18 = vsel %vm468_vm0, %v19804_v3, %v9712_v4  ;;  %v19808_v4 = vld [vmem:[#allocation12_spill] sm:$0xff] }
 0x848   :  { %v13512_v46 = vcombine.low %v9865_v14, %v10001_v49  ;;  %v13513_v15 = vcombine.high %v9865_v14, %v10001_v49  ;;  %v9440_v30 = vrot.slane %v9430_v61, 4  ;;  %11775 = vmatpush2.bf16.msra.mxu0 %v11497_v62  ;;  %v9576_v23 = vrot.slane %v9566_v5, 4 }
 0x849   :  { %v9729_v52 = vsel %vm19805_vm10, %v9702_v9, %v9728_v39  ;;  %v19806_v19 = vrot.slane %v18450_v1, 4  ;;  %v13510_v21 = vcombine.low %v9863_v43, %v9999_v48  ;;  %v13511_v42 = vcombine.high %v9863_v43, %v9999_v48 }
 0x84a   :  { %v9592_v16 = vsel %vm468_vm0, %v9576_v23, %v9577_v44  ;;  %11817 = vmatprep.subr.bf16.mxu1 %v13513_v15  ;;  %v9456_v40 = vsel %vm468_vm0, %v9440_v30, %v9441_v26  ;;  %v9033_v7 = vrot.slane %v19808_v4, 4  ;;  %v9454_v44 = vsel %vm468_vm0, %v9439_v58, %v9440_v30 }
 0x84b   :  { %v9590_v22 = vsel %vm468_vm0, %v19806_v19, %v9576_v23  ;;  %v9593_v38 = vsel %vm19807_vm1, %v9566_v5, %v9592_v16  ;;  %v9158_v24 = vpop.permute.xlu1 %9157  ;;  %v9294_v37 = vpop.permute.xlu0 %9293  ;;  %11818 = vmatpush2.bf16.msra.mxu1 %v13512_v46  ;;  %11776 = vmatprep.subr.bf16.mxu0 %v13511_v42  ;;  %v9727_v60 = vsel %vm19810_vm3, %v18448_v10, %v9726_v18  ;;  %vm19811_vm4 = vcmask 236544  }
 0x84c   :  { %v13496_v32 = vcombine.low %v9593_v38, %v9729_v52  ;;  %v13497_v47 = vcombine.high %v9593_v38, %v9729_v52  ;;  %v9168_v11 = vrot.slane %v9158_v24, 4  ;;  %v9304_v9 = vrot.slane %v9294_v37, 4  ;;  %11777 = vmatpush2.bf16.msra.mxu0 %v13510_v21  ;;  %vm19813_vm5 = vmmov %vm19811_vm4 }
 0x84d   :  { %v9591_v31 = vsel %vm19809_vm2, %v18450_v1, %v9590_v22  ;;  %v9457_v20 = vsel %vm19811_vm4, %v9430_v61, %v9456_v40  ;;  %v19812_v6 = vrot.slane %v18476_v50, 4 }
 0x84e   :  { %v9184_v2 = vsel %vm468_vm0, %v9168_v11, %v9169_v51  ;;  %v9320_v14 = vsel %vm468_vm0, %v9304_v9, %v9305_v27  ;;  %v9182_v58 = vsel %vm468_vm0, %v9167_v33, %v9168_v11  ;;  %v13494_v36 = vcombine.low %v9591_v31, %v9727_v60  ;;  %11819 = vmatprep.subr.bf16.mxu1 %v13497_v47 }
 0x84f   :  { %v9318_v0 = vsel %vm468_vm0, %v19812_v6, %v9304_v9  ;;  %v9321_v1 = vsel %vm3161_vm14, %v9294_v37, %v9320_v14  ;;  %v13495_v54 = vcombine.high %v9591_v31, %v9727_v60  ;;  %v8886_v10 = vpop.permute.xlu1 %8885  ;;  %v9022_v57 = vpop.permute.xlu0 %9021  ;;  %11820 = vmatpush2.bf16.msra.mxu1 %v13496_v32  ;;  %v9185_v12 = vsel %vm3024_vm15, %v9158_v24, %v9184_v2  ;;  %v11836_v14 = vld [vmem:[%s19815_s3] sm:$0xff] }
 0x850   :  { %v13480_v39 = vcombine.low %v9321_v1, %v9457_v20  ;;  %v13481_v49 = vcombine.high %v9321_v1, %v9457_v20  ;;  %v8896_v61 = vrot.slane %v8886_v10, 4  ;;  %v9032_v62 = vrot.slane %v9022_v57, 4 }
 0x851   :  { %11778 = vmatprep.subr.bf16.mxu0 %v13495_v54  ;;  %v9319_v27 = vsel %vm3161_vm14, %v18476_v50, %v9318_v0  ;;  %v9455_v33 = vsel %vm19813_vm5, %v18474_v17, %v9454_v44  ;;  %v9183_v30 = vsel %vm3024_vm15, %v18503_v28, %v9182_v58  ;;  %v19814_v32 = vmov 0   ;;  %v19816_v58 = vld [vmem:[#allocation4_spill] sm:$0xff] }
 0x852   :  { %11779 = vmatpush2.bf16.msra.mxu0 %v13494_v36  ;;  %v9046_v5 = vsel %vm468_vm0, %v9031_v13, %v9032_v62  ;;  %v9048_v46 = vsel %vm468_vm0, %v9032_v62, %v9033_v7  ;;  %v13478_v15 = vcombine.low %v9319_v27, %v9455_v33  ;;  %v8910_v23 = vsel %vm468_vm0, %v8895_v53, %v8896_v61  ;;  %v19817_v36 = vld [vmem:[#allocation5_spill] sm:$0xff] }
 0x853   :  { %v9049_v50 = vsel %vm2887_vm11, %v9022_v57, %v9048_v46  ;;  %v13479_v55 = vcombine.high %v9319_v27, %v9455_v33  ;;  %11821 = vmatprep.subr.bf16.mxu1 %v13481_v49  ;;  %v8888_v17 = vpop.permute.xlu1 %8887  ;;  %v8750_v26 = vpop.permute.xlu0 %8749  ;;  %v9047_v59 = vsel %vm2887_vm11, %v18505_v8, %v9046_v5  ;;  %v8911_v8 = vsel %vm2750_vm12, %v18534_v63, %v8910_v23  ;;  %v19820_v46 = vld [vmem:[#allocation8_spill] sm:$0xff] }
 0x854   :  { %v13464_v13 = vcombine.low %v9049_v50, %v9185_v12  ;;  %v13465_v51 = vcombine.high %v9049_v50, %v9185_v12  ;;  %v8897_v43 = vrot.slane %v8888_v17, 4  ;;  %11822 = vmatpush2.bf16.msra.mxu1 %v13480_v39  ;;  %v8760_v48 = vrot.slane %v8750_v26, 4  ;;  %v19818_v39 = vld [vmem:[#allocation6_spill] sm:$0xff]  ;;  %v19819_v12 = vld [vmem:[#allocation7_spill] sm:$0xff]  ;;  %v19821_v50 = vld [vmem:[#allocation9_spill] sm:$0xff] }
 0x855   :  { %11780 = vmatprep.subr.bf16.mxu0 %v13479_v55  ;;  %v13463_v28 = vcombine.high %v9047_v59, %v9183_v30  ;;  %v13462_v3 = vcombine.low %v9047_v59, %v9183_v30  ;;  %v18771_v1 = vrot.slane %v11836_v14, %v19816_v58  ;;  %v18774_v54 = vrot.slane %v11836_v14, %v19817_v36  ;;  %v19822_v59 = vld [vmem:[#allocation10_spill] sm:$0xff] }
 0x856   :  { %11781 = vmatpush2.bf16.msra.mxu0 %v13478_v15  ;;  %v8774_v53 = vsel %vm468_vm0, %v8759_v45, %v8760_v48  ;;  %11823 = vmatprep.subr.bf16.mxu1 %v13465_v51  ;;  %v8912_v19 = vsel %vm468_vm0, %v8896_v61, %v8897_v43  ;;  %v18781_v49 = vrot.slane %v11836_v14, %v19818_v39  ;;  %v11837_v51 = vld [vmem:[%s19815_s3 + $0x8] sm:$0xff] }
 0x857   :  { %11782 = vmatprep.subr.bf16.mxu0 %v13463_v28  ;;  %v8752_v18 = vpop.permute.xlu0 %8751  ;;  %v8775_v52 = vsel %vm2613_vm13, %v18536_v34, %v8774_v53  ;;  %v8913_v21 = vsel %vm2750_vm12, %v8886_v10, %v8912_v19  ;;  %v11920_v10 = vmul.f32 %v18771_v1, %v18472_v29  ;;  %v11921_v57 = vmul.f32 %v18774_v54, %v18484_v25  ;;  %v19823_v28 = vld [vmem:[#allocation11_spill] sm:$0xff] }
 0x858   :  { %11824 = vmatpush2.bf16.msra.mxu1 %v13464_v13  ;;  %v8761_v22 = vrot.slane %v8752_v18, 4  ;;  %v13447_v16 = vcombine.high %v8775_v52, %v8911_v8  ;;  %v13446_v38 = vcombine.low %v8775_v52, %v8911_v8  ;;  %v11922_v62 = vmul.f32 %v18781_v49, %v18519_v35 }
 0x859   :  { %v11936_v61 = vadd.f32 %v11921_v57, %v11920_v10  ;;  %v18786_v27 = vrot.slane %v11836_v14, %v19819_v12  ;;  %v18791_v15 = vrot.slane %v11836_v14, %v19820_v46  ;;  %v18796_v55 = vrot.slane %v11836_v14, %v19821_v50 }
 0x85a   :  { %11783 = vmatpush2.bf16.msra.mxu0 %v13462_v3  ;;  %v8776_v40 = vsel %vm468_vm0, %v8760_v48, %v8761_v22  ;;  %v18801_v13 = vrot.slane %v11836_v14, %v19822_v59  ;;  %v18809_v53 = vrot.slane %v11836_v14, %v19823_v28  ;;  %v18812_v3 = vrot.slane %v11837_v51, %v19816_v58 }
 0x85b   :  { %11784 = vmatprep.subr.bf16.mxu0 %v13447_v16  ;;  %v8777_v45 = vsel %vm2613_vm13, %v8750_v26, %v8776_v40  ;;  %v11937_v33 = vadd.f32 %v11936_v61, %v11922_v62  ;;  %v11923_v5 = vmul.f32 %v18786_v27, %v18523_v56  ;;  %v18819_v19 = vrot.slane %v11837_v51, %v19817_v36 }
 0x85c   :  { %v13448_v42 = vcombine.low %v8777_v45, %v8913_v21  ;;  %v13449_v24 = vcombine.high %v8777_v45, %v8913_v21  ;;  %v18822_v16 = vrot.slane %v11837_v51, %v19818_v39  ;;  %v18829_v21 = vrot.slane %v11837_v51, %v19819_v12 }
 0x85d   :  { %v11938_v30 = vadd.f32 %v11937_v33, %v11923_v5  ;;  %v18846_v14 = vrot.slane %v11837_v51, %v19823_v28 }
 0x85e   :  { %11785 = vmatpush2.bf16.msra.mxu0 %v13446_v38  ;;  %11825 = vmatprep.subr.bf16.mxu1 %v13449_v24  ;;  %v18747_v34 = vpop.f32.mrf.mxu0 }
 0x85f   :  { %11826 = vmatpush2.bf16.msra.mxu1 %v13448_v42  ;;  %v11924_v23 = vmul.f32 %v18791_v15, %v18747_v34 }
 0x860   :  { %v18749_v63 = vpop.f32.mrf.mxu0 }
 0x861   :  { %11787 = vmatmul.mubr.bf16.vlgmr.msra.gmra.mxu0 %v17626_v41  ;;  %v11939_v17 = vadd.f32 %v11938_v30, %v11924_v23  ;;  %v11925_v26 = vmul.f32 %v18796_v55, %v18749_v63 }
 0x862   :  { %11828 = vmatmul.mubr.bf16.vlgmr.msra.gmra.mxu1 %v17626_v41  ;;  %v11628_v37 = vpop.f32.mrf.mxu0  ;;  %12214 = vmatprep.mubr.bf16.mxu0 %v19814_v32 }
 0x863   :  { %12255 = vmatprep.mubr.bf16.mxu1 %v19814_v32  ;;  %v11940_v43 = vadd.f32 %v11939_v17, %v11925_v26 }
 0x864   :  { %v11629_v47 = vpop.f32.mrf.mxu0 }
 0x865   :  { %v18834_v47 = vrot.slane %v11837_v51, %v19820_v46 }
 0x86a   :  { %v18755_v11 = vpop.f32.mrf.mxu1 }
 0x86b   :  { %v11926_v48 = vmul.f32 %v18801_v13, %v18755_v11 }
 0x86c   :  { %v18757_v9 = vpop.f32.mrf.mxu1 }
 0x86d   :  { %v11941_v18 = vadd.f32 %v11940_v43, %v11926_v48  ;;  %v11927_v52 = vmul.f32 %v18809_v53, %v18757_v9 }
 0x86e   :  { %v11669_v4 = vpop.f32.mrf.mxu1 }
 0x86f   :  { %v11942_v22 = vadd.f32 %v11941_v18, %v11927_v52  ;;  %v18837_v4 = vrot.slane %v11837_v51, %v19821_v50  ;;  %v12022_v50 = vld [vmem:[%s19824_s13] sm:$0xff] }
 0x870   :  { %v11670_v7 = vpop.f32.mrf.mxu1 }
 0x871   :  { %v18840_v7 = vrot.slane %v11837_v51, %v19822_v59 }
 0x8c6   :  { %v18759_v44 = vpop.f32.mrf.mxu0 }
 0x8c7   :  { %v11928_v8 = vmul.f32 %v18812_v3, %v18759_v44 }
 0x8c8   :  { %v18761_v31 = vpop.f32.mrf.mxu0 }
 0x8c9   :  { %v11943_v40 = vadd.f32 %v11942_v22, %v11928_v8  ;;  %v11929_v38 = vmul.f32 %v18819_v19, %v18761_v31 }
 0x8ca   :  { %v11710_v60 = vpop.f32.mrf.mxu0 }
 0x8cb   :  { %v11944_v42 = vadd.f32 %v11943_v40, %v11929_v38 }
 0x8cc   :  { %v11711_v20 = vpop.f32.mrf.mxu0 }
 0x8d2   :  { %v18763_v2 = vpop.f32.mrf.mxu1 }
 0x8d3   :  { %v11930_v45 = vmul.f32 %v18822_v16, %v18763_v2 }
 0x8d4   :  { %v18765_v41 = vpop.f32.mrf.mxu1 }
 0x8d5   :  { %v11945_v24 = vadd.f32 %v11944_v42, %v11930_v45  ;;  %v11931_v37 = vmul.f32 %v18829_v21, %v18765_v41 }
 0x8d6   :  { %v11751_v6 = vpop.f32.mrf.mxu1 }
 0x8d7   :  { %v11946_v20 = vadd.f32 %v11945_v24, %v11931_v37 }
 0x8d8   :  { %v11752_v0 = vpop.f32.mrf.mxu1 }
 0x921   :  { %v11788_v60 = vpop.f32.mrf.mxu0 }
 0x922   :  { %v11932_v6 = vmul.f32 %v18834_v47, %v11788_v60  ;;  %v18843_v0 = vpop.f32.mrf.mxu1 }
 0x923   :  { %v11790_v58 = vpop.f32.mrf.mxu0  ;;  %v11934_v57 = vmul.f32 %v18840_v7, %v18843_v0 }
 0x924   :  { %v11947_v36 = vadd.f32 %v11946_v20, %v11932_v6  ;;  %v11933_v10 = vmul.f32 %v18837_v4, %v11790_v58  ;;  %v18851_v39 = vpop.f32.mrf.mxu1 }
 0x925   :  { %v11792_v61 = vpop.f32.mrf.mxu0  ;;  %v11935_v12 = vmul.f32 %v18846_v14, %v18851_v39 }
 0x926   :  { %v11948_v62 = vadd.f32 %v11947_v36, %v11933_v10  ;;  %v11833_v33 = vpop.f32.mrf.mxu1 }
 0x927   :  { %v11793_v5 = vpop.f32.mrf.mxu0 }
 0x928   :  { %v11949_v46 = vadd.f32 %v11948_v62, %v11934_v57  ;;  %v11834_v30 = vpop.f32.mrf.mxu1 }
 0x92a   :  { %v11950_v23 = vadd.f32 %v11949_v46, %v11935_v12 }
 0x92c   :  { %11951 = vadd.xlane.f32.xlu0 %v11950_v23 }
 0x942   :  { %12025 = vperm.xlu0 %14076, %v12022_v50  }
 0x9b5   :  { %v11952_v17 = vpop.xlane.xlu0 %11951 }
 0x9b6   :  { %v11953_v26 = vmul.f32 0.0009765625, %v11952_v17 }
 0x9b8   :  { %v18859_v59 = vsub.f32 %v18472_v29, %v11953_v26  ;;  %v18862_v51 = vsub.f32 %v18484_v25, %v11953_v26  ;;  %v18865_v43 = vsub.f32 %v18519_v35, %v11953_v26  ;;  %v18872_v18 = vsub.f32 %v18523_v56, %v11953_v26 }
 0x9b9   :  { %v18875_v52 = vsub.f32 %v18747_v34, %v11953_v26  ;;  %v18880_v35 = vsub.f32 %v18749_v63, %v11953_v26  ;;  %v18885_v40 = vsub.f32 %v18755_v11, %v11953_v26  ;;  %v11961_v45 = vsub.f32 %v18757_v9, %v11953_v26 }
 0x9ba   :  { %v11970_v48 = vmul.f32 %v18859_v59, %v18771_v1  ;;  %v11971_v28 = vmul.f32 %v18862_v51, %v18774_v54  ;;  %v11972_v29 = vmul.f32 %v18865_v43, %v18781_v49  ;;  %v11973_v22 = vmul.f32 %v18872_v18, %v18786_v27 }
 0x9bb   :  { %v11974_v56 = vmul.f32 %v18875_v52, %v18791_v15  ;;  %v11975_v42 = vmul.f32 %v18880_v35, %v18796_v55  ;;  %v18893_v63 = vsub.f32 %v18759_v44, %v11953_v26  ;;  %v11976_v20 = vmul.f32 %v18885_v40, %v18801_v13 }
 0x9bc   :  { %v11986_v25 = vmul.f32 %v11970_v48, %v11970_v48  ;;  %v11987_v8 = vmul.f32 %v11971_v28, %v11971_v28  ;;  %v11988_v38 = vmul.f32 %v11972_v29, %v11972_v29  ;;  %v11989_v24 = vmul.f32 %v11973_v22, %v11973_v22 }
 0x9bd   :  { %v11990_v11 = vmul.f32 %v11974_v56, %v11974_v56  ;;  %v11963_v36 = vsub.f32 %v18761_v31, %v11953_v26  ;;  %v11977_v10 = vmul.f32 %v11961_v45, %v18809_v53  ;;  %v11991_v57 = vmul.f32 %v11975_v42, %v11975_v42 }
 0x9be   :  { %v12002_v34 = vadd.f32 %v11987_v8, %v11986_v25  ;;  %v11964_v9 = vsub.f32 %v18763_v2, %v11953_v26  ;;  %v11978_v62 = vmul.f32 %v18893_v63, %v18812_v3  ;;  %v11992_v12 = vmul.f32 %v11976_v20, %v11976_v20 }
 0x9bf   :  { %v11965_v44 = vsub.f32 %v18765_v41, %v11953_v26  ;;  %v11979_v5 = vmul.f32 %v11963_v36, %v18819_v19  ;;  %v11993_v46 = vmul.f32 %v11977_v10, %v11977_v10  ;;  %v11966_v23 = vsub.f32 %v11788_v60, %v11953_v26 }
 0x9c0   :  { %v12003_v37 = vadd.f32 %v12002_v34, %v11988_v38  ;;  %v11980_v31 = vmul.f32 %v11964_v9, %v18822_v16  ;;  %v11994_v50 = vmul.f32 %v11978_v62, %v11978_v62  ;;  %v11967_v48 = vsub.f32 %v11790_v58, %v11953_v26 }
 0x9c1   :  { %v11981_v28 = vmul.f32 %v11965_v44, %v18829_v21  ;;  %v11995_v2 = vmul.f32 %v11979_v5, %v11979_v5  ;;  %v18907_v25 = vsub.f32 %v18843_v0, %v11953_v26  ;;  %v11982_v8 = vmul.f32 %v11966_v23, %v18834_v47 }
 0x9c2   :  { %v12004_v6 = vadd.f32 %v12003_v37, %v11989_v24  ;;  %v11996_v41 = vmul.f32 %v11980_v31, %v11980_v31  ;;  %v11969_v56 = vsub.f32 %v18851_v39, %v11953_v26  ;;  %v11983_v60 = vmul.f32 %v11967_v48, %v18837_v4  ;;  %v12060_v39 = vld [vmem:[%s19825_s17] sm:$0xff] }
 0x9c3   :  { %v11997_v38 = vmul.f32 %v11981_v28, %v11981_v28  ;;  %v11984_v58 = vmul.f32 %v18907_v25, %v18840_v7  ;;  %v11998_v42 = vmul.f32 %v11982_v8, %v11982_v8 }
 0x9c4   :  { %v12005_v61 = vadd.f32 %v12004_v6, %v11990_v11  ;;  %v11985_v37 = vmul.f32 %v11969_v56, %v18846_v14  ;;  %v11999_v20 = vmul.f32 %v11983_v60, %v11983_v60 }
 0x9c5   :  { %v12000_v11 = vmul.f32 %v11984_v58, %v11984_v58 }
 0x9c6   :  { %v12006_v33 = vadd.f32 %v12005_v61, %v11991_v57  ;;  %v12001_v10 = vmul.f32 %v11985_v37, %v11985_v37 }
 0x9c8   :  { %v12007_v30 = vadd.f32 %v12006_v33, %v11992_v12  ;;  %v18918_v33 = vpop.permute.xlu0 %12025 }
 0x9c9   :  { %v18921_v5 = vmul.f32 %v18918_v33, %v11969_v56  ;;  %v12028_v31 = vmul.f32 %v18918_v33, %v18859_v59  ;;  %v12035_v28 = vmul.f32 %v18918_v33, %v11961_v45  ;;  %v12036_v59 = vmul.f32 %v18918_v33, %v18893_v63 }
 0x9ca   :  { %v12008_v17 = vadd.f32 %v12007_v30, %v11993_v46  ;;  %v12029_v46 = vmul.f32 %v18918_v33, %v18862_v51  ;;  %v12031_v30 = vmul.f32 %v18918_v33, %v18872_v18  ;;  %v12034_v51 = vmul.f32 %v18918_v33, %v18885_v40 }
 0x9cb   :  { %v12039_v18 = vmul.f32 %v18918_v33, %v11965_v44  ;;  %v18947_v45 = vmul.f32 %v18918_v33, %v11966_v23 }
 0x9cc   :  { %v12009_v29 = vadd.f32 %v12008_v17, %v11994_v50  ;;  %v12030_v50 = vmul.f32 %v18918_v33, %v18865_v43  ;;  %v12033_v17 = vmul.f32 %v18918_v33, %v18880_v35  ;;  %v12038_v43 = vmul.f32 %v18918_v33, %v11964_v9 }
 0x9cd   :  { %v12041_v35 = vmul.f32 %v18918_v33, %v11967_v48 }
 0x9ce   :  { %v12010_v22 = vadd.f32 %v12009_v29, %v11995_v2  ;;  %v12032_v2 = vmul.f32 %v18918_v33, %v18875_v52  ;;  %v12037_v29 = vmul.f32 %v18918_v33, %v11963_v36 }
 0x9d0   :  { %v12011_v34 = vadd.f32 %v12010_v22, %v11996_v41 }
 0x9d2   :  { %v12012_v24 = vadd.f32 %v12011_v34, %v11997_v38 }
 0x9d4   :  { %v12013_v0 = vadd.f32 %v12012_v24, %v11998_v42 }
 0x9d6   :  { %v12014_v6 = vadd.f32 %v12013_v0, %v11999_v20 }
 0x9d8   :  { %v12015_v57 = vadd.f32 %v12014_v6, %v12000_v11 }
 0x9da   :  { %v12016_v61 = vadd.f32 %v12015_v57, %v12001_v10 }
 0x9dc   :  { %12017 = vadd.xlane.f32.xlu1 %v12016_v61 }
 0x9ed   :  { %12063 = vperm.xlu1 %14075, %v12060_v39  }
 0xa65   :  { %v12018_v26 = vpop.xlane.xlu1 %12017 }
 0xa66   :  { %v12019_v62 = vmul.f32 0.0009765625, %v12018_v26 }
 0xa68   :  { %v12020_v12 = vadd.f32 1e-05, %v12019_v62 }
 0xa69   :  { %v18953_v41 = vpop.permute.xlu1 %12063 }
 0xa6a   :  { %14085 = vrsqrt.f32 %v12020_v12 }
 0xa77   :  { %v18940_v8 = vpop.eup %14085 }
 0xa78   :  { %v12045_v52 = vmul.f32 %v18940_v8, %v12029_v46  ;;  %v12047_v40 = vmul.f32 %v18940_v8, %v12031_v30  ;;  %v12044_v36 = vmul.f32 %v18940_v8, %v12028_v31  ;;  %v12046_v44 = vmul.f32 %v18940_v8, %v12030_v50 }
 0xa79   :  { %v12049_v22 = vmul.f32 %v18940_v8, %v12033_v17  ;;  %v12051_v63 = vmul.f32 %v18940_v8, %v12035_v28  ;;  %v12048_v9 = vmul.f32 %v18940_v8, %v12032_v2  ;;  %v12050_v48 = vmul.f32 %v18940_v8, %v12034_v51 }
 0xa7a   :  { %v12067_v23 = vadd.f32 %v18953_v41, %v12045_v52  ;;  %v12069_v56 = vadd.f32 %v18953_v41, %v12047_v40  ;;  %v12066_v60 = vadd.f32 %v18953_v41, %v12044_v36  ;;  %v12068_v38 = vadd.f32 %v18953_v41, %v12046_v44 }
 0xa7b   :  { %v12071_v34 = vadd.f32 %v18953_v41, %v12049_v22  ;;  %v12073_v58 = vadd.f32 %v18953_v41, %v12051_v63  ;;  %v12070_v42 = vadd.f32 %v18953_v41, %v12048_v9  ;;  %v12072_v24 = vadd.f32 %v18953_v41, %v12050_v48 }
 0xa7c   :  { %v12083_v37 = vmax.f32 %v12067_v23, 0.0  ;;  %v12085_v20 = vmax.f32 %v12069_v56, 0.0  ;;  %v12082_v0 = vmax.f32 %v12066_v60, 0.0  ;;  %v12084_v11 = vmax.f32 %v12068_v38, 0.0 }
 0xa7d   :  { %v12087_v6 = vmax.f32 %v12071_v34, 0.0  ;;  %v12089_v10 = vmax.f32 %v12073_v58, 0.0  ;;  %v12086_v57 = vmax.f32 %v12070_v42, 0.0  ;;  %v12088_v61 = vmax.f32 %v12072_v24, 0.0 }
 0xa7e   :  { %v12099_v39 = vmul.f32 %v12083_v37, %v18774_v54  ;;  %v12101_v26 = vmul.f32 %v12085_v20, %v18786_v27  ;;  %v12098_v62 = vmul.f32 %v12082_v0, %v18771_v1  ;;  %v12100_v12 = vmul.f32 %v12084_v11, %v18781_v49 }
 0xa7f   :  { %v12103_v46 = vmul.f32 %v12087_v6, %v18796_v55  ;;  %v12105_v30 = vmul.f32 %v12089_v10, %v18809_v53  ;;  %v12102_v31 = vmul.f32 %v12086_v57, %v18791_v15  ;;  %v12104_v50 = vmul.f32 %v12088_v61, %v18801_v13  ;;  %v18984_v13 = vld [vmem:[%s19826_s21] sm:$0xf] }
 0xa80   :  { %v12116_v17 = vpack.c.bf16 %v12099_v39, %v12099_v39  ;;  %v12118_v28 = vpack.c.bf16 %v12101_v26, %v12101_v26  ;;  %v12115_v2 = vpack.c.bf16 %v12098_v62, %v12098_v62  ;;  %v12117_v51 = vpack.c.bf16 %v12100_v12, %v12100_v12 }
 0xa81   :  { %v12120_v52 = vpack.c.bf16 %v12103_v46, %v12103_v46  ;;  %v12122_v54 = vpack.c.bf16 %v12105_v30, %v12105_v30  ;;  %v12119_v40 = vpack.c.bf16 %v12102_v31, %v12102_v31  ;;  %v12121_v27 = vpack.c.bf16 %v12104_v50, %v12104_v50  ;;  %v12510_v46 = vld [vmem:[%s19151_s15] sm:$0xff]  ;;  %v12512_v31 = vld [vmem:[%s19151_s15 + $0x10] sm:$0xff] }
 0xa82   :  { %13546 = vmatprep.subr.msk.bf16.mxu0 %vm468_vm0, %v12116_v17  ;;  %13548 = vmatprep.subr.msk.bf16.mxu1 %vm468_vm0, %v12118_v28  ;;  %v12135_v1 = vsel %vm468_vm0, %v12115_v2, 0  ;;  %v12141_v49 = vsel %vm468_vm0, %v12117_v51, 0  ;;  %v12053_v15 = vmul.f32 %v18940_v8, %v12037_v29  ;;  %v12055_v55 = vmul.f32 %v18940_v8, %v12039_v18  ;;  %v12513_v51 = vld [vmem:[%s19151_s15 + $0x18] sm:$0xff] }
 0xa83   :  { %12197 = vmatpush1.bf16.msra.mxu0 %v12135_v1  ;;  %12238 = vmatpush1.bf16.msra.mxu1 %v12141_v49  ;;  %v12147_v53 = vsel %vm468_vm0, %v12119_v40, 0  ;;  %v12052_v36 = vmul.f32 %v18940_v8, %v12036_v59  ;;  %v12054_v44 = vmul.f32 %v18940_v8, %v12038_v43  ;;  %v12042_v22 = vmul.f32 %v18918_v33, %v18907_v25 }
 0xa84   :  { %13550 = vmatprep.subr.msk.bf16.mxu0 %vm468_vm0, %v12120_v52  ;;  %13552 = vmatprep.subr.msk.bf16.mxu1 %vm468_vm0, %v12122_v54  ;;  %v12153_v29 = vsel %vm468_vm0, %v12121_v27, 0  ;;  %v12075_v18 = vadd.f32 %v18953_v41, %v12053_v15  ;;  %v12077_v63 = vadd.f32 %v18953_v41, %v12055_v55  ;;  %v12057_v9 = vmul.f32 %v18940_v8, %v12041_v35  ;;  %v12514_v55 = vld [vmem:[%s19151_s15 + $0x20] sm:$0xff] }
 0xa85   :  { %v12074_v48 = vadd.f32 %v18953_v41, %v12052_v36  ;;  %v12076_v59 = vadd.f32 %v18953_v41, %v12054_v44  ;;  %v12059_v43 = vmul.f32 %v18940_v8, %v18921_v5  ;;  %v12056_v25 = vmul.f32 %v18940_v8, %v18947_v45 }
 0xa86   :  { %13547 = vmatmul.mubr.msk.bf16.vlgmr.msra.gmra.mxu0 %vm5940_vm6, %v18984_v13  ;;  %13549 = vmatmul.mubr.msk.bf16.vlgmr.msra.gmra.mxu1 %vm5940_vm6, %v18984_v13  ;;  %v12091_v33 = vmax.f32 %v12075_v18, 0.0  ;;  %v12093_v23 = vmax.f32 %v12077_v63, 0.0  ;;  %v12079_v35 = vadd.f32 %v18953_v41, %v12057_v9  ;;  %v12058_v56 = vmul.f32 %v18940_v8, %v12042_v22  ;;  %v12517_v63 = vld [vmem:[%s19151_s15 + $0x38] sm:$0xff] }
 0xa87   :  { %12279 = vmatpush1.bf16.msra.mxu0 %v12147_v53  ;;  %12320 = vmatpush1.bf16.msra.mxu1 %v12153_v29  ;;  %v12090_v60 = vmax.f32 %v12074_v48, 0.0  ;;  %v12092_v38 = vmax.f32 %v12076_v59, 0.0  ;;  %v12081_v5 = vadd.f32 %v18953_v41, %v12059_v43  ;;  %v12078_v45 = vadd.f32 %v18953_v41, %v12056_v25  ;;  %v12516_v53 = vld [vmem:[%s19151_s15 + $0x30] sm:$0xff]  ;;  %v12515_v29 = vld [vmem:[%s19151_s15 + $0x28] sm:$0xff] }
 0xa88   :  { %v12107_v34 = vmul.f32 %v12091_v33, %v18819_v19  ;;  %v12109_v58 = vmul.f32 %v12093_v23, %v18829_v21  ;;  %12296 = vmatprep.mubr.bf16.mxu0 %v19814_v32  ;;  %12337 = vmatprep.mubr.bf16.mxu1 %v19814_v32  ;;  %v12095_v42 = vmax.f32 %v12079_v35, 0.0  ;;  %v12080_v24 = vadd.f32 %v18953_v41, %v12058_v56  ;;  %v12518_v35 = vld [vmem:[%s19151_s15 + $0x40] sm:$0xff] }
 0xa89   :  { %v12106_v8 = vmul.f32 %v12090_v60, %v18812_v3  ;;  %v12108_v37 = vmul.f32 %v12092_v38, %v18822_v16  ;;  %v12097_v20 = vmax.f32 %v12081_v5, 0.0  ;;  %v12094_v0 = vmax.f32 %v12078_v45, 0.0  ;;  %v12520_v60 = vld [vmem:[%s19151_s15 + $0x50] sm:$0xff] }
 0xa8a   :  { %v12124_v11 = vpack.c.bf16 %v12107_v34, %v12107_v34  ;;  %v12126_v6 = vpack.c.bf16 %v12109_v58, %v12109_v58  ;;  %v12111_v10 = vmul.f32 %v12095_v42, %v18837_v4  ;;  %v12096_v19 = vmax.f32 %v12080_v24, 0.0  ;;  %v12519_v34 = vld [vmem:[%s19151_s15 + $0x48] sm:$0xff]  ;;  %v12521_v42 = vld [vmem:[%s19151_s15 + $0x58] sm:$0xff] }
 0xa8b   :  { %v12123_v57 = vpack.c.bf16 %v12106_v8, %v12106_v8  ;;  %v12125_v21 = vpack.c.bf16 %v12108_v37, %v12108_v37  ;;  %v12113_v61 = vmul.f32 %v12097_v20, %v18846_v14  ;;  %v12110_v3 = vmul.f32 %v12094_v0, %v18834_v47 }
 0xa8c   :  { %13554 = vmatprep.subr.msk.bf16.mxu0 %vm468_vm0, %v12124_v11  ;;  %13556 = vmatprep.subr.msk.bf16.mxu1 %vm468_vm0, %v12126_v6  ;;  %v12128_v41 = vpack.c.bf16 %v12111_v10, %v12111_v10  ;;  %v12112_v14 = vmul.f32 %v12096_v19, %v18840_v7  ;;  %v12522_v10 = vld [vmem:[%s19151_s15 + $0x60] sm:$0xff] }
 0xa8d   :  { %v12159_v16 = vsel %vm468_vm0, %v12123_v57, 0  ;;  %v12165_v4 = vsel %vm468_vm0, %v12125_v21, 0  ;;  %v12130_v39 = vpack.c.bf16 %v12113_v61, %v12113_v61  ;;  %v12127_v47 = vpack.c.bf16 %v12110_v3, %v12110_v3  ;;  %v12524_v57 = vld [vmem:[%s19151_s15 + $0x70] sm:$0xff]  ;;  %v12523_v3 = vld [vmem:[%s19151_s15 + $0x68] sm:$0xff] }
 0xa8e   :  { %13551 = vmatmul.mubr.msk.bf16.vlgmr.msra.gmra.mxu0 %vm5940_vm6, %v18984_v13  ;;  %13553 = vmatmul.mubr.msk.bf16.vlgmr.msra.gmra.mxu1 %vm5940_vm6, %v18984_v13  ;;  %v12129_v26 = vpack.c.bf16 %v12112_v14, %v12112_v14 }
 0xa8f   :  { %12361 = vmatpush1.bf16.msra.mxu0 %v12159_v16  ;;  %12402 = vmatpush1.bf16.msra.mxu1 %v12165_v4  ;;  %v12171_v7 = vsel %vm468_vm0, %v12127_v47, 0  ;;  %v12525_v4 = vld [vmem:[%s19151_s15 + $0x78] sm:$0xff] }
 0xa90   :  { %13558 = vmatprep.subr.msk.bf16.mxu0 %vm468_vm0, %v12128_v41  ;;  %13560 = vmatprep.subr.msk.bf16.mxu1 %vm468_vm0, %v12130_v39  ;;  %v12177_v62 = vsel %vm468_vm0, %v12129_v26, 0 }
 0xa91   :  { %12378 = vmatprep.mubr.bf16.mxu0 %v19814_v32  ;;  %12419 = vmatprep.mubr.bf16.mxu1 %v19814_v32 }
 0xa96   :  { %13555 = vmatmul.mubr.msk.bf16.vlgmr.msra.gmra.mxu0 %vm5940_vm6, %v18984_v13  ;;  %13557 = vmatmul.mubr.msk.bf16.vlgmr.msra.gmra.mxu1 %vm5940_vm6, %v18984_v13 }
 0xa97   :  { %12443 = vmatpush1.bf16.msra.mxu0 %v12171_v7  ;;  %12484 = vmatpush1.bf16.msra.mxu1 %v12177_v62 }
 0xa98   :  { %12460 = vmatprep.mubr.bf16.mxu0 %v19814_v32  ;;  %12501 = vmatprep.mubr.bf16.mxu1 %v19814_v32  ;;  %v12511_v32 = vld [vmem:[%s19151_s15 + $0x8] sm:$0xff] }
 0xa9e   :  { %13559 = vmatmul.mubr.msk.bf16.vlgmr.msra.gmra.mxu0 %vm5940_vm6, %v18984_v13  ;;  %13561 = vmatmul.mubr.msk.bf16.vlgmr.msra.gmra.mxu1 %vm5940_vm6, %v18984_v13 }
 0xb46   :  { %v12216_v12 = vpop.f32.mrf.mxu0  ;;  %v12257_v30 = vpop.f32.mrf.mxu1 }
 0xb47   :  { %v12526_v50 = vadd.f32 %v12510_v46, %v12216_v12  ;;  %v12528_v17 = vadd.f32 %v12512_v31, %v12257_v30 }
 0xb48   :  { %v12218_v28 = vpop.f32.mrf.mxu0  ;;  %v12259_v2 = vpop.f32.mrf.mxu1 }
 0xb49   :  { %12542 = vst [vmem:[%s19151_s15] sm:$0xff] %v12526_v50  ;;  %12544 = vst [vmem:[%s19151_s15 + $0x10] sm:$0xff] %v12528_v17  ;;  %v12527_v52 = vadd.f32 %v12511_v32, %v12218_v28  ;;  %v12529_v54 = vadd.f32 %v12513_v51, %v12259_v2 }
 0xb4a   :  { %v12220_v40 = vpop.f32.mrf.mxu0  ;;  %v12261_v27 = vpop.f32.mrf.mxu1 }
 0xb4b   :  { %12543 = vst [vmem:[%s19151_s15 + $0x8] sm:$0xff] %v12527_v52  ;;  %12545 = vst [vmem:[%s19151_s15 + $0x18] sm:$0xff] %v12529_v54 }
 0xb4c   :  { %v12221_v1 = vpop.f32.mrf.mxu0  ;;  %v12262_v49 = vpop.f32.mrf.mxu1 }
 0xb4e   :  { %v12298_v15 = vpop.f32.mrf.mxu0  ;;  %v12339_v13 = vpop.f32.mrf.mxu1 }
 0xb4f   :  { %v12530_v36 = vadd.f32 %v12514_v55, %v12298_v15  ;;  %v12532_v44 = vadd.f32 %v12516_v53, %v12339_v13 }
 0xb50   :  { %v12300_v22 = vpop.f32.mrf.mxu0  ;;  %v12341_v18 = vpop.f32.mrf.mxu1 }
 0xb51   :  { %12546 = vst [vmem:[%s19151_s15 + $0x20] sm:$0xff] %v12530_v36  ;;  %12548 = vst [vmem:[%s19151_s15 + $0x30] sm:$0xff] %v12532_v44  ;;  %v12531_v9 = vadd.f32 %v12515_v29, %v12300_v22  ;;  %v12533_v48 = vadd.f32 %v12517_v63, %v12341_v18 }
 0xb52   :  { %v12302_v59 = vpop.f32.mrf.mxu0  ;;  %v12343_v43 = vpop.f32.mrf.mxu1 }
 0xb53   :  { %12547 = vst [vmem:[%s19151_s15 + $0x28] sm:$0xff] %v12531_v9  ;;  %12549 = vst [vmem:[%s19151_s15 + $0x38] sm:$0xff] %v12533_v48 }
 0xb54   :  { %v12303_v25 = vpop.f32.mrf.mxu0  ;;  %v12344_v33 = vpop.f32.mrf.mxu1 }
 0xb56   :  { %v12380_v23 = vpop.f32.mrf.mxu0  ;;  %v12421_v56 = vpop.f32.mrf.mxu1 }
 0xb57   :  { %v12534_v38 = vadd.f32 %v12518_v35, %v12380_v23  ;;  %v12536_v5 = vadd.f32 %v12520_v60, %v12421_v56 }
 0xb58   :  { %v12382_v45 = vpop.f32.mrf.mxu0  ;;  %v12423_v58 = vpop.f32.mrf.mxu1 }
 0xb59   :  { %12550 = vst [vmem:[%s19151_s15 + $0x40] sm:$0xff] %v12534_v38  ;;  %12552 = vst [vmem:[%s19151_s15 + $0x50] sm:$0xff] %v12536_v5  ;;  %v12535_v24 = vadd.f32 %v12519_v34, %v12382_v45  ;;  %v12537_v8 = vadd.f32 %v12521_v42, %v12423_v58 }
 0xb5a   :  { %v12384_v37 = vpop.f32.mrf.mxu0  ;;  %v12425_v20 = vpop.f32.mrf.mxu1 }
 0xb5b   :  { %12551 = vst [vmem:[%s19151_s15 + $0x48] sm:$0xff] %v12535_v24  ;;  %12553 = vst [vmem:[%s19151_s15 + $0x58] sm:$0xff] %v12537_v8 }
 0xb5c   :  { %v12385_v0 = vpop.f32.mrf.mxu0  ;;  %v12426_v11 = vpop.f32.mrf.mxu1 }
 0xb5e   :  { %v12462_v6 = vpop.f32.mrf.mxu0  ;;  %v12503_v19 = vpop.f32.mrf.mxu1 }
 0xb5f   :  { %v12538_v21 = vadd.f32 %v12522_v10, %v12462_v6  ;;  %v12540_v61 = vadd.f32 %v12524_v57, %v12503_v19 }
 0xb60   :  { %v12464_v41 = vpop.f32.mrf.mxu0  ;;  %v12505_v16 = vpop.f32.mrf.mxu1 }
 0xb61   :  { %12554 = vst [vmem:[%s19151_s15 + $0x60] sm:$0xff] %v12538_v21  ;;  %12556 = vst [vmem:[%s19151_s15 + $0x70] sm:$0xff] %v12540_v61  ;;  %v12539_v39 = vadd.f32 %v12523_v3, %v12464_v41  ;;  %v12541_v14 = vadd.f32 %v12525_v4, %v12505_v16 }
 0xb62   :  { %v12466_v47 = vpop.f32.mrf.mxu0  ;;  %v12507_v26 = vpop.f32.mrf.mxu1 }
 0xb63   :  { %12555 = vst [vmem:[%s19151_s15 + $0x68] sm:$0xff] %v12539_v39  ;;  %12557 = vst [vmem:[%s19151_s15 + $0x78] sm:$0xff] %v12541_v14 }
 0xb64   :  { %v12467_v7 = vpop.f32.mrf.mxu0  ;;  %v12508_v62 = vpop.f32.mrf.mxu1 }

</bundles_post_ra>
